<compile_context>
chip_gen: v7x
topology: tpu7x:2x2x1
jax: 0.10.0
libtpu: 0.0.40
codegen_flags: <defaults>
</compile_context>

<pallas_src>
import jax
import jax.numpy as jnp
from jax.experimental import pallas as pl
from jax.experimental.pallas import tpu as pltpu

BN_EPS = 1e-5
LANE = 128


def _round_up(x, m):
    return (x + m - 1) // m * m


def _pool_linear_kernel(feats_ref, w_ref, z_ref):
    # feats_ref: (tb, C, HW)  NCHW backbone block (C on sublanes, HW on lanes)
    # w_ref:     (C, Ep)      Linear weight, bf16, resident across grid steps
    # z_ref:     (tb, Ep)     f32 output of pooled @ W
    tb, c_dim, hw = feats_ref.shape
    ep = z_ref.shape[-1]
    inv_hw = 1.0 / hw

    # Chunk the channel axis so the f32 intermediate of the spatial reduction
    # stays bounded (one (tb, cc, HW) slab + a (tb, Ep) accumulator) instead of
    # a full-block f32 copy that would spill / blow the VMEM budget.
    cc = next((c for c in (256, 512, 128) if c_dim % c == 0), c_dim)
    n_chunks = c_dim // cc

    def body(ci, acc):
        c0 = pl.multiple_of(ci * cc, cc)
        slab = feats_ref[:, pl.ds(c0, cc), :]                         # (tb, cc, HW)
        # AdaptiveAvgPool2d((1,1)) == spatial mean; f32 accumulation fused into
        # the lane-axis reduction.
        pooled = jnp.sum(slab, axis=-1, dtype=jnp.float32) * inv_hw   # (tb, cc)
        w_chunk = w_ref[pl.ds(c0, cc), :].astype(jnp.float32)         # (cc, Ep)
        return acc + jnp.dot(pooled, w_chunk,
                             preferred_element_type=jnp.float32)

    acc0 = jnp.zeros((tb, ep), jnp.float32)
    z_ref[...] = jax.lax.fori_loop(0, n_chunks, body, acc0).astype(z_ref.dtype)


def _batchnorm1d_kernel(z_ref, gamma_ref, beta_ref, out_ref):
    # BatchNorm1d training-mode forward: per-feature batch mean / biased var.
    # The full batch axis is inside every block, so feature tiling is exact.
    z = z_ref[...]
    mu = jnp.mean(z, axis=0, keepdims=True)
    diff = z - mu
    var = jnp.mean(diff * diff, axis=0, keepdims=True)
    out_ref[...] = (gamma_ref[...] * diff * jax.lax.rsqrt(var + BN_EPS)
                    + beta_ref[...]).astype(out_ref.dtype)


def encoder_cnn_head(feature_maps, w_t, bias, gamma, beta, *,
                     batch_tile=32, vmem_limit_bytes=48 << 20):
    """feature_maps: (B, C, H, W) NCHW backbone output (f32 or bf16).

    Returns (B, E) float32 == BatchNorm1d(Linear(avg_pool(features))),
    training-mode BN forward (batch statistics), matching the PyTorch head.

    Tuning: batch_tile=32 / 48 MiB fits v7x's 64 MiB-per-TC VMEM; on v5e/v6e
    (128 MiB VMEM) raise to batch_tile=64 and vmem_limit_bytes ~96 MiB.
    """
    B, C, H, W = feature_maps.shape
    HW = H * W
    E = w_t.shape[1]
    Ep = _round_up(E, LANE)            # lane-dense output stores (unmasked vst)
    tb = batch_tile

    # Free contiguous reshape only -- no transpose / pad HBM pass.  The kernel
    # pools over the lane (HW) axis and the pooled (tb, C) tile feeds the MXU.
    feats = feature_maps.reshape(B, C, HW)

    # Resident Linear weight in bf16 (halves VMEM + its DMA); padded embed
    # columns are zero and sliced off at the end.
    w_p = jnp.pad(w_t, ((0, 0), (0, Ep - E))).astype(jnp.bfloat16)
    g_p = jnp.pad(gamma.astype(jnp.float32), (0, Ep - E),
                  constant_values=1.0).reshape(1, Ep)
    be_p = jnp.pad(beta.astype(jnp.float32), (0, Ep - E)).reshape(1, Ep)

    # Training-mode BatchNorm subtracts the per-feature batch mean, so the
    # Linear bias cancels exactly -- drop it (one fewer resident buffer / DMA).
    del bias

    n_bt = pl.cdiv(B, tb)  # ragged last batch block is masked on writeback

    cost = pl.CostEstimate(
        flops=2 * B * C * Ep + B * C * HW,
        transcendentals=0,
        bytes_accessed=(feats.size * feats.dtype.itemsize
                        + w_p.size * 2 + B * Ep * 4),
    )

    # --- Kernel 1: spatial mean + Linear, tiled & pipelined over batch. -----
    z = pl.pallas_call(
        _pool_linear_kernel,
        out_shape=jax.ShapeDtypeStruct((B, Ep), jnp.float32),
        grid_spec=pltpu.PrefetchScalarGridSpec(
            num_scalar_prefetch=0,
            grid=(n_bt,),
            in_specs=[
                pl.BlockSpec((tb, C, HW), lambda i: (i, 0, 0)),
                pl.BlockSpec((C, Ep), lambda i: (0, 0)),    # resident weight
            ],
            out_specs=pl.BlockSpec((tb, Ep), lambda i: (i, 0)),
        ),
        compiler_params=pltpu.CompilerParams(
            dimension_semantics=("parallel",),   # 2-TC sharding on v7x
            vmem_limit_bytes=vmem_limit_bytes,
        ),
        cost_estimate=cost,
    )(feats, w_p)

    # --- Kernel 2: BatchNorm1d, tiled over the embedding (feature) axis. ----
    out = pl.pallas_call(
        _batchnorm1d_kernel,
        out_shape=jax.ShapeDtypeStruct((B, Ep), jnp.float32),
        grid_spec=pltpu.PrefetchScalarGridSpec(
            num_scalar_prefetch=0,
            grid=(Ep // LANE,),
            in_specs=[
                pl.BlockSpec((B, LANE), lambda j: (0, j)),
                pl.BlockSpec((1, LANE), lambda j: (0, j)),
                pl.BlockSpec((1, LANE), lambda j: (0, j)),
            ],
            out_specs=pl.BlockSpec((B, LANE), lambda j: (0, j)),
        ),
        compiler_params=pltpu.CompilerParams(
            dimension_semantics=("parallel",),
            vmem_limit_bytes=32 << 20,
        ),
    )(z, g_p, be_p)

    return out[:, :E]


def _reference(feature_maps, w_t, bias, gamma, beta):
    B, C, H, W = feature_maps.shape
    pooled = jnp.mean(feature_maps.astype(jnp.float32).reshape(B, C, H * W),
                      axis=-1)
    z = pooled @ w_t + bias
    mu = jnp.mean(z, axis=0, keepdims=True)
    var = jnp.mean((z - mu) ** 2, axis=0, keepdims=True)
    return gamma * (z - mu) * jax.lax.rsqrt(var + BN_EPS) + beta


if __name__ == "__main__":
    # Real module: C = resnet.fc.in_features = 2048, spatial 7x7, embed = 300.
    # Small demo:  C = 256, spatial 4x4, embed = 32, batch = 48 so the tb=32
    # batch grid gets a ragged last block (exercises masked writeback).
    B, C, H, W, embed_size = 48, 256, 4, 4, 32

    key = jax.random.PRNGKey(0)
    k_feat, k_w, k_b = jax.random.split(key, 3)

    # Synthetic backbone feature maps (stand-in for frozen ResNet-101 output),
    # fed in bf16 to halve HBM traffic; accumulation stays f32 in-kernel.
    feature_maps = jax.random.normal(
        k_feat, (B, C, H, W), dtype=jnp.float32).astype(jnp.bfloat16)

    # Deterministic parameter init (nn.Linear-style uniform, BN affine defaults).
    bound = 1.0 / (C ** 0.5)
    w_t = jax.random.uniform(k_w, (C, embed_size), jnp.float32, -bound, bound)
    bias = jax.random.uniform(k_b, (embed_size,), jnp.float32, -bound, bound)
    gamma = jnp.ones((embed_size,), jnp.float32)   # BatchNorm1d weight
    beta = jnp.zeros((embed_size,), jnp.float32)   # BatchNorm1d bias

    out = encoder_cnn_head(feature_maps, w_t, bias, gamma, beta, batch_tile=32)
    out = jax.block_until_ready(out)

    ref = _reference(feature_maps, w_t, bias, gamma, beta)
    assert out.shape == (B, embed_size)
    # 2e-2 tolerance: the kernel quantizes the Linear weight to bf16 for the
    # MXU while the reference stays f32.  (The Linear bias cancels exactly
    # under training-mode BN, so dropping it in the kernel is not an error.)
    assert jnp.allclose(out, ref, atol=2e-2, rtol=2e-2), "mismatch vs reference"

    print("KERNEL_OK")
</pallas_src>

<mosaic_0001>
module attributes {stable_mosaic.version = 11 : i64} {
  func.func @_pool_linear_kernel(%arg0: i32, %arg1: memref<32x256x16xbf16, #tpu.memory_space<vmem>>, %arg2: memref<256x128xbf16, #tpu.memory_space<vmem>>, %arg3: memref<32x128xf32, #tpu.memory_space<vmem>>) attributes {dimension_semantics = [#tpu.dimension_semantics<parallel>], iteration_bounds = array<i64: 2>, scalar_prefetch = 0 : i64, scratch_operands = 0 : i64, tpu.core_type = #tpu.core_type<tc>, window_params = [{transform_indices = @transform_0, window_bounds = array<i64: 32, 256, 16>}, {pipeline_mode = #tpu.pipeline_mode<synchronous>, transform_indices = @transform_1, window_bounds = array<i64: 256, 128>}, {transform_indices = @transform_2, window_bounds = array<i64: 32, 128>}]} {
    %cst = arith.constant 0.000000e+00 : f32
    %0 = vector.broadcast %cst : f32 to vector<32x128xf32>
    %c0_i32 = arith.constant 0 : i32
    %c256_i32 = arith.constant 256 : i32
    %1 = arith.muli %c0_i32, %c256_i32 : i32
    %2 = tpu.assume_multiple %1, 256 : i32
    %c0 = arith.constant 0 : index
    %3 = arith.index_cast %2 : i32 to index
    %c0_0 = arith.constant 0 : index
    %4 = vector.load %arg1[%c0, %3, %c0_0] : memref<32x256x16xbf16, #tpu.memory_space<vmem>>, vector<32x256x16xbf16>
    %5 = arith.extf %4 : vector<32x256x16xbf16> to vector<32x256x16xf32>
    %cst_1 = arith.constant dense<0.000000e+00> : vector<32x256xf32>
    %6 = vector.multi_reduction <add>, %5, %cst_1 [2] : vector<32x256x16xf32> to vector<32x256xf32>
    %cst_2 = arith.constant 6.250000e-02 : f32
    %7 = vector.broadcast %cst_2 : f32 to vector<32x256xf32>
    %8 = arith.mulf %6, %7 : vector<32x256xf32>
    %9 = arith.index_cast %2 : i32 to index
    %c0_3 = arith.constant 0 : index
    %10 = vector.load %arg2[%9, %c0_3] : memref<256x128xbf16, #tpu.memory_space<vmem>>, vector<256x128xbf16>
    %11 = arith.extf %10 : vector<256x128xbf16> to vector<256x128xf32>
    %cst_4 = arith.constant dense<0.000000e+00> : vector<32x128xf32>
    %12 = tpu.matmul %8, %11, %cst_4 {dimension_numbers = #tpu.dot_dimension_numbers<[1], [0], [0], [1], [0, 0, 1, 1], [], []>} : vector<32x256xf32>, vector<256x128xf32>, vector<32x128xf32> -> vector<32x128xf32>
    %13 = arith.addf %0, %12 : vector<32x128xf32>
    %c1_i32 = arith.constant 1 : i32
    %c0_5 = arith.constant 0 : index
    %c0_6 = arith.constant 0 : index
    %14 = vector.load %arg3[%c0_5, %c0_6] : memref<32x128xf32, #tpu.memory_space<vmem>>, vector<32x128xf32>
    tpu.vector_store %arg3[%c0_5, %c0_6], %13 {strides = array<i32>} : memref<32x128xf32, #tpu.memory_space<vmem>>, vector<32x128xf32>,
    return
  }
  func.func @transform_0(%arg0: i32) -> (i32, i32, i32) {
    %c0_i32 = arith.constant 0 : i32
    %c0_i32_0 = arith.constant 0 : i32
    %c0_i32_1 = arith.constant 0 : i32
    return %arg0, %c0_i32, %c0_i32_0 : i32, i32, i32
  }
  func.func @transform_1(%arg0: i32) -> (i32, i32) {
    %c0_i32 = arith.constant 0 : i32
    %c0_i32_0 = arith.constant 0 : i32
    %c0_i32_1 = arith.constant 0 : i32
    return %c0_i32, %c0_i32_0 : i32, i32
  }
  func.func @transform_2(%arg0: i32) -> (i32, i32) {
    %c0_i32 = arith.constant 0 : i32
    %c0_i32_0 = arith.constant 0 : i32
    return %arg0, %c0_i32 : i32, i32
  }
}

</mosaic_0001>

<bundles_post_ra>
// kernel: tpu_custom_call.1
= control target key start
LH: loop header
LB: loop body
LE: loop exit
PB: predicated region body
PF: predicated region fallthrough
CT: control target
= control target key end

     0   :  { %7 = vsyncpa [#allocation3], 0  ;;  %s20158_s0 = inlined_call_operand.vmem [shape: bf16[48,256,16], index: 0, kind: input, shape index: {}]   ;;  %s20159_s1 = inlined_call_operand.vmem [shape: bf16[256,128], index: 1, kind: input, shape index: {}]   ;;  %s20160_s2 = inlined_call_operand.hbm [shape: f32[48,128], index: 2, kind: output, shape index: {}]  }
   0x1   :  { %9 = vsyncpa [#allocation3 + $0x1], 0  ;;  %s15611_s9 = smov 0   ;;  %s15613_s10 = smov 0  }
   0x2   :  { %s15615_s11 = smov 0   ;;  %s15617_s12 = smov 0  }
   0x3 LB: > { %s15632_s13 = sadd.s32 4294967295, %s15591_s12   ;;  %s12740_s14 = sadd.s32 4294967294, %s15591_s12   ;;  %s15591_s12 = sphi %s15617_s12, %s20357_s12   ;;  %s15587_s11 = sphi %s15615_s11, %s20356_s11   ;;  %s15583_s10 = sphi %s15613_s10, %s20355_s10   ;;  %s15579_s9 = sphi %s15611_s9, %s20354_s9  }
   0x4   : > { %s15636_s15 = sadd.s32 1, %s15591_s12   ;;  %s69_s16 = sadd.s32 1, %s15587_s11 }
   0x5   : > { %s66_s17 = ssub.s32 %s15591_s12, %s15636_s15  ;;  %p79_p0 = scmp.ne.s32.totalorder %s15587_s11, %s15583_s10 }
   0x6   : > { %p67_p1 = scmp.eq.s32.totalorder %s66_s17, 0  ;;  %p80_p2 = scmp.eq.s32.totalorder %s15632_s13, 1 }
   0x7   : > { %p85_p3 = scmp.ne.s32.totalorder %s15583_s10, %s15579_s9  ;;  %p86_p4 = scmp.eq.s32.totalorder %s12740_s14, 1 }
   0x8   : > { %s15647_s18 = scalar_select %p67_p1, %s15587_s11, %s69_s16  }
   0x9   : > { %p15649_p5 = por %p80_p2, %p79_p0  ;;  %p15653_p6 = por %p86_p4, %p85_p3 }
   0xa   : > { %p12743_p7 = scmp.ge.s32.totalorder %s15591_s12, 1  ;;  %p127_p8 = scmp.lt.s32.totalorder %s15591_s12, 3 }
   0xc   : > { %p128_p9 = pnand %p12743_p7, %p127_p8 }
   0xd   : > { %s12745_s21 = sshll.u32 (!%p128_p9), %s15632_s13, 5  ;;  %vm2225_vm0 = vcmask (!%p128_p9), 130048   ;;  %vm7421_vm1 = vcmask (!%p128_p9), 130112   ;;  %vm7428_vm2 = vcmask (!%p128_p9), 195712   ;;  %vm7435_vm3 = vcmask (!%p128_p9), 261312  }
   0xe   : > { %131 = sbr.rel (%p128_p9) target bundleno = 2466 (0x9a2), region = 28  ;;  %p161_p10 = scmp.lt.s32.totalorder (!%p128_p9), %s12745_s21, 47  ;;  %vm7442_vm4 = vcmask (!%p128_p9), 326912   ;;  %vm7449_vm5 = vcmask (!%p128_p9), 392512   ;;  %vm7456_vm6 = vcmask (!%p128_p9), 458112   ;;  %vm7463_vm7 = vcmask (!%p128_p9), 523712  }
   0xf   : > { %vm20169_vm8 = vcmask (!%p128_p9), 589312   ;;  %vm20162_vm9 = vcmask (!%p128_p9), 654912   ;;  %vm7484_vm10 = vcmask (!%p128_p9), 720512   ;;  %vm20161_vm11 = vcmask (!%p128_p9), 786112  }
  0x10   : > { %vm7498_vm12 = vcmask (!%p128_p9), 851712   ;;  %vm7505_vm13 = vcmask (!%p128_p9), 917312   ;;  %vm7512_vm14 = vcmask (!%p128_p9), 982912   ;;  %vm7519_vm15 = vcmask (!%p128_p9), 1048512  }
  0x15   : > { %s20359_s21 = smov (!%p161_p10, %s12745_s21), 47  ;;  %s12749_s24 = sshll.u32 (%p15649_p5), %s15632_s13, 2 }
  0x16   : > { %s12757_s22 = sshll.u32 %s20359_s21, 7  ;;  %s152_s21 = sand.u32 1, %s15583_s10  }
  0x17   : > { %s15663_s25 = scalar_lea.vmem %s20158_s0, %s12757_s22  ;;  %s12744_s22 = sshll.u32 %s152_s21, 5 }
  0x18   : > { %v14871_v0 = vld [vmem:[%s15663_s25 + $0x8] sm:$0xff]   ;;  %v12760_v1 = vld [vmem:[%s15663_s25] sm:$0xff]   ;;  %v14872_v6 = vld [vmem:[%s15663_s25 + $0x10] sm:$0xff]   ;;  %s17269_s23 = scalar_lea.vmem [#allocation2], %s12744_s22  ;;  %s12667_s26 = ssub.s32 (%p15649_p5), 6, %s12749_s24 }
  0x19   : > { %v12765_v2 = vunpack.c.l.bf16 %v14871_v0  ;;  %v12761_v3 = vunpack.c.l.bf16 %v12760_v1  ;;  %v12766_v4 = vunpack.c.h.bf16 %v14871_v0  ;;  %v12762_v5 = vunpack.c.h.bf16 %v12760_v1  ;;  %v14873_v13 = vld [vmem:[%s15663_s25 + $0x18] sm:$0xff]   ;;  %v14874_v18 = vld [vmem:[%s15663_s25 + $0x20] sm:$0xff]   ;;  %v14875_v23 = vld [vmem:[%s15663_s25 + $0x28] sm:$0xff]   ;;  %p12668_p11 = scmp.lt.s32.totalorder (%p15649_p5), %s12667_s26, 4 }
  0x1a   : > { %v12770_v11 = vunpack.c.h.bf16 %v14872_v6  ;;  %v12769_v12 = vunpack.c.l.bf16 %v14872_v6  ;;  %v12774_v16 = vunpack.c.h.bf16 %v14873_v13  ;;  %v12773_v17 = vunpack.c.l.bf16 %v14873_v13  ;;  %v14876_v28 = vld [vmem:[%s15663_s25 + $0x30] sm:$0xff]   ;;  %v14877_v33 = vld [vmem:[%s15663_s25 + $0x38] sm:$0xff]   ;;  %v14878_v38 = vld [vmem:[%s15663_s25 + $0x40] sm:$0xff]  }
  0x1b   : > { %v2232_v7 = vsel %vm2225_vm0, %v12765_v2, 0.0  ;;  %v2226_v8 = vsel %vm2225_vm0, %v12761_v3, 0.0  ;;  %v2235_v9 = vsel %vm2225_vm0, %v12766_v4, 0.0  ;;  %v2229_v10 = vsel %vm2225_vm0, %v12762_v5, 0.0  ;;  %v14879_v43 = vld [vmem:[%s15663_s25 + $0x48] sm:$0xff]   ;;  %v14880_v48 = vld [vmem:[%s15663_s25 + $0x50] sm:$0xff]  }
  0x1c   : > { %2233 = vadd.xlane.f32.xlu1 %v2232_v7  ;;  %2227 = vadd.xlane.f32.xlu0 %v2226_v8  ;;  %v2241_v14 = vsel %vm2225_vm0, %v12770_v11, 0.0  ;;  %v2238_v15 = vsel %vm2225_vm0, %v12769_v12, 0.0  ;;  %v2247_v19 = vsel %vm2225_vm0, %v12774_v16, 0.0  ;;  %v2244_v20 = vsel %vm2225_vm0, %v12773_v17, 0.0  ;;  %v14881_v53 = vld [vmem:[%s15663_s25 + $0x58] sm:$0xff]   ;;  %v14882_v58 = vld [vmem:[%s15663_s25 + $0x60] sm:$0xff]  }
  0x1d   : > { %v12778_v21 = vunpack.c.h.bf16 %v14874_v18  ;;  %v12777_v22 = vunpack.c.l.bf16 %v14874_v18  ;;  %v12782_v26 = vunpack.c.h.bf16 %v14875_v23  ;;  %v12781_v27 = vunpack.c.l.bf16 %v14875_v23  ;;  %v14883_v63 = vld [vmem:[%s15663_s25 + $0x68] sm:$0xff]   ;;  %v14884_v4 = vld [vmem:[%s15663_s25 + $0x70] sm:$0xff]  }
  0x1e   : > { %v12786_v31 = vunpack.c.h.bf16 %v14876_v28  ;;  %v12785_v32 = vunpack.c.l.bf16 %v14876_v28  ;;  %v12790_v36 = vunpack.c.h.bf16 %v14877_v33  ;;  %v12789_v37 = vunpack.c.l.bf16 %v14877_v33 }
  0x1f   : > { %v2253_v24 = vsel %vm2225_vm0, %v12778_v21, 0.0  ;;  %v2250_v25 = vsel %vm2225_vm0, %v12777_v22, 0.0  ;;  %v2259_v29 = vsel %vm2225_vm0, %v12782_v26, 0.0  ;;  %v2256_v30 = vsel %vm2225_vm0, %v12781_v27, 0.0 }
  0x20   : > { %2236 = vadd.xlane.f32.xlu1 %v2235_v9  ;;  %2230 = vadd.xlane.f32.xlu0 %v2229_v10  ;;  %v2265_v34 = vsel %vm2225_vm0, %v12786_v31, 0.0  ;;  %v2262_v35 = vsel %vm2225_vm0, %v12785_v32, 0.0  ;;  %v2271_v39 = vsel %vm2225_vm0, %v12790_v36, 0.0  ;;  %v2268_v40 = vsel %vm2225_vm0, %v12789_v37, 0.0  ;;  %v14885_v9 = vld [vmem:[%s15663_s25 + $0x78] sm:$0xff]  }
  0x21   : > { %v12794_v41 = vunpack.c.h.bf16 %v14878_v38  ;;  %v12793_v42 = vunpack.c.l.bf16 %v14878_v38  ;;  %v12798_v46 = vunpack.c.h.bf16 %v14879_v43  ;;  %v12797_v47 = vunpack.c.l.bf16 %v14879_v43 }
  0x22   : > { %v12802_v51 = vunpack.c.h.bf16 %v14880_v48  ;;  %v12801_v52 = vunpack.c.l.bf16 %v14880_v48  ;;  %v12806_v56 = vunpack.c.h.bf16 %v14881_v53  ;;  %v12805_v57 = vunpack.c.l.bf16 %v14881_v53 }
  0x23   : > { %v2277_v44 = vsel %vm2225_vm0, %v12794_v41, 0.0  ;;  %v2274_v45 = vsel %vm2225_vm0, %v12793_v42, 0.0  ;;  %v2283_v49 = vsel %vm2225_vm0, %v12798_v46, 0.0  ;;  %v2280_v50 = vsel %vm2225_vm0, %v12797_v47, 0.0 }
  0x24   : > { %2242 = vadd.xlane.f32.xlu1 %v2241_v14  ;;  %2239 = vadd.xlane.f32.xlu0 %v2238_v15  ;;  %v2289_v54 = vsel %vm2225_vm0, %v12802_v51, 0.0  ;;  %v2286_v55 = vsel %vm2225_vm0, %v12801_v52, 0.0  ;;  %v2295_v59 = vsel %vm2225_vm0, %v12806_v56, 0.0  ;;  %v2292_v60 = vsel %vm2225_vm0, %v12805_v57, 0.0  ;;  %v14886_v14 = vld [vmem:[%s15663_s25 + $0x80] sm:$0xff]  }
  0x25   : > { %v12810_v61 = vunpack.c.h.bf16 %v14882_v58  ;;  %v12809_v62 = vunpack.c.l.bf16 %v14882_v58  ;;  %v12814_v2 = vunpack.c.h.bf16 %v14883_v63  ;;  %v12813_v3 = vunpack.c.l.bf16 %v14883_v63 }
  0x26   : > { %v12818_v7 = vunpack.c.h.bf16 %v14884_v4  ;;  %v12817_v8 = vunpack.c.l.bf16 %v14884_v4  ;;  %v12822_v12 = vunpack.c.h.bf16 %v14885_v9  ;;  %v12821_v13 = vunpack.c.l.bf16 %v14885_v9 }
  0x27   : > { %v2301_v0 = vsel %vm2225_vm0, %v12810_v61, 0.0  ;;  %v2298_v1 = vsel %vm2225_vm0, %v12809_v62, 0.0  ;;  %v2307_v5 = vsel %vm2225_vm0, %v12814_v2, 0.0  ;;  %v2304_v6 = vsel %vm2225_vm0, %v12813_v3, 0.0 }
  0x28   : > { %2248 = vadd.xlane.f32.xlu1 %v2247_v19  ;;  %2245 = vadd.xlane.f32.xlu0 %v2244_v20  ;;  %v2313_v10 = vsel %vm2225_vm0, %v12818_v7, 0.0  ;;  %v2310_v11 = vsel %vm2225_vm0, %v12817_v8, 0.0  ;;  %v2319_v15 = vsel %vm2225_vm0, %v12822_v12, 0.0  ;;  %v2316_v16 = vsel %vm2225_vm0, %v12821_v13, 0.0  ;;  %v14887_v19 = vld [vmem:[%s15663_s25 + $0x88] sm:$0xff]  }
  0x29   : > { %v12826_v17 = vunpack.c.h.bf16 %v14886_v14  ;;  %v12825_v18 = vunpack.c.l.bf16 %v14886_v14  ;;  %v12830_v22 = vunpack.c.h.bf16 %v14887_v19  ;;  %v12829_v23 = vunpack.c.l.bf16 %v14887_v19 }
  0x2b   : > { %v2325_v20 = vsel %vm2225_vm0, %v12826_v17, 0.0  ;;  %v2322_v21 = vsel %vm2225_vm0, %v12825_v18, 0.0  ;;  %v2328_v26 = vsel %vm2225_vm0, %v12829_v23, 0.0 }
  0x2c   : > { %2254 = vadd.xlane.f32.xlu1 %v2253_v24  ;;  %2251 = vadd.xlane.f32.xlu0 %v2250_v25  ;;  %v14888_v24 = vld [vmem:[%s15663_s25 + $0x90] sm:$0xff]   ;;  %v2331_v25 = vsel %vm2225_vm0, %v12830_v22, 0.0 }
  0x2d   : > { %v12834_v27 = vunpack.c.h.bf16 %v14888_v24  ;;  %v12833_v28 = vunpack.c.l.bf16 %v14888_v24 }
  0x2f   : > { %v2334_v31 = vsel %vm2225_vm0, %v12833_v28, 0.0 }
  0x30   : > { %2260 = vadd.xlane.f32.xlu1 %v2259_v29  ;;  %2257 = vadd.xlane.f32.xlu0 %v2256_v30  ;;  %v14889_v29 = vld [vmem:[%s15663_s25 + $0x98] sm:$0xff]   ;;  %v2337_v30 = vsel %vm2225_vm0, %v12834_v27, 0.0 }
  0x31   : > { %v12838_v32 = vunpack.c.h.bf16 %v14889_v29  ;;  %v12837_v33 = vunpack.c.l.bf16 %v14889_v29 }
  0x33   : > { %v2340_v36 = vsel %vm2225_vm0, %v12837_v33, 0.0 }
  0x34   : > { %2266 = vadd.xlane.f32.xlu1 %v2265_v34  ;;  %2263 = vadd.xlane.f32.xlu0 %v2262_v35  ;;  %v14890_v34 = vld [vmem:[%s15663_s25 + $0xa0] sm:$0xff]   ;;  %v2343_v35 = vsel %vm2225_vm0, %v12838_v32, 0.0 }
  0x35   : > { %v12842_v37 = vunpack.c.h.bf16 %v14890_v34  ;;  %v12841_v38 = vunpack.c.l.bf16 %v14890_v34 }
  0x37   : > { %v2346_v41 = vsel %vm2225_vm0, %v12841_v38, 0.0 }
  0x38   : > { %2272 = vadd.xlane.f32.xlu1 %v2271_v39  ;;  %2269 = vadd.xlane.f32.xlu0 %v2268_v40  ;;  %v14891_v39 = vld [vmem:[%s15663_s25 + $0xa8] sm:$0xff]   ;;  %v2349_v40 = vsel %vm2225_vm0, %v12842_v37, 0.0 }
  0x39   : > { %v12846_v42 = vunpack.c.h.bf16 %v14891_v39  ;;  %v12845_v43 = vunpack.c.l.bf16 %v14891_v39 }
  0x3b   : > { %v2352_v46 = vsel %vm2225_vm0, %v12845_v43, 0.0 }
  0x3c   : > { %2278 = vadd.xlane.f32.xlu1 %v2277_v44  ;;  %2275 = vadd.xlane.f32.xlu0 %v2274_v45  ;;  %v14892_v44 = vld [vmem:[%s15663_s25 + $0xb0] sm:$0xff]   ;;  %v2355_v45 = vsel %vm2225_vm0, %v12846_v42, 0.0 }
  0x3d   : > { %v12850_v47 = vunpack.c.h.bf16 %v14892_v44  ;;  %v12849_v48 = vunpack.c.l.bf16 %v14892_v44 }
  0x3f   : > { %v2358_v51 = vsel %vm2225_vm0, %v12849_v48, 0.0 }
  0x40   : > { %2284 = vadd.xlane.f32.xlu1 %v2283_v49  ;;  %2281 = vadd.xlane.f32.xlu0 %v2280_v50  ;;  %v14893_v49 = vld [vmem:[%s15663_s25 + $0xb8] sm:$0xff]   ;;  %v2361_v50 = vsel %vm2225_vm0, %v12850_v47, 0.0 }
  0x41   : > { %v12854_v52 = vunpack.c.h.bf16 %v14893_v49  ;;  %v12853_v53 = vunpack.c.l.bf16 %v14893_v49 }
  0x43   : > { %v2364_v56 = vsel %vm2225_vm0, %v12853_v53, 0.0  ;;  %v14907_v53 = vld [vmem:[%s15663_s25 + $0x128] sm:$0xff]  }
  0x44   : > { %2290 = vadd.xlane.f32.xlu1 %v2289_v54  ;;  %2287 = vadd.xlane.f32.xlu0 %v2286_v55  ;;  %v14894_v54 = vld [vmem:[%s15663_s25 + $0xc0] sm:$0xff]   ;;  %v2367_v55 = vsel %vm2225_vm0, %v12854_v52, 0.0 }
  0x45   : > { %v12858_v57 = vunpack.c.h.bf16 %v14894_v54  ;;  %v12857_v58 = vunpack.c.l.bf16 %v14894_v54 }
  0x47   : > { %v2370_v61 = vsel %vm2225_vm0, %v12857_v58, 0.0  ;;  %v12910_v58 = vunpack.c.h.bf16 %v14907_v53 }
  0x48   : > { %2296 = vadd.xlane.f32.xlu1 %v2295_v59  ;;  %2293 = vadd.xlane.f32.xlu0 %v2292_v60  ;;  %v14895_v59 = vld [vmem:[%s15663_s25 + $0xc8] sm:$0xff]   ;;  %v2373_v60 = vsel %vm2225_vm0, %v12858_v57, 0.0 }
  0x49   : > { %v12862_v62 = vunpack.c.h.bf16 %v14895_v59  ;;  %v12861_v63 = vunpack.c.l.bf16 %v14895_v59 }
  0x4b   : > { %v2376_v2 = vsel %vm2225_vm0, %v12861_v63, 0.0 }
  0x4c   : > { %2302 = vadd.xlane.f32.xlu1 %v2301_v0  ;;  %2299 = vadd.xlane.f32.xlu0 %v2298_v1  ;;  %v14896_v0 = vld [vmem:[%s15663_s25 + $0xd0] sm:$0xff]   ;;  %v2379_v1 = vsel %vm2225_vm0, %v12862_v62, 0.0 }
  0x4d   : > { %v12866_v3 = vunpack.c.h.bf16 %v14896_v0  ;;  %v12865_v4 = vunpack.c.l.bf16 %v14896_v0  ;;  %v14908_v62 = vld [vmem:[%s15663_s25 + $0x130] sm:$0xff]  }
  0x4f   : > { %v2382_v7 = vsel %vm2225_vm0, %v12865_v4, 0.0  ;;  %v12909_v4 = vunpack.c.l.bf16 %v14907_v53 }
  0x50   : > { %2308 = vadd.xlane.f32.xlu1 %v2307_v5  ;;  %2305 = vadd.xlane.f32.xlu0 %v2304_v6  ;;  %v14897_v5 = vld [vmem:[%s15663_s25 + $0xd8] sm:$0xff]   ;;  %v2385_v6 = vsel %vm2225_vm0, %v12866_v3, 0.0 }
  0x51   : > { %v12870_v8 = vunpack.c.h.bf16 %v14897_v5  ;;  %v12869_v9 = vunpack.c.l.bf16 %v14897_v5  ;;  %v2451_v5 = vsel %vm2225_vm0, %v12910_v58, 0.0  ;;  %v14911_v58 = vld [vmem:[%s15663_s25 + $0x148] sm:$0xff]  }
  0x53   : > { %v2388_v12 = vsel %vm2225_vm0, %v12869_v9, 0.0 }
  0x54   : > { %2314 = vadd.xlane.f32.xlu1 %v2313_v10  ;;  %2311 = vadd.xlane.f32.xlu0 %v2310_v11  ;;  %v14898_v10 = vld [vmem:[%s15663_s25 + $0xe0] sm:$0xff]   ;;  %v2391_v11 = vsel %vm2225_vm0, %v12870_v8, 0.0  ;;  %v12914_v8 = vunpack.c.h.bf16 %v14908_v62 }
  0x55   : > { %v12874_v13 = vunpack.c.h.bf16 %v14898_v10  ;;  %v12873_v14 = vunpack.c.l.bf16 %v14898_v10 }
  0x57   : > { %v2394_v17 = vsel %vm2225_vm0, %v12873_v14, 0.0 }
  0x58   : > { %2320 = vadd.xlane.f32.xlu1 %v2319_v15  ;;  %2317 = vadd.xlane.f32.xlu0 %v2316_v16  ;;  %v14899_v15 = vld [vmem:[%s15663_s25 + $0xe8] sm:$0xff]   ;;  %v2397_v16 = vsel %vm2225_vm0, %v12874_v13, 0.0 }
  0x59   : > { %v12878_v18 = vunpack.c.h.bf16 %v14899_v15  ;;  %v12877_v19 = vunpack.c.l.bf16 %v14899_v15 }
  0x5b   : > { %v2400_v22 = vsel %vm2225_vm0, %v12877_v19, 0.0 }
  0x5c   : > { %2326 = vadd.xlane.f32.xlu1 %v2325_v20  ;;  %2323 = vadd.xlane.f32.xlu0 %v2322_v21  ;;  %v14900_v20 = vld [vmem:[%s15663_s25 + $0xf0] sm:$0xff]   ;;  %v2403_v21 = vsel %vm2225_vm0, %v12878_v18, 0.0  ;;  %v12913_v18 = vunpack.c.l.bf16 %v14908_v62 }
  0x5d   : > { %v12882_v23 = vunpack.c.h.bf16 %v14900_v20  ;;  %v12881_v24 = vunpack.c.l.bf16 %v14900_v20 }
  0x5f   : > { %v2406_v27 = vsel %vm2225_vm0, %v12881_v24, 0.0 }
  0x60   : > { %2332 = vadd.xlane.f32.xlu1 %v2331_v25  ;;  %2329 = vadd.xlane.f32.xlu0 %v2328_v26  ;;  %v14901_v25 = vld [vmem:[%s15663_s25 + $0xf8] sm:$0xff]   ;;  %v2409_v26 = vsel %vm2225_vm0, %v12882_v23, 0.0 }
  0x61   : > { %v12886_v28 = vunpack.c.h.bf16 %v14901_v25  ;;  %v12885_v29 = vunpack.c.l.bf16 %v14901_v25 }
  0x63   : > { %v2412_v32 = vsel %vm2225_vm0, %v12885_v29, 0.0  ;;  %v2457_v29 = vsel %vm2225_vm0, %v12914_v8, 0.0  ;;  %v12925_v8 = vunpack.c.l.bf16 %v14911_v58 }
  0x64   : > { %2338 = vadd.xlane.f32.xlu1 %v2337_v30  ;;  %2335 = vadd.xlane.f32.xlu0 %v2334_v31  ;;  %v14902_v30 = vld [vmem:[%s15663_s25 + $0x100] sm:$0xff]   ;;  %v2415_v31 = vsel %vm2225_vm0, %v12886_v28, 0.0 }
  0x65   : > { %v12890_v33 = vunpack.c.h.bf16 %v14902_v30  ;;  %v12889_v34 = vunpack.c.l.bf16 %v14902_v30 }
  0x67   : > { %v2418_v37 = vsel %vm2225_vm0, %v12889_v34, 0.0 }
  0x68   : > { %2344 = vadd.xlane.f32.xlu1 %v2343_v35  ;;  %2341 = vadd.xlane.f32.xlu0 %v2340_v36  ;;  %v14903_v35 = vld [vmem:[%s15663_s25 + $0x108] sm:$0xff]   ;;  %v2421_v36 = vsel %vm2225_vm0, %v12890_v33, 0.0  ;;  %v2454_v33 = vsel %vm2225_vm0, %v12913_v18, 0.0 }
  0x69   : > { %v12894_v38 = vunpack.c.h.bf16 %v14903_v35  ;;  %v12893_v39 = vunpack.c.l.bf16 %v14903_v35 }
  0x6b   : > { %v2424_v42 = vsel %vm2225_vm0, %v12893_v39, 0.0  ;;  %v14910_v39 = vld [vmem:[%s15663_s25 + $0x140] sm:$0xff]  }
  0x6c   : > { %2350 = vadd.xlane.f32.xlu1 %v2349_v40  ;;  %2347 = vadd.xlane.f32.xlu0 %v2346_v41  ;;  %v14904_v40 = vld [vmem:[%s15663_s25 + $0x110] sm:$0xff]   ;;  %v2427_v41 = vsel %vm2225_vm0, %v12894_v38, 0.0  ;;  %v12921_v53 = vunpack.c.l.bf16 %v14910_v39 }
  0x6d   : > { %v12898_v43 = vunpack.c.h.bf16 %v14904_v40  ;;  %v12897_v44 = vunpack.c.l.bf16 %v14904_v40 }
  0x6f   : > { %v2433_v47 = vsel %vm2225_vm0, %v12898_v43, 0.0  ;;  %v2430_v48 = vsel %vm2225_vm0, %v12897_v44, 0.0 }
  0x70   : > { %2356 = vadd.xlane.f32.xlu1 %v2355_v45  ;;  %2353 = vadd.xlane.f32.xlu0 %v2352_v46  ;;  %v14905_v45 = vld [vmem:[%s15663_s25 + $0x118] sm:$0xff]  }
  0x71   : > { %v12902_v46 = vunpack.c.h.bf16 %v14905_v45  ;;  %v12901_v49 = vunpack.c.l.bf16 %v14905_v45 }
  0x73   : > { %v2439_v52 = vsel %vm2225_vm0, %v12902_v46, 0.0  ;;  %v2436_v54 = vsel %vm2225_vm0, %v12901_v49, 0.0 }
  0x74   : > { %2362 = vadd.xlane.f32.xlu1 %v2361_v50  ;;  %2359 = vadd.xlane.f32.xlu0 %v2358_v51  ;;  %v7410_v50 = vlaneseq  ;;  %v14906_v51 = vld [vmem:[%s15663_s25 + $0x120] sm:$0xff]  }
  0x75   : > { %v12905_v57 = vunpack.c.l.bf16 %v14906_v51 }
  0x76   : > { %v15777_v59 = vshrl.u32 %v7410_v50, 7 }
  0x77   : > { %v2442_v3 = vsel %vm2225_vm0, %v12905_v57, 0.0 }
  0x78   : > { %2368 = vadd.xlane.f32.xlu1 %v2367_v55  ;;  %2365 = vadd.xlane.f32.xlu0 %v2364_v56  ;;  %v15775_v55 = vand.u32 127, %v7410_v50  ;;  %v12906_v56 = vunpack.c.h.bf16 %v14906_v51 }
  0x7a   : > { %v7423_v63 = vadd.s32 4294967280, %v15775_v55  ;;  %v15790_v9 = vsub.s32 %v15775_v55, %v15777_v59  ;;  %v7458_v24 = vadd.s32 4294967240, %v15775_v55  ;;  %v7451_v25 = vadd.s32 4294967248, %v15775_v55 }
  0x7b   : > { %v7472_v43 = vadd.s32 4294967224, %v15775_v55  ;;  %v7486_v62 = vadd.s32 4294967208, %v15775_v55 }
  0x7c   : > { %2374 = vadd.xlane.f32.xlu1 %v2373_v60  ;;  %2371 = vadd.xlane.f32.xlu0 %v2370_v61  ;;  %v7430_v60 = vadd.s32 4294967272, %v15775_v55  ;;  %v7416_v61 = vadd.s32 4294967288, %v15775_v55  ;;  %v15799_v13 = vsub.s32 %v7423_v63, %v15777_v59 }
  0x7d   : > { %v15852_v18 = vsub.s32 %v7486_v62, %v15777_v59 }
  0x80   : > { %2380 = vadd.xlane.f32.xlu1 %v2379_v1  ;;  %2377 = vadd.xlane.f32.xlu0 %v2376_v2  ;;  %v2445_v2 = vsel %vm2225_vm0, %v12906_v56, 0.0 }
  0x84   : > { %2386 = vadd.xlane.f32.xlu1 %v2385_v6  ;;  %2383 = vadd.xlane.f32.xlu0 %v2382_v7  ;;  %v7444_v6 = vadd.s32 4294967256, %v15775_v55  ;;  %v7437_v7 = vadd.s32 4294967264, %v15775_v55 }
  0x86   : > { %v15807_v23 = vsub.s32 %v7437_v7, %v15777_v59  ;;  %v12926_v7 = vunpack.c.h.bf16 %v14911_v58 }
  0x88   : > { %2392 = vadd.xlane.f32.xlu1 %v2391_v11  ;;  %2389 = vadd.xlane.f32.xlu0 %v2388_v12  ;;  %v15793_v11 = vsub.s32 %v7430_v60, %v15777_v59  ;;  %v15796_v12 = vsub.s32 %v7416_v61, %v15777_v59  ;;  %v15837_v61 = vsub.s32 %v7472_v43, %v15777_v59 }
  0x8c   : > { %2398 = vadd.xlane.f32.xlu1 %v2397_v16  ;;  %2395 = vadd.xlane.f32.xlu0 %v2394_v17  ;;  %v2448_v17 = vsel %vm2225_vm0, %v12909_v4, 0.0 }
  0x90   : > { %2404 = vadd.xlane.f32.xlu1 %v2403_v21  ;;  %2401 = vadd.xlane.f32.xlu0 %v2400_v22  ;;  %v14909_v21 = vld [vmem:[%s15663_s25 + $0x138] sm:$0xff]   ;;  %v15804_v22 = vsub.s32 %v7444_v6, %v15777_v59  ;;  %v2466_v6 = vsel %vm2225_vm0, %v12921_v53, 0.0 }
  0x91   : > { %v12918_v34 = vunpack.c.h.bf16 %v14909_v21  ;;  %v12917_v35 = vunpack.c.l.bf16 %v14909_v21 }
  0x93   : > { %v2463_v50 = vsel %vm2225_vm0, %v12918_v34, 0.0  ;;  %v2460_v51 = vsel %vm2225_vm0, %v12917_v35, 0.0  ;;  %v14913_v35 = vld [vmem:[%s15663_s25 + $0x158] sm:$0xff]  }
  0x94   : > { %2410 = vadd.xlane.f32.xlu1 %v2409_v26  ;;  %2407 = vadd.xlane.f32.xlu0 %v2406_v27 }
  0x98   : > { %2416 = vadd.xlane.f32.xlu1 %v2415_v31  ;;  %2413 = vadd.xlane.f32.xlu0 %v2412_v32 }
  0x9c   : > { %2422 = vadd.xlane.f32.xlu1 %v2421_v36  ;;  %2419 = vadd.xlane.f32.xlu0 %v2418_v37 }
  0xa0   : > { %2428 = vadd.xlane.f32.xlu1 %v2427_v41  ;;  %2425 = vadd.xlane.f32.xlu0 %v2424_v42  ;;  %v15821_v41 = vsub.s32 %v7458_v24, %v15777_v59  ;;  %v15824_v42 = vsub.s32 %v7451_v25, %v15777_v59  ;;  %v7493_v25 = vadd.s32 4294967200, %v15775_v55 }
  0xa2   : > { %v15873_v43 = vsub.s32 %v7493_v25, %v15777_v59 }
  0xa4   : > { %2434 = vadd.xlane.f32.xlu1 %v2433_v47  ;;  %2431 = vadd.xlane.f32.xlu0 %v2430_v48  ;;  %v7465_v47 = vadd.s32 4294967232, %v15775_v55 }
  0xa8   : > { %2440 = vadd.xlane.f32.xlu1 %v2439_v52  ;;  %2437 = vadd.xlane.f32.xlu0 %v2436_v54  ;;  %v12922_v52 = vunpack.c.h.bf16 %v14910_v39 }
  0xa9   : > { %v2234_v0 = vpop.xlane.xlu1 %2233  ;;  %v2228_v1 = vpop.xlane.xlu0 %2227 }
  0xaa   : > { %v5298_v10 = vmul.f32 0.0625, %v2228_v1  ;;  %v5300_v14 = vmul.f32 0.0625, %v2234_v0  ;;  %v15843_v1 = vsub.s32 %v7465_v47, %v15777_v59 }
  0xac   : > { %2446 = vadd.xlane.f32.xlu1 %v2445_v2  ;;  %2443 = vadd.xlane.f32.xlu0 %v2442_v3  ;;  %v7415_v26 = vrot.slane %v5298_v10, %v15790_v9  ;;  %v7427_v30 = vrot.slane %v5300_v14, %v15799_v13  ;;  %v7479_v2 = vadd.s32 4294967216, %v15775_v55 }
  0xad   : > { %v2237_v15 = vpop.xlane.xlu1 %2236  ;;  %v2231_v16 = vpop.xlane.xlu0 %2230 }
  0xae   : > { %v5301_v19 = vmul.f32 0.0625, %v2237_v15  ;;  %v5299_v20 = vmul.f32 0.0625, %v2231_v16  ;;  %v14912_v16 = vld [vmem:[%s15663_s25 + $0x150] sm:$0xff]   ;;  %v15858_v24 = vsub.s32 %v7479_v2, %v15777_v59 }
  0xb0   : > { %v7434_v27 = vrot.slane %v5301_v19, %v15793_v11  ;;  %v7420_v28 = vrot.slane %v5299_v20, %v15796_v12  ;;  %2452 = vadd.xlane.f32.xlu1 %v2451_v5  ;;  %2449 = vadd.xlane.f32.xlu0 %v2448_v17  ;;  %v2469_v5 = vsel %vm2225_vm0, %v12922_v52, 0.0  ;;  %v7500_v19 = vadd.s32 4294967192, %v15775_v55 }
  0xb1   : > { %v2243_v31 = vpop.xlane.xlu1 %2242  ;;  %v2240_v32 = vpop.xlane.xlu0 %2239 }
  0xb2   : > { %v7422_v36 = vsel %vm7421_vm1, %v7420_v28, %v7415_v26  ;;  %v5303_v37 = vmul.f32 0.0625, %v2243_v31  ;;  %v5302_v38 = vmul.f32 0.0625, %v2240_v32  ;;  %v2475_v28 = vsel %vm2225_vm0, %v12926_v7, 0.0 }
  0xb3   : > { %v7429_v40 = vsel %vm7428_vm2, %v7427_v30, %v7422_v36  ;;  %v12930_v30 = vunpack.c.h.bf16 %v14912_v16  ;;  %v12929_v31 = vunpack.c.l.bf16 %v14912_v16 }
  0xb4   : > { %v7448_v44 = vrot.slane %v5303_v37, %v15804_v22  ;;  %v7436_v45 = vsel %vm7435_vm3, %v7434_v27, %v7429_v40  ;;  %v7441_v46 = vrot.slane %v5302_v38, %v15807_v23  ;;  %2458 = vadd.xlane.f32.xlu1 %v2457_v29  ;;  %2455 = vadd.xlane.f32.xlu0 %v2454_v33  ;;  %v2472_v29 = vsel %vm2225_vm0, %v12925_v8, 0.0  ;;  %v14915_v8 = vld [vmem:[%s15663_s25 + $0x168] sm:$0xff]  }
  0xb5   : > { %v2249_v48 = vpop.xlane.xlu1 %2248  ;;  %v2246_v49 = vpop.xlane.xlu0 %2245  ;;  %v15867_v37 = vsub.s32 %v7500_v19, %v15777_v59  ;;  %v7514_v38 = vadd.s32 4294967176, %v15775_v55  ;;  %v2481_v47 = vsel %vm2225_vm0, %v12930_v30, 0.0 }
  0xb6   : > { %v7443_v54 = vsel %vm7442_vm4, %v7441_v46, %v7436_v45  ;;  %v5305_v56 = vmul.f32 0.0625, %v2249_v48  ;;  %v5304_v57 = vmul.f32 0.0625, %v2246_v49  ;;  %v2478_v48 = vsel %vm2225_vm0, %v12929_v31, 0.0 }
  0xb7   : > { %v7450_v60 = vsel %vm7449_vm5, %v7448_v44, %v7443_v54  ;;  %v7507_v44 = vadd.s32 4294967184, %v15775_v55  ;;  %v12934_v49 = vunpack.c.h.bf16 %v14913_v35  ;;  %v14914_v54 = vld [vmem:[%s15663_s25 + $0x160] sm:$0xff]  }
  0xb8   : > { %v7462_v63 = vrot.slane %v5305_v56, %v15821_v41  ;;  %v7455_v0 = vrot.slane %v5304_v57, %v15824_v42  ;;  %2464 = vadd.xlane.f32.xlu1 %v2463_v50  ;;  %2461 = vadd.xlane.f32.xlu0 %v2460_v51  ;;  %v12933_v50 = vunpack.c.l.bf16 %v14913_v35  ;;  %v15882_v57 = vsub.s32 %v7514_v38, %v15777_v59 }
  0xb9   : > { %v2255_v3 = vpop.xlane.xlu1 %2254  ;;  %v2252_v4 = vpop.xlane.xlu0 %2251 }
  0xba   : > { %v7457_v10 = vsel %vm7456_vm6, %v7455_v0, %v7450_v60  ;;  %v5307_v14 = vmul.f32 0.0625, %v2255_v3  ;;  %v5306_v15 = vmul.f32 0.0625, %v2252_v4  ;;  %v15887_v60 = vsub.s32 %v7507_v44, %v15777_v59 }
  0xbb   : > { %v7464_v17 = vsel %vm7463_vm7, %v7462_v63, %v7457_v10  ;;  %v2487_v0 = vsel %vm2225_vm0, %v12934_v49, 0.0  ;;  %v2484_v2 = vsel %vm2225_vm0, %v12933_v50, 0.0  ;;  %v12938_v3 = vunpack.c.h.bf16 %v14914_v54 }
  0xbc   : > { %v7476_v20 = vrot.slane %v5307_v14, %v15837_v61  ;;  %v7469_v21 = vrot.slane %v5306_v15, %v15843_v1  ;;  %2470 = vadd.xlane.f32.xlu1 %v2469_v5  ;;  %2467 = vadd.xlane.f32.xlu0 %v2466_v6  ;;  %v12937_v4 = vunpack.c.l.bf16 %v14914_v54 }
  0xbd   : > { %v2261_v26 = vpop.xlane.xlu1 %2260  ;;  %v2258_v27 = vpop.xlane.xlu0 %2257 }
  0xbe   : > { %v7471_v32 = vsel %vm20169_vm8, %v7469_v21, %v7464_v17  ;;  %v5309_v33 = vmul.f32 0.0625, %v2261_v26  ;;  %v5308_v34 = vmul.f32 0.0625, %v2258_v27  ;;  %v2493_v17 = vsel %vm2225_vm0, %v12938_v3, 0.0 }
  0xbf   : > { %v7478_v36 = vsel %vm20162_vm9, %v7476_v20, %v7471_v32  ;;  %v2490_v19 = vsel %vm2225_vm0, %v12937_v4, 0.0  ;;  %v12942_v20 = vunpack.c.h.bf16 %v14915_v8  ;;  %v12941_v21 = vunpack.c.l.bf16 %v14915_v8 }
  0xc0   : > { %v7490_v39 = vrot.slane %v5309_v33, %v15852_v18  ;;  %v7483_v40 = vrot.slane %v5308_v34, %v15858_v24  ;;  %2476 = vadd.xlane.f32.xlu1 %v2475_v28  ;;  %2473 = vadd.xlane.f32.xlu0 %v2472_v29  ;;  %v14916_v28 = vld [vmem:[%s15663_s25 + $0x170] sm:$0xff]  }
  0xc1   : > { %v2267_v45 = vpop.xlane.xlu1 %2266  ;;  %v2264_v46 = vpop.xlane.xlu0 %2263  ;;  %v2499_v34 = vsel %vm2225_vm0, %v12942_v20, 0.0  ;;  %v2496_v35 = vsel %vm2225_vm0, %v12941_v21, 0.0  ;;  %v12945_v38 = vunpack.c.l.bf16 %v14916_v28 }
  0xc2   : > { %v7485_v51 = vsel %vm7484_vm10, %v7483_v40, %v7478_v36  ;;  %v5311_v52 = vmul.f32 0.0625, %v2267_v45  ;;  %v5310_v53 = vmul.f32 0.0625, %v2264_v46  ;;  %v12946_v36 = vunpack.c.h.bf16 %v14916_v28  ;;  %v14917_v45 = vld [vmem:[%s15663_s25 + $0x178] sm:$0xff]  }
  0xc3   : > { %v7492_v56 = vsel %vm20161_vm11, %v7490_v39, %v7485_v51  ;;  %v2502_v51 = vsel %vm2225_vm0, %v12945_v38, 0.0 }
  0xc4   : > { %v7504_v55 = vrot.slane %v5311_v52, %v15867_v37  ;;  %v7497_v58 = vrot.slane %v5310_v53, %v15873_v43  ;;  %2482 = vadd.xlane.f32.xlu1 %v2481_v47  ;;  %2479 = vadd.xlane.f32.xlu0 %v2478_v48  ;;  %v2505_v50 = vsel %vm2225_vm0, %v12946_v36, 0.0  ;;  %v12950_v52 = vunpack.c.h.bf16 %v14917_v45 }
  0xc5   : > { %v2273_v62 = vpop.xlane.xlu1 %2272  ;;  %v2270_v63 = vpop.xlane.xlu0 %2269  ;;  %v12949_v53 = vunpack.c.l.bf16 %v14917_v45 }
  0xc6   : > { %v7499_v5 = vsel %vm7498_vm12, %v7497_v58, %v7492_v56  ;;  %v5313_v6 = vmul.f32 0.0625, %v2273_v62  ;;  %v5312_v7 = vmul.f32 0.0625, %v2270_v63  ;;  %v14918_v58 = vld [vmem:[%s15663_s25 + $0x180] sm:$0xff]   ;;  %v2511_v4 = vsel %vm2225_vm0, %v12950_v52, 0.0 }
  0xc7   : > { %v7506_v10 = vsel %vm7505_vm13, %v7504_v55, %v7499_v5  ;;  %v2508_v5 = vsel %vm2225_vm0, %v12949_v53, 0.0 }
  0xc8   : > { %v7518_v59 = vrot.slane %v5313_v6, %v15882_v57  ;;  %v7511_v14 = vrot.slane %v5312_v7, %v15887_v60  ;;  %2488 = vadd.xlane.f32.xlu1 %v2487_v0  ;;  %2485 = vadd.xlane.f32.xlu0 %v2484_v2  ;;  %v12954_v6 = vunpack.c.h.bf16 %v14918_v58  ;;  %v12953_v7 = vunpack.c.l.bf16 %v14918_v58 }
  0xc9   : > { %v2279_v15 = vpop.xlane.xlu1 %2278  ;;  %v2276_v16 = vpop.xlane.xlu0 %2275 }
  0xca   : > { %v7513_v25 = vsel %vm7512_vm14, %v7511_v14, %v7506_v10  ;;  %v5315_v26 = vmul.f32 0.0625, %v2279_v15  ;;  %v5314_v27 = vmul.f32 0.0625, %v2276_v16  ;;  %v14919_v14 = vld [vmem:[%s15663_s25 + $0x188] sm:$0xff]   ;;  %v2517_v21 = vsel %vm2225_vm0, %v12954_v6, 0.0 }
  0xcb   : > { %v15901_v29 = vsel %vm7519_vm15, %v7518_v59, %v7513_v25  ;;  %v2514_v25 = vsel %vm2225_vm0, %v12953_v7, 0.0 }
  0xcc   : > { %v7528_v30 = vrot.slane %v5315_v26, %v15796_v12  ;;  %v7524_v31 = vrot.slane %v5314_v27, %v15790_v9  ;;  %2494 = vadd.xlane.f32.xlu1 %v2493_v17  ;;  %2491 = vadd.xlane.f32.xlu0 %v2490_v19  ;;  %v12958_v26 = vunpack.c.h.bf16 %v14919_v14  ;;  %v12957_v27 = vunpack.c.l.bf16 %v14919_v14 }
  0xcd   : > { %v2285_v32 = vpop.xlane.xlu1 %2284  ;;  %v2282_v33 = vpop.xlane.xlu0 %2281 }
  0xce   : > { %v7529_v39 = vsel %vm7421_vm1, %v7528_v30, %v7524_v31  ;;  %v5317_v40 = vmul.f32 0.0625, %v2285_v32  ;;  %v5316_v44 = vmul.f32 0.0625, %v2282_v33  ;;  %v14920_v32 = vld [vmem:[%s15663_s25 + $0x190] sm:$0xff]  }
  0xcf   : > { %v12961_v45 = vunpack.c.l.bf16 %v14920_v32 }
  0xd0   : > { %v7538_v46 = vrot.slane %v5317_v40, %v15793_v11  ;;  %v7533_v47 = vrot.slane %v5316_v44, %v15799_v13  ;;  %2500 = vadd.xlane.f32.xlu1 %v2499_v34  ;;  %2497 = vadd.xlane.f32.xlu0 %v2496_v35  ;;  %v2520_v40 = vsel %vm2225_vm0, %v12957_v27, 0.0  ;;  %v12962_v44 = vunpack.c.h.bf16 %v14920_v32 }
  0xd1   : > { %v2291_v48 = vpop.xlane.xlu1 %2290  ;;  %v2288_v49 = vpop.xlane.xlu0 %2287 }
  0xd2   : > { %v7534_v54 = vsel %vm7428_vm2, %v7533_v47, %v7529_v39  ;;  %v5319_v56 = vmul.f32 0.0625, %v2291_v48  ;;  %v5318_v55 = vmul.f32 0.0625, %v2288_v49  ;;  %v2523_v39 = vsel %vm2225_vm0, %v12958_v26, 0.0  ;;  %v14921_v49 = vld [vmem:[%s15663_s25 + $0x198] sm:$0xff]  }
  0xd3   : > { %v7539_v62 = vsel %vm7435_vm3, %v7538_v46, %v7534_v54  ;;  %v12966_v58 = vunpack.c.h.bf16 %v14921_v49 }
  0xd4   : > { %v7548_v63 = vrot.slane %v5319_v56, %v15804_v22  ;;  %v7543_v0 = vrot.slane %v5318_v55, %v15807_v23  ;;  %2506 = vadd.xlane.f32.xlu1 %v2505_v50  ;;  %2503 = vadd.xlane.f32.xlu0 %v2502_v51  ;;  %v2529_v56 = vsel %vm2225_vm0, %v12962_v44, 0.0  ;;  %v2526_v55 = vsel %vm2225_vm0, %v12961_v45, 0.0 }
  0xd5   : > { %v2297_v2 = vpop.xlane.xlu1 %2296  ;;  %v2294_v3 = vpop.xlane.xlu0 %2293 }
  0xd6   : > { %v7544_v8 = vsel %vm7442_vm4, %v7543_v0, %v7539_v62  ;;  %v5321_v10 = vmul.f32 0.0625, %v2297_v2  ;;  %v5320_v59 = vmul.f32 0.0625, %v2294_v3  ;;  %v12965_v62 = vunpack.c.l.bf16 %v14921_v49  ;;  %v14922_v3 = vld [vmem:[%s15663_s25 + $0x1a0] sm:$0xff]  }
  0xd7   : > { %v7549_v15 = vsel %vm7449_vm5, %v7548_v63, %v7544_v8  ;;  %v12970_v14 = vunpack.c.h.bf16 %v14922_v3 }
  0xd8   : > { %v7558_v16 = vrot.slane %v5321_v10, %v15821_v41  ;;  %v7553_v17 = vrot.slane %v5320_v59, %v15824_v42  ;;  %2512 = vadd.xlane.f32.xlu1 %v2511_v4  ;;  %2509 = vadd.xlane.f32.xlu0 %v2508_v5  ;;  %v2535_v10 = vsel %vm2225_vm0, %v12966_v58, 0.0  ;;  %v2532_v59 = vsel %vm2225_vm0, %v12965_v62, 0.0 }
  0xd9   : > { %v2303_v19 = vpop.xlane.xlu1 %2302  ;;  %v2300_v20 = vpop.xlane.xlu0 %2299 }
  0xda   : > { %v7554_v28 = vsel %vm7456_vm6, %v7553_v17, %v7549_v15  ;;  %v5323_v30 = vmul.f32 0.0625, %v2303_v19  ;;  %v5322_v31 = vmul.f32 0.0625, %v2300_v20  ;;  %v12969_v15 = vunpack.c.l.bf16 %v14922_v3  ;;  %v14923_v20 = vld [vmem:[%s15663_s25 + $0x1a8] sm:$0xff]  }
  0xdb   : > { %v7559_v33 = vsel %vm7463_vm7, %v7558_v16, %v7554_v28  ;;  %v12974_v32 = vunpack.c.h.bf16 %v14923_v20 }
  0xdc   : > { %v7568_v34 = vrot.slane %v5323_v30, %v15837_v61  ;;  %v7563_v35 = vrot.slane %v5322_v31, %v15843_v1  ;;  %2518 = vadd.xlane.f32.xlu1 %v2517_v21  ;;  %2515 = vadd.xlane.f32.xlu0 %v2514_v25  ;;  %v2541_v30 = vsel %vm2225_vm0, %v12970_v14, 0.0  ;;  %v2538_v31 = vsel %vm2225_vm0, %v12969_v15, 0.0 }
  0xdd   : > { %v2309_v36 = vpop.xlane.xlu1 %2308  ;;  %v2306_v38 = vpop.xlane.xlu0 %2305 }
  0xde   : > { %v7564_v46 = vsel %vm20169_vm8, %v7563_v35, %v7559_v33  ;;  %v5325_v47 = vmul.f32 0.0625, %v2309_v36  ;;  %v5324_v48 = vmul.f32 0.0625, %v2306_v38  ;;  %v12973_v33 = vunpack.c.l.bf16 %v14923_v20  ;;  %v14924_v38 = vld [vmem:[%s15663_s25 + $0x1b0] sm:$0xff]  }
  0xdf   : > { %v7569_v50 = vsel %vm20162_vm9, %v7568_v34, %v7564_v46  ;;  %v12978_v49 = vunpack.c.h.bf16 %v14924_v38 }
  0xe0   : > { %v7578_v51 = vrot.slane %v5325_v47, %v15852_v18  ;;  %v7573_v52 = vrot.slane %v5324_v48, %v15858_v24  ;;  %2524 = vadd.xlane.f32.xlu1 %v2523_v39  ;;  %2521 = vadd.xlane.f32.xlu0 %v2520_v40  ;;  %v2547_v47 = vsel %vm2225_vm0, %v12974_v32, 0.0  ;;  %v2544_v48 = vsel %vm2225_vm0, %v12973_v33, 0.0 }
  0xe1   : > { %v2315_v53 = vpop.xlane.xlu1 %2314  ;;  %v2312_v54 = vpop.xlane.xlu0 %2311 }
  0xe2   : > { %v7574_v63 = vsel %vm7484_vm10, %v7573_v52, %v7569_v50  ;;  %v5327_v0 = vmul.f32 0.0625, %v2315_v53  ;;  %v5326_v2 = vmul.f32 0.0625, %v2312_v54  ;;  %v12977_v50 = vunpack.c.l.bf16 %v14924_v38  ;;  %v14925_v54 = vld [vmem:[%s15663_s25 + $0x1b8] sm:$0xff]  }
  0xe3   : > { %v7579_v4 = vsel %vm20161_vm11, %v7578_v51, %v7574_v63  ;;  %v2553_v63 = vsel %vm2225_vm0, %v12978_v49, 0.0  ;;  %v12981_v3 = vunpack.c.l.bf16 %v14925_v54 }
  0xe4   : > { %v7588_v5 = vrot.slane %v5327_v0, %v15867_v37  ;;  %v7583_v6 = vrot.slane %v5326_v2, %v15873_v43  ;;  %2530 = vadd.xlane.f32.xlu1 %v2529_v56  ;;  %2527 = vadd.xlane.f32.xlu0 %v2526_v55  ;;  %v2550_v0 = vsel %vm2225_vm0, %v12977_v50, 0.0  ;;  %v12982_v2 = vunpack.c.h.bf16 %v14925_v54 }
  0xe5   : > { %v2321_v7 = vpop.xlane.xlu1 %2320  ;;  %v2318_v8 = vpop.xlane.xlu0 %2317 }
  0xe6   : > { %v7584_v16 = vsel %vm7498_vm12, %v7583_v6, %v7579_v4  ;;  %v5329_v17 = vmul.f32 0.0625, %v2321_v7  ;;  %v5328_v19 = vmul.f32 0.0625, %v2318_v8  ;;  %v14926_v7 = vld [vmem:[%s15663_s25 + $0x1c0] sm:$0xff]  }
  0xe7   : > { %v7589_v21 = vsel %vm7505_vm13, %v7588_v5, %v7584_v16  ;;  %v2559_v16 = vsel %vm2225_vm0, %v12982_v2, 0.0  ;;  %v12985_v20 = vunpack.c.l.bf16 %v14926_v7 }
  0xe8   : > { %v7598_v25 = vrot.slane %v5329_v17, %v15882_v57  ;;  %v7593_v26 = vrot.slane %v5328_v19, %v15887_v60  ;;  %2536 = vadd.xlane.f32.xlu1 %v2535_v10  ;;  %2533 = vadd.xlane.f32.xlu0 %v2532_v59  ;;  %v2556_v17 = vsel %vm2225_vm0, %v12981_v3, 0.0  ;;  %v12986_v19 = vunpack.c.h.bf16 %v14926_v7 }
  0xe9   : > { %v2327_v27 = vpop.xlane.xlu1 %2326  ;;  %v2324_v28 = vpop.xlane.xlu0 %2323 }
  0xea   : > { %v7594_v34 = vsel %vm7512_vm14, %v7593_v26, %v7589_v21  ;;  %v5331_v35 = vmul.f32 0.0625, %v2327_v27  ;;  %v5330_v36 = vmul.f32 0.0625, %v2324_v28  ;;  %v14927_v27 = vld [vmem:[%s15663_s25 + $0x1c8] sm:$0xff]  }
  0xeb   : > { %v15958_v39 = vsel %vm7519_vm15, %v7598_v25, %v7594_v34  ;;  %v2565_v34 = vsel %vm2225_vm0, %v12986_v19, 0.0  ;;  %v12989_v38 = vunpack.c.l.bf16 %v14927_v27 }
  0xec   : > { %v7607_v40 = vrot.slane %v5331_v35, %v15796_v12  ;;  %v7603_v44 = vrot.slane %v5330_v36, %v15790_v9  ;;  %2542 = vadd.xlane.f32.xlu1 %v2541_v30  ;;  %2539 = vadd.xlane.f32.xlu0 %v2538_v31  ;;  %v2562_v35 = vsel %vm2225_vm0, %v12985_v20, 0.0  ;;  %v12990_v36 = vunpack.c.h.bf16 %v14927_v27 }
  0xed   : > { %v2333_v45 = vpop.xlane.xlu1 %2332  ;;  %v2330_v46 = vpop.xlane.xlu0 %2329 }
  0xee   : > { %v7608_v51 = vsel %vm7421_vm1, %v7607_v40, %v7603_v44  ;;  %v5333_v52 = vmul.f32 0.0625, %v2333_v45  ;;  %v5332_v53 = vmul.f32 0.0625, %v2330_v46  ;;  %v14928_v46 = vld [vmem:[%s15663_s25 + $0x1d0] sm:$0xff]  }
  0xef   : > { %v12994_v54 = vunpack.c.h.bf16 %v14928_v46 }
  0xf0   : > { %v7617_v56 = vrot.slane %v5333_v52, %v15793_v11  ;;  %v7612_v55 = vrot.slane %v5332_v53, %v15799_v13  ;;  %2548 = vadd.xlane.f32.xlu1 %v2547_v47  ;;  %2545 = vadd.xlane.f32.xlu0 %v2544_v48  ;;  %v2571_v52 = vsel %vm2225_vm0, %v12990_v36, 0.0  ;;  %v2568_v53 = vsel %vm2225_vm0, %v12989_v38, 0.0 }
  0xf1   : > { %v2339_v58 = vpop.xlane.xlu1 %2338  ;;  %v2336_v62 = vpop.xlane.xlu0 %2335 }
  0xf2   : > { %v7613_v4 = vsel %vm7428_vm2, %v7612_v55, %v7608_v51  ;;  %v5335_v5 = vmul.f32 0.0625, %v2339_v58  ;;  %v5334_v6 = vmul.f32 0.0625, %v2336_v62 }
  0xf3   : > { %v7618_v8 = vsel %vm7435_vm3, %v7617_v56, %v7613_v4  ;;  %v12993_v56 = vunpack.c.l.bf16 %v14928_v46 }
  0xf4   : > { %v7627_v10 = vrot.slane %v5335_v5, %v15804_v22  ;;  %v7622_v59 = vrot.slane %v5334_v6, %v15807_v23  ;;  %2554 = vadd.xlane.f32.xlu1 %v2553_v63  ;;  %2551 = vadd.xlane.f32.xlu0 %v2550_v0  ;;  %v14929_v63 = vld [vmem:[%s15663_s25 + $0x1d8] sm:$0xff]   ;;  %v2577_v6 = vsel %vm2225_vm0, %v12994_v54, 0.0 }
  0xf5   : > { %v2345_v14 = vpop.xlane.xlu1 %2344  ;;  %v2342_v15 = vpop.xlane.xlu0 %2341  ;;  %v2574_v7 = vsel %vm2225_vm0, %v12993_v56, 0.0 }
  0xf6   : > { %v7623_v21 = vsel %vm7442_vm4, %v7622_v59, %v7618_v8  ;;  %v5337_v25 = vmul.f32 0.0625, %v2345_v14  ;;  %v5336_v26 = vmul.f32 0.0625, %v2342_v15  ;;  %v12998_v8 = vunpack.c.h.bf16 %v14929_v63 }
  0xf7   : > { %v7628_v28 = vsel %vm7449_vm5, %v7627_v10, %v7623_v21  ;;  %v12997_v10 = vunpack.c.l.bf16 %v14929_v63 }
  0xf8   : > { %v7637_v30 = vrot.slane %v5337_v25, %v15821_v41  ;;  %v7632_v31 = vrot.slane %v5336_v26, %v15824_v42  ;;  %2560 = vadd.xlane.f32.xlu1 %v2559_v16  ;;  %2557 = vadd.xlane.f32.xlu0 %v2556_v17  ;;  %v14930_v16 = vld [vmem:[%s15663_s25 + $0x1e0] sm:$0xff]   ;;  %v2583_v26 = vsel %vm2225_vm0, %v12998_v8, 0.0 }
  0xf9   : > { %v2351_v32 = vpop.xlane.xlu1 %2350  ;;  %v2348_v33 = vpop.xlane.xlu0 %2347  ;;  %v2580_v27 = vsel %vm2225_vm0, %v12997_v10, 0.0 }
  0xfa   : > { %v7633_v40 = vsel %vm7456_vm6, %v7632_v31, %v7628_v28  ;;  %v5339_v44 = vmul.f32 0.0625, %v2351_v32  ;;  %v5338_v45 = vmul.f32 0.0625, %v2348_v33  ;;  %v13002_v28 = vunpack.c.h.bf16 %v14930_v16 }
  0xfb   : > { %v7638_v47 = vsel %vm7463_vm7, %v7637_v30, %v7633_v40  ;;  %v13001_v30 = vunpack.c.l.bf16 %v14930_v16 }
  0xfc   : > { %v7647_v48 = vrot.slane %v5339_v44, %v15837_v61  ;;  %v7642_v49 = vrot.slane %v5338_v45, %v15843_v1  ;;  %2566 = vadd.xlane.f32.xlu1 %v2565_v34  ;;  %2563 = vadd.xlane.f32.xlu0 %v2562_v35  ;;  %v14931_v34 = vld [vmem:[%s15663_s25 + $0x1e8] sm:$0xff]   ;;  %v2589_v45 = vsel %vm2225_vm0, %v13002_v28, 0.0 }
  0xfd   : > { %v2357_v50 = vpop.xlane.xlu1 %2356  ;;  %v2354_v51 = vpop.xlane.xlu0 %2353  ;;  %v2586_v46 = vsel %vm2225_vm0, %v13001_v30, 0.0 }
  0xfe   : > { %v7643_v55 = vsel %vm20169_vm8, %v7642_v49, %v7638_v47  ;;  %v5341_v58 = vmul.f32 0.0625, %v2357_v50  ;;  %v5340_v62 = vmul.f32 0.0625, %v2354_v51  ;;  %v13006_v47 = vunpack.c.h.bf16 %v14931_v34 }
  0xff   : > { %v7648_v0 = vsel %vm20162_vm9, %v7647_v48, %v7643_v55  ;;  %v13005_v48 = vunpack.c.l.bf16 %v14931_v34 }
 0x100   : > { %v7657_v2 = vrot.slane %v5341_v58, %v15852_v18  ;;  %v7652_v3 = vrot.slane %v5340_v62, %v15858_v24  ;;  %2572 = vadd.xlane.f32.xlu1 %v2571_v52  ;;  %2569 = vadd.xlane.f32.xlu0 %v2568_v53  ;;  %v14932_v52 = vld [vmem:[%s15663_s25 + $0x1f0] sm:$0xff]   ;;  %v2595_v63 = vsel %vm2225_vm0, %v13006_v47, 0.0 }
 0x101   : > { %v2363_v4 = vpop.xlane.xlu1 %2362  ;;  %v2360_v5 = vpop.xlane.xlu0 %2359 }
 0x102   : > { %v7653_v59 = vsel %vm7484_vm10, %v7652_v3, %v7648_v0  ;;  %v5343_v14 = vmul.f32 0.0625, %v2363_v4  ;;  %v5342_v15 = vmul.f32 0.0625, %v2360_v5  ;;  %v2592_v0 = vsel %vm2225_vm0, %v13005_v48, 0.0 }
 0x103   : > { %v7658_v17 = vsel %vm20161_vm11, %v7657_v2, %v7653_v59  ;;  %vm20163_vm11 = vcmask 1041409   ;;  %v13010_v2 = vunpack.c.h.bf16 %v14932_v52  ;;  %v13009_v3 = vunpack.c.l.bf16 %v14932_v52 }
 0x104   : > { %v7667_v19 = vrot.slane %v5343_v14, %v15867_v37  ;;  %v7662_v20 = vrot.slane %v5342_v15, %v15873_v43  ;;  %2578 = vadd.xlane.f32.xlu1 %v2577_v6  ;;  %2575 = vadd.xlane.f32.xlu0 %v2574_v7  ;;  %v14933_v6 = vld [vmem:[%s15663_s25 + $0x1f8] sm:$0xff]  }
 0x105   : > { %v2369_v21 = vpop.xlane.xlu1 %2368  ;;  %v2366_v25 = vpop.xlane.xlu0 %2365  ;;  %v2601_v14 = vsel %vm2225_vm0, %v13010_v2, 0.0  ;;  %v2598_v15 = vsel %vm2225_vm0, %v13009_v3, 0.0  ;;  %v13014_v16 = vunpack.c.h.bf16 %v14933_v6 }
 0x106   : > { %v7663_v31 = vsel %vm7498_vm12, %v7662_v20, %v7658_v17  ;;  %v5345_v32 = vmul.f32 0.0625, %v2369_v21  ;;  %v5344_v33 = vmul.f32 0.0625, %v2366_v25  ;;  %v13013_v17 = vunpack.c.l.bf16 %v14933_v6  ;;  %v14934_v25 = vld [vmem:[%s15663_s25 + $0x200] sm:$0xff]  }
 0x107   : > { %v7668_v35 = vsel %vm7505_vm13, %v7667_v19, %v7663_v31  ;;  %v13018_v34 = vunpack.c.h.bf16 %v14934_v25 }
 0x108   : > { %v7677_v36 = vrot.slane %v5345_v32, %v15882_v57  ;;  %v7672_v38 = vrot.slane %v5344_v33, %v15887_v60  ;;  %2584 = vadd.xlane.f32.xlu1 %v2583_v26  ;;  %2581 = vadd.xlane.f32.xlu0 %v2580_v27  ;;  %v2607_v32 = vsel %vm2225_vm0, %v13014_v16, 0.0  ;;  %v2604_v33 = vsel %vm2225_vm0, %v13013_v17, 0.0 }
 0x109   : > { %v2375_v40 = vpop.xlane.xlu1 %2374  ;;  %v2372_v44 = vpop.xlane.xlu0 %2371 }
 0x10a   : > { %v7673_v49 = vsel %vm7512_vm14, %v7672_v38, %v7668_v35  ;;  %v5347_v50 = vmul.f32 0.0625, %v2375_v40  ;;  %v5346_v51 = vmul.f32 0.0625, %v2372_v44  ;;  %v13017_v35 = vunpack.c.l.bf16 %v14934_v25  ;;  %v14935_v44 = vld [vmem:[%s15663_s25 + $0x208] sm:$0xff]  }
 0x10b   : > { %v7678_v53 = vsel %vm7519_vm15, %v7677_v36, %v7673_v49  ;;  %v13022_v52 = vunpack.c.h.bf16 %v14935_v44 }
 0x10c   : > { %v16017_v54 = vsel %vm20163_vm11, %v7678_v53, %v15901_v29  ;;  %v7686_v56 = vrot.slane %v5347_v50, %v15796_v12  ;;  %v7682_v55 = vrot.slane %v5346_v51, %v15790_v9  ;;  %2590 = vadd.xlane.f32.xlu1 %v2589_v45  ;;  %2587 = vadd.xlane.f32.xlu0 %v2586_v46  ;;  %v2613_v50 = vsel %vm2225_vm0, %v13018_v34, 0.0 }
 0x10d   : > { %v2381_v58 = vpop.xlane.xlu1 %2380  ;;  %v2378_v62 = vpop.xlane.xlu0 %2377  ;;  %v2610_v51 = vsel %vm2225_vm0, %v13017_v35, 0.0  ;;  %v13021_v53 = vunpack.c.l.bf16 %v14935_v44 }
 0x10e   : > { %v7687_v4 = vsel %vm7421_vm1, %v7686_v56, %v7682_v55  ;;  %v5349_v5 = vmul.f32 0.0625, %v2381_v58  ;;  %v5348_v29 = vmul.f32 0.0625, %v2378_v62  ;;  %v14936_v62 = vld [vmem:[%s15663_s25 + $0x210] sm:$0xff]  }
 0x10f   : > { %v13026_v6 = vunpack.c.h.bf16 %v14936_v62 }
 0x110   : > { %v7696_v7 = vrot.slane %v5349_v5, %v15793_v11  ;;  %v7691_v8 = vrot.slane %v5348_v29, %v15799_v13  ;;  %2596 = vadd.xlane.f32.xlu1 %v2595_v63  ;;  %2593 = vadd.xlane.f32.xlu0 %v2592_v0  ;;  %v2619_v5 = vsel %vm2225_vm0, %v13022_v52, 0.0  ;;  %v2616_v29 = vsel %vm2225_vm0, %v13021_v53, 0.0 }
 0x111   : > { %v2387_v10 = vpop.xlane.xlu1 %2386  ;;  %v2384_v59 = vpop.xlane.xlu0 %2383 }
 0x112   : > { %v7692_v19 = vsel %vm7428_vm2, %v7691_v8, %v7687_v4  ;;  %v5351_v20 = vmul.f32 0.0625, %v2387_v10  ;;  %v5350_v21 = vmul.f32 0.0625, %v2384_v59 }
 0x113   : > { %v7697_v26 = vsel %vm7435_vm3, %v7696_v7, %v7692_v19  ;;  %v13025_v7 = vunpack.c.l.bf16 %v14936_v62 }
 0x114   : > { %v7706_v27 = vrot.slane %v5351_v20, %v15804_v22  ;;  %v7701_v28 = vrot.slane %v5350_v21, %v15807_v23  ;;  %2602 = vadd.xlane.f32.xlu1 %v2601_v14  ;;  %2599 = vadd.xlane.f32.xlu0 %v2598_v15  ;;  %v14937_v14 = vld [vmem:[%s15663_s25 + $0x218] sm:$0xff]   ;;  %v2625_v21 = vsel %vm2225_vm0, %v13026_v6, 0.0 }
 0x115   : > { %v2393_v30 = vpop.xlane.xlu1 %2392  ;;  %v2390_v31 = vpop.xlane.xlu0 %2389  ;;  %v2622_v25 = vsel %vm2225_vm0, %v13025_v7, 0.0 }
 0x116   : > { %v7702_v36 = vsel %vm7442_vm4, %v7701_v28, %v7697_v26  ;;  %v5353_v38 = vmul.f32 0.0625, %v2393_v30  ;;  %v5352_v40 = vmul.f32 0.0625, %v2390_v31  ;;  %v13030_v26 = vunpack.c.h.bf16 %v14937_v14 }
 0x117   : > { %v7707_v45 = vsel %vm7449_vm5, %v7706_v27, %v7702_v36  ;;  %v13029_v27 = vunpack.c.l.bf16 %v14937_v14 }
 0x118   : > { %v7716_v46 = vrot.slane %v5353_v38, %v15821_v41  ;;  %v7711_v47 = vrot.slane %v5352_v40, %v15824_v42  ;;  %2608 = vadd.xlane.f32.xlu1 %v2607_v32  ;;  %2605 = vadd.xlane.f32.xlu0 %v2604_v33  ;;  %v14938_v32 = vld [vmem:[%s15663_s25 + $0x220] sm:$0xff]   ;;  %v2631_v40 = vsel %vm2225_vm0, %v13030_v26, 0.0 }
 0x119   : > { %v2399_v48 = vpop.xlane.xlu1 %2398  ;;  %v2396_v49 = vpop.xlane.xlu0 %2395  ;;  %v2628_v44 = vsel %vm2225_vm0, %v13029_v27, 0.0 }
 0x11a   : > { %v7712_v56 = vsel %vm7456_vm6, %v7711_v47, %v7707_v45  ;;  %v5355_v55 = vmul.f32 0.0625, %v2399_v48  ;;  %v5354_v58 = vmul.f32 0.0625, %v2396_v49  ;;  %v13034_v45 = vunpack.c.h.bf16 %v14938_v32 }
 0x11b   : > { %v7717_v63 = vsel %vm7463_vm7, %v7716_v46, %v7712_v56  ;;  %v13033_v46 = vunpack.c.l.bf16 %v14938_v32 }
 0x11c   : > { %v7726_v0 = vrot.slane %v5355_v55, %v15837_v61  ;;  %v7721_v2 = vrot.slane %v5354_v58, %v15843_v1  ;;  %2614 = vadd.xlane.f32.xlu1 %v2613_v50  ;;  %2611 = vadd.xlane.f32.xlu0 %v2610_v51  ;;  %v14939_v50 = vld [vmem:[%s15663_s25 + $0x228] sm:$0xff]   ;;  %v2637_v58 = vsel %vm2225_vm0, %v13034_v45, 0.0 }
 0x11d   : > { %v2405_v3 = vpop.xlane.xlu1 %2404  ;;  %v2402_v4 = vpop.xlane.xlu0 %2401  ;;  %v2634_v62 = vsel %vm2225_vm0, %v13033_v46, 0.0 }
 0x11e   : > { %v7722_v8 = vsel %vm20169_vm8, %v7721_v2, %v7717_v63  ;;  %v5357_v10 = vmul.f32 0.0625, %v2405_v3  ;;  %v5356_v59 = vmul.f32 0.0625, %v2402_v4  ;;  %v13038_v63 = vunpack.c.h.bf16 %v14939_v50 }
 0x11f   : > { %v7727_v15 = vsel %vm20162_vm9, %v7726_v0, %v7722_v8  ;;  %vm20172_vm9 = vcmask 786112   ;;  %v13037_v0 = vunpack.c.l.bf16 %v14939_v50 }
 0x120   : > { %v7736_v16 = vrot.slane %v5357_v10, %v15852_v18  ;;  %v7731_v17 = vrot.slane %v5356_v59, %v15858_v24  ;;  %2620 = vadd.xlane.f32.xlu1 %v2619_v5  ;;  %2617 = vadd.xlane.f32.xlu0 %v2616_v29  ;;  %v14940_v5 = vld [vmem:[%s15663_s25 + $0x230] sm:$0xff]   ;;  %v2643_v14 = vsel %vm2225_vm0, %v13038_v63, 0.0 }
 0x121   : > { %v2411_v19 = vpop.xlane.xlu1 %2410  ;;  %v2408_v20 = vpop.xlane.xlu0 %2407 }
 0x122   : > { %v7732_v28 = vsel %vm7484_vm10, %v7731_v17, %v7727_v15  ;;  %v5359_v30 = vmul.f32 0.0625, %v2411_v19  ;;  %v5358_v31 = vmul.f32 0.0625, %v2408_v20  ;;  %v2640_v15 = vsel %vm2225_vm0, %v13037_v0, 0.0 }
 0x123   : > { %v7737_v33 = vsel %vm20172_vm9, %v7736_v16, %v7732_v28  ;;  %v13042_v16 = vunpack.c.h.bf16 %v14940_v5  ;;  %v13041_v17 = vunpack.c.l.bf16 %v14940_v5  ;;  %vm20173_vm9 = vcmask 654912  }
 0x124   : > { %v7746_v34 = vrot.slane %v5359_v30, %v15867_v37  ;;  %v7741_v35 = vrot.slane %v5358_v31, %v15873_v43  ;;  %2626 = vadd.xlane.f32.xlu1 %v2625_v21  ;;  %2623 = vadd.xlane.f32.xlu0 %v2622_v25  ;;  %v14941_v21 = vld [vmem:[%s15663_s25 + $0x238] sm:$0xff]  }
 0x125   : > { %v2417_v36 = vpop.xlane.xlu1 %2416  ;;  %v2414_v38 = vpop.xlane.xlu0 %2413  ;;  %v2649_v30 = vsel %vm2225_vm0, %v13042_v16, 0.0  ;;  %v2646_v31 = vsel %vm2225_vm0, %v13041_v17, 0.0  ;;  %v13046_v32 = vunpack.c.h.bf16 %v14941_v21 }
 0x126   : > { %v7742_v47 = vsel %vm7498_vm12, %v7741_v35, %v7737_v33  ;;  %v5361_v48 = vmul.f32 0.0625, %v2417_v36  ;;  %v5360_v49 = vmul.f32 0.0625, %v2414_v38  ;;  %v13045_v33 = vunpack.c.l.bf16 %v14941_v21  ;;  %v14942_v38 = vld [vmem:[%s15663_s25 + $0x240] sm:$0xff]  }
 0x127   : > { %v7747_v51 = vsel %vm7505_vm13, %v7746_v34, %v7742_v47  ;;  %v13050_v50 = vunpack.c.h.bf16 %v14942_v38 }
 0x128   : > { %v7756_v52 = vrot.slane %v5361_v48, %v15882_v57  ;;  %v7751_v53 = vrot.slane %v5360_v49, %v15887_v60  ;;  %2632 = vadd.xlane.f32.xlu1 %v2631_v40  ;;  %2629 = vadd.xlane.f32.xlu0 %v2628_v44  ;;  %v2655_v48 = vsel %vm2225_vm0, %v13046_v32, 0.0  ;;  %v2652_v49 = vsel %vm2225_vm0, %v13045_v33, 0.0 }
 0x129   : > { %v2423_v56 = vpop.xlane.xlu1 %2422  ;;  %v2420_v55 = vpop.xlane.xlu0 %2419 }
 0x12a   : > { %v7752_v2 = vsel %vm7512_vm14, %v7751_v53, %v7747_v51  ;;  %v5363_v3 = vmul.f32 0.0625, %v2423_v56  ;;  %v5362_v4 = vmul.f32 0.0625, %v2420_v55  ;;  %v13049_v51 = vunpack.c.l.bf16 %v14942_v38  ;;  %v14943_v55 = vld [vmem:[%s15663_s25 + $0x248] sm:$0xff]  }
 0x12b   : > { %v7757_v29 = vsel %vm7519_vm15, %v7756_v52, %v7752_v2  ;;  %v13054_v5 = vunpack.c.h.bf16 %v14943_v55 }
 0x12c   : > { %v16076_v6 = vsel %vm20163_vm11, %v7757_v29, %v15958_v39  ;;  %v7765_v7 = vrot.slane %v5363_v3, %v15796_v12  ;;  %v7761_v8 = vrot.slane %v5362_v4, %v15790_v9  ;;  %2638 = vadd.xlane.f32.xlu1 %v2637_v58  ;;  %2635 = vadd.xlane.f32.xlu0 %v2634_v62  ;;  %v2661_v3 = vsel %vm2225_vm0, %v13050_v50, 0.0 }
 0x12d   : > { %v2429_v10 = vpop.xlane.xlu1 %2428  ;;  %v2426_v59 = vpop.xlane.xlu0 %2425  ;;  %v2658_v4 = vsel %vm2225_vm0, %v13049_v51, 0.0  ;;  %v13053_v29 = vunpack.c.l.bf16 %v14943_v55  ;;  %vm20175_vm11 = vcmask 654912  }
 0x12e   : > { %v7766_v19 = vsel %vm7421_vm1, %v7765_v7, %v7761_v8  ;;  %v5365_v20 = vmul.f32 0.0625, %v2429_v10  ;;  %v5364_v39 = vmul.f32 0.0625, %v2426_v59  ;;  %v14944_v59 = vld [vmem:[%s15663_s25 + $0x250] sm:$0xff]  }
 0x12f   : > { %v13058_v21 = vunpack.c.h.bf16 %v14944_v59 }
 0x130   : > { %v7775_v25 = vrot.slane %v5365_v20, %v15793_v11  ;;  %v7770_v26 = vrot.slane %v5364_v39, %v15799_v13  ;;  %2644 = vadd.xlane.f32.xlu1 %v2643_v14  ;;  %2641 = vadd.xlane.f32.xlu0 %v2640_v15  ;;  %v2667_v20 = vsel %vm2225_vm0, %v13054_v5, 0.0  ;;  %v2664_v39 = vsel %vm2225_vm0, %v13053_v29, 0.0 }
 0x131   : > { %v2435_v27 = vpop.xlane.xlu1 %2434  ;;  %v2432_v28 = vpop.xlane.xlu0 %2431 }
 0x132   : > { %v7771_v34 = vsel %vm7428_vm2, %v7770_v26, %v7766_v19  ;;  %v5367_v35 = vmul.f32 0.0625, %v2435_v27  ;;  %v5366_v36 = vmul.f32 0.0625, %v2432_v28 }
 0x133   : > { %v7776_v40 = vsel %vm7435_vm3, %v7775_v25, %v7771_v34  ;;  %v13057_v25 = vunpack.c.l.bf16 %v14944_v59 }
 0x134   : > { %v7785_v44 = vrot.slane %v5367_v35, %v15804_v22  ;;  %v7780_v45 = vrot.slane %v5366_v36, %v15807_v23  ;;  %2650 = vadd.xlane.f32.xlu1 %v2649_v30  ;;  %2647 = vadd.xlane.f32.xlu0 %v2646_v31  ;;  %v14945_v30 = vld [vmem:[%s15663_s25 + $0x258] sm:$0xff]   ;;  %v2673_v36 = vsel %vm2225_vm0, %v13058_v21, 0.0 }
 0x135   : > { %v2441_v46 = vpop.xlane.xlu1 %2440  ;;  %v2438_v47 = vpop.xlane.xlu0 %2437  ;;  %v2670_v38 = vsel %vm2225_vm0, %v13057_v25, 0.0 }
 0x136   : > { %v7781_v52 = vsel %vm7442_vm4, %v7780_v45, %v7776_v40  ;;  %v5369_v53 = vmul.f32 0.0625, %v2441_v46  ;;  %v5368_v56 = vmul.f32 0.0625, %v2438_v47  ;;  %v13062_v40 = vunpack.c.h.bf16 %v14945_v30 }
 0x137   : > { %v7786_v58 = vsel %vm7449_vm5, %v7785_v44, %v7781_v52  ;;  %v13061_v44 = vunpack.c.l.bf16 %v14945_v30 }
 0x138   : > { %v7795_v62 = vrot.slane %v5369_v53, %v15821_v41  ;;  %v7790_v63 = vrot.slane %v5368_v56, %v15824_v42  ;;  %2656 = vadd.xlane.f32.xlu1 %v2655_v48  ;;  %2653 = vadd.xlane.f32.xlu0 %v2652_v49  ;;  %v14946_v48 = vld [vmem:[%s15663_s25 + $0x260] sm:$0xff]   ;;  %v2679_v56 = vsel %vm2225_vm0, %v13062_v40, 0.0 }
 0x139   : > { %v2447_v0 = vpop.xlane.xlu1 %2446  ;;  %v2444_v2 = vpop.xlane.xlu0 %2443  ;;  %v2676_v55 = vsel %vm2225_vm0, %v13061_v44, 0.0 }
 0x13a   : > { %v7791_v7 = vsel %vm7456_vm6, %v7790_v63, %v7786_v58  ;;  %v5371_v8 = vmul.f32 0.0625, %v2447_v0  ;;  %v5370_v10 = vmul.f32 0.0625, %v2444_v2  ;;  %v13066_v58 = vunpack.c.h.bf16 %v14946_v48 }
 0x13b   : > { %v7796_v14 = vsel %vm7463_vm7, %v7795_v62, %v7791_v7  ;;  %v13065_v62 = vunpack.c.l.bf16 %v14946_v48 }
 0x13c   : > { %v7805_v15 = vrot.slane %v5371_v8, %v15837_v61  ;;  %v7800_v16 = vrot.slane %v5370_v10, %v15843_v1  ;;  %2662 = vadd.xlane.f32.xlu1 %v2661_v3  ;;  %2659 = vadd.xlane.f32.xlu0 %v2658_v4  ;;  %v14947_v3 = vld [vmem:[%s15663_s25 + $0x268] sm:$0xff]   ;;  %v2685_v10 = vsel %vm2225_vm0, %v13066_v58, 0.0 }
 0x13d   : > { %v2453_v17 = vpop.xlane.xlu1 %2452  ;;  %v2450_v19 = vpop.xlane.xlu0 %2449  ;;  %v2682_v59 = vsel %vm2225_vm0, %v13065_v62, 0.0 }
 0x13e   : > { %v7801_v26 = vsel %vm20169_vm8, %v7800_v16, %v7796_v14  ;;  %v5373_v27 = vmul.f32 0.0625, %v2453_v17  ;;  %v5372_v28 = vmul.f32 0.0625, %v2450_v19  ;;  %v13070_v14 = vunpack.c.h.bf16 %v14947_v3 }
 0x13f   : > { %v7806_v31 = vsel %vm20173_vm9, %v7805_v15, %v7801_v26  ;;  %vm20174_vm9 = vcmask 786112   ;;  %v13069_v15 = vunpack.c.l.bf16 %v14947_v3 }
 0x140   : > { %v7815_v32 = vrot.slane %v5373_v27, %v15852_v18  ;;  %v7810_v33 = vrot.slane %v5372_v28, %v15858_v24  ;;  %2668 = vadd.xlane.f32.xlu1 %v2667_v20  ;;  %2665 = vadd.xlane.f32.xlu0 %v2664_v39  ;;  %v14948_v20 = vld [vmem:[%s15663_s25 + $0x270] sm:$0xff]   ;;  %v2691_v30 = vsel %vm2225_vm0, %v13070_v14, 0.0 }
 0x141   : > { %v2459_v34 = vpop.xlane.xlu1 %2458  ;;  %v2456_v35 = vpop.xlane.xlu0 %2455 }
 0x142   : > { %v7811_v45 = vsel %vm7484_vm10, %v7810_v33, %v7806_v31  ;;  %v5375_v46 = vmul.f32 0.0625, %v2459_v34  ;;  %v5374_v47 = vmul.f32 0.0625, %v2456_v35  ;;  %v2688_v31 = vsel %vm2225_vm0, %v13069_v15, 0.0 }
 0x143   : > { %v7816_v49 = vsel %vm20174_vm9, %v7815_v32, %v7811_v45  ;;  %vm20164_vm9 = vcmask 1042434   ;;  %v13074_v32 = vunpack.c.h.bf16 %v14948_v20  ;;  %v13073_v33 = vunpack.c.l.bf16 %v14948_v20 }
 0x144   : > { %v7825_v50 = vrot.slane %v5375_v46, %v15867_v37  ;;  %v7820_v51 = vrot.slane %v5374_v47, %v15873_v43  ;;  %2674 = vadd.xlane.f32.xlu1 %v2673_v36  ;;  %2671 = vadd.xlane.f32.xlu0 %v2670_v38  ;;  %v14949_v36 = vld [vmem:[%s15663_s25 + $0x278] sm:$0xff]  }
 0x145   : > { %v2465_v52 = vpop.xlane.xlu1 %2464  ;;  %v2462_v53 = vpop.xlane.xlu0 %2461  ;;  %v2697_v46 = vsel %vm2225_vm0, %v13074_v32, 0.0  ;;  %v2694_v47 = vsel %vm2225_vm0, %v13073_v33, 0.0  ;;  %v13078_v48 = vunpack.c.h.bf16 %v14949_v36 }
 0x146   : > { %v7821_v63 = vsel %vm7498_vm12, %v7820_v51, %v7816_v49  ;;  %v5377_v0 = vmul.f32 0.0625, %v2465_v52  ;;  %v5376_v2 = vmul.f32 0.0625, %v2462_v53  ;;  %v13077_v49 = vunpack.c.l.bf16 %v14949_v36  ;;  %v14950_v53 = vld [vmem:[%s15663_s25 + $0x280] sm:$0xff]  }
 0x147   : > { %v7826_v4 = vsel %vm7505_vm13, %v7825_v50, %v7821_v63  ;;  %v13082_v3 = vunpack.c.h.bf16 %v14950_v53 }
 0x148   : > { %v7835_v5 = vrot.slane %v5377_v0, %v15882_v57  ;;  %v7830_v29 = vrot.slane %v5376_v2, %v15887_v60  ;;  %2680 = vadd.xlane.f32.xlu1 %v2679_v56  ;;  %2677 = vadd.xlane.f32.xlu0 %v2676_v55  ;;  %v2703_v0 = vsel %vm2225_vm0, %v13078_v48, 0.0  ;;  %v2700_v2 = vsel %vm2225_vm0, %v13077_v49, 0.0 }
 0x149   : > { %v2471_v7 = vpop.xlane.xlu1 %2470  ;;  %v2468_v8 = vpop.xlane.xlu0 %2467 }
 0x14a   : > { %v7831_v16 = vsel %vm7512_vm14, %v7830_v29, %v7826_v4  ;;  %v5379_v17 = vmul.f32 0.0625, %v2471_v7  ;;  %v5378_v19 = vmul.f32 0.0625, %v2468_v8  ;;  %v13081_v4 = vunpack.c.l.bf16 %v14950_v53  ;;  %v14951_v8 = vld [vmem:[%s15663_s25 + $0x288] sm:$0xff]  }
 0x14b   : > { %v7836_v39 = vsel %vm7519_vm15, %v7835_v5, %v7831_v16  ;;  %v13086_v20 = vunpack.c.h.bf16 %v14951_v8 }
 0x14c   : > { %v16135_v21 = vsel %vm20164_vm9, %v7836_v39, %v16017_v54  ;;  %v7844_v25 = vrot.slane %v5379_v17, %v15796_v12  ;;  %v7840_v26 = vrot.slane %v5378_v19, %v15790_v9  ;;  %2686 = vadd.xlane.f32.xlu1 %v2685_v10  ;;  %2683 = vadd.xlane.f32.xlu0 %v2682_v59  ;;  %v2709_v17 = vsel %vm2225_vm0, %v13082_v3, 0.0 }
 0x14d   : > { %v2477_v27 = vpop.xlane.xlu1 %2476  ;;  %v2474_v28 = vpop.xlane.xlu0 %2473  ;;  %v2706_v19 = vsel %vm2225_vm0, %v13081_v4, 0.0  ;;  %v13085_v39 = vunpack.c.l.bf16 %v14951_v8 }
 0x14e   : > { %v7845_v34 = vsel %vm7421_vm1, %v7844_v25, %v7840_v26  ;;  %v5381_v35 = vmul.f32 0.0625, %v2477_v27  ;;  %v5380_v54 = vmul.f32 0.0625, %v2474_v28  ;;  %v14952_v28 = vld [vmem:[%s15663_s25 + $0x290] sm:$0xff]  }
 0x14f   : > { %v13090_v36 = vunpack.c.h.bf16 %v14952_v28 }
 0x150   : > { %v7854_v38 = vrot.slane %v5381_v35, %v15793_v11  ;;  %v7849_v40 = vrot.slane %v5380_v54, %v15799_v13  ;;  %2692 = vadd.xlane.f32.xlu1 %v2691_v30  ;;  %2689 = vadd.xlane.f32.xlu0 %v2688_v31  ;;  %v2715_v35 = vsel %vm2225_vm0, %v13086_v20, 0.0  ;;  %v2712_v54 = vsel %vm2225_vm0, %v13085_v39, 0.0 }
 0x151   : > { %v2483_v44 = vpop.xlane.xlu1 %2482  ;;  %v2480_v45 = vpop.xlane.xlu0 %2479 }
 0x152   : > { %v7850_v50 = vsel %vm7428_vm2, %v7849_v40, %v7845_v34  ;;  %v5383_v51 = vmul.f32 0.0625, %v2483_v44  ;;  %v5382_v52 = vmul.f32 0.0625, %v2480_v45 }
 0x153   : > { %v7855_v56 = vsel %vm7435_vm3, %v7854_v38, %v7850_v50  ;;  %v13089_v38 = vunpack.c.l.bf16 %v14952_v28 }
 0x154   : > { %v7864_v55 = vrot.slane %v5383_v51, %v15804_v22  ;;  %v7859_v58 = vrot.slane %v5382_v52, %v15807_v23  ;;  %2698 = vadd.xlane.f32.xlu1 %v2697_v46  ;;  %2695 = vadd.xlane.f32.xlu0 %v2694_v47  ;;  %v14953_v46 = vld [vmem:[%s15663_s25 + $0x298] sm:$0xff]   ;;  %v2721_v52 = vsel %vm2225_vm0, %v13090_v36, 0.0 }
 0x155   : > { %v2489_v62 = vpop.xlane.xlu1 %2488  ;;  %v2486_v63 = vpop.xlane.xlu0 %2485  ;;  %v2718_v53 = vsel %vm2225_vm0, %v13089_v38, 0.0 }
 0x156   : > { %v7860_v5 = vsel %vm7442_vm4, %v7859_v58, %v7855_v56  ;;  %v5385_v29 = vmul.f32 0.0625, %v2489_v62  ;;  %v5384_v7 = vmul.f32 0.0625, %v2486_v63  ;;  %v13094_v56 = vunpack.c.h.bf16 %v14953_v46 }
 0x157   : > { %v7865_v10 = vsel %vm7449_vm5, %v7864_v55, %v7860_v5  ;;  %v13093_v55 = vunpack.c.l.bf16 %v14953_v46 }
 0x158   : > { %v7874_v59 = vrot.slane %v5385_v29, %v15821_v41  ;;  %v7869_v14 = vrot.slane %v5384_v7, %v15824_v42  ;;  %2704 = vadd.xlane.f32.xlu1 %v2703_v0  ;;  %2701 = vadd.xlane.f32.xlu0 %v2700_v2  ;;  %v14954_v0 = vld [vmem:[%s15663_s25 + $0x2a0] sm:$0xff]   ;;  %v2727_v7 = vsel %vm2225_vm0, %v13094_v56, 0.0 }
 0x159   : > { %v2495_v15 = vpop.xlane.xlu1 %2494  ;;  %v2492_v16 = vpop.xlane.xlu0 %2491  ;;  %v2724_v8 = vsel %vm2225_vm0, %v13093_v55, 0.0 }
 0x15a   : > { %v7870_v25 = vsel %vm7456_vm6, %v7869_v14, %v7865_v10  ;;  %v5387_v26 = vmul.f32 0.0625, %v2495_v15  ;;  %v5386_v27 = vmul.f32 0.0625, %v2492_v16  ;;  %v13098_v10 = vunpack.c.h.bf16 %v14954_v0 }
 0x15b   : > { %v7875_v30 = vsel %vm7463_vm7, %v7874_v59, %v7870_v25  ;;  %v13097_v59 = vunpack.c.l.bf16 %v14954_v0 }
 0x15c   : > { %v7884_v31 = vrot.slane %v5387_v26, %v15837_v61  ;;  %v7879_v32 = vrot.slane %v5386_v27, %v15843_v1  ;;  %2710 = vadd.xlane.f32.xlu1 %v2709_v17  ;;  %2707 = vadd.xlane.f32.xlu0 %v2706_v19  ;;  %v14955_v17 = vld [vmem:[%s15663_s25 + $0x2a8] sm:$0xff]   ;;  %v2733_v27 = vsel %vm2225_vm0, %v13098_v10, 0.0 }
 0x15d   : > { %v2501_v33 = vpop.xlane.xlu1 %2500  ;;  %v2498_v34 = vpop.xlane.xlu0 %2497  ;;  %v2730_v28 = vsel %vm2225_vm0, %v13097_v59, 0.0 }
 0x15e   : > { %v7880_v40 = vsel %vm20169_vm8, %v7879_v32, %v7875_v30  ;;  %v5389_v44 = vmul.f32 0.0625, %v2501_v33  ;;  %v5388_v45 = vmul.f32 0.0625, %v2498_v34  ;;  %v13102_v30 = vunpack.c.h.bf16 %v14955_v17 }
 0x15f   : > { %v7885_v47 = vsel %vm20175_vm11, %v7884_v31, %v7880_v40  ;;  %vm20176_vm11 = vcmask 786112   ;;  %v13101_v31 = vunpack.c.l.bf16 %v14955_v17 }
 0x160   : > { %v7894_v48 = vrot.slane %v5389_v44, %v15852_v18  ;;  %v7889_v49 = vrot.slane %v5388_v45, %v15858_v24  ;;  %2716 = vadd.xlane.f32.xlu1 %v2715_v35  ;;  %2713 = vadd.xlane.f32.xlu0 %v2712_v54  ;;  %v14956_v35 = vld [vmem:[%s15663_s25 + $0x2b0] sm:$0xff]   ;;  %v2739_v46 = vsel %vm2225_vm0, %v13102_v30, 0.0 }
 0x161   : > { %v2507_v50 = vpop.xlane.xlu1 %2506  ;;  %v2504_v51 = vpop.xlane.xlu0 %2503 }
 0x162   : > { %v7890_v58 = vsel %vm7484_vm10, %v7889_v49, %v7885_v47  ;;  %v5391_v62 = vmul.f32 0.0625, %v2507_v50  ;;  %v5390_v63 = vmul.f32 0.0625, %v2504_v51  ;;  %v2736_v47 = vsel %vm2225_vm0, %v13101_v31, 0.0 }
 0x163   : > { %v7895_v2 = vsel %vm20176_vm11, %v7894_v48, %v7890_v58  ;;  %v13106_v48 = vunpack.c.h.bf16 %v14956_v35  ;;  %v13105_v49 = vunpack.c.l.bf16 %v14956_v35  ;;  %vm20177_vm11 = vcmask 654912  }
 0x164   : > { %v7904_v3 = vrot.slane %v5391_v62, %v15867_v37  ;;  %v7899_v4 = vrot.slane %v5390_v63, %v15873_v43  ;;  %2722 = vadd.xlane.f32.xlu1 %v2721_v52  ;;  %2719 = vadd.xlane.f32.xlu0 %v2718_v53  ;;  %v14957_v53 = vld [vmem:[%s15663_s25 + $0x2b8] sm:$0xff]  }
 0x165   : > { %v2513_v5 = vpop.xlane.xlu1 %2512  ;;  %v2510_v29 = vpop.xlane.xlu0 %2509  ;;  %v2745_v62 = vsel %vm2225_vm0, %v13106_v48, 0.0  ;;  %v2742_v63 = vsel %vm2225_vm0, %v13105_v49, 0.0  ;;  %v13110_v0 = vunpack.c.h.bf16 %v14957_v53 }
 0x166   : > { %v7900_v14 = vsel %vm7498_vm12, %v7899_v4, %v7895_v2  ;;  %v5393_v15 = vmul.f32 0.0625, %v2513_v5  ;;  %v5392_v16 = vmul.f32 0.0625, %v2510_v29  ;;  %v13109_v2 = vunpack.c.l.bf16 %v14957_v53  ;;  %v14958_v29 = vld [vmem:[%s15663_s25 + $0x2c0] sm:$0xff]  }
 0x167   : > { %v7905_v19 = vsel %vm7505_vm13, %v7904_v3, %v7900_v14  ;;  %v13114_v17 = vunpack.c.h.bf16 %v14958_v29 }
 0x168   : > { %v7914_v20 = vrot.slane %v5393_v15, %v15882_v57  ;;  %v7909_v39 = vrot.slane %v5392_v16, %v15887_v60  ;;  %2728 = vadd.xlane.f32.xlu1 %v2727_v7  ;;  %2725 = vadd.xlane.f32.xlu0 %v2724_v8  ;;  %v2751_v15 = vsel %vm2225_vm0, %v13110_v0, 0.0  ;;  %v2748_v16 = vsel %vm2225_vm0, %v13109_v2, 0.0 }
 0x169   : > { %v2519_v25 = vpop.xlane.xlu1 %2518  ;;  %v2516_v26 = vpop.xlane.xlu0 %2515 }
 0x16a   : > { %v7910_v32 = vsel %vm7512_vm14, %v7909_v39, %v7905_v19  ;;  %v5395_v33 = vmul.f32 0.0625, %v2519_v25  ;;  %v5394_v34 = vmul.f32 0.0625, %v2516_v26  ;;  %v13113_v19 = vunpack.c.l.bf16 %v14958_v29  ;;  %v14959_v26 = vld [vmem:[%s15663_s25 + $0x2c8] sm:$0xff]  }
 0x16b   : > { %v7915_v54 = vsel %vm7519_vm15, %v7914_v20, %v7910_v32  ;;  %v13118_v35 = vunpack.c.h.bf16 %v14959_v26 }
 0x16c   : > { %v7923_v36 = vrot.slane %v5395_v33, %v15796_v12  ;;  %v7919_v38 = vrot.slane %v5394_v34, %v15790_v9  ;;  %2734 = vadd.xlane.f32.xlu1 %v2733_v27  ;;  %2731 = vadd.xlane.f32.xlu0 %v2730_v28  ;;  %v16196_v40 = vsel %vm20164_vm9, %v7915_v54, %v16076_v6  ;;  %v2757_v33 = vsel %vm2225_vm0, %v13114_v17, 0.0 }
 0x16d   : > { %v2525_v44 = vpop.xlane.xlu1 %2524  ;;  %v2522_v45 = vpop.xlane.xlu0 %2521  ;;  %v2754_v34 = vsel %vm2225_vm0, %v13113_v19, 0.0  ;;  %v13117_v54 = vunpack.c.l.bf16 %v14959_v26  ;;  %vm20179_vm9 = vcmask 654912  }
 0x16e   : > { %v7924_v50 = vsel %vm7421_vm1, %v7923_v36, %v7919_v38  ;;  %v5397_v51 = vmul.f32 0.0625, %v2525_v44  ;;  %v5396_v52 = vmul.f32 0.0625, %v2522_v45  ;;  %v14960_v45 = vld [vmem:[%s15663_s25 + $0x2d0] sm:$0xff]  }
 0x16f   : > { %v13122_v53 = vunpack.c.h.bf16 %v14960_v45 }
 0x170   : > { %v7933_v56 = vrot.slane %v5397_v51, %v15793_v11  ;;  %v7928_v55 = vrot.slane %v5396_v52, %v15799_v13  ;;  %2740 = vadd.xlane.f32.xlu1 %v2739_v46  ;;  %2737 = vadd.xlane.f32.xlu0 %v2736_v47  ;;  %v2763_v51 = vsel %vm2225_vm0, %v13118_v35, 0.0  ;;  %v2760_v52 = vsel %vm2225_vm0, %v13117_v54, 0.0 }
 0x171   : > { %v2531_v6 = vpop.xlane.xlu1 %2530  ;;  %v2528_v58 = vpop.xlane.xlu0 %2527 }
 0x172   : > { %v7929_v3 = vsel %vm7428_vm2, %v7928_v55, %v7924_v50  ;;  %v5399_v4 = vmul.f32 0.0625, %v2531_v6  ;;  %v5398_v5 = vmul.f32 0.0625, %v2528_v58 }
 0x173   : > { %v7934_v7 = vsel %vm7435_vm3, %v7933_v56, %v7929_v3  ;;  %v13121_v56 = vunpack.c.l.bf16 %v14960_v45 }
 0x174   : > { %v7943_v8 = vrot.slane %v5399_v4, %v15804_v22  ;;  %v7938_v10 = vrot.slane %v5398_v5, %v15807_v23  ;;  %2746 = vadd.xlane.f32.xlu1 %v2745_v62  ;;  %2743 = vadd.xlane.f32.xlu0 %v2742_v63  ;;  %v14961_v62 = vld [vmem:[%s15663_s25 + $0x2d8] sm:$0xff]   ;;  %v2769_v5 = vsel %vm2225_vm0, %v13122_v53, 0.0 }
 0x175   : > { %v2537_v59 = vpop.xlane.xlu1 %2536  ;;  %v2534_v14 = vpop.xlane.xlu0 %2533  ;;  %v2766_v29 = vsel %vm2225_vm0, %v13121_v56, 0.0 }
 0x176   : > { %v7939_v20 = vsel %vm7442_vm4, %v7938_v10, %v7934_v7  ;;  %v5401_v39 = vmul.f32 0.0625, %v2537_v59  ;;  %v5400_v25 = vmul.f32 0.0625, %v2534_v14  ;;  %v13126_v7 = vunpack.c.h.bf16 %v14961_v62  ;;  %v14962_v10 = vld [vmem:[%s15663_s25 + $0x2e0] sm:$0xff]  }
 0x177   : > { %v7944_v27 = vsel %vm7449_vm5, %v7943_v8, %v7939_v20  ;;  %v13125_v8 = vunpack.c.l.bf16 %v14961_v62  ;;  %v13130_v20 = vunpack.c.h.bf16 %v14962_v10 }
 0x178   : > { %v7953_v28 = vrot.slane %v5401_v39, %v15821_v41  ;;  %v7948_v30 = vrot.slane %v5400_v25, %v15824_v42  ;;  %2752 = vadd.xlane.f32.xlu1 %v2751_v15  ;;  %2749 = vadd.xlane.f32.xlu0 %v2748_v16  ;;  %v2775_v26 = vsel %vm2225_vm0, %v13126_v7, 0.0 }
 0x179   : > { %v2543_v31 = vpop.xlane.xlu1 %2542  ;;  %v2540_v32 = vpop.xlane.xlu0 %2539 }
 0x17a   : > { %v7949_v36 = vsel %vm7456_vm6, %v7948_v30, %v7944_v27  ;;  %v5403_v38 = vmul.f32 0.0625, %v2543_v31  ;;  %v5402_v44 = vmul.f32 0.0625, %v2540_v32  ;;  %v2772_v27 = vsel %vm2225_vm0, %v13125_v8, 0.0 }
 0x17b   : > { %v7954_v46 = vsel %vm7463_vm7, %v7953_v28, %v7949_v36  ;;  %v13129_v28 = vunpack.c.l.bf16 %v14962_v10  ;;  %v2781_v36 = vsel %vm2225_vm0, %v13130_v20, 0.0 }
 0x17c   : > { %v7963_v47 = vrot.slane %v5403_v38, %v15837_v61  ;;  %v7958_v48 = vrot.slane %v5402_v44, %v15843_v1  ;;  %2758 = vadd.xlane.f32.xlu1 %v2757_v33  ;;  %2755 = vadd.xlane.f32.xlu0 %v2754_v34  ;;  %v14963_v33 = vld [vmem:[%s15663_s25 + $0x2e8] sm:$0xff]  }
 0x17d   : > { %v2549_v49 = vpop.xlane.xlu1 %2548  ;;  %v2546_v50 = vpop.xlane.xlu0 %2545  ;;  %v2778_v45 = vsel %vm2225_vm0, %v13129_v28, 0.0 }
 0x17e   : > { %v7959_v55 = vsel %vm20169_vm8, %v7958_v48, %v7954_v46  ;;  %v5405_v6 = vmul.f32 0.0625, %v2549_v49  ;;  %v5404_v58 = vmul.f32 0.0625, %v2546_v50  ;;  %v13134_v46 = vunpack.c.h.bf16 %v14963_v33 }
 0x17f   : > { %v7964_v63 = vsel %vm20177_vm11, %v7963_v47, %v7959_v55  ;;  %vm20178_vm11 = vcmask 786112   ;;  %v13133_v47 = vunpack.c.l.bf16 %v14963_v33 }
 0x180   : > { %v7973_v0 = vrot.slane %v5405_v6, %v15852_v18  ;;  %v7968_v2 = vrot.slane %v5404_v58, %v15858_v24  ;;  %2764 = vadd.xlane.f32.xlu1 %v2763_v51  ;;  %2761 = vadd.xlane.f32.xlu0 %v2760_v52  ;;  %v14964_v51 = vld [vmem:[%s15663_s25 + $0x2f0] sm:$0xff]   ;;  %v2787_v62 = vsel %vm2225_vm0, %v13134_v46, 0.0 }
 0x181   : > { %v2555_v3 = vpop.xlane.xlu1 %2554  ;;  %v2552_v4 = vpop.xlane.xlu0 %2551 }
 0x182   : > { %v7969_v59 = vsel %vm7484_vm10, %v7968_v2, %v7964_v63  ;;  %v5407_v14 = vmul.f32 0.0625, %v2555_v3  ;;  %v5406_v15 = vmul.f32 0.0625, %v2552_v4  ;;  %v2784_v63 = vsel %vm2225_vm0, %v13133_v47, 0.0 }
 0x183   : > { %v7974_v16 = vsel %vm20178_vm11, %v7973_v0, %v7969_v59  ;;  %vm20165_vm11 = vcmask 1043459   ;;  %v13138_v0 = vunpack.c.h.bf16 %v14964_v51  ;;  %v13137_v2 = vunpack.c.l.bf16 %v14964_v51 }
 0x184   : > { %v7983_v17 = vrot.slane %v5407_v14, %v15867_v37  ;;  %v7978_v19 = vrot.slane %v5406_v15, %v15873_v43  ;;  %2770 = vadd.xlane.f32.xlu1 %v2769_v5  ;;  %2767 = vadd.xlane.f32.xlu0 %v2766_v29  ;;  %v14965_v29 = vld [vmem:[%s15663_s25 + $0x2f8] sm:$0xff]  }
 0x185   : > { %v2561_v39 = vpop.xlane.xlu1 %2560  ;;  %v2558_v25 = vpop.xlane.xlu0 %2557  ;;  %v2793_v59 = vsel %vm2225_vm0, %v13138_v0, 0.0  ;;  %v2790_v14 = vsel %vm2225_vm0, %v13137_v2, 0.0  ;;  %v13142_v15 = vunpack.c.h.bf16 %v14965_v29 }
 0x186   : > { %v7979_v30 = vsel %vm7498_vm12, %v7978_v19, %v7974_v16  ;;  %v5409_v31 = vmul.f32 0.0625, %v2561_v39  ;;  %v5408_v32 = vmul.f32 0.0625, %v2558_v25  ;;  %v13141_v16 = vunpack.c.l.bf16 %v14965_v29  ;;  %v14966_v39 = vld [vmem:[%s15663_s25 + $0x300] sm:$0xff]  }
 0x187   : > { %v7984_v34 = vsel %vm7505_vm13, %v7983_v17, %v7979_v30  ;;  %v13146_v33 = vunpack.c.h.bf16 %v14966_v39 }
 0x188   : > { %v7993_v35 = vrot.slane %v5409_v31, %v15882_v57  ;;  %v7988_v54 = vrot.slane %v5408_v32, %v15887_v60  ;;  %2776 = vadd.xlane.f32.xlu1 %v2775_v26  ;;  %2773 = vadd.xlane.f32.xlu0 %v2772_v27  ;;  %v2799_v31 = vsel %vm2225_vm0, %v13142_v15, 0.0  ;;  %v2796_v32 = vsel %vm2225_vm0, %v13141_v16, 0.0 }
 0x189   : > { %v2567_v38 = vpop.xlane.xlu1 %2566  ;;  %v2564_v44 = vpop.xlane.xlu0 %2563 }
 0x18a   : > { %v7989_v48 = vsel %vm7512_vm14, %v7988_v54, %v7984_v34  ;;  %v5411_v49 = vmul.f32 0.0625, %v2567_v38  ;;  %v5410_v50 = vmul.f32 0.0625, %v2564_v44  ;;  %v13145_v34 = vunpack.c.l.bf16 %v14966_v39  ;;  %v14967_v38 = vld [vmem:[%s15663_s25 + $0x308] sm:$0xff]  }
 0x18b   : > { %v7994_v52 = vsel %vm7519_vm15, %v7993_v35, %v7989_v48  ;;  %v13150_v51 = vunpack.c.h.bf16 %v14967_v38 }
 0x18c   : > { %v8002_v53 = vrot.slane %v5411_v49, %v15796_v12  ;;  %v7998_v56 = vrot.slane %v5410_v50, %v15790_v9  ;;  %2782 = vadd.xlane.f32.xlu1 %v2781_v36  ;;  %2779 = vadd.xlane.f32.xlu0 %v2778_v45  ;;  %v16255_v55 = vsel %vm20165_vm11, %v7994_v52, %v16135_v21  ;;  %v2805_v49 = vsel %vm2225_vm0, %v13146_v33, 0.0 }
 0x18d   : > { %v2573_v6 = vpop.xlane.xlu1 %2572  ;;  %v2570_v58 = vpop.xlane.xlu0 %2569  ;;  %v2802_v50 = vsel %vm2225_vm0, %v13145_v34, 0.0  ;;  %v13149_v52 = vunpack.c.l.bf16 %v14967_v38 }
 0x18e   : > { %v8003_v3 = vsel %vm7421_vm1, %v8002_v53, %v7998_v56  ;;  %v5413_v4 = vmul.f32 0.0625, %v2573_v6  ;;  %v5412_v5 = vmul.f32 0.0625, %v2570_v58  ;;  %v14968_v58 = vld [vmem:[%s15663_s25 + $0x310] sm:$0xff]  }
 0x18f   : > { %v13154_v29 = vunpack.c.h.bf16 %v14968_v58 }
 0x190   : > { %v8012_v7 = vrot.slane %v5413_v4, %v15793_v11  ;;  %v8007_v8 = vrot.slane %v5412_v5, %v15799_v13  ;;  %2788 = vadd.xlane.f32.xlu1 %v2787_v62  ;;  %2785 = vadd.xlane.f32.xlu0 %v2784_v63  ;;  %v2811_v4 = vsel %vm2225_vm0, %v13150_v51, 0.0  ;;  %v2808_v5 = vsel %vm2225_vm0, %v13149_v52, 0.0 }
 0x191   : > { %v2579_v21 = vpop.xlane.xlu1 %2578  ;;  %v2576_v10 = vpop.xlane.xlu0 %2575 }
 0x192   : > { %v8008_v17 = vsel %vm7428_vm2, %v8007_v8, %v8003_v3  ;;  %v5415_v19 = vmul.f32 0.0625, %v2579_v21  ;;  %v5414_v20 = vmul.f32 0.0625, %v2576_v10 }
 0x193   : > { %v8013_v25 = vsel %vm7435_vm3, %v8012_v7, %v8008_v17  ;;  %v13153_v7 = vunpack.c.l.bf16 %v14968_v58 }
 0x194   : > { %v8022_v26 = vrot.slane %v5415_v19, %v15804_v22  ;;  %v8017_v27 = vrot.slane %v5414_v20, %v15807_v23  ;;  %2794 = vadd.xlane.f32.xlu1 %v2793_v59  ;;  %2791 = vadd.xlane.f32.xlu0 %v2790_v14  ;;  %v14969_v59 = vld [vmem:[%s15663_s25 + $0x318] sm:$0xff]   ;;  %v2817_v20 = vsel %vm2225_vm0, %v13154_v29, 0.0 }
 0x195   : > { %v2585_v28 = vpop.xlane.xlu1 %2584  ;;  %v2582_v30 = vpop.xlane.xlu0 %2581  ;;  %v2814_v39 = vsel %vm2225_vm0, %v13153_v7, 0.0 }
 0x196   : > { %v8018_v35 = vsel %vm7442_vm4, %v8017_v27, %v8013_v25  ;;  %v5417_v54 = vmul.f32 0.0625, %v2585_v28  ;;  %v5416_v36 = vmul.f32 0.0625, %v2582_v30  ;;  %v13158_v25 = vunpack.c.h.bf16 %v14969_v59 }
 0x197   : > { %v8023_v44 = vsel %vm7449_vm5, %v8022_v26, %v8018_v35  ;;  %v13157_v26 = vunpack.c.l.bf16 %v14969_v59 }
 0x198   : > { %v8032_v45 = vrot.slane %v5417_v54, %v15821_v41  ;;  %v8027_v46 = vrot.slane %v5416_v36, %v15824_v42  ;;  %2800 = vadd.xlane.f32.xlu1 %v2799_v31  ;;  %2797 = vadd.xlane.f32.xlu0 %v2796_v32  ;;  %v14970_v31 = vld [vmem:[%s15663_s25 + $0x320] sm:$0xff]   ;;  %v2823_v36 = vsel %vm2225_vm0, %v13158_v25, 0.0 }
 0x199   : > { %v2591_v47 = vpop.xlane.xlu1 %2590  ;;  %v2588_v48 = vpop.xlane.xlu0 %2587  ;;  %v2820_v38 = vsel %vm2225_vm0, %v13157_v26, 0.0 }
 0x19a   : > { %v8028_v53 = vsel %vm7456_vm6, %v8027_v46, %v8023_v44  ;;  %v5419_v56 = vmul.f32 0.0625, %v2591_v47  ;;  %v5418_v6 = vmul.f32 0.0625, %v2588_v48  ;;  %v13162_v44 = vunpack.c.h.bf16 %v14970_v31 }
 0x19b   : > { %v8033_v62 = vsel %vm7463_vm7, %v8032_v45, %v8028_v53  ;;  %v13161_v45 = vunpack.c.l.bf16 %v14970_v31 }
 0x19c   : > { %v8042_v63 = vrot.slane %v5419_v56, %v15837_v61  ;;  %v8037_v0 = vrot.slane %v5418_v6, %v15843_v1  ;;  %2806 = vadd.xlane.f32.xlu1 %v2805_v49  ;;  %2803 = vadd.xlane.f32.xlu0 %v2802_v50  ;;  %v14971_v49 = vld [vmem:[%s15663_s25 + $0x328] sm:$0xff]   ;;  %v2829_v6 = vsel %vm2225_vm0, %v13162_v44, 0.0 }
 0x19d   : > { %v2597_v2 = vpop.xlane.xlu1 %2596  ;;  %v2594_v3 = vpop.xlane.xlu0 %2593  ;;  %v2826_v58 = vsel %vm2225_vm0, %v13161_v45, 0.0 }
 0x19e   : > { %v8038_v8 = vsel %vm20169_vm8, %v8037_v0, %v8033_v62  ;;  %v5421_v21 = vmul.f32 0.0625, %v2597_v2  ;;  %v5420_v10 = vmul.f32 0.0625, %v2594_v3  ;;  %v13166_v62 = vunpack.c.h.bf16 %v14971_v49 }
 0x19f   : > { %v8043_v14 = vsel %vm20179_vm9, %v8042_v63, %v8038_v8  ;;  %vm20180_vm9 = vcmask 786112   ;;  %v13165_v63 = vunpack.c.l.bf16 %v14971_v49 }
 0x1a0   : > { %v8052_v15 = vrot.slane %v5421_v21, %v15852_v18  ;;  %v8047_v16 = vrot.slane %v5420_v10, %v15858_v24  ;;  %2812 = vadd.xlane.f32.xlu1 %v2811_v4  ;;  %2809 = vadd.xlane.f32.xlu0 %v2808_v5  ;;  %v14972_v4 = vld [vmem:[%s15663_s25 + $0x330] sm:$0xff]   ;;  %v2835_v59 = vsel %vm2225_vm0, %v13166_v62, 0.0 }
 0x1a1   : > { %v2603_v17 = vpop.xlane.xlu1 %2602  ;;  %v2600_v19 = vpop.xlane.xlu0 %2599 }
 0x1a2   : > { %v8048_v27 = vsel %vm7484_vm10, %v8047_v16, %v8043_v14  ;;  %v5423_v28 = vmul.f32 0.0625, %v2603_v17  ;;  %v5422_v30 = vmul.f32 0.0625, %v2600_v19  ;;  %v2832_v14 = vsel %vm2225_vm0, %v13165_v63, 0.0 }
 0x1a3   : > { %v8053_v32 = vsel %vm20180_vm9, %v8052_v15, %v8048_v27  ;;  %v13170_v15 = vunpack.c.h.bf16 %v14972_v4  ;;  %v13169_v16 = vunpack.c.l.bf16 %v14972_v4  ;;  %vm20181_vm9 = vcmask 654912  }
 0x1a4   : > { %v8062_v33 = vrot.slane %v5423_v28, %v15867_v37  ;;  %v8057_v34 = vrot.slane %v5422_v30, %v15873_v43  ;;  %2818 = vadd.xlane.f32.xlu1 %v2817_v20  ;;  %2815 = vadd.xlane.f32.xlu0 %v2814_v39  ;;  %v14973_v39 = vld [vmem:[%s15663_s25 + $0x338] sm:$0xff]  }
 0x1a5   : > { %v2609_v35 = vpop.xlane.xlu1 %2608  ;;  %v2606_v54 = vpop.xlane.xlu0 %2605  ;;  %v2841_v28 = vsel %vm2225_vm0, %v13170_v15, 0.0  ;;  %v2838_v30 = vsel %vm2225_vm0, %v13169_v16, 0.0  ;;  %v13174_v31 = vunpack.c.h.bf16 %v14973_v39 }
 0x1a6   : > { %v8058_v46 = vsel %vm7498_vm12, %v8057_v34, %v8053_v32  ;;  %v5425_v47 = vmul.f32 0.0625, %v2609_v35  ;;  %v5424_v48 = vmul.f32 0.0625, %v2606_v54  ;;  %v13173_v32 = vunpack.c.l.bf16 %v14973_v39  ;;  %v14974_v54 = vld [vmem:[%s15663_s25 + $0x340] sm:$0xff]  }
 0x1a7   : > { %v8063_v50 = vsel %vm7505_vm13, %v8062_v33, %v8058_v46  ;;  %v13178_v49 = vunpack.c.h.bf16 %v14974_v54 }
 0x1a8   : > { %v8072_v51 = vrot.slane %v5425_v47, %v15882_v57  ;;  %v8067_v52 = vrot.slane %v5424_v48, %v15887_v60  ;;  %2824 = vadd.xlane.f32.xlu1 %v2823_v36  ;;  %2821 = vadd.xlane.f32.xlu0 %v2820_v38  ;;  %v2847_v47 = vsel %vm2225_vm0, %v13174_v31, 0.0  ;;  %v2844_v48 = vsel %vm2225_vm0, %v13173_v32, 0.0 }
 0x1a9   : > { %v2615_v53 = vpop.xlane.xlu1 %2614  ;;  %v2612_v56 = vpop.xlane.xlu0 %2611 }
 0x1aa   : > { %v8068_v0 = vsel %vm7512_vm14, %v8067_v52, %v8063_v50  ;;  %v5427_v2 = vmul.f32 0.0625, %v2615_v53  ;;  %v5426_v3 = vmul.f32 0.0625, %v2612_v56  ;;  %v13177_v50 = vunpack.c.l.bf16 %v14974_v54  ;;  %v14975_v56 = vld [vmem:[%s15663_s25 + $0x348] sm:$0xff]  }
 0x1ab   : > { %v8073_v5 = vsel %vm7519_vm15, %v8072_v51, %v8068_v0  ;;  %v13182_v4 = vunpack.c.h.bf16 %v14975_v56 }
 0x1ac   : > { %v8081_v29 = vrot.slane %v5427_v2, %v15796_v12  ;;  %v8077_v7 = vrot.slane %v5426_v3, %v15790_v9  ;;  %2830 = vadd.xlane.f32.xlu1 %v2829_v6  ;;  %2827 = vadd.xlane.f32.xlu0 %v2826_v58  ;;  %v16314_v8 = vsel %vm20165_vm11, %v8073_v5, %v16196_v40  ;;  %v2853_v2 = vsel %vm2225_vm0, %v13178_v49, 0.0 }
 0x1ad   : > { %v2621_v21 = vpop.xlane.xlu1 %2620  ;;  %v2618_v10 = vpop.xlane.xlu0 %2617  ;;  %v2850_v3 = vsel %vm2225_vm0, %v13177_v50, 0.0  ;;  %v13181_v5 = vunpack.c.l.bf16 %v14975_v56  ;;  %vm20183_vm11 = vcmask 654912  }
 0x1ae   : > { %v8082_v17 = vsel %vm7421_vm1, %v8081_v29, %v8077_v7  ;;  %v5429_v19 = vmul.f32 0.0625, %v2621_v21  ;;  %v5428_v20 = vmul.f32 0.0625, %v2618_v10  ;;  %v14976_v10 = vld [vmem:[%s15663_s25 + $0x350] sm:$0xff]  }
 0x1af   : > { %v13186_v39 = vunpack.c.h.bf16 %v14976_v10 }
 0x1b0   : > { %v8091_v25 = vrot.slane %v5429_v19, %v15793_v11  ;;  %v8086_v26 = vrot.slane %v5428_v20, %v15799_v13  ;;  %2836 = vadd.xlane.f32.xlu1 %v2835_v59  ;;  %2833 = vadd.xlane.f32.xlu0 %v2832_v14  ;;  %v2859_v19 = vsel %vm2225_vm0, %v13182_v4, 0.0  ;;  %v2856_v20 = vsel %vm2225_vm0, %v13181_v5, 0.0 }
 0x1b1   : > { %v2627_v40 = vpop.xlane.xlu1 %2626  ;;  %v2624_v27 = vpop.xlane.xlu0 %2623 }
 0x1b2   : > { %v8087_v33 = vsel %vm7428_vm2, %v8086_v26, %v8082_v17  ;;  %v5431_v34 = vmul.f32 0.0625, %v2627_v40  ;;  %v5430_v35 = vmul.f32 0.0625, %v2624_v27 }
 0x1b3   : > { %v8092_v36 = vsel %vm7435_vm3, %v8091_v25, %v8087_v33  ;;  %v13185_v25 = vunpack.c.l.bf16 %v14976_v10 }
 0x1b4   : > { %v8101_v38 = vrot.slane %v5431_v34, %v15804_v22  ;;  %v8096_v44 = vrot.slane %v5430_v35, %v15807_v23  ;;  %2842 = vadd.xlane.f32.xlu1 %v2841_v28  ;;  %2839 = vadd.xlane.f32.xlu0 %v2838_v30  ;;  %v14977_v28 = vld [vmem:[%s15663_s25 + $0x358] sm:$0xff]   ;;  %v2865_v35 = vsel %vm2225_vm0, %v13186_v39, 0.0 }
 0x1b5   : > { %v2633_v45 = vpop.xlane.xlu1 %2632  ;;  %v2630_v46 = vpop.xlane.xlu0 %2629  ;;  %v2862_v54 = vsel %vm2225_vm0, %v13185_v25, 0.0 }
 0x1b6   : > { %v8097_v51 = vsel %vm7442_vm4, %v8096_v44, %v8092_v36  ;;  %v5433_v52 = vmul.f32 0.0625, %v2633_v45  ;;  %v5432_v53 = vmul.f32 0.0625, %v2630_v46  ;;  %v13190_v36 = vunpack.c.h.bf16 %v14977_v28  ;;  %v14978_v44 = vld [vmem:[%s15663_s25 + $0x360] sm:$0xff]  }
 0x1b7   : > { %v8102_v6 = vsel %vm7449_vm5, %v8101_v38, %v8097_v51  ;;  %v13189_v38 = vunpack.c.l.bf16 %v14977_v28  ;;  %v13194_v51 = vunpack.c.h.bf16 %v14978_v44 }
 0x1b8   : > { %v8111_v58 = vrot.slane %v5433_v52, %v15821_v41  ;;  %v8106_v62 = vrot.slane %v5432_v53, %v15824_v42  ;;  %2848 = vadd.xlane.f32.xlu1 %v2847_v47  ;;  %2845 = vadd.xlane.f32.xlu0 %v2844_v48  ;;  %v2871_v56 = vsel %vm2225_vm0, %v13190_v36, 0.0 }
 0x1b9   : > { %v2639_v63 = vpop.xlane.xlu1 %2638  ;;  %v2636_v0 = vpop.xlane.xlu0 %2635 }
 0x1ba   : > { %v8107_v29 = vsel %vm7456_vm6, %v8106_v62, %v8102_v6  ;;  %v5435_v7 = vmul.f32 0.0625, %v2639_v63  ;;  %v5434_v21 = vmul.f32 0.0625, %v2636_v0  ;;  %v2868_v6 = vsel %vm2225_vm0, %v13189_v38, 0.0 }
 0x1bb   : > { %v8112_v59 = vsel %vm7463_vm7, %v8111_v58, %v8107_v29  ;;  %v13193_v58 = vunpack.c.l.bf16 %v14978_v44  ;;  %v2877_v29 = vsel %vm2225_vm0, %v13194_v51, 0.0 }
 0x1bc   : > { %v8121_v14 = vrot.slane %v5435_v7, %v15837_v61  ;;  %v8116_v15 = vrot.slane %v5434_v21, %v15843_v1  ;;  %2854 = vadd.xlane.f32.xlu1 %v2853_v2  ;;  %2851 = vadd.xlane.f32.xlu0 %v2850_v3  ;;  %v14979_v2 = vld [vmem:[%s15663_s25 + $0x368] sm:$0xff]  }
 0x1bd   : > { %v2645_v16 = vpop.xlane.xlu1 %2644  ;;  %v2642_v17 = vpop.xlane.xlu0 %2641  ;;  %v2874_v10 = vsel %vm2225_vm0, %v13193_v58, 0.0 }
 0x1be   : > { %v8117_v26 = vsel %vm20169_vm8, %v8116_v15, %v8112_v59  ;;  %v5437_v40 = vmul.f32 0.0625, %v2645_v16  ;;  %v5436_v27 = vmul.f32 0.0625, %v2642_v17  ;;  %v13198_v59 = vunpack.c.h.bf16 %v14979_v2 }
 0x1bf   : > { %v8122_v30 = vsel %vm20181_vm9, %v8121_v14, %v8117_v26  ;;  %vm20182_vm9 = vcmask 786112   ;;  %v13197_v14 = vunpack.c.l.bf16 %v14979_v2 }
 0x1c0   : > { %v8131_v31 = vrot.slane %v5437_v40, %v15852_v18  ;;  %v8126_v32 = vrot.slane %v5436_v27, %v15858_v24  ;;  %2860 = vadd.xlane.f32.xlu1 %v2859_v19  ;;  %2857 = vadd.xlane.f32.xlu0 %v2856_v20  ;;  %v14980_v19 = vld [vmem:[%s15663_s25 + $0x370] sm:$0xff]   ;;  %v2883_v28 = vsel %vm2225_vm0, %v13198_v59, 0.0 }
 0x1c1   : > { %v2651_v33 = vpop.xlane.xlu1 %2650  ;;  %v2648_v34 = vpop.xlane.xlu0 %2647 }
 0x1c2   : > { %v8127_v45 = vsel %vm7484_vm10, %v8126_v32, %v8122_v30  ;;  %v5439_v46 = vmul.f32 0.0625, %v2651_v33  ;;  %v5438_v47 = vmul.f32 0.0625, %v2648_v34  ;;  %v2880_v30 = vsel %vm2225_vm0, %v13197_v14, 0.0 }
 0x1c3   : > { %v8132_v48 = vsel %vm20182_vm9, %v8131_v31, %v8127_v45  ;;  %vm20166_vm9 = vcmask 1044484   ;;  %v13202_v31 = vunpack.c.h.bf16 %v14980_v19  ;;  %v13201_v32 = vunpack.c.l.bf16 %v14980_v19 }
 0x1c4   : > { %v8141_v49 = vrot.slane %v5439_v46, %v15867_v37  ;;  %v8136_v50 = vrot.slane %v5438_v47, %v15873_v43  ;;  %2866 = vadd.xlane.f32.xlu1 %v2865_v35  ;;  %2863 = vadd.xlane.f32.xlu0 %v2862_v54  ;;  %v14981_v54 = vld [vmem:[%s15663_s25 + $0x378] sm:$0xff]  }
 0x1c5   : > { %v2657_v52 = vpop.xlane.xlu1 %2656  ;;  %v2654_v53 = vpop.xlane.xlu0 %2653  ;;  %v2889_v45 = vsel %vm2225_vm0, %v13202_v31, 0.0  ;;  %v2886_v46 = vsel %vm2225_vm0, %v13201_v32, 0.0  ;;  %v13206_v47 = vunpack.c.h.bf16 %v14981_v54 }
 0x1c6   : > { %v8137_v62 = vsel %vm7498_vm12, %v8136_v50, %v8132_v48  ;;  %v5441_v63 = vmul.f32 0.0625, %v2657_v52  ;;  %v5440_v0 = vmul.f32 0.0625, %v2654_v53  ;;  %v13205_v48 = vunpack.c.l.bf16 %v14981_v54  ;;  %v14982_v52 = vld [vmem:[%s15663_s25 + $0x380] sm:$0xff]  }
 0x1c7   : > { %v8142_v3 = vsel %vm7505_vm13, %v8141_v49, %v8137_v62  ;;  %v13210_v2 = vunpack.c.h.bf16 %v14982_v52 }
 0x1c8   : > { %v8151_v4 = vrot.slane %v5441_v63, %v15882_v57  ;;  %v8146_v5 = vrot.slane %v5440_v0, %v15887_v60  ;;  %2872 = vadd.xlane.f32.xlu1 %v2871_v56  ;;  %2869 = vadd.xlane.f32.xlu0 %v2868_v6  ;;  %v2895_v63 = vsel %vm2225_vm0, %v13206_v47, 0.0  ;;  %v2892_v0 = vsel %vm2225_vm0, %v13205_v48, 0.0 }
 0x1c9   : > { %v2663_v7 = vpop.xlane.xlu1 %2662  ;;  %v2660_v21 = vpop.xlane.xlu0 %2659 }
 0x1ca   : > { %v8147_v15 = vsel %vm7512_vm14, %v8146_v5, %v8142_v3  ;;  %v5443_v16 = vmul.f32 0.0625, %v2663_v7  ;;  %v5442_v17 = vmul.f32 0.0625, %v2660_v21  ;;  %v13209_v3 = vunpack.c.l.bf16 %v14982_v52  ;;  %v14983_v7 = vld [vmem:[%s15663_s25 + $0x388] sm:$0xff]  }
 0x1cb   : > { %v8152_v20 = vsel %vm7519_vm15, %v8151_v4, %v8147_v15  ;;  %v13214_v19 = vunpack.c.h.bf16 %v14983_v7 }
 0x1cc   : > { %v8160_v39 = vrot.slane %v5443_v16, %v15796_v12  ;;  %v8156_v25 = vrot.slane %v5442_v17, %v15790_v9  ;;  %2878 = vadd.xlane.f32.xlu1 %v2877_v29  ;;  %2875 = vadd.xlane.f32.xlu0 %v2874_v10  ;;  %v16373_v26 = vsel %vm20166_vm9, %v8152_v20, %v16255_v55  ;;  %v2901_v16 = vsel %vm2225_vm0, %v13210_v2, 0.0 }
 0x1cd   : > { %v2669_v40 = vpop.xlane.xlu1 %2668  ;;  %v2666_v27 = vpop.xlane.xlu0 %2665  ;;  %v2898_v17 = vsel %vm2225_vm0, %v13209_v3, 0.0  ;;  %v13213_v20 = vunpack.c.l.bf16 %v14983_v7 }
 0x1ce   : > { %v8161_v33 = vsel %vm7421_vm1, %v8160_v39, %v8156_v25  ;;  %v5445_v34 = vmul.f32 0.0625, %v2669_v40  ;;  %v5444_v35 = vmul.f32 0.0625, %v2666_v27  ;;  %v14984_v27 = vld [vmem:[%s15663_s25 + $0x390] sm:$0xff]  }
 0x1cf   : > { %v13218_v54 = vunpack.c.h.bf16 %v14984_v27 }
 0x1d0   : > { %v8170_v36 = vrot.slane %v5445_v34, %v15793_v11  ;;  %v8165_v38 = vrot.slane %v5444_v35, %v15799_v13  ;;  %2884 = vadd.xlane.f32.xlu1 %v2883_v28  ;;  %2881 = vadd.xlane.f32.xlu0 %v2880_v30  ;;  %v2907_v34 = vsel %vm2225_vm0, %v13214_v19, 0.0  ;;  %v2904_v35 = vsel %vm2225_vm0, %v13213_v20, 0.0 }
 0x1d1   : > { %v2675_v55 = vpop.xlane.xlu1 %2674  ;;  %v2672_v44 = vpop.xlane.xlu0 %2671 }
 0x1d2   : > { %v8166_v49 = vsel %vm7428_vm2, %v8165_v38, %v8161_v33  ;;  %v5447_v50 = vmul.f32 0.0625, %v2675_v55  ;;  %v5446_v51 = vmul.f32 0.0625, %v2672_v44 }
 0x1d3   : > { %v8171_v53 = vsel %vm7435_vm3, %v8170_v36, %v8166_v49  ;;  %v13217_v36 = vunpack.c.l.bf16 %v14984_v27 }
 0x1d4   : > { %v8180_v56 = vrot.slane %v5447_v50, %v15804_v22  ;;  %v8175_v6 = vrot.slane %v5446_v51, %v15807_v23  ;;  %2890 = vadd.xlane.f32.xlu1 %v2889_v45  ;;  %2887 = vadd.xlane.f32.xlu0 %v2886_v46  ;;  %v14985_v45 = vld [vmem:[%s15663_s25 + $0x398] sm:$0xff]   ;;  %v2913_v51 = vsel %vm2225_vm0, %v13218_v54, 0.0 }
 0x1d5   : > { %v2681_v58 = vpop.xlane.xlu1 %2680  ;;  %v2678_v62 = vpop.xlane.xlu0 %2677  ;;  %v2910_v52 = vsel %vm2225_vm0, %v13217_v36, 0.0 }
 0x1d6   : > { %v8176_v4 = vsel %vm7442_vm4, %v8175_v6, %v8171_v53  ;;  %v5449_v5 = vmul.f32 0.0625, %v2681_v58  ;;  %v5448_v29 = vmul.f32 0.0625, %v2678_v62  ;;  %v13222_v53 = vunpack.c.h.bf16 %v14985_v45 }
 0x1d7   : > { %v8181_v21 = vsel %vm7449_vm5, %v8180_v56, %v8176_v4  ;;  %v13221_v56 = vunpack.c.l.bf16 %v14985_v45 }
 0x1d8   : > { %v8190_v10 = vrot.slane %v5449_v5, %v15821_v41  ;;  %v8185_v59 = vrot.slane %v5448_v29, %v15824_v42  ;;  %2896 = vadd.xlane.f32.xlu1 %v2895_v63  ;;  %2893 = vadd.xlane.f32.xlu0 %v2892_v0  ;;  %v14986_v63 = vld [vmem:[%s15663_s25 + $0x3a0] sm:$0xff]   ;;  %v2919_v29 = vsel %vm2225_vm0, %v13222_v53, 0.0 }
 0x1d9   : > { %v2687_v14 = vpop.xlane.xlu1 %2686  ;;  %v2684_v15 = vpop.xlane.xlu0 %2683  ;;  %v2916_v7 = vsel %vm2225_vm0, %v13221_v56, 0.0 }
 0x1da   : > { %v8186_v39 = vsel %vm7456_vm6, %v8185_v59, %v8181_v21  ;;  %v5451_v25 = vmul.f32 0.0625, %v2687_v14  ;;  %v5450_v40 = vmul.f32 0.0625, %v2684_v15  ;;  %v13226_v21 = vunpack.c.h.bf16 %v14986_v63 }
 0x1db   : > { %v8191_v28 = vsel %vm7463_vm7, %v8190_v10, %v8186_v39  ;;  %v13225_v10 = vunpack.c.l.bf16 %v14986_v63 }
 0x1dc   : > { %v8200_v30 = vrot.slane %v5451_v25, %v15837_v61  ;;  %v8195_v31 = vrot.slane %v5450_v40, %v15843_v1  ;;  %2902 = vadd.xlane.f32.xlu1 %v2901_v16  ;;  %2899 = vadd.xlane.f32.xlu0 %v2898_v17  ;;  %v14987_v16 = vld [vmem:[%s15663_s25 + $0x3a8] sm:$0xff]   ;;  %v2925_v40 = vsel %vm2225_vm0, %v13226_v21, 0.0 }
 0x1dd   : > { %v2693_v32 = vpop.xlane.xlu1 %2692  ;;  %v2690_v33 = vpop.xlane.xlu0 %2689  ;;  %v2922_v27 = vsel %vm2225_vm0, %v13225_v10, 0.0 }
 0x1de   : > { %v8196_v38 = vsel %vm20169_vm8, %v8195_v31, %v8191_v28  ;;  %v5453_v55 = vmul.f32 0.0625, %v2693_v32  ;;  %v5452_v44 = vmul.f32 0.0625, %v2690_v33  ;;  %v13230_v28 = vunpack.c.h.bf16 %v14987_v16 }
 0x1df   : > { %v8201_v46 = vsel %vm20183_vm11, %v8200_v30, %v8196_v38  ;;  %vm20184_vm11 = vcmask 786112   ;;  %v13229_v30 = vunpack.c.l.bf16 %v14987_v16 }
 0x1e0   : > { %v8210_v47 = vrot.slane %v5453_v55, %v15852_v18  ;;  %v8205_v48 = vrot.slane %v5452_v44, %v15858_v24  ;;  %2908 = vadd.xlane.f32.xlu1 %v2907_v34  ;;  %2905 = vadd.xlane.f32.xlu0 %v2904_v35  ;;  %v14988_v34 = vld [vmem:[%s15663_s25 + $0x3b0] sm:$0xff]   ;;  %v2931_v45 = vsel %vm2225_vm0, %v13230_v28, 0.0 }
 0x1e1   : > { %v2699_v49 = vpop.xlane.xlu1 %2698  ;;  %v2696_v50 = vpop.xlane.xlu0 %2695 }
 0x1e2   : > { %v8206_v6 = vsel %vm7484_vm10, %v8205_v48, %v8201_v46  ;;  %v5455_v58 = vmul.f32 0.0625, %v2699_v49  ;;  %v5454_v62 = vmul.f32 0.0625, %v2696_v50  ;;  %v2928_v46 = vsel %vm2225_vm0, %v13229_v30, 0.0 }
 0x1e3   : > { %v8211_v0 = vsel %vm20184_vm11, %v8210_v47, %v8206_v6  ;;  %v13234_v47 = vunpack.c.h.bf16 %v14988_v34  ;;  %v13233_v48 = vunpack.c.l.bf16 %v14988_v34  ;;  %vm20185_vm11 = vcmask 654912  }
 0x1e4   : > { %v8220_v2 = vrot.slane %v5455_v58, %v15867_v37  ;;  %v8215_v3 = vrot.slane %v5454_v62, %v15873_v43  ;;  %2914 = vadd.xlane.f32.xlu1 %v2913_v51  ;;  %2911 = vadd.xlane.f32.xlu0 %v2910_v52  ;;  %v14989_v52 = vld [vmem:[%s15663_s25 + $0x3b8] sm:$0xff]  }
 0x1e5   : > { %v2705_v4 = vpop.xlane.xlu1 %2704  ;;  %v2702_v5 = vpop.xlane.xlu0 %2701  ;;  %v2937_v58 = vsel %vm2225_vm0, %v13234_v47, 0.0  ;;  %v2934_v62 = vsel %vm2225_vm0, %v13233_v48, 0.0  ;;  %v13238_v63 = vunpack.c.h.bf16 %v14989_v52 }
 0x1e6   : > { %v8216_v59 = vsel %vm7498_vm12, %v8215_v3, %v8211_v0  ;;  %v5457_v14 = vmul.f32 0.0625, %v2705_v4  ;;  %v5456_v15 = vmul.f32 0.0625, %v2702_v5  ;;  %v13237_v0 = vunpack.c.l.bf16 %v14989_v52  ;;  %v14990_v5 = vld [vmem:[%s15663_s25 + $0x3c0] sm:$0xff]  }
 0x1e7   : > { %v8221_v17 = vsel %vm7505_vm13, %v8220_v2, %v8216_v59  ;;  %v13242_v16 = vunpack.c.h.bf16 %v14990_v5 }
 0x1e8   : > { %v8230_v19 = vrot.slane %v5457_v14, %v15882_v57  ;;  %v8225_v20 = vrot.slane %v5456_v15, %v15887_v60  ;;  %2920 = vadd.xlane.f32.xlu1 %v2919_v29  ;;  %2917 = vadd.xlane.f32.xlu0 %v2916_v7  ;;  %v2943_v14 = vsel %vm2225_vm0, %v13238_v63, 0.0  ;;  %v2940_v15 = vsel %vm2225_vm0, %v13237_v0, 0.0 }
 0x1e9   : > { %v2711_v39 = vpop.xlane.xlu1 %2710  ;;  %v2708_v25 = vpop.xlane.xlu0 %2707 }
 0x1ea   : > { %v8226_v31 = vsel %vm7512_vm14, %v8225_v20, %v8221_v17  ;;  %v5459_v32 = vmul.f32 0.0625, %v2711_v39  ;;  %v5458_v33 = vmul.f32 0.0625, %v2708_v25  ;;  %v13241_v17 = vunpack.c.l.bf16 %v14990_v5  ;;  %v14991_v25 = vld [vmem:[%s15663_s25 + $0x3c8] sm:$0xff]  }
 0x1eb   : > { %v8231_v35 = vsel %vm7519_vm15, %v8230_v19, %v8226_v31  ;;  %v13246_v34 = vunpack.c.h.bf16 %v14991_v25 }
 0x1ec   : > { %v8239_v54 = vrot.slane %v5459_v32, %v15796_v12  ;;  %v8235_v36 = vrot.slane %v5458_v33, %v15790_v9  ;;  %2926 = vadd.xlane.f32.xlu1 %v2925_v40  ;;  %2923 = vadd.xlane.f32.xlu0 %v2922_v27  ;;  %v16432_v38 = vsel %vm20166_vm9, %v8231_v35, %v16314_v8  ;;  %v2949_v32 = vsel %vm2225_vm0, %v13242_v16, 0.0 }
 0x1ed   : > { %v2717_v55 = vpop.xlane.xlu1 %2716  ;;  %v2714_v44 = vpop.xlane.xlu0 %2713  ;;  %v2946_v33 = vsel %vm2225_vm0, %v13241_v17, 0.0  ;;  %v13245_v35 = vunpack.c.l.bf16 %v14991_v25  ;;  %vm20187_vm9 = vcmask 654912  }
 0x1ee   : > { %v8240_v49 = vsel %vm7421_vm1, %v8239_v54, %v8235_v36  ;;  %v5461_v50 = vmul.f32 0.0625, %v2717_v55  ;;  %v5460_v51 = vmul.f32 0.0625, %v2714_v44  ;;  %v14992_v44 = vld [vmem:[%s15663_s25 + $0x3d0] sm:$0xff]  }
 0x1ef   : > { %v13250_v52 = vunpack.c.h.bf16 %v14992_v44 }
 0x1f0   : > { %v8249_v53 = vrot.slane %v5461_v50, %v15793_v11  ;;  %v8244_v56 = vrot.slane %v5460_v51, %v15799_v13  ;;  %2932 = vadd.xlane.f32.xlu1 %v2931_v45  ;;  %2929 = vadd.xlane.f32.xlu0 %v2928_v46  ;;  %v2955_v50 = vsel %vm2225_vm0, %v13246_v34, 0.0  ;;  %v2952_v51 = vsel %vm2225_vm0, %v13245_v35, 0.0 }
 0x1f1   : > { %v2723_v8 = vpop.xlane.xlu1 %2722  ;;  %v2720_v6 = vpop.xlane.xlu0 %2719 }
 0x1f2   : > { %v8245_v2 = vsel %vm7428_vm2, %v8244_v56, %v8240_v49  ;;  %v5463_v3 = vmul.f32 0.0625, %v2723_v8  ;;  %v5462_v4 = vmul.f32 0.0625, %v2720_v6 }
 0x1f3   : > { %v8250_v29 = vsel %vm7435_vm3, %v8249_v53, %v8245_v2  ;;  %v13249_v53 = vunpack.c.l.bf16 %v14992_v44 }
 0x1f4   : > { %v8259_v7 = vrot.slane %v5463_v3, %v15804_v22  ;;  %v8254_v21 = vrot.slane %v5462_v4, %v15807_v23  ;;  %2938 = vadd.xlane.f32.xlu1 %v2937_v58  ;;  %2935 = vadd.xlane.f32.xlu0 %v2934_v62  ;;  %v14993_v58 = vld [vmem:[%s15663_s25 + $0x3d8] sm:$0xff]   ;;  %v2961_v4 = vsel %vm2225_vm0, %v13250_v52, 0.0 }
 0x1f5   : > { %v2729_v10 = vpop.xlane.xlu1 %2728  ;;  %v2726_v59 = vpop.xlane.xlu0 %2725  ;;  %v2958_v5 = vsel %vm2225_vm0, %v13249_v53, 0.0 }
 0x1f6   : > { %v8255_v19 = vsel %vm7442_vm4, %v8254_v21, %v8250_v29  ;;  %v5465_v20 = vmul.f32 0.0625, %v2729_v10  ;;  %v5464_v39 = vmul.f32 0.0625, %v2726_v59  ;;  %v13254_v29 = vunpack.c.h.bf16 %v14993_v58  ;;  %v14994_v21 = vld [vmem:[%s15663_s25 + $0x3e0] sm:$0xff]  }
 0x1f7   : > { %v8260_v40 = vsel %vm7449_vm5, %v8259_v7, %v8255_v19  ;;  %v13253_v7 = vunpack.c.l.bf16 %v14993_v58  ;;  %v13258_v19 = vunpack.c.h.bf16 %v14994_v21 }
 0x1f8   : > { %v8269_v27 = vrot.slane %v5465_v20, %v15821_v41  ;;  %v8264_v28 = vrot.slane %v5464_v39, %v15824_v42  ;;  %2944 = vadd.xlane.f32.xlu1 %v2943_v14  ;;  %2941 = vadd.xlane.f32.xlu0 %v2940_v15  ;;  %v2967_v25 = vsel %vm2225_vm0, %v13254_v29, 0.0  ;;  %v14997_v29 = vld [vmem:[%s15663_s25 + $0x3f8] sm:$0xff]  }
 0x1f9   : > { %v2735_v30 = vpop.xlane.xlu1 %2734  ;;  %v2732_v31 = vpop.xlane.xlu0 %2731 }
 0x1fa   : > { %v8265_v54 = vsel %vm7456_vm6, %v8264_v28, %v8260_v40  ;;  %v5467_v36 = vmul.f32 0.0625, %v2735_v30  ;;  %v5466_v55 = vmul.f32 0.0625, %v2732_v31  ;;  %v2964_v40 = vsel %vm2225_vm0, %v13253_v7, 0.0 }
 0x1fb   : > { %v8270_v45 = vsel %vm7463_vm7, %v8269_v27, %v8265_v54  ;;  %v13257_v27 = vunpack.c.l.bf16 %v14994_v21  ;;  %v2973_v54 = vsel %vm2225_vm0, %v13258_v19, 0.0  ;;  %v15390_v19 = vld [vmem:[%s20159_s1 + $0x48] sm:$0xff]  }
 0x1fc   : > { %v8279_v46 = vrot.slane %v5467_v36, %v15837_v61  ;;  %v8274_v47 = vrot.slane %v5466_v55, %v15843_v1  ;;  %2950 = vadd.xlane.f32.xlu1 %v2949_v32  ;;  %2947 = vadd.xlane.f32.xlu0 %v2946_v33  ;;  %v14995_v32 = vld [vmem:[%s15663_s25 + $0x3e8] sm:$0xff]  }
 0x1fd   : > { %v2741_v48 = vpop.xlane.xlu1 %2740  ;;  %v2738_v49 = vpop.xlane.xlu0 %2737  ;;  %v2970_v44 = vsel %vm2225_vm0, %v13257_v27, 0.0  ;;  %v15382_v27 = vld [vmem:[%s20159_s1 + $0x8] sm:$0xff]  }
 0x1fe   : > { %v8275_v56 = vsel %vm20169_vm8, %v8274_v47, %v8270_v45  ;;  %v5469_v8 = vmul.f32 0.0625, %v2741_v48  ;;  %v5468_v6 = vmul.f32 0.0625, %v2738_v49  ;;  %v13262_v45 = vunpack.c.h.bf16 %v14995_v32 }
 0x1ff   : > { %v8280_v62 = vsel %vm20185_vm11, %v8279_v46, %v8275_v56  ;;  %vm20186_vm11 = vcmask 786112   ;;  %v13261_v46 = vunpack.c.l.bf16 %v14995_v32 }
 0x200   : > { %v8289_v63 = vrot.slane %v5469_v8, %v15852_v18  ;;  %v8284_v0 = vrot.slane %v5468_v6, %v15858_v24  ;;  %2956 = vadd.xlane.f32.xlu1 %v2955_v50  ;;  %2953 = vadd.xlane.f32.xlu0 %v2952_v51  ;;  %v14996_v50 = vld [vmem:[%s15663_s25 + $0x3f0] sm:$0xff]   ;;  %v2979_v58 = vsel %vm2225_vm0, %v13262_v45, 0.0 }
 0x201   : > { %v2747_v2 = vpop.xlane.xlu1 %2746  ;;  %v2744_v3 = vpop.xlane.xlu0 %2743 }
 0x202   : > { %v8285_v10 = vsel %vm7484_vm10, %v8284_v0, %v8280_v62  ;;  %v5471_v59 = vmul.f32 0.0625, %v2747_v2  ;;  %v5470_v14 = vmul.f32 0.0625, %v2744_v3  ;;  %v2976_v62 = vsel %vm2225_vm0, %v13261_v46, 0.0  ;;  %v15389_v2 = vld [vmem:[%s20159_s1 + $0x40] sm:$0xff]  }
 0x203   : > { %v8290_v15 = vsel %vm20186_vm11, %v8289_v63, %v8285_v10  ;;  %vm20167_vm11 = vcmask 1045509   ;;  %v13266_v63 = vunpack.c.h.bf16 %v14996_v50  ;;  %v13265_v0 = vunpack.c.l.bf16 %v14996_v50  ;;  %15442 = vmatprep.subr.bf16.mxu0 %v15389_v2  ;;  %15473 = vmatprep.subr.bf16.mxu1 %v15389_v2 }
 0x204   : > { %v8299_v16 = vrot.slane %v5471_v59, %v15867_v37  ;;  %v8294_v17 = vrot.slane %v5470_v14, %v15873_v43  ;;  %2962 = vadd.xlane.f32.xlu1 %v2961_v4  ;;  %2959 = vadd.xlane.f32.xlu0 %v2958_v5 }
 0x205   : > { %v2753_v20 = vpop.xlane.xlu1 %2752  ;;  %v2750_v39 = vpop.xlane.xlu0 %2749  ;;  %v2985_v14 = vsel %vm2225_vm0, %v13266_v63, 0.0  ;;  %v15392_v63 = vld [vmem:[%s20159_s1 + $0x58] sm:$0xff]  }
 0x206   : > { %v8295_v28 = vsel %vm7498_vm12, %v8294_v17, %v8290_v15  ;;  %v5473_v30 = vmul.f32 0.0625, %v2753_v20  ;;  %v5472_v31 = vmul.f32 0.0625, %v2750_v39  ;;  %v2982_v15 = vsel %vm2225_vm0, %v13265_v0, 0.0 }
 0x207   : > { %v8300_v33 = vsel %vm7505_vm13, %v8299_v16, %v8295_v28  ;;  %v13270_v16 = vunpack.c.h.bf16 %v14997_v29  ;;  %v13269_v17 = vunpack.c.l.bf16 %v14997_v29 }
 0x208   : > { %v8309_v34 = vrot.slane %v5473_v30, %v15882_v57  ;;  %v8304_v35 = vrot.slane %v5472_v31, %v15887_v60  ;;  %2968 = vadd.xlane.f32.xlu1 %v2967_v25  ;;  %2965 = vadd.xlane.f32.xlu0 %v2964_v40  ;;  %v14998_v40 = vld [vmem:[%s15663_s25 + $0x400] sm:$0xff]  }
 0x209   : > { %v2759_v36 = vpop.xlane.xlu1 %2758  ;;  %v2756_v55 = vpop.xlane.xlu0 %2755 }
 0x20a   : > { %v8305_v47 = vsel %vm7512_vm14, %v8304_v35, %v8300_v33  ;;  %v5475_v48 = vmul.f32 0.0625, %v2759_v36  ;;  %v5474_v49 = vmul.f32 0.0625, %v2756_v55  ;;  %v2988_v35 = vsel %vm2225_vm0, %v13269_v17, 0.0  ;;  %v15391_v55 = vld [vmem:[%s20159_s1 + $0x50] sm:$0xff]   ;;  %v15393_v17 = vld [vmem:[%s20159_s1 + $0x60] sm:$0xff]  }
 0x20b   : > { %v8310_v51 = vsel %vm7519_vm15, %v8309_v34, %v8305_v47  ;;  %v2991_v34 = vsel %vm2225_vm0, %v13270_v16, 0.0  ;;  %v13273_v36 = vunpack.c.l.bf16 %v14998_v40  ;;  %v14999_v47 = vld [vmem:[%s15663_s25 + $0x408] sm:$0xff]  }
 0x20c   : > { %v8318_v52 = vrot.slane %v5475_v48, %v15796_v12  ;;  %v8314_v53 = vrot.slane %v5474_v49, %v15790_v9  ;;  %2974 = vadd.xlane.f32.xlu1 %v2973_v54  ;;  %2971 = vadd.xlane.f32.xlu0 %v2970_v44  ;;  %v16491_v56 = vsel %vm20167_vm11, %v8310_v51, %v16373_v26  ;;  %v14808_v26 = vld [vmem:[%s20159_s1] sm:$0xff]   ;;  %v13274_v54 = vunpack.c.h.bf16 %v14998_v40  ;;  %v15383_v48 = vld [vmem:[%s20159_s1 + $0x10] sm:$0xff]  }
 0x20d   : > { %v2765_v8 = vpop.xlane.xlu1 %2764  ;;  %v2762_v6 = vpop.xlane.xlu0 %2761  ;;  %15444 = vmatpush3.bf16.msra.mxu0 %v14808_v26  ;;  %15481 = vmatpush3.bf16.msra.mxu1 %v14808_v26  ;;  %v15385_v40 = vld [vmem:[%s20159_s1 + $0x20] sm:$0xff]  }
 0x20e   : > { %v8319_v3 = vsel %vm7421_vm1, %v8318_v52, %v8314_v53  ;;  %v5477_v4 = vmul.f32 0.0625, %v2765_v8  ;;  %v5476_v5 = vmul.f32 0.0625, %v2762_v6  ;;  %15446 = vmatprep.subr.bf16.mxu0 %v15390_v19  ;;  %15474 = vmatprep.subr.bf16.mxu1 %v15390_v19  ;;  %v2997_v8 = vsel %vm2225_vm0, %v13274_v54, 0.0 }
 0x20f   : > { %v2994_v6 = vsel %vm2225_vm0, %v13273_v36, 0.0  ;;  %v15394_v36 = vld [vmem:[%s20159_s1 + $0x68] sm:$0xff]  }
 0x210   : > { %v8328_v7 = vrot.slane %v5477_v4, %v15793_v11  ;;  %v8323_v21 = vrot.slane %v5476_v5, %v15799_v13  ;;  %2980 = vadd.xlane.f32.xlu1 %v2979_v58  ;;  %2977 = vadd.xlane.f32.xlu0 %v2976_v62  ;;  %v13278_v58 = vunpack.c.h.bf16 %v14999_v47  ;;  %v13277_v62 = vunpack.c.l.bf16 %v14999_v47  ;;  %v15000_v4 = vld [vmem:[%s15663_s25 + $0x410] sm:$0xff]   ;;  %v15384_v5 = vld [vmem:[%s20159_s1 + $0x18] sm:$0xff]   ;;  %v15386_v47 = vld [vmem:[%s20159_s1 + $0x28] sm:$0xff]  }
 0x211   : > { %v2771_v10 = vpop.xlane.xlu1 %2770  ;;  %v2768_v59 = vpop.xlane.xlu0 %2767  ;;  %15448 = vmatpush3.bf16.msra.mxu0 %v15382_v27  ;;  %15482 = vmatpush3.bf16.msra.mxu1 %v15382_v27  ;;  %v13281_v16 = vunpack.c.l.bf16 %v15000_v4 }
 0x212   : > { %v8324_v20 = vsel %vm7428_vm2, %v8323_v21, %v8319_v3  ;;  %v5479_v39 = vmul.f32 0.0625, %v2771_v10  ;;  %v5478_v25 = vmul.f32 0.0625, %v2768_v59  ;;  %15450 = vmatprep.subr.bf16.mxu0 %v15391_v55  ;;  %15475 = vmatprep.subr.bf16.mxu1 %v15391_v55  ;;  %v3003_v59 = vsel %vm2225_vm0, %v13278_v58, 0.0 }
 0x213   : > { %v8329_v28 = vsel %vm7435_vm3, %v8328_v7, %v8324_v20 }
 0x214   : > { %v8338_v30 = vrot.slane %v5479_v39, %v15804_v22  ;;  %v8333_v31 = vrot.slane %v5478_v25, %v15807_v23  ;;  %2986 = vadd.xlane.f32.xlu1 %v2985_v14  ;;  %2983 = vadd.xlane.f32.xlu0 %v2982_v15  ;;  %v3000_v14 = vsel %vm2225_vm0, %v13277_v62, 0.0  ;;  %v13282_v15 = vunpack.c.h.bf16 %v15000_v4  ;;  %v15001_v25 = vld [vmem:[%s15663_s25 + $0x418] sm:$0xff]   ;;  %v15395_v62 = vld [vmem:[%s20159_s1 + $0x70] sm:$0xff]  }
 0x215   : > { %v2777_v32 = vpop.xlane.xlu1 %2776  ;;  %v2774_v33 = vpop.xlane.xlu0 %2773  ;;  %15452 = vmatpush3.bf16.msra.mxu0 %v15383_v48  ;;  %15483 = vmatpush3.bf16.msra.mxu1 %v15383_v48  ;;  %v13285_v54 = vunpack.c.l.bf16 %v15001_v25  ;;  %v15387_v4 = vld [vmem:[%s20159_s1 + $0x30] sm:$0xff]  }
 0x216   : > { %v8334_v44 = vsel %vm7442_vm4, %v8333_v31, %v8329_v28  ;;  %v5481_v45 = vmul.f32 0.0625, %v2777_v32  ;;  %v5480_v46 = vmul.f32 0.0625, %v2774_v33  ;;  %15454 = vmatprep.subr.bf16.mxu0 %v15392_v63  ;;  %15476 = vmatprep.subr.bf16.mxu1 %v15392_v63  ;;  %v3009_v33 = vsel %vm2225_vm0, %v13282_v15, 0.0 }
 0x217   : > { %v8339_v49 = vsel %vm7449_vm5, %v8338_v30, %v8334_v44 }
 0x218   : > { %v8348_v50 = vrot.slane %v5481_v45, %v15821_v41  ;;  %v8343_v51 = vrot.slane %v5480_v46, %v15824_v42  ;;  %2992 = vadd.xlane.f32.xlu1 %v2991_v34  ;;  %2989 = vadd.xlane.f32.xlu0 %v2988_v35  ;;  %v3006_v34 = vsel %vm2225_vm0, %v13281_v16, 0.0  ;;  %v13286_v35 = vunpack.c.h.bf16 %v15001_v25  ;;  %v15002_v46 = vld [vmem:[%s15663_s25 + $0x420] sm:$0xff]   ;;  %v15396_v16 = vld [vmem:[%s20159_s1 + $0x78] sm:$0xff]  }
 0x219   : > { %v2783_v52 = vpop.xlane.xlu1 %2782  ;;  %v2780_v53 = vpop.xlane.xlu0 %2779  ;;  %15456 = vmatpush3.bf16.msra.mxu0 %v15384_v5  ;;  %15484 = vmatpush3.bf16.msra.mxu1 %v15384_v5  ;;  %v13289_v58 = vunpack.c.l.bf16 %v15002_v46  ;;  %v15388_v25 = vld [vmem:[%s20159_s1 + $0x38] sm:$0xff]  }
 0x21a   : > { %v8344_v0 = vsel %vm7456_vm6, %v8343_v51, %v8339_v49  ;;  %v5483_v2 = vmul.f32 0.0625, %v2783_v52  ;;  %v5482_v3 = vmul.f32 0.0625, %v2780_v53  ;;  %15458 = vmatprep.subr.bf16.mxu0 %v15393_v17  ;;  %15477 = vmatprep.subr.bf16.mxu1 %v15393_v17  ;;  %v3015_v53 = vsel %vm2225_vm0, %v13286_v35, 0.0 }
 0x21b   : > { %v8349_v29 = vsel %vm7463_vm7, %v8348_v50, %v8344_v0 }
 0x21c   : > { %v8358_v26 = vrot.slane %v5483_v2, %v15837_v61  ;;  %v8353_v7 = vrot.slane %v5482_v3, %v15843_v1  ;;  %2998 = vadd.xlane.f32.xlu1 %v2997_v8  ;;  %2995 = vadd.xlane.f32.xlu0 %v2994_v6  ;;  %v3012_v8 = vsel %vm2225_vm0, %v13285_v54, 0.0  ;;  %v13290_v6 = vunpack.c.h.bf16 %v15002_v46  ;;  %v15003_v3 = vld [vmem:[%s15663_s25 + $0x428] sm:$0xff]  }
 0x21d   : > { %v2789_v21 = vpop.xlane.xlu1 %2788  ;;  %v2786_v10 = vpop.xlane.xlu0 %2785  ;;  %15460 = vmatpush3.bf16.msra.mxu0 %v15385_v40  ;;  %15485 = vmatpush3.bf16.msra.mxu1 %v15385_v40  ;;  %v13293_v15 = vunpack.c.l.bf16 %v15003_v3 }
 0x21e   : > { %v8354_v19 = vsel %vm20169_vm8, %v8353_v7, %v8349_v29  ;;  %v5485_v20 = vmul.f32 0.0625, %v2789_v21  ;;  %v5484_v39 = vmul.f32 0.0625, %v2786_v10  ;;  %15462 = vmatprep.subr.bf16.mxu0 %v15394_v36  ;;  %15478 = vmatprep.subr.bf16.mxu1 %v15394_v36  ;;  %v3021_v10 = vsel %vm2225_vm0, %v13290_v6, 0.0 }
 0x21f   : > { %v8359_v27 = vsel %vm20187_vm9, %v8358_v26, %v8354_v19  ;;  %vm20188_vm9 = vcmask 786112  }
 0x220   : > { %v8368_v28 = vrot.slane %v5485_v20, %v15852_v18  ;;  %v8363_v30 = vrot.slane %v5484_v39, %v15858_v24  ;;  %3004 = vadd.xlane.f32.xlu1 %v3003_v59  ;;  %3001 = vadd.xlane.f32.xlu0 %v3000_v14  ;;  %v3018_v59 = vsel %vm2225_vm0, %v13289_v58, 0.0  ;;  %v13294_v14 = vunpack.c.h.bf16 %v15003_v3  ;;  %v15004_v39 = vld [vmem:[%s15663_s25 + $0x430] sm:$0xff]   ;;  %v15006_v58 = vld [vmem:[%s15663_s25 + $0x440] sm:$0xff]  }
 0x221   : > { %v2795_v31 = vpop.xlane.xlu1 %2794  ;;  %v2792_v32 = vpop.xlane.xlu0 %2791  ;;  %15464 = vmatpush3.bf16.msra.mxu0 %v15386_v47  ;;  %15486 = vmatpush3.bf16.msra.mxu1 %v15386_v47  ;;  %v13298_v35 = vunpack.c.h.bf16 %v15004_v39  ;;  %v13297_v54 = vunpack.c.l.bf16 %v15004_v39 }
 0x222   : > { %v8364_v55 = vsel %vm7484_vm10, %v8363_v30, %v8359_v27  ;;  %v5487_v44 = vmul.f32 0.0625, %v2795_v31  ;;  %v5486_v45 = vmul.f32 0.0625, %v2792_v32  ;;  %15466 = vmatprep.subr.bf16.mxu0 %v15395_v62  ;;  %15479 = vmatprep.subr.bf16.mxu1 %v15395_v62 }
 0x223   : > { %v8369_v48 = vsel %vm20188_vm9, %v8368_v28, %v8364_v55  ;;  %vm20189_vm9 = vcmask 654912  }
 0x224   : > { %v8378_v49 = vrot.slane %v5487_v44, %v15867_v37  ;;  %v8373_v50 = vrot.slane %v5486_v45, %v15873_v43  ;;  %3010 = vadd.xlane.f32.xlu1 %v3009_v33  ;;  %3007 = vadd.xlane.f32.xlu0 %v3006_v34  ;;  %v3027_v33 = vsel %vm2225_vm0, %v13294_v14, 0.0  ;;  %v3024_v34 = vsel %vm2225_vm0, %v13293_v15, 0.0  ;;  %v15005_v45 = vld [vmem:[%s15663_s25 + $0x438] sm:$0xff]  }
 0x225   : > { %v2801_v51 = vpop.xlane.xlu1 %2800  ;;  %v2798_v52 = vpop.xlane.xlu0 %2797  ;;  %15468 = vmatpush3.bf16.msra.mxu0 %v15387_v4  ;;  %15487 = vmatpush3.bf16.msra.mxu1 %v15387_v4 }
 0x226   : > { %v8374_v63 = vsel %vm7498_vm12, %v8373_v50, %v8369_v48  ;;  %v5489_v0 = vmul.f32 0.0625, %v2801_v51  ;;  %v5488_v2 = vmul.f32 0.0625, %v2798_v52  ;;  %15470 = vmatprep.subr.bf16.mxu0 %v15396_v16  ;;  %15480 = vmatprep.subr.bf16.mxu1 %v15396_v16  ;;  %v3030_v50 = vsel %vm2225_vm0, %v13297_v54, 0.0 }
 0x227   : > { %v8379_v5 = vsel %vm7505_vm13, %v8378_v49, %v8374_v63  ;;  %v3033_v49 = vsel %vm2225_vm0, %v13298_v35, 0.0  ;;  %v13302_v51 = vunpack.c.h.bf16 %v15005_v45  ;;  %v13301_v52 = vunpack.c.l.bf16 %v15005_v45 }
 0x228   : > { %v8388_v29 = vrot.slane %v5489_v0, %v15882_v57  ;;  %v8383_v26 = vrot.slane %v5488_v2, %v15887_v60  ;;  %3016 = vadd.xlane.f32.xlu1 %v3015_v53  ;;  %3013 = vadd.xlane.f32.xlu0 %v3012_v8 }
 0x229   : > { %v2807_v7 = vpop.xlane.xlu1 %2806  ;;  %v2804_v21 = vpop.xlane.xlu0 %2803  ;;  %15472 = vmatpush3.bf16.msra.mxu0 %v15388_v25  ;;  %15488 = vmatpush3.bf16.msra.mxu1 %v15388_v25  ;;  %v3039_v4 = vsel %vm2225_vm0, %v13302_v51, 0.0 }
 0x22a   : > { %v8384_v17 = vsel %vm7512_vm14, %v8383_v26, %v8379_v5  ;;  %v5491_v19 = vmul.f32 0.0625, %v2807_v7  ;;  %v5490_v20 = vmul.f32 0.0625, %v2804_v21  ;;  %v3036_v5 = vsel %vm2225_vm0, %v13301_v52, 0.0 }
 0x22b   : > { %v8389_v40 = vsel %vm7519_vm15, %v8388_v29, %v8384_v17  ;;  %v13306_v29 = vunpack.c.h.bf16 %v15006_v58  ;;  %v13305_v26 = vunpack.c.l.bf16 %v15006_v58 }
 0x22c   : > { %v8397_v27 = vrot.slane %v5491_v19, %v15796_v12  ;;  %v8393_v28 = vrot.slane %v5490_v20, %v15790_v9  ;;  %3022 = vadd.xlane.f32.xlu1 %v3021_v10  ;;  %3019 = vadd.xlane.f32.xlu0 %v3018_v59  ;;  %v16598_v30 = vsel %vm20167_vm11, %v8389_v40, %v16432_v38  ;;  %v15007_v59 = vld [vmem:[%s15663_s25 + $0x448] sm:$0xff]   ;;  %vm20191_vm11 = vcmask 654912  }
 0x22d   : > { %v2813_v31 = vpop.xlane.xlu1 %2812  ;;  %v2810_v32 = vpop.xlane.xlu0 %2809  ;;  %v3045_v20 = vsel %vm2225_vm0, %v13306_v29, 0.0  ;;  %v3042_v39 = vsel %vm2225_vm0, %v13305_v26, 0.0  ;;  %v13310_v25 = vunpack.c.h.bf16 %v15007_v59  ;;  %v13309_v40 = vunpack.c.l.bf16 %v15007_v59 }
 0x22e   : > { %v8398_v36 = vsel %vm7421_vm1, %v8397_v27, %v8393_v28  ;;  %v5493_v55 = vmul.f32 0.0625, %v2813_v31  ;;  %v5492_v44 = vmul.f32 0.0625, %v2810_v32  ;;  %v15008_v32 = vld [vmem:[%s15663_s25 + $0x450] sm:$0xff]  }
 0x22f   : > { %v13314_v45 = vunpack.c.h.bf16 %v15008_v32 }
 0x230   : > { %v8407_v46 = vrot.slane %v5493_v55, %v15793_v11  ;;  %v8402_v47 = vrot.slane %v5492_v44, %v15799_v13  ;;  %3028 = vadd.xlane.f32.xlu1 %v3027_v33  ;;  %3025 = vadd.xlane.f32.xlu0 %v3024_v34  ;;  %v3051_v55 = vsel %vm2225_vm0, %v13310_v25, 0.0  ;;  %v3048_v44 = vsel %vm2225_vm0, %v13309_v40, 0.0 }
 0x231   : > { %v2819_v38 = vpop.xlane.xlu1 %2818  ;;  %v2816_v48 = vpop.xlane.xlu0 %2815 }
 0x232   : > { %v8403_v53 = vsel %vm7428_vm2, %v8402_v47, %v8398_v36  ;;  %v5495_v8 = vmul.f32 0.0625, %v2819_v38  ;;  %v5494_v6 = vmul.f32 0.0625, %v2816_v48 }
 0x233   : > { %v8408_v62 = vsel %vm7435_vm3, %v8407_v46, %v8403_v53  ;;  %v13313_v46 = vunpack.c.l.bf16 %v15008_v32 }
 0x234   : > { %v8417_v63 = vrot.slane %v5495_v8, %v15804_v22  ;;  %v8412_v0 = vrot.slane %v5494_v6, %v15807_v23  ;;  %3034 = vadd.xlane.f32.xlu1 %v3033_v49  ;;  %3031 = vadd.xlane.f32.xlu0 %v3030_v50  ;;  %v15009_v49 = vld [vmem:[%s15663_s25 + $0x458] sm:$0xff]   ;;  %v3057_v6 = vsel %vm2225_vm0, %v13314_v45, 0.0 }
 0x235   : > { %v2825_v2 = vpop.xlane.xlu1 %2824  ;;  %v2822_v3 = vpop.xlane.xlu0 %2821  ;;  %v3054_v58 = vsel %vm2225_vm0, %v13313_v46, 0.0 }
 0x236   : > { %v8413_v7 = vsel %vm7442_vm4, %v8412_v0, %v8408_v62  ;;  %v5497_v21 = vmul.f32 0.0625, %v2825_v2  ;;  %v5496_v10 = vmul.f32 0.0625, %v2822_v3  ;;  %v13318_v62 = vunpack.c.h.bf16 %v15009_v49  ;;  %v15010_v0 = vld [vmem:[%s15663_s25 + $0x460] sm:$0xff]  }
 0x237   : > { %v8418_v14 = vsel %vm7449_vm5, %v8417_v63, %v8413_v7  ;;  %v13317_v63 = vunpack.c.l.bf16 %v15009_v49  ;;  %v13322_v7 = vunpack.c.h.bf16 %v15010_v0 }
 0x238   : > { %v8427_v15 = vrot.slane %v5497_v21, %v15821_v41  ;;  %v8422_v16 = vrot.slane %v5496_v10, %v15824_v42  ;;  %3040 = vadd.xlane.f32.xlu1 %v3039_v4  ;;  %3037 = vadd.xlane.f32.xlu0 %v3036_v5  ;;  %v3063_v59 = vsel %vm2225_vm0, %v13318_v62, 0.0 }
 0x239   : > { %v2831_v17 = vpop.xlane.xlu1 %2830  ;;  %v2828_v19 = vpop.xlane.xlu0 %2827 }
 0x23a   : > { %v8423_v27 = vsel %vm7456_vm6, %v8422_v16, %v8418_v14  ;;  %v5499_v28 = vmul.f32 0.0625, %v2831_v17  ;;  %v5498_v31 = vmul.f32 0.0625, %v2828_v19  ;;  %v3060_v14 = vsel %vm2225_vm0, %v13317_v63, 0.0 }
 0x23b   : > { %v8428_v33 = vsel %vm7463_vm7, %v8427_v15, %v8423_v27  ;;  %v13321_v15 = vunpack.c.l.bf16 %v15010_v0  ;;  %v3069_v27 = vsel %vm2225_vm0, %v13322_v7, 0.0 }
 0x23c   : > { %v8437_v34 = vrot.slane %v5499_v28, %v15837_v61  ;;  %v8432_v35 = vrot.slane %v5498_v31, %v15843_v1  ;;  %3046 = vadd.xlane.f32.xlu1 %v3045_v20  ;;  %3043 = vadd.xlane.f32.xlu0 %v3042_v39  ;;  %v15011_v20 = vld [vmem:[%s15663_s25 + $0x468] sm:$0xff]  }
 0x23d   : > { %v2837_v54 = vpop.xlane.xlu1 %2836  ;;  %v2834_v36 = vpop.xlane.xlu0 %2833  ;;  %v3066_v32 = vsel %vm2225_vm0, %v13321_v15, 0.0 }
 0x23e   : > { %v8433_v47 = vsel %vm20169_vm8, %v8432_v35, %v8428_v33  ;;  %v5501_v38 = vmul.f32 0.0625, %v2837_v54  ;;  %v5500_v48 = vmul.f32 0.0625, %v2834_v36  ;;  %v13326_v33 = vunpack.c.h.bf16 %v15011_v20 }
 0x23f   : > { %v8438_v50 = vsel %vm20189_vm9, %v8437_v34, %v8433_v47  ;;  %vm20190_vm9 = vcmask 786112   ;;  %v13325_v34 = vunpack.c.l.bf16 %v15011_v20 }
 0x240   : > { %v8447_v51 = vrot.slane %v5501_v38, %v15852_v18  ;;  %v8442_v52 = vrot.slane %v5500_v48, %v15858_v24  ;;  %3052 = vadd.xlane.f32.xlu1 %v3051_v55  ;;  %3049 = vadd.xlane.f32.xlu0 %v3048_v44  ;;  %v15012_v55 = vld [vmem:[%s15663_s25 + $0x470] sm:$0xff]   ;;  %v3075_v49 = vsel %vm2225_vm0, %v13326_v33, 0.0 }
 0x241   : > { %v2843_v53 = vpop.xlane.xlu1 %2842  ;;  %v2840_v8 = vpop.xlane.xlu0 %2839 }
 0x242   : > { %v8443_v2 = vsel %vm7484_vm10, %v8442_v52, %v8438_v50  ;;  %v5503_v3 = vmul.f32 0.0625, %v2843_v53  ;;  %v5502_v4 = vmul.f32 0.0625, %v2840_v8  ;;  %v3072_v50 = vsel %vm2225_vm0, %v13325_v34, 0.0 }
 0x243   : > { %v8448_v5 = vsel %vm20190_vm9, %v8447_v51, %v8443_v2  ;;  %vm20168_vm9 = vcmask 1046534   ;;  %v13330_v51 = vunpack.c.h.bf16 %v15012_v55  ;;  %v13329_v52 = vunpack.c.l.bf16 %v15012_v55 }
 0x244   : > { %v8457_v29 = vrot.slane %v5503_v3, %v15867_v37  ;;  %v8452_v26 = vrot.slane %v5502_v4, %v15873_v43  ;;  %3058 = vadd.xlane.f32.xlu1 %v3057_v6  ;;  %3055 = vadd.xlane.f32.xlu0 %v3054_v58  ;;  %v15013_v58 = vld [vmem:[%s15663_s25 + $0x478] sm:$0xff]  }
 0x245   : > { %v2849_v21 = vpop.xlane.xlu1 %2848  ;;  %v2846_v10 = vpop.xlane.xlu0 %2845  ;;  %v3081_v2 = vsel %vm2225_vm0, %v13330_v51, 0.0  ;;  %v3078_v3 = vsel %vm2225_vm0, %v13329_v52, 0.0  ;;  %v13334_v4 = vunpack.c.h.bf16 %v15013_v58 }
 0x246   : > { %v8453_v16 = vsel %vm7498_vm12, %v8452_v26, %v8448_v5  ;;  %v5505_v17 = vmul.f32 0.0625, %v2849_v21  ;;  %v5504_v19 = vmul.f32 0.0625, %v2846_v10  ;;  %v13333_v5 = vunpack.c.l.bf16 %v15013_v58  ;;  %v15014_v21 = vld [vmem:[%s15663_s25 + $0x480] sm:$0xff]  }
 0x247   : > { %v8458_v39 = vsel %vm7505_vm13, %v8457_v29, %v8453_v16  ;;  %v13338_v20 = vunpack.c.h.bf16 %v15014_v21 }
 0x248   : > { %v8467_v25 = vrot.slane %v5505_v17, %v15882_v57  ;;  %v8462_v40 = vrot.slane %v5504_v19, %v15887_v60  ;;  %3064 = vadd.xlane.f32.xlu1 %v3063_v59  ;;  %3061 = vadd.xlane.f32.xlu0 %v3060_v14  ;;  %v3087_v17 = vsel %vm2225_vm0, %v13334_v4, 0.0  ;;  %v3084_v19 = vsel %vm2225_vm0, %v13333_v5, 0.0 }
 0x249   : > { %v2855_v28 = vpop.xlane.xlu1 %2854  ;;  %v2852_v31 = vpop.xlane.xlu0 %2851 }
 0x24a   : > { %v8463_v35 = vsel %vm7512_vm14, %v8462_v40, %v8458_v39  ;;  %v5507_v54 = vmul.f32 0.0625, %v2855_v28  ;;  %v5506_v36 = vmul.f32 0.0625, %v2852_v31  ;;  %v13337_v39 = vunpack.c.l.bf16 %v15014_v21  ;;  %v15015_v28 = vld [vmem:[%s15663_s25 + $0x488] sm:$0xff]  }
 0x24b   : > { %v8468_v44 = vsel %vm7519_vm15, %v8467_v25, %v8463_v35  ;;  %v13342_v55 = vunpack.c.h.bf16 %v15015_v28 }
 0x24c   : > { %v8476_v45 = vrot.slane %v5507_v54, %v15796_v12  ;;  %v8472_v46 = vrot.slane %v5506_v36, %v15790_v9  ;;  %3070 = vadd.xlane.f32.xlu1 %v3069_v27  ;;  %3067 = vadd.xlane.f32.xlu0 %v3066_v32  ;;  %v16657_v47 = vsel %vm20168_vm9, %v8468_v44, %v16491_v56  ;;  %v3093_v54 = vsel %vm2225_vm0, %v13338_v20, 0.0 }
 0x24d   : > { %v2861_v38 = vpop.xlane.xlu1 %2860  ;;  %v2858_v48 = vpop.xlane.xlu0 %2857  ;;  %v3090_v36 = vsel %vm2225_vm0, %v13337_v39, 0.0  ;;  %v13341_v44 = vunpack.c.l.bf16 %v15015_v28 }
 0x24e   : > { %v8477_v53 = vsel %vm7421_vm1, %v8476_v45, %v8472_v46  ;;  %v5509_v8 = vmul.f32 0.0625, %v2861_v38  ;;  %v5508_v6 = vmul.f32 0.0625, %v2858_v48  ;;  %v15016_v48 = vld [vmem:[%s15663_s25 + $0x490] sm:$0xff]  }
 0x24f   : > { %v13346_v58 = vunpack.c.h.bf16 %v15016_v48 }
 0x250   : > { %v8486_v62 = vrot.slane %v5509_v8, %v15793_v11  ;;  %v8481_v63 = vrot.slane %v5508_v6, %v15799_v13  ;;  %3076 = vadd.xlane.f32.xlu1 %v3075_v49  ;;  %3073 = vadd.xlane.f32.xlu0 %v3072_v50  ;;  %v3099_v8 = vsel %vm2225_vm0, %v13342_v55, 0.0  ;;  %v3096_v6 = vsel %vm2225_vm0, %v13341_v44, 0.0 }
 0x251   : > { %v2867_v56 = vpop.xlane.xlu1 %2866  ;;  %v2864_v0 = vpop.xlane.xlu0 %2863 }
 0x252   : > { %v8482_v29 = vsel %vm7428_vm2, %v8481_v63, %v8477_v53  ;;  %v5511_v26 = vmul.f32 0.0625, %v2867_v56  ;;  %v5510_v7 = vmul.f32 0.0625, %v2864_v0 }
 0x253   : > { %v8487_v10 = vsel %vm7435_vm3, %v8486_v62, %v8482_v29  ;;  %v13345_v62 = vunpack.c.l.bf16 %v15016_v48 }
 0x254   : > { %v8496_v59 = vrot.slane %v5511_v26, %v15804_v22  ;;  %v8491_v14 = vrot.slane %v5510_v7, %v15807_v23  ;;  %3082 = vadd.xlane.f32.xlu1 %v3081_v2  ;;  %3079 = vadd.xlane.f32.xlu0 %v3078_v3  ;;  %v15017_v2 = vld [vmem:[%s15663_s25 + $0x498] sm:$0xff]   ;;  %v3105_v7 = vsel %vm2225_vm0, %v13346_v58, 0.0 }
 0x255   : > { %v2873_v15 = vpop.xlane.xlu1 %2872  ;;  %v2870_v16 = vpop.xlane.xlu0 %2869  ;;  %v3102_v21 = vsel %vm2225_vm0, %v13345_v62, 0.0 }
 0x256   : > { %v8492_v25 = vsel %vm7442_vm4, %v8491_v14, %v8487_v10  ;;  %v5513_v40 = vmul.f32 0.0625, %v2873_v15  ;;  %v5512_v27 = vmul.f32 0.0625, %v2870_v16  ;;  %v13350_v10 = vunpack.c.h.bf16 %v15017_v2 }
 0x257   : > { %v8497_v31 = vsel %vm7449_vm5, %v8496_v59, %v8492_v25  ;;  %v13349_v59 = vunpack.c.l.bf16 %v15017_v2  ;;  %v15021_v2 = vld [vmem:[%s15663_s25 + $0x4b8] sm:$0xff]  }
 0x258   : > { %v8506_v32 = vrot.slane %v5513_v40, %v15821_v41  ;;  %v8501_v33 = vrot.slane %v5512_v27, %v15824_v42  ;;  %3088 = vadd.xlane.f32.xlu1 %v3087_v17  ;;  %3085 = vadd.xlane.f32.xlu0 %v3084_v19  ;;  %v15018_v17 = vld [vmem:[%s15663_s25 + $0x4a0] sm:$0xff]   ;;  %v3111_v27 = vsel %vm2225_vm0, %v13350_v10, 0.0 }
 0x259   : > { %v2879_v34 = vpop.xlane.xlu1 %2878  ;;  %v2876_v35 = vpop.xlane.xlu0 %2875  ;;  %v3108_v28 = vsel %vm2225_vm0, %v13349_v59, 0.0 }
 0x25a   : > { %v8502_v45 = vsel %vm7456_vm6, %v8501_v33, %v8497_v31  ;;  %v5515_v46 = vmul.f32 0.0625, %v2879_v34  ;;  %v5514_v38 = vmul.f32 0.0625, %v2876_v35  ;;  %v13354_v31 = vunpack.c.h.bf16 %v15018_v17 }
 0x25b   : > { %v8507_v49 = vsel %vm7463_vm7, %v8506_v32, %v8502_v45  ;;  %v13353_v32 = vunpack.c.l.bf16 %v15018_v17  ;;  %v15023_v17 = vld [vmem:[%s15663_s25 + $0x4c8] sm:$0xff]  }
 0x25c   : > { %v8516_v50 = vrot.slane %v5515_v46, %v15837_v61  ;;  %v8511_v51 = vrot.slane %v5514_v38, %v15843_v1  ;;  %3094 = vadd.xlane.f32.xlu1 %v3093_v54  ;;  %3091 = vadd.xlane.f32.xlu0 %v3090_v36  ;;  %v15019_v54 = vld [vmem:[%s15663_s25 + $0x4a8] sm:$0xff]   ;;  %v3117_v38 = vsel %vm2225_vm0, %v13354_v31, 0.0 }
 0x25d   : > { %v2885_v52 = vpop.xlane.xlu1 %2884  ;;  %v2882_v53 = vpop.xlane.xlu0 %2881  ;;  %v3114_v48 = vsel %vm2225_vm0, %v13353_v32, 0.0 }
 0x25e   : > { %v8512_v63 = vsel %vm20169_vm8, %v8511_v51, %v8507_v49  ;;  %v5517_v56 = vmul.f32 0.0625, %v2885_v52  ;;  %v5516_v0 = vmul.f32 0.0625, %v2882_v53  ;;  %v13358_v49 = vunpack.c.h.bf16 %v15019_v54  ;;  %v15020_v51 = vld [vmem:[%s15663_s25 + $0x4b0] sm:$0xff]  }
 0x25f   : > { %v8517_v3 = vsel %vm20191_vm11, %v8516_v50, %v8512_v63  ;;  %vm20192_vm11 = vcmask 786112   ;;  %v13357_v50 = vunpack.c.l.bf16 %v15019_v54 }
 0x260   : > { %v8526_v4 = vrot.slane %v5517_v56, %v15852_v18  ;;  %v8521_v5 = vrot.slane %v5516_v0, %v15858_v24  ;;  %3100 = vadd.xlane.f32.xlu1 %v3099_v8  ;;  %3097 = vadd.xlane.f32.xlu0 %v3096_v6  ;;  %v3123_v62 = vsel %vm2225_vm0, %v13358_v49, 0.0  ;;  %v13362_v56 = vunpack.c.h.bf16 %v15020_v51 }
 0x261   : > { %v2891_v29 = vpop.xlane.xlu1 %2890  ;;  %v2888_v26 = vpop.xlane.xlu0 %2887  ;;  %v3120_v63 = vsel %vm2225_vm0, %v13357_v50, 0.0  ;;  %v13361_v0 = vunpack.c.l.bf16 %v15020_v51  ;;  %v15026_v51 = vld [vmem:[%s15663_s25 + $0x4e0] sm:$0xff]  }
 0x262   : > { %v8522_v14 = vsel %vm7484_vm10, %v8521_v5, %v8517_v3  ;;  %v5519_v15 = vmul.f32 0.0625, %v2891_v29  ;;  %v5518_v16 = vmul.f32 0.0625, %v2888_v26  ;;  %v13366_v29 = vunpack.c.h.bf16 %v15021_v2 }
 0x263   : > { %v8527_v19 = vsel %vm20192_vm11, %v8526_v4, %v8522_v14  ;;  %v3126_v5 = vsel %vm2225_vm0, %v13361_v0, 0.0  ;;  %v13365_v26 = vunpack.c.l.bf16 %v15021_v2  ;;  %vm20193_vm11 = vcmask 654912  }
 0x264   : > { %v8536_v20 = vrot.slane %v5519_v15, %v15867_v37  ;;  %v8531_v39 = vrot.slane %v5518_v16, %v15873_v43  ;;  %3106 = vadd.xlane.f32.xlu1 %v3105_v7  ;;  %3103 = vadd.xlane.f32.xlu0 %v3102_v21  ;;  %v15022_v7 = vld [vmem:[%s15663_s25 + $0x4c0] sm:$0xff]   ;;  %v3135_v59 = vsel %vm2225_vm0, %v13366_v29, 0.0  ;;  %v15027_v29 = vld [vmem:[%s15663_s25 + $0x4e8] sm:$0xff]  }
 0x265   : > { %v2897_v25 = vpop.xlane.xlu1 %2896  ;;  %v2894_v40 = vpop.xlane.xlu0 %2893  ;;  %v3132_v14 = vsel %vm2225_vm0, %v13365_v26, 0.0  ;;  %v13370_v15 = vunpack.c.h.bf16 %v15022_v7  ;;  %v13369_v16 = vunpack.c.l.bf16 %v15022_v7 }
 0x266   : > { %v8532_v33 = vsel %vm7498_vm12, %v8531_v39, %v8527_v19  ;;  %v5521_v34 = vmul.f32 0.0625, %v2897_v25  ;;  %v5520_v35 = vmul.f32 0.0625, %v2894_v40  ;;  %v13374_v40 = vunpack.c.h.bf16 %v15023_v17 }
 0x267   : > { %v8537_v36 = vsel %vm7505_vm13, %v8536_v20, %v8532_v33  ;;  %v3141_v39 = vsel %vm2225_vm0, %v13370_v15, 0.0  ;;  %v3138_v25 = vsel %vm2225_vm0, %v13369_v16, 0.0 }
 0x268   : > { %v8546_v55 = vrot.slane %v5521_v34, %v15882_v57  ;;  %v8541_v44 = vrot.slane %v5520_v35, %v15887_v60  ;;  %3112 = vadd.xlane.f32.xlu1 %v3111_v27  ;;  %3109 = vadd.xlane.f32.xlu0 %v3108_v28  ;;  %v13373_v27 = vunpack.c.l.bf16 %v15023_v17  ;;  %v15024_v28 = vld [vmem:[%s15663_s25 + $0x4d0] sm:$0xff]   ;;  %v3147_v33 = vsel %vm2225_vm0, %v13374_v40, 0.0 }
 0x269   : > { %v16707_v45 = vpop.xlane.xlu1 %2902  ;;  %v16709_v46 = vpop.xlane.xlu0 %2899  ;;  %v13378_v35 = vunpack.c.h.bf16 %v15024_v28  ;;  %v13377_v54 = vunpack.c.l.bf16 %v15024_v28 }
 0x26a   : > { %v8542_v52 = vsel %vm7512_vm14, %v8541_v44, %v8537_v36  ;;  %v3144_v34 = vsel %vm2225_vm0, %v13373_v27, 0.0  ;;  %v15025_v36 = vld [vmem:[%s15663_s25 + $0x4d8] sm:$0xff]  }
 0x26b   : > { %v8547_v53 = vsel %vm7519_vm15, %v8546_v55, %v8542_v52  ;;  %v13382_v49 = vunpack.c.h.bf16 %v15025_v36  ;;  %v13381_v50 = vunpack.c.l.bf16 %v15025_v36  ;;  %v5523_v52 = vmul.f32 0.0625, %v16707_v45 }
 0x26c   : > { %3118 = vadd.xlane.f32.xlu1 %v3117_v38  ;;  %3115 = vadd.xlane.f32.xlu0 %v3114_v48  ;;  %v16718_v8 = vsel %vm20168_vm9, %v8547_v53, %v16598_v30  ;;  %v3129_v30 = vsel %vm2225_vm0, %v13362_v56, 0.0  ;;  %v3153_v38 = vsel %vm2225_vm0, %v13378_v35, 0.0  ;;  %v3150_v48 = vsel %vm2225_vm0, %v13377_v54, 0.0 }
 0x26d   : > { %v16720_v6 = vpop.xlane.xlu1 %2908  ;;  %v2906_v58 = vpop.xlane.xlu0 %2905  ;;  %v5522_v53 = vmul.f32 0.0625, %v16709_v46  ;;  %v3159_v0 = vsel %vm2225_vm0, %v13382_v49, 0.0  ;;  %v3156_v2 = vsel %vm2225_vm0, %v13381_v50, 0.0  ;;  %v8555_v26 = vrot.slane %v5523_v52, %v15796_v12 }
 0x26e   : > { %v5525_v46 = vmul.f32 0.0625, %v16720_v6  ;;  %vm20195_vm9 = vcmask 654912  }
 0x26f   : > { %v8551_v45 = vrot.slane %v5522_v53, %v15790_v9 }
 0x270   : > { %3124 = vadd.xlane.f32.xlu1 %v3123_v62  ;;  %3121 = vadd.xlane.f32.xlu0 %v3120_v63  ;;  %v5524_v62 = vmul.f32 0.0625, %v2906_v58  ;;  %v15028_v58 = vld [vmem:[%s15663_s25 + $0x4f0] sm:$0xff]  }
 0x271   : > { %v16725_v3 = vpop.xlane.xlu1 %2914  ;;  %v2912_v4 = vpop.xlane.xlu0 %2911  ;;  %v13394_v28 = vunpack.c.h.bf16 %v15028_v58  ;;  %v8556_v6 = vsel %vm7421_vm1, %v8555_v26, %v8551_v45  ;;  %v13393_v52 = vunpack.c.l.bf16 %v15028_v58 }
 0x272   : > { %v8560_v7 = vrot.slane %v5524_v62, %v15799_v13 }
 0x274   : > { %3130 = vadd.xlane.f32.xlu1 %v3129_v30  ;;  %3127 = vadd.xlane.f32.xlu0 %v3126_v5  ;;  %v13386_v30 = vunpack.c.h.bf16 %v15026_v51  ;;  %v13385_v5 = vunpack.c.l.bf16 %v15026_v51 }
 0x275   : > { %v16730_v21 = vpop.xlane.xlu1 %2920  ;;  %v16732_v10 = vpop.xlane.xlu0 %2917 }
 0x276   : > { %v3165_v17 = vsel %vm2225_vm0, %v13386_v30, 0.0  ;;  %v5528_v54 = vmul.f32 0.0625, %v16732_v10  ;;  %v5529_v30 = vmul.f32 0.0625, %v16730_v21  ;;  %v3174_v21 = vsel %vm2225_vm0, %v13393_v52, 0.0 }
 0x278   : > { %3136 = vadd.xlane.f32.xlu1 %v3135_v59  ;;  %3133 = vadd.xlane.f32.xlu0 %v3132_v14  ;;  %v5526_v59 = vmul.f32 0.0625, %v2912_v4  ;;  %v13390_v14 = vunpack.c.h.bf16 %v15027_v29  ;;  %v5527_v4 = vmul.f32 0.0625, %v16725_v3  ;;  %v8580_v45 = vrot.slane %v5528_v54, %v15824_v42  ;;  %v15031_v54 = vld [vmem:[%s15663_s25 + $0x508] sm:$0xff]  }
 0x279   : > { %v16737_v19 = vpop.xlane.xlu1 %2926  ;;  %v16739_v20 = vpop.xlane.xlu0 %2923 }
 0x27a   : > { %v8570_v35 = vrot.slane %v5526_v59, %v15807_v23  ;;  %v3171_v36 = vsel %vm2225_vm0, %v13390_v14, 0.0  ;;  %v8575_v10 = vrot.slane %v5527_v4, %v15804_v22 }
 0x27c   : > { %3142 = vadd.xlane.f32.xlu1 %v3141_v39  ;;  %3139 = vadd.xlane.f32.xlu0 %v3138_v25  ;;  %v3162_v39 = vsel %vm2225_vm0, %v13385_v5, 0.0  ;;  %v13389_v25 = vunpack.c.l.bf16 %v15027_v29  ;;  %v15030_v29 = vld [vmem:[%s15663_s25 + $0x500] sm:$0xff]  }
 0x27d   : > { %v16744_v31 = vpop.xlane.xlu1 %2932  ;;  %v16746_v32 = vpop.xlane.xlu0 %2929 }
 0x27e   : > { %v3168_v3 = vsel %vm2225_vm0, %v13389_v25, 0.0 }
 0x280   : > { %3148 = vadd.xlane.f32.xlu1 %v3147_v33  ;;  %3145 = vadd.xlane.f32.xlu0 %v3144_v34  ;;  %v8565_v33 = vrot.slane %v5525_v46, %v15793_v11  ;;  %v8561_v34 = vsel %vm7428_vm2, %v8560_v7, %v8556_v6  ;;  %v5530_v46 = vmul.f32 0.0625, %v16739_v20  ;;  %v8585_v20 = vrot.slane %v5529_v30, %v15821_v41 }
 0x281   : > { %v16751_v55 = vpop.xlane.xlu1 %2938  ;;  %v16753_v44 = vpop.xlane.xlu0 %2935  ;;  %v5533_v30 = vmul.f32 0.0625, %v16744_v31 }
 0x282   : > { %v8590_v4 = vrot.slane %v5530_v46, %v15843_v1 }
 0x284   : > { %3154 = vadd.xlane.f32.xlu1 %v3153_v38  ;;  %3151 = vadd.xlane.f32.xlu0 %v3150_v48  ;;  %v15029_v38 = vld [vmem:[%s15663_s25 + $0x4f8] sm:$0xff]  }
 0x285   : > { %v16760_v63 = vpop.xlane.xlu1 %2944  ;;  %v16762_v56 = vpop.xlane.xlu0 %2941  ;;  %v13398_v5 = vunpack.c.h.bf16 %v15029_v38 }
 0x287   : > { %v3183_v6 = vsel %vm2225_vm0, %v13398_v5, 0.0 }
 0x288   : > { %3160 = vadd.xlane.f32.xlu1 %v3159_v0  ;;  %3157 = vadd.xlane.f32.xlu0 %v3156_v2  ;;  %v3177_v0 = vsel %vm2225_vm0, %v13394_v28, 0.0  ;;  %v8566_v2 = vsel %vm7435_vm3, %v8565_v33, %v8561_v34  ;;  %v5531_v28 = vmul.f32 0.0625, %v16737_v19  ;;  %v5532_v34 = vmul.f32 0.0625, %v16746_v32 }
 0x289   : > { %v2951_v15 = vpop.xlane.xlu1 %2950  ;;  %v2948_v16 = vpop.xlane.xlu0 %2947  ;;  %v8571_v26 = vsel %vm7442_vm4, %v8570_v35, %v8566_v2 }
 0x28a   : > { %v5539_v40 = vmul.f32 0.0625, %v2951_v15  ;;  %v5538_v27 = vmul.f32 0.0625, %v2948_v16  ;;  %v13397_v16 = vunpack.c.l.bf16 %v15029_v38  ;;  %v8600_v5 = vrot.slane %v5532_v34, %v15858_v24 }
 0x28c   : > { %3166 = vadd.xlane.f32.xlu1 %v3165_v17  ;;  %3163 = vadd.xlane.f32.xlu0 %v3162_v39  ;;  %v8634_v48 = vrot.slane %v5539_v40, %v15796_v12  ;;  %v8630_v49 = vrot.slane %v5538_v27, %v15790_v9  ;;  %v13402_v40 = vunpack.c.h.bf16 %v15030_v29  ;;  %v8576_v27 = vsel %vm7449_vm5, %v8575_v10, %v8571_v26  ;;  %v15032_v26 = vld [vmem:[%s15663_s25 + $0x510] sm:$0xff]  }
 0x28d   : > { %v2957_v50 = vpop.xlane.xlu1 %2956  ;;  %v2954_v51 = vpop.xlane.xlu0 %2953  ;;  %v8581_v33 = vsel %vm7456_vm6, %v8580_v45, %v8576_v27  ;;  %v3180_v19 = vsel %vm2225_vm0, %v13397_v16, 0.0  ;;  %v13405_v10 = vunpack.c.l.bf16 %v15031_v54  ;;  %v5534_v45 = vmul.f32 0.0625, %v16753_v44 }
 0x28e   : > { %v5541_v53 = vmul.f32 0.0625, %v2957_v50  ;;  %v5540_v62 = vmul.f32 0.0625, %v2954_v51  ;;  %v8635_v7 = vsel %vm7421_vm1, %v8634_v48, %v8630_v49  ;;  %v13401_v50 = vunpack.c.l.bf16 %v15030_v29 }
 0x28f   : > { %v3189_v32 = vsel %vm2225_vm0, %v13402_v40, 0.0  ;;  %v8605_v44 = vrot.slane %v5533_v30, %v15852_v18  ;;  %v3192_v27 = vsel %vm2225_vm0, %v13405_v10, 0.0  ;;  %v5537_v30 = vmul.f32 0.0625, %v16760_v63 }
 0x290   : > { %v8639_v58 = vrot.slane %v5540_v62, %v15799_v13  ;;  %3172 = vadd.xlane.f32.xlu1 %v3171_v36  ;;  %3169 = vadd.xlane.f32.xlu0 %v3168_v3  ;;  %v8644_v59 = vrot.slane %v5541_v53, %v15793_v11  ;;  %v8595_v53 = vrot.slane %v5531_v28, %v15837_v61  ;;  %v5535_v28 = vmul.f32 0.0625, %v16751_v55 }
 0x291   : > { %v2963_v14 = vpop.xlane.xlu1 %2962  ;;  %v2960_v15 = vpop.xlane.xlu0 %2959  ;;  %v8586_v62 = vsel %vm7463_vm7, %v8585_v20, %v8581_v33 }
 0x292   : > { %v8640_v17 = vsel %vm7428_vm2, %v8639_v58, %v8635_v7  ;;  %v5543_v39 = vmul.f32 0.0625, %v2963_v14  ;;  %v5542_v25 = vmul.f32 0.0625, %v2960_v15  ;;  %v8591_v2 = vsel %vm20169_vm8, %v8590_v4, %v8586_v62 }
 0x293   : > { %v8645_v38 = vsel %vm7435_vm3, %v8644_v59, %v8640_v17  ;;  %v3186_v14 = vsel %vm2225_vm0, %v13401_v50, 0.0  ;;  %v8596_v16 = vsel %vm20193_vm11, %v8595_v53, %v8591_v2  ;;  %vm20194_vm11 = vcmask 786112   ;;  %v15034_v2 = vld [vmem:[%s15663_s25 + $0x520] sm:$0xff]  }
 0x294   : > { %v8649_v35 = vrot.slane %v5542_v25, %v15807_v23  ;;  %3178 = vadd.xlane.f32.xlu1 %v3177_v0  ;;  %3175 = vadd.xlane.f32.xlu0 %v3174_v21  ;;  %v8654_v36 = vrot.slane %v5543_v39, %v15804_v22  ;;  %v13406_v0 = vunpack.c.h.bf16 %v15031_v54  ;;  %v13410_v39 = vunpack.c.h.bf16 %v15032_v26  ;;  %v15033_v54 = vld [vmem:[%s15663_s25 + $0x518] sm:$0xff]  }
 0x295   : > { %v2969_v48 = vpop.xlane.xlu1 %2968  ;;  %v2966_v49 = vpop.xlane.xlu0 %2965  ;;  %v13409_v25 = vunpack.c.l.bf16 %v15032_v26  ;;  %v8601_v40 = vsel %vm7484_vm10, %v8600_v5, %v8596_v16 }
 0x296   : > { %v8650_v51 = vsel %vm7442_vm4, %v8649_v35, %v8645_v38  ;;  %v5545_v3 = vmul.f32 0.0625, %v2969_v48  ;;  %v5544_v52 = vmul.f32 0.0625, %v2966_v49  ;;  %v3195_v17 = vsel %vm2225_vm0, %v13406_v0, 0.0 }
 0x297   : > { %v8655_v58 = vsel %vm7449_vm5, %v8654_v36, %v8650_v51  ;;  %v5536_v49 = vmul.f32 0.0625, %v16762_v56  ;;  %v3198_v55 = vsel %vm2225_vm0, %v13409_v25, 0.0  ;;  %v8606_v50 = vsel %vm20194_vm11, %v8605_v44, %v8601_v40 }
 0x298   : > { %v8659_v29 = vrot.slane %v5544_v52, %v15824_v42  ;;  %3184 = vadd.xlane.f32.xlu1 %v3183_v6  ;;  %3181 = vadd.xlane.f32.xlu0 %v3180_v19  ;;  %v8664_v46 = vrot.slane %v5545_v3, %v15821_v41  ;;  %v8610_v6 = vrot.slane %v5534_v45, %v15873_v43  ;;  %v3201_v19 = vsel %vm2225_vm0, %v13410_v39, 0.0 }
 0x299   : > { %v2975_v7 = vpop.xlane.xlu1 %2974  ;;  %v2972_v59 = vpop.xlane.xlu0 %2971  ;;  %v13414_v3 = vunpack.c.h.bf16 %v15033_v54  ;;  %v13413_v52 = vunpack.c.l.bf16 %v15033_v54  ;;  %v8620_v45 = vrot.slane %v5536_v49, %v15887_v60  ;;  %v8625_v39 = vrot.slane %v5537_v30, %v15882_v57 }
 0x29a   : > { %v8660_v15 = vsel %vm7456_vm6, %v8659_v29, %v8655_v58  ;;  %v5547_v31 = vmul.f32 0.0625, %v2975_v7  ;;  %v5546_v21 = vmul.f32 0.0625, %v2972_v59  ;;  %v8611_v53 = vsel %vm7498_vm12, %v8610_v6, %v8606_v50 }
 0x29b   : > { %v8665_v4 = vsel %vm7463_vm7, %v8664_v46, %v8660_v15  ;;  %v3207_v58 = vsel %vm2225_vm0, %v13414_v3, 0.0  ;;  %v3204_v7 = vsel %vm2225_vm0, %v13413_v52, 0.0  ;;  %v13418_v59 = vunpack.c.h.bf16 %v15034_v2 }
 0x29c   : > { %v8669_v20 = vrot.slane %v5546_v21, %v15843_v1  ;;  %3190 = vadd.xlane.f32.xlu1 %v3189_v32  ;;  %3187 = vadd.xlane.f32.xlu0 %v3186_v14  ;;  %v8674_v33 = vrot.slane %v5547_v31, %v15837_v61  ;;  %v8615_v32 = vrot.slane %v5535_v28, %v15867_v37  ;;  %v13417_v21 = vunpack.c.l.bf16 %v15034_v2 }
 0x29d   : > { %v2981_v34 = vpop.xlane.xlu1 %2980  ;;  %v2978_v35 = vpop.xlane.xlu0 %2977 }
 0x29e   : > { %v8670_v36 = vsel %vm20169_vm8, %v8669_v20, %v8665_v4  ;;  %v5549_v38 = vmul.f32 0.0625, %v2981_v34  ;;  %v5548_v48 = vmul.f32 0.0625, %v2978_v35  ;;  %v8616_v16 = vsel %vm7505_vm13, %v8615_v32, %v8611_v53 }
 0x29f   : > { %v8675_v56 = vsel %vm20195_vm9, %v8674_v33, %v8670_v36  ;;  %vm20196_vm9 = vmmov %vm20194_vm11  ;;  %v8621_v20 = vsel %vm7512_vm14, %v8620_v45, %v8616_v16  ;;  %vm12510_vm11 = vcmask 1047559   ;;  %v3213_v34 = vsel %vm2225_vm0, %v13418_v59, 0.0 }
 0x2a0   : > { %v8679_v51 = vrot.slane %v5548_v48, %v15858_v24  ;;  %3196 = vadd.xlane.f32.xlu1 %v3195_v17  ;;  %3193 = vadd.xlane.f32.xlu0 %v3192_v27  ;;  %v8684_v62 = vrot.slane %v5549_v38, %v15852_v18  ;;  %v15035_v17 = vld [vmem:[%s15663_s25 + $0x528] sm:$0xff]   ;;  %v3210_v35 = vsel %vm2225_vm0, %v13417_v21, 0.0  ;;  %v15038_v21 = vld [vmem:[%s15663_s25 + $0x540] sm:$0xff]  }
 0x2a1   : > { %v2987_v0 = vpop.xlane.xlu1 %2986  ;;  %v2984_v10 = vpop.xlane.xlu0 %2983  ;;  %v13422_v6 = vunpack.c.h.bf16 %v15035_v17  ;;  %v13421_v36 = vunpack.c.l.bf16 %v15035_v17 }
 0x2a2   : > { %v8680_v5 = vsel %vm7484_vm10, %v8679_v51, %v8675_v56  ;;  %v5551_v29 = vmul.f32 0.0625, %v2987_v0  ;;  %v5550_v26 = vmul.f32 0.0625, %v2984_v10 }
 0x2a3   : > { %v8685_v63 = vsel %vm20196_vm9, %v8684_v62, %v8680_v5  ;;  %v3219_v32 = vsel %vm2225_vm0, %v13422_v6, 0.0  ;;  %v3216_v0 = vsel %vm2225_vm0, %v13421_v36, 0.0  ;;  %vm20197_vm9 = vcmask 654912  }
 0x2a4   : > { %v8689_v46 = vrot.slane %v5550_v26, %v15873_v43  ;;  %3202 = vadd.xlane.f32.xlu1 %v3201_v19  ;;  %3199 = vadd.xlane.f32.xlu0 %v3198_v55  ;;  %v8694_v14 = vrot.slane %v5551_v29, %v15867_v37  ;;  %v8626_v19 = vsel %vm7519_vm15, %v8625_v39, %v8621_v20  ;;  %v15036_v55 = vld [vmem:[%s15663_s25 + $0x530] sm:$0xff]   ;;  %v15037_v26 = vld [vmem:[%s15663_s25 + $0x538] sm:$0xff]  }
 0x2a5   : > { %v2993_v15 = vpop.xlane.xlu1 %2992  ;;  %v2990_v31 = vpop.xlane.xlu0 %2989  ;;  %v12511_v56 = vsel %vm12510_vm11, %v8626_v19, %v16657_v47  ;;  %v13426_v10 = vunpack.c.h.bf16 %v15036_v55  ;;  %v13425_v2 = vunpack.c.l.bf16 %v15036_v55  ;;  %v13430_v59 = vunpack.c.h.bf16 %v15037_v26 }
 0x2a6   : > { %v8690_v25 = vsel %vm7498_vm12, %v8689_v46, %v8685_v63  ;;  %v5553_v44 = vmul.f32 0.0625, %v2993_v15  ;;  %v5552_v40 = vmul.f32 0.0625, %v2990_v31 }
 0x2a7   : > { %v8695_v54 = vsel %vm7505_vm13, %v8694_v14, %v8690_v25  ;;  %v3225_v47 = vsel %vm2225_vm0, %v13426_v10, 0.0  ;;  %v13429_v14 = vunpack.c.l.bf16 %v15037_v26 }
 0x2a8   : > { %v8704_v27 = vrot.slane %v5553_v44, %v15882_v57  ;;  %v8699_v28 = vrot.slane %v5552_v40, %v15887_v60  ;;  %3208 = vadd.xlane.f32.xlu1 %v3207_v58  ;;  %3205 = vadd.xlane.f32.xlu0 %v3204_v7  ;;  %v3222_v7 = vsel %vm2225_vm0, %v13425_v2, 0.0  ;;  %v3231_v40 = vsel %vm2225_vm0, %v13430_v59, 0.0 }
 0x2a9   : > { %v2999_v33 = vpop.xlane.xlu1 %2998  ;;  %v2996_v4 = vpop.xlane.xlu0 %2995  ;;  %v3228_v20 = vsel %vm2225_vm0, %v13429_v14, 0.0 }
 0x2aa   : > { %v5555_v38 = vmul.f32 0.0625, %v2999_v33  ;;  %v5554_v48 = vmul.f32 0.0625, %v2996_v4  ;;  %v8700_v49 = vsel %vm7512_vm14, %v8699_v28, %v8695_v54  ;;  %v13433_v28 = vunpack.c.l.bf16 %v15038_v21 }
 0x2ab   : > { %v8705_v50 = vsel %vm7519_vm15, %v8704_v27, %v8700_v49  ;;  %v13434_v27 = vunpack.c.h.bf16 %v15038_v21 }
 0x2ac   : > { %v8713_v51 = vrot.slane %v5555_v38, %v15796_v12  ;;  %v8709_v3 = vrot.slane %v5554_v48, %v15790_v9  ;;  %3214 = vadd.xlane.f32.xlu1 %v3213_v34  ;;  %3211 = vadd.xlane.f32.xlu0 %v3210_v35  ;;  %v12518_v52 = vsel %vm12510_vm11, %v8705_v50, %v16718_v8  ;;  %v15039_v34 = vld [vmem:[%s15663_s25 + $0x548] sm:$0xff]   ;;  %v3234_v19 = vsel %vm2225_vm0, %v13433_v28, 0.0 }
 0x2ad   : > { %v3005_v53 = vpop.xlane.xlu1 %3004  ;;  %12633 = vmatprep.mubr.f32.mxu0 %v12518_v52  ;;  %v3002_v62 = vpop.xlane.xlu0 %3001  ;;  %v3237_v49 = vsel %vm2225_vm0, %v13434_v27, 0.0  ;;  %v13438_v55 = vunpack.c.h.bf16 %v15039_v34  ;;  %v13437_v50 = vunpack.c.l.bf16 %v15039_v34 }
 0x2ae   : > { %v8714_v30 = vsel %vm7421_vm1, %v8713_v51, %v8709_v3  ;;  %v5557_v5 = vmul.f32 0.0625, %v3005_v53  ;;  %v5556_v29 = vmul.f32 0.0625, %v3002_v62  ;;  %12634 = vmatmul.mubr.f32.vlgmr.msra.gmra.mrb[0].mxu0 %v12511_v56 }
 0x2af   : > { %v3243_v2 = vsel %vm2225_vm0, %v13438_v55, 0.0 }
 0x2b0   : > { %v8723_v8 = vrot.slane %v5557_v5, %v15793_v11  ;;  %v8718_v45 = vrot.slane %v5556_v29, %v15799_v13  ;;  %3220 = vadd.xlane.f32.xlu1 %v3219_v32  ;;  %3217 = vadd.xlane.f32.xlu0 %v3216_v0  ;;  %v15040_v32 = vld [vmem:[%s15663_s25 + $0x550] sm:$0xff]  }
 0x2b1   : > { %v3011_v46 = vpop.xlane.xlu1 %3010  ;;  %v3008_v58 = vpop.xlane.xlu0 %3007  ;;  %v13442_v5 = vunpack.c.h.bf16 %v15040_v32  ;;  %v13441_v29 = vunpack.c.l.bf16 %v15040_v32 }
 0x2b2   : > { %v8719_v63 = vsel %vm7428_vm2, %v8718_v45, %v8714_v30  ;;  %v5559_v15 = vmul.f32 0.0625, %v3011_v46  ;;  %v5558_v31 = vmul.f32 0.0625, %v3008_v58  ;;  %v3240_v30 = vsel %vm2225_vm0, %v13437_v50, 0.0  ;;  %v15041_v46 = vld [vmem:[%s15663_s25 + $0x558] sm:$0xff]  }
 0x2b3   : > { %v8724_v16 = vsel %vm7435_vm3, %v8723_v8, %v8719_v63  ;;  %v3249_v63 = vsel %vm2225_vm0, %v13442_v5, 0.0  ;;  %v13445_v21 = vunpack.c.l.bf16 %v15041_v46 }
 0x2b4   : > { %v8733_v17 = vrot.slane %v5559_v15, %v15804_v22  ;;  %v8728_v39 = vrot.slane %v5558_v31, %v15807_v23  ;;  %3226 = vadd.xlane.f32.xlu1 %v3225_v47  ;;  %3223 = vadd.xlane.f32.xlu0 %v3222_v7  ;;  %v3246_v15 = vsel %vm2225_vm0, %v13441_v29, 0.0  ;;  %v13446_v31 = vunpack.c.h.bf16 %v15041_v46 }
 0x2b5   : > { %v3017_v25 = vpop.xlane.xlu1 %3016  ;;  %v3014_v44 = vpop.xlane.xlu0 %3013 }
 0x2b6   : > { %v8729_v6 = vsel %vm7442_vm4, %v8728_v39, %v8724_v16  ;;  %v5561_v33 = vmul.f32 0.0625, %v3017_v25  ;;  %v5560_v4 = vmul.f32 0.0625, %v3014_v44  ;;  %v15042_v25 = vld [vmem:[%s15663_s25 + $0x560] sm:$0xff]  }
 0x2b7   : > { %v8734_v35 = vsel %vm7449_vm5, %v8733_v17, %v8729_v6  ;;  %v3255_v6 = vsel %vm2225_vm0, %v13446_v31, 0.0  ;;  %v13449_v34 = vunpack.c.l.bf16 %v15042_v25 }
 0x2b8   : > { %v8743_v54 = vrot.slane %v5561_v33, %v15821_v41  ;;  %v8738_v36 = vrot.slane %v5560_v4, %v15824_v42  ;;  %3232 = vadd.xlane.f32.xlu1 %v3231_v40  ;;  %3229 = vadd.xlane.f32.xlu0 %v3228_v20  ;;  %v3252_v33 = vsel %vm2225_vm0, %v13445_v21, 0.0  ;;  %v13450_v4 = vunpack.c.h.bf16 %v15042_v25 }
 0x2b9   : > { %v3023_v38 = vpop.xlane.xlu1 %3022  ;;  %v3020_v48 = vpop.xlane.xlu0 %3019 }
 0x2ba   : > { %v8739_v51 = vsel %vm7456_vm6, %v8738_v36, %v8734_v35  ;;  %v5563_v3 = vmul.f32 0.0625, %v3023_v38  ;;  %v5562_v52 = vmul.f32 0.0625, %v3020_v48  ;;  %v15043_v38 = vld [vmem:[%s15663_s25 + $0x568] sm:$0xff]  }
 0x2bb   : > { %v8744_v53 = vsel %vm7463_vm7, %v8743_v54, %v8739_v51  ;;  %v3261_v51 = vsel %vm2225_vm0, %v13450_v4, 0.0  ;;  %v13453_v32 = vunpack.c.l.bf16 %v15043_v38 }
 0x2bc   : > { %v8753_v62 = vrot.slane %v5563_v3, %v15837_v61  ;;  %v8748_v56 = vrot.slane %v5562_v52, %v15843_v1  ;;  %3238 = vadd.xlane.f32.xlu1 %v3237_v49  ;;  %3235 = vadd.xlane.f32.xlu0 %v3234_v19  ;;  %v3258_v3 = vsel %vm2225_vm0, %v13449_v34, 0.0  ;;  %v13454_v52 = vunpack.c.h.bf16 %v15043_v38 }
 0x2bd   : > { %v3029_v0 = vpop.xlane.xlu1 %3028  ;;  %v3026_v10 = vpop.xlane.xlu0 %3025 }
 0x2be   : > { %v8749_v26 = vsel %vm20169_vm8, %v8748_v56, %v8744_v53  ;;  %v5565_v8 = vmul.f32 0.0625, %v3029_v0  ;;  %v5564_v45 = vmul.f32 0.0625, %v3026_v10  ;;  %v15044_v0 = vld [vmem:[%s15663_s25 + $0x570] sm:$0xff]  }
 0x2bf   : > { %v8754_v58 = vsel %vm20197_vm9, %v8753_v62, %v8749_v26  ;;  %vm20198_vm9 = vcmask 786112   ;;  %v3267_v26 = vsel %vm2225_vm0, %v13454_v52, 0.0  ;;  %v13457_v46 = vunpack.c.l.bf16 %v15044_v0 }
 0x2c0   : > { %v8763_v47 = vrot.slane %v5565_v8, %v15852_v18  ;;  %v8758_v7 = vrot.slane %v5564_v45, %v15858_v24  ;;  %3244 = vadd.xlane.f32.xlu1 %v3243_v2  ;;  %3241 = vadd.xlane.f32.xlu0 %v3240_v30  ;;  %v3264_v8 = vsel %vm2225_vm0, %v13453_v32, 0.0  ;;  %v13458_v45 = vunpack.c.h.bf16 %v15044_v0 }
 0x2c1   : > { %v3035_v59 = vpop.xlane.xlu1 %3034  ;;  %v3032_v14 = vpop.xlane.xlu0 %3031 }
 0x2c2   : > { %v8759_v16 = vsel %vm7484_vm10, %v8758_v7, %v8754_v58  ;;  %v5567_v17 = vmul.f32 0.0625, %v3035_v59  ;;  %v5566_v39 = vmul.f32 0.0625, %v3032_v14  ;;  %v15045_v59 = vld [vmem:[%s15663_s25 + $0x578] sm:$0xff]   ;;  %v3273_v21 = vsel %vm2225_vm0, %v13458_v45, 0.0 }
 0x2c3   : > { %v8764_v44 = vsel %vm20198_vm9, %v8763_v47, %v8759_v16  ;;  %v3270_v16 = vsel %vm2225_vm0, %v13457_v46, 0.0  ;;  %vm20199_vm9 = vcmask 654912  }
 0x2c4   : > { %v8773_v40 = vrot.slane %v5567_v17, %v15867_v37  ;;  %v8768_v20 = vrot.slane %v5566_v39, %v15873_v43  ;;  %3250 = vadd.xlane.f32.xlu1 %v3249_v63  ;;  %3247 = vadd.xlane.f32.xlu0 %v3246_v15  ;;  %v13462_v17 = vunpack.c.h.bf16 %v15045_v59  ;;  %v13461_v39 = vunpack.c.l.bf16 %v15045_v59 }
 0x2c5   : > { %v3041_v27 = vpop.xlane.xlu1 %3040  ;;  %v3038_v28 = vpop.xlane.xlu0 %3037 }
 0x2c6   : > { %v8769_v35 = vsel %vm7498_vm12, %v8768_v20, %v8764_v44  ;;  %v5569_v54 = vmul.f32 0.0625, %v3041_v27  ;;  %v5568_v36 = vmul.f32 0.0625, %v3038_v28  ;;  %v15046_v20 = vld [vmem:[%s15663_s25 + $0x580] sm:$0xff]   ;;  %v3279_v34 = vsel %vm2225_vm0, %v13462_v17, 0.0 }
 0x2c7   : > { %v8774_v48 = vsel %vm7505_vm13, %v8773_v40, %v8769_v35  ;;  %v3276_v35 = vsel %vm2225_vm0, %v13461_v39, 0.0 }
 0x2c8   : > { %v8783_v49 = vrot.slane %v5569_v54, %v15882_v57  ;;  %v8778_v19 = vrot.slane %v5568_v36, %v15887_v60  ;;  %3256 = vadd.xlane.f32.xlu1 %v3255_v6  ;;  %3253 = vadd.xlane.f32.xlu0 %v3252_v33  ;;  %v13466_v54 = vunpack.c.h.bf16 %v15046_v20  ;;  %v13465_v36 = vunpack.c.l.bf16 %v15046_v20 }
 0x2c9   : > { %v3047_v55 = vpop.xlane.xlu1 %3046  ;;  %v3044_v50 = vpop.xlane.xlu0 %3043 }
 0x2ca   : > { %v8779_v53 = vsel %vm7512_vm14, %v8778_v19, %v8774_v48  ;;  %v5571_v62 = vmul.f32 0.0625, %v3047_v55  ;;  %v5570_v56 = vmul.f32 0.0625, %v3044_v50  ;;  %v15047_v19 = vld [vmem:[%s15663_s25 + $0x588] sm:$0xff]   ;;  %v3285_v32 = vsel %vm2225_vm0, %v13466_v54, 0.0 }
 0x2cb   : > { %v16927_v10 = vsel %vm7519_vm15, %v8783_v49, %v8779_v53  ;;  %v3282_v53 = vsel %vm2225_vm0, %v13465_v36, 0.0 }
 0x2cc   : > { %v8792_v2 = vrot.slane %v5571_v62, %v15796_v12  ;;  %v8788_v30 = vrot.slane %v5570_v56, %v15790_v9  ;;  %3262 = vadd.xlane.f32.xlu1 %v3261_v51  ;;  %3259 = vadd.xlane.f32.xlu0 %v3258_v3  ;;  %v13470_v62 = vunpack.c.h.bf16 %v15047_v19  ;;  %v13469_v56 = vunpack.c.l.bf16 %v15047_v19 }
 0x2cd   : > { %v3053_v5 = vpop.xlane.xlu1 %3052  ;;  %v3050_v29 = vpop.xlane.xlu0 %3049 }
 0x2ce   : > { %v8793_v58 = vsel %vm7421_vm1, %v8792_v2, %v8788_v30  ;;  %v5573_v47 = vmul.f32 0.0625, %v3053_v5  ;;  %v5572_v7 = vmul.f32 0.0625, %v3050_v29  ;;  %v15048_v5 = vld [vmem:[%s15663_s25 + $0x590] sm:$0xff]  }
 0x2cf   : > { %v13473_v59 = vunpack.c.l.bf16 %v15048_v5 }
 0x2d0   : > { %v8802_v14 = vrot.slane %v5573_v47, %v15793_v11  ;;  %v8797_v63 = vrot.slane %v5572_v7, %v15799_v13  ;;  %3268 = vadd.xlane.f32.xlu1 %v3267_v26  ;;  %3265 = vadd.xlane.f32.xlu0 %v3264_v8  ;;  %v3288_v47 = vsel %vm2225_vm0, %v13469_v56, 0.0  ;;  %v13474_v7 = vunpack.c.h.bf16 %v15048_v5 }
 0x2d1   : > { %v3059_v15 = vpop.xlane.xlu1 %3058  ;;  %v3056_v31 = vpop.xlane.xlu0 %3055 }
 0x2d2   : > { %v8798_v25 = vsel %vm7428_vm2, %v8797_v63, %v8793_v58  ;;  %v5575_v44 = vmul.f32 0.0625, %v3059_v15  ;;  %v5574_v40 = vmul.f32 0.0625, %v3056_v31  ;;  %v3291_v58 = vsel %vm2225_vm0, %v13470_v62, 0.0  ;;  %v15049_v31 = vld [vmem:[%s15663_s25 + $0x598] sm:$0xff]  }
 0x2d3   : > { %v8803_v27 = vsel %vm7435_vm3, %v8802_v14, %v8798_v25  ;;  %v13478_v20 = vunpack.c.h.bf16 %v15049_v31 }
 0x2d4   : > { %v8812_v28 = vrot.slane %v5575_v44, %v15804_v22  ;;  %v8807_v6 = vrot.slane %v5574_v40, %v15807_v23  ;;  %3274 = vadd.xlane.f32.xlu1 %v3273_v21  ;;  %3271 = vadd.xlane.f32.xlu0 %v3270_v16  ;;  %v3297_v44 = vsel %vm2225_vm0, %v13474_v7, 0.0  ;;  %v3294_v40 = vsel %vm2225_vm0, %v13473_v59, 0.0 }
 0x2d5   : > { %v3065_v33 = vpop.xlane.xlu1 %3064  ;;  %v3062_v4 = vpop.xlane.xlu0 %3061 }
 0x2d6   : > { %v8808_v38 = vsel %vm7442_vm4, %v8807_v6, %v8803_v27  ;;  %v5577_v48 = vmul.f32 0.0625, %v3065_v33  ;;  %v5576_v49 = vmul.f32 0.0625, %v3062_v4  ;;  %v13477_v27 = vunpack.c.l.bf16 %v15049_v31  ;;  %v15050_v4 = vld [vmem:[%s15663_s25 + $0x5a0] sm:$0xff]  }
 0x2d7   : > { %v8813_v55 = vsel %vm7449_vm5, %v8812_v28, %v8808_v38  ;;  %v13482_v19 = vunpack.c.h.bf16 %v15050_v4 }
 0x2d8   : > { %v8822_v50 = vrot.slane %v5577_v48, %v15821_v41  ;;  %v8817_v51 = vrot.slane %v5576_v49, %v15824_v42  ;;  %3280 = vadd.xlane.f32.xlu1 %v3279_v34  ;;  %3277 = vadd.xlane.f32.xlu0 %v3276_v35  ;;  %v3303_v48 = vsel %vm2225_vm0, %v13478_v20, 0.0  ;;  %v3300_v49 = vsel %vm2225_vm0, %v13477_v27, 0.0 }
 0x2d9   : > { %v3071_v3 = vpop.xlane.xlu1 %3070  ;;  %v3068_v52 = vpop.xlane.xlu0 %3067 }
 0x2da   : > { %v8818_v0 = vsel %vm7456_vm6, %v8817_v51, %v8813_v55  ;;  %v5579_v2 = vmul.f32 0.0625, %v3071_v3  ;;  %v5578_v30 = vmul.f32 0.0625, %v3068_v52  ;;  %v13481_v55 = vunpack.c.l.bf16 %v15050_v4  ;;  %v15051_v52 = vld [vmem:[%s15663_s25 + $0x5a8] sm:$0xff]  }
 0x2db   : > { %v8823_v29 = vsel %vm7463_vm7, %v8822_v50, %v8818_v0  ;;  %v13486_v5 = vunpack.c.h.bf16 %v15051_v52 }
 0x2dc   : > { %v8832_v26 = vrot.slane %v5579_v2, %v15837_v61  ;;  %v8827_v8 = vrot.slane %v5578_v30, %v15843_v1  ;;  %3286 = vadd.xlane.f32.xlu1 %v3285_v32  ;;  %3283 = vadd.xlane.f32.xlu0 %v3282_v53  ;;  %v3309_v2 = vsel %vm2225_vm0, %v13482_v19, 0.0  ;;  %v3306_v30 = vsel %vm2225_vm0, %v13481_v55, 0.0 }
 0x2dd   : > { %v3077_v45 = vpop.xlane.xlu1 %3076  ;;  %v3074_v46 = vpop.xlane.xlu0 %3073 }
 0x2de   : > { %v8828_v14 = vsel %vm20169_vm8, %v8827_v8, %v8823_v29  ;;  %v5581_v63 = vmul.f32 0.0625, %v3077_v45  ;;  %v5580_v15 = vmul.f32 0.0625, %v3074_v46  ;;  %v13485_v29 = vunpack.c.l.bf16 %v15051_v52  ;;  %v15052_v46 = vld [vmem:[%s15663_s25 + $0x5b0] sm:$0xff]  }
 0x2df   : > { %v8833_v21 = vsel %vm20199_vm9, %v8832_v26, %v8828_v14  ;;  %vm20200_vm9 = vcmask 786112   ;;  %v13490_v31 = vunpack.c.h.bf16 %v15052_v46 }
 0x2e0   : > { %v8842_v16 = vrot.slane %v5581_v63, %v15852_v18  ;;  %v8837_v17 = vrot.slane %v5580_v15, %v15858_v24  ;;  %3292 = vadd.xlane.f32.xlu1 %v3291_v58  ;;  %3289 = vadd.xlane.f32.xlu0 %v3288_v47  ;;  %v3315_v63 = vsel %vm2225_vm0, %v13486_v5, 0.0  ;;  %v3312_v15 = vsel %vm2225_vm0, %v13485_v29, 0.0 }
 0x2e1   : > { %v3083_v39 = vpop.xlane.xlu1 %3082  ;;  %v3080_v25 = vpop.xlane.xlu0 %3079 }
 0x2e2   : > { %v8838_v28 = vsel %vm7484_vm10, %v8837_v17, %v8833_v21  ;;  %v5583_v6 = vmul.f32 0.0625, %v3083_v39  ;;  %v5582_v33 = vmul.f32 0.0625, %v3080_v25  ;;  %v13489_v21 = vunpack.c.l.bf16 %v15052_v46  ;;  %v15053_v25 = vld [vmem:[%s15663_s25 + $0x5b8] sm:$0xff]  }
 0x2e3   : > { %v8843_v34 = vsel %vm20200_vm9, %v8842_v16, %v8838_v28  ;;  %v3321_v28 = vsel %vm2225_vm0, %v13490_v31, 0.0  ;;  %v13493_v4 = vunpack.c.l.bf16 %v15053_v25  ;;  %vm20201_vm9 = vcmask 654912  }
 0x2e4   : > { %v8852_v35 = vrot.slane %v5583_v6, %v15867_v37  ;;  %v8847_v54 = vrot.slane %v5582_v33, %v15873_v43  ;;  %3298 = vadd.xlane.f32.xlu1 %v3297_v44  ;;  %3295 = vadd.xlane.f32.xlu0 %v3294_v40  ;;  %v3318_v6 = vsel %vm2225_vm0, %v13489_v21, 0.0  ;;  %v13494_v33 = vunpack.c.h.bf16 %v15053_v25 }
 0x2e5   : > { %v3089_v36 = vpop.xlane.xlu1 %3088  ;;  %v3086_v38 = vpop.xlane.xlu0 %3085 }
 0x2e6   : > { %v8848_v50 = vsel %vm7498_vm12, %v8847_v54, %v8843_v34  ;;  %v5585_v51 = vmul.f32 0.0625, %v3089_v36  ;;  %v5584_v3 = vmul.f32 0.0625, %v3086_v38  ;;  %v15054_v36 = vld [vmem:[%s15663_s25 + $0x5c0] sm:$0xff]  }
 0x2e7   : > { %v8853_v32 = vsel %vm7505_vm13, %v8852_v35, %v8848_v50  ;;  %v3327_v50 = vsel %vm2225_vm0, %v13494_v33, 0.0  ;;  %v13497_v52 = vunpack.c.l.bf16 %v15054_v36 }
 0x2e8   : > { %v8862_v53 = vrot.slane %v5585_v51, %v15882_v57  ;;  %v8857_v62 = vrot.slane %v5584_v3, %v15887_v60  ;;  %3304 = vadd.xlane.f32.xlu1 %v3303_v48  ;;  %3301 = vadd.xlane.f32.xlu0 %v3300_v49  ;;  %v3324_v51 = vsel %vm2225_vm0, %v13493_v4, 0.0  ;;  %v13498_v3 = vunpack.c.h.bf16 %v15054_v36 }
 0x2e9   : > { %v3095_v56 = vpop.xlane.xlu1 %3094  ;;  %v3092_v0 = vpop.xlane.xlu0 %3091 }
 0x2ea   : > { %v8858_v26 = vsel %vm7512_vm14, %v8857_v62, %v8853_v32  ;;  %v5587_v8 = vmul.f32 0.0625, %v3095_v56  ;;  %v5586_v45 = vmul.f32 0.0625, %v3092_v0  ;;  %v15055_v56 = vld [vmem:[%s15663_s25 + $0x5c8] sm:$0xff]  }
 0x2eb   : > { %v16984_v58 = vsel %vm7519_vm15, %v8862_v53, %v8858_v26  ;;  %v3333_v26 = vsel %vm2225_vm0, %v13498_v3, 0.0  ;;  %v13501_v46 = vunpack.c.l.bf16 %v15055_v56 }
 0x2ec   : > { %v8871_v47 = vrot.slane %v5587_v8, %v15796_v12  ;;  %v8867_v7 = vrot.slane %v5586_v45, %v15790_v9  ;;  %3310 = vadd.xlane.f32.xlu1 %v3309_v2  ;;  %3307 = vadd.xlane.f32.xlu0 %v3306_v30  ;;  %v3330_v8 = vsel %vm2225_vm0, %v13497_v52, 0.0  ;;  %v13502_v45 = vunpack.c.h.bf16 %v15055_v56 }
 0x2ed   : > { %v3101_v59 = vpop.xlane.xlu1 %3100  ;;  %v3098_v14 = vpop.xlane.xlu0 %3097 }
 0x2ee   : > { %v8872_v16 = vsel %vm7421_vm1, %v8871_v47, %v8867_v7  ;;  %v5589_v17 = vmul.f32 0.0625, %v3101_v59  ;;  %v5588_v39 = vmul.f32 0.0625, %v3098_v14  ;;  %v15056_v14 = vld [vmem:[%s15663_s25 + $0x5d0] sm:$0xff]  }
 0x2ef   : > { %v13506_v25 = vunpack.c.h.bf16 %v15056_v14 }
 0x2f0   : > { %v8881_v44 = vrot.slane %v5589_v17, %v15793_v11  ;;  %v8876_v40 = vrot.slane %v5588_v39, %v15799_v13  ;;  %3316 = vadd.xlane.f32.xlu1 %v3315_v63  ;;  %3313 = vadd.xlane.f32.xlu0 %v3312_v15  ;;  %v3339_v17 = vsel %vm2225_vm0, %v13502_v45, 0.0  ;;  %v3336_v39 = vsel %vm2225_vm0, %v13501_v46, 0.0 }
 0x2f1   : > { %v3107_v20 = vpop.xlane.xlu1 %3106  ;;  %v3104_v27 = vpop.xlane.xlu0 %3103 }
 0x2f2   : > { %v8877_v34 = vsel %vm7428_vm2, %v8876_v40, %v8872_v16  ;;  %v5591_v35 = vmul.f32 0.0625, %v3107_v20  ;;  %v5590_v54 = vmul.f32 0.0625, %v3104_v27 }
 0x2f3   : > { %v8882_v38 = vsel %vm7435_vm3, %v8881_v44, %v8877_v34  ;;  %v13505_v44 = vunpack.c.l.bf16 %v15056_v14 }
 0x2f4   : > { %v8891_v48 = vrot.slane %v5591_v35, %v15804_v22  ;;  %v8886_v49 = vrot.slane %v5590_v54, %v15807_v23  ;;  %3322 = vadd.xlane.f32.xlu1 %v3321_v28  ;;  %3319 = vadd.xlane.f32.xlu0 %v3318_v6  ;;  %v15057_v28 = vld [vmem:[%s15663_s25 + $0x5d8] sm:$0xff]   ;;  %v3345_v54 = vsel %vm2225_vm0, %v13506_v25, 0.0 }
 0x2f5   : > { %v3113_v19 = vpop.xlane.xlu1 %3112  ;;  %v3110_v55 = vpop.xlane.xlu0 %3109  ;;  %v3342_v36 = vsel %vm2225_vm0, %v13505_v44, 0.0 }
 0x2f6   : > { %v8887_v32 = vsel %vm7442_vm4, %v8886_v49, %v8882_v38  ;;  %v5593_v53 = vmul.f32 0.0625, %v3113_v19  ;;  %v5592_v62 = vmul.f32 0.0625, %v3110_v55  ;;  %v13510_v38 = vunpack.c.h.bf16 %v15057_v28 }
 0x2f7   : > { %v8892_v0 = vsel %vm7449_vm5, %v8891_v48, %v8887_v32  ;;  %v13509_v48 = vunpack.c.l.bf16 %v15057_v28 }
 0x2f8   : > { %v8901_v2 = vrot.slane %v5593_v53, %v15821_v41  ;;  %v8896_v30 = vrot.slane %v5592_v62, %v15824_v42  ;;  %3328 = vadd.xlane.f32.xlu1 %v3327_v50  ;;  %3325 = vadd.xlane.f32.xlu0 %v3324_v51  ;;  %v15058_v50 = vld [vmem:[%s15663_s25 + $0x5e0] sm:$0xff]   ;;  %v3351_v62 = vsel %vm2225_vm0, %v13510_v38, 0.0 }
 0x2f9   : > { %v3119_v5 = vpop.xlane.xlu1 %3118  ;;  %v3116_v29 = vpop.xlane.xlu0 %3115  ;;  %v3348_v56 = vsel %vm2225_vm0, %v13509_v48, 0.0 }
 0x2fa   : > { %v8897_v47 = vsel %vm7456_vm6, %v8896_v30, %v8892_v0  ;;  %v5595_v7 = vmul.f32 0.0625, %v3119_v5  ;;  %v5594_v59 = vmul.f32 0.0625, %v3116_v29  ;;  %v13514_v0 = vunpack.c.h.bf16 %v15058_v50 }
 0x2fb   : > { %v8902_v63 = vsel %vm7463_vm7, %v8901_v2, %v8897_v47  ;;  %v13513_v2 = vunpack.c.l.bf16 %v15058_v50 }
 0x2fc   : > { %v8911_v15 = vrot.slane %v5595_v7, %v15837_v61  ;;  %v8906_v31 = vrot.slane %v5594_v59, %v15843_v1  ;;  %3334 = vadd.xlane.f32.xlu1 %v3333_v26  ;;  %3331 = vadd.xlane.f32.xlu0 %v3330_v8  ;;  %v15059_v26 = vld [vmem:[%s15663_s25 + $0x5e8] sm:$0xff]   ;;  %v3357_v59 = vsel %vm2225_vm0, %v13514_v0, 0.0 }
 0x2fd   : > { %v3125_v21 = vpop.xlane.xlu1 %3124  ;;  %v3122_v16 = vpop.xlane.xlu0 %3121  ;;  %v3354_v14 = vsel %vm2225_vm0, %v13513_v2, 0.0 }
 0x2fe   : > { %v8907_v40 = vsel %vm20169_vm8, %v8906_v31, %v8902_v63  ;;  %v5597_v20 = vmul.f32 0.0625, %v3125_v21  ;;  %v5596_v27 = vmul.f32 0.0625, %v3122_v16  ;;  %v13518_v63 = vunpack.c.h.bf16 %v15059_v26 }
 0x2ff   : > { %v8912_v6 = vsel %vm20201_vm9, %v8911_v15, %v8907_v40  ;;  %vm20202_vm9 = vcmask 786112   ;;  %v13517_v15 = vunpack.c.l.bf16 %v15059_v26 }
 0x300   : > { %v8921_v33 = vrot.slane %v5597_v20, %v15852_v18  ;;  %v8916_v4 = vrot.slane %v5596_v27, %v15858_v24  ;;  %3340 = vadd.xlane.f32.xlu1 %v3339_v17  ;;  %3337 = vadd.xlane.f32.xlu0 %v3336_v39  ;;  %v15060_v17 = vld [vmem:[%s15663_s25 + $0x5f0] sm:$0xff]   ;;  %v3363_v28 = vsel %vm2225_vm0, %v13518_v63, 0.0 }
 0x301   : > { %v3131_v34 = vpop.xlane.xlu1 %3130  ;;  %v3128_v35 = vpop.xlane.xlu0 %3127 }
 0x302   : > { %v8917_v49 = vsel %vm7484_vm10, %v8916_v4, %v8912_v6  ;;  %v5599_v19 = vmul.f32 0.0625, %v3131_v34  ;;  %v5598_v55 = vmul.f32 0.0625, %v3128_v35  ;;  %v3360_v6 = vsel %vm2225_vm0, %v13517_v15, 0.0 }
 0x303   : > { %v8922_v51 = vsel %vm20202_vm9, %v8921_v33, %v8917_v49  ;;  %vm20203_vm9 = vcmask 1041409   ;;  %v13522_v33 = vunpack.c.h.bf16 %v15060_v17  ;;  %v13521_v4 = vunpack.c.l.bf16 %v15060_v17 }
 0x304   : > { %v8931_v3 = vrot.slane %v5599_v19, %v15867_v37  ;;  %v8926_v52 = vrot.slane %v5598_v55, %v15873_v43  ;;  %3346 = vadd.xlane.f32.xlu1 %v3345_v54  ;;  %3343 = vadd.xlane.f32.xlu0 %v3342_v36  ;;  %v15061_v54 = vld [vmem:[%s15663_s25 + $0x5f8] sm:$0xff]  }
 0x305   : > { %v3137_v32 = vpop.xlane.xlu1 %3136  ;;  %v3134_v53 = vpop.xlane.xlu0 %3133  ;;  %v3369_v19 = vsel %vm2225_vm0, %v13522_v33, 0.0  ;;  %v3366_v55 = vsel %vm2225_vm0, %v13521_v4, 0.0  ;;  %v13526_v50 = vunpack.c.h.bf16 %v15061_v54 }
 0x306   : > { %v8927_v30 = vsel %vm7498_vm12, %v8926_v52, %v8922_v51  ;;  %v5601_v5 = vmul.f32 0.0625, %v3137_v32  ;;  %v5600_v29 = vmul.f32 0.0625, %v3134_v53  ;;  %v13525_v51 = vunpack.c.l.bf16 %v15061_v54  ;;  %v15062_v53 = vld [vmem:[%s15663_s25 + $0x600] sm:$0xff]  }
 0x307   : > { %v8932_v8 = vsel %vm7505_vm13, %v8931_v3, %v8927_v30  ;;  %v13530_v26 = vunpack.c.h.bf16 %v15062_v53 }
 0x308   : > { %v8941_v45 = vrot.slane %v5601_v5, %v15882_v57  ;;  %v8936_v46 = vrot.slane %v5600_v29, %v15887_v60  ;;  %3352 = vadd.xlane.f32.xlu1 %v3351_v62  ;;  %3349 = vadd.xlane.f32.xlu0 %v3348_v56  ;;  %v3375_v5 = vsel %vm2225_vm0, %v13526_v50, 0.0  ;;  %v3372_v29 = vsel %vm2225_vm0, %v13525_v51, 0.0 }
 0x309   : > { %v3143_v47 = vpop.xlane.xlu1 %3142  ;;  %v3140_v7 = vpop.xlane.xlu0 %3139 }
 0x30a   : > { %v8937_v31 = vsel %vm7512_vm14, %v8936_v46, %v8932_v8  ;;  %v5603_v21 = vmul.f32 0.0625, %v3143_v47  ;;  %v5602_v16 = vmul.f32 0.0625, %v3140_v7  ;;  %v13529_v8 = vunpack.c.l.bf16 %v15062_v53  ;;  %v15063_v7 = vld [vmem:[%s15663_s25 + $0x608] sm:$0xff]  }
 0x30b   : > { %v8942_v39 = vsel %vm7519_vm15, %v8941_v45, %v8937_v31  ;;  %v13534_v17 = vunpack.c.h.bf16 %v15063_v7 }
 0x30c   : > { %v17044_v25 = vsel %vm20203_vm9, %v8942_v39, %v16927_v10  ;;  %v8950_v44 = vrot.slane %v5603_v21, %v15796_v12  ;;  %v8946_v40 = vrot.slane %v5602_v16, %v15790_v9  ;;  %3358 = vadd.xlane.f32.xlu1 %v3357_v59  ;;  %3355 = vadd.xlane.f32.xlu0 %v3354_v14  ;;  %v3381_v21 = vsel %vm2225_vm0, %v13530_v26, 0.0 }
 0x30d   : > { %v3149_v20 = vpop.xlane.xlu1 %3148  ;;  %v3146_v27 = vpop.xlane.xlu0 %3145  ;;  %v3378_v16 = vsel %vm2225_vm0, %v13529_v8, 0.0  ;;  %v13533_v39 = vunpack.c.l.bf16 %v15063_v7  ;;  %vm20204_vm9 = vcmask 654912  }
 0x30e   : > { %v8951_v34 = vsel %vm7421_vm1, %v8950_v44, %v8946_v40  ;;  %v5605_v35 = vmul.f32 0.0625, %v3149_v20  ;;  %v5604_v10 = vmul.f32 0.0625, %v3146_v27  ;;  %v15064_v27 = vld [vmem:[%s15663_s25 + $0x610] sm:$0xff]  }
 0x30f   : > { %v13538_v54 = vunpack.c.h.bf16 %v15064_v27 }
 0x310   : > { %v8960_v36 = vrot.slane %v5605_v35, %v15793_v11  ;;  %v8955_v38 = vrot.slane %v5604_v10, %v15799_v13  ;;  %3364 = vadd.xlane.f32.xlu1 %v3363_v28  ;;  %3361 = vadd.xlane.f32.xlu0 %v3360_v6  ;;  %v3387_v35 = vsel %vm2225_vm0, %v13534_v17, 0.0  ;;  %v3384_v10 = vsel %vm2225_vm0, %v13533_v39, 0.0 }
 0x311   : > { %v3155_v48 = vpop.xlane.xlu1 %3154  ;;  %v3152_v49 = vpop.xlane.xlu0 %3151 }
 0x312   : > { %v8956_v3 = vsel %vm7428_vm2, %v8955_v38, %v8951_v34  ;;  %v5607_v52 = vmul.f32 0.0625, %v3155_v48  ;;  %v5606_v32 = vmul.f32 0.0625, %v3152_v49 }
 0x313   : > { %v8961_v62 = vsel %vm7435_vm3, %v8960_v36, %v8956_v3  ;;  %v13537_v36 = vunpack.c.l.bf16 %v15064_v27 }
 0x314   : > { %v8970_v56 = vrot.slane %v5607_v52, %v15804_v22  ;;  %v8965_v0 = vrot.slane %v5606_v32, %v15807_v23  ;;  %3370 = vadd.xlane.f32.xlu1 %v3369_v19  ;;  %3367 = vadd.xlane.f32.xlu0 %v3366_v55  ;;  %v15065_v19 = vld [vmem:[%s15663_s25 + $0x618] sm:$0xff]   ;;  %v3393_v32 = vsel %vm2225_vm0, %v13538_v54, 0.0 }
 0x315   : > { %v3161_v2 = vpop.xlane.xlu1 %3160  ;;  %v3158_v30 = vpop.xlane.xlu0 %3157  ;;  %v3390_v53 = vsel %vm2225_vm0, %v13537_v36, 0.0 }
 0x316   : > { %v8966_v45 = vsel %vm7442_vm4, %v8965_v0, %v8961_v62  ;;  %v5609_v46 = vmul.f32 0.0625, %v3161_v2  ;;  %v5608_v47 = vmul.f32 0.0625, %v3158_v30  ;;  %v13542_v62 = vunpack.c.h.bf16 %v15065_v19 }
 0x317   : > { %v8971_v59 = vsel %vm7449_vm5, %v8970_v56, %v8966_v45  ;;  %v13541_v56 = vunpack.c.l.bf16 %v15065_v19 }
 0x318   : > { %v8980_v14 = vrot.slane %v5609_v46, %v15821_v41  ;;  %v8975_v63 = vrot.slane %v5608_v47, %v15824_v42  ;;  %3376 = vadd.xlane.f32.xlu1 %v3375_v5  ;;  %3373 = vadd.xlane.f32.xlu0 %v3372_v29  ;;  %v15066_v5 = vld [vmem:[%s15663_s25 + $0x620] sm:$0xff]   ;;  %v3399_v47 = vsel %vm2225_vm0, %v13542_v62, 0.0 }
 0x319   : > { %v3167_v15 = vpop.xlane.xlu1 %3166  ;;  %v3164_v31 = vpop.xlane.xlu0 %3163  ;;  %v3396_v7 = vsel %vm2225_vm0, %v13541_v56, 0.0 }
 0x31a   : > { %v8976_v44 = vsel %vm7456_vm6, %v8975_v63, %v8971_v59  ;;  %v5611_v40 = vmul.f32 0.0625, %v3167_v15  ;;  %v5610_v20 = vmul.f32 0.0625, %v3164_v31  ;;  %v13546_v59 = vunpack.c.h.bf16 %v15066_v5 }
 0x31b   : > { %v8981_v28 = vsel %vm7463_vm7, %v8980_v14, %v8976_v44  ;;  %v13545_v14 = vunpack.c.l.bf16 %v15066_v5 }
 0x31c   : > { %v8990_v6 = vrot.slane %v5611_v40, %v15837_v61  ;;  %v8985_v33 = vrot.slane %v5610_v20, %v15843_v1  ;;  %3382 = vadd.xlane.f32.xlu1 %v3381_v21  ;;  %3379 = vadd.xlane.f32.xlu0 %v3378_v16  ;;  %v15067_v21 = vld [vmem:[%s15663_s25 + $0x628] sm:$0xff]   ;;  %v3405_v20 = vsel %vm2225_vm0, %v13546_v59, 0.0 }
 0x31d   : > { %v3173_v4 = vpop.xlane.xlu1 %3172  ;;  %v3170_v34 = vpop.xlane.xlu0 %3169  ;;  %v3402_v27 = vsel %vm2225_vm0, %v13545_v14, 0.0 }
 0x31e   : > { %v8986_v38 = vsel %vm20169_vm8, %v8985_v33, %v8981_v28  ;;  %v5613_v48 = vmul.f32 0.0625, %v3173_v4  ;;  %v5612_v49 = vmul.f32 0.0625, %v3170_v34  ;;  %v13550_v28 = vunpack.c.h.bf16 %v15067_v21 }
 0x31f   : > { %v8991_v55 = vsel %vm20204_vm9, %v8990_v6, %v8986_v38  ;;  %vm20205_vm9 = vcmask 786112   ;;  %v13549_v6 = vunpack.c.l.bf16 %v15067_v21 }
 0x320   : > { %v9000_v50 = vrot.slane %v5613_v48, %v15852_v18  ;;  %v8995_v51 = vrot.slane %v5612_v49, %v15858_v24  ;;  %3388 = vadd.xlane.f32.xlu1 %v3387_v35  ;;  %3385 = vadd.xlane.f32.xlu0 %v3384_v10  ;;  %v15068_v35 = vld [vmem:[%s15663_s25 + $0x630] sm:$0xff]   ;;  %v3411_v19 = vsel %vm2225_vm0, %v13550_v28, 0.0 }
 0x321   : > { %v3179_v3 = vpop.xlane.xlu1 %3178  ;;  %v3176_v52 = vpop.xlane.xlu0 %3175 }
 0x322   : > { %v8996_v0 = vsel %vm7484_vm10, %v8995_v51, %v8991_v55  ;;  %v5615_v2 = vmul.f32 0.0625, %v3179_v3  ;;  %v5614_v30 = vmul.f32 0.0625, %v3176_v52  ;;  %v3408_v55 = vsel %vm2225_vm0, %v13549_v6, 0.0 }
 0x323   : > { %v9001_v29 = vsel %vm20205_vm9, %v9000_v50, %v8996_v0  ;;  %vm20206_vm9 = vcmask 1041409   ;;  %v13554_v50 = vunpack.c.h.bf16 %v15068_v35  ;;  %v13553_v51 = vunpack.c.l.bf16 %v15068_v35 }
 0x324   : > { %v9010_v26 = vrot.slane %v5615_v2, %v15867_v37  ;;  %v9005_v8 = vrot.slane %v5614_v30, %v15873_v43  ;;  %3394 = vadd.xlane.f32.xlu1 %v3393_v32  ;;  %3391 = vadd.xlane.f32.xlu0 %v3390_v53  ;;  %v15069_v32 = vld [vmem:[%s15663_s25 + $0x638] sm:$0xff]  }
 0x325   : > { %v3185_v45 = vpop.xlane.xlu1 %3184  ;;  %v3182_v46 = vpop.xlane.xlu0 %3181  ;;  %v3417_v2 = vsel %vm2225_vm0, %v13554_v50, 0.0  ;;  %v3414_v30 = vsel %vm2225_vm0, %v13553_v51, 0.0  ;;  %v13558_v5 = vunpack.c.h.bf16 %v15069_v32 }
 0x326   : > { %v9006_v63 = vsel %vm7498_vm12, %v9005_v8, %v9001_v29  ;;  %v5617_v15 = vmul.f32 0.0625, %v3185_v45  ;;  %v5616_v31 = vmul.f32 0.0625, %v3182_v46  ;;  %v13557_v29 = vunpack.c.l.bf16 %v15069_v32  ;;  %v15070_v46 = vld [vmem:[%s15663_s25 + $0x640] sm:$0xff]  }
 0x327   : > { %v9011_v16 = vsel %vm7505_vm13, %v9010_v26, %v9006_v63  ;;  %v13562_v21 = vunpack.c.h.bf16 %v15070_v46 }
 0x328   : > { %v9020_v17 = vrot.slane %v5617_v15, %v15882_v57  ;;  %v9015_v39 = vrot.slane %v5616_v31, %v15887_v60  ;;  %3400 = vadd.xlane.f32.xlu1 %v3399_v47  ;;  %3397 = vadd.xlane.f32.xlu0 %v3396_v7  ;;  %v3423_v15 = vsel %vm2225_vm0, %v13558_v5, 0.0  ;;  %v3420_v31 = vsel %vm2225_vm0, %v13557_v29, 0.0 }
 0x329   : > { %v3191_v44 = vpop.xlane.xlu1 %3190  ;;  %v3188_v40 = vpop.xlane.xlu0 %3187 }
 0x32a   : > { %v9016_v33 = vsel %vm7512_vm14, %v9015_v39, %v9011_v16  ;;  %v5619_v4 = vmul.f32 0.0625, %v3191_v44  ;;  %v5618_v34 = vmul.f32 0.0625, %v3188_v40  ;;  %v13561_v16 = vunpack.c.l.bf16 %v15070_v46  ;;  %v15071_v40 = vld [vmem:[%s15663_s25 + $0x648] sm:$0xff]  }
 0x32b   : > { %v9021_v10 = vsel %vm7519_vm15, %v9020_v17, %v9016_v33  ;;  %v13566_v35 = vunpack.c.h.bf16 %v15071_v40 }
 0x32c   : > { %v17103_v54 = vsel %vm20206_vm9, %v9021_v10, %v16984_v58  ;;  %v9029_v36 = vrot.slane %v5619_v4, %v15796_v12  ;;  %v9025_v38 = vrot.slane %v5618_v34, %v15790_v9  ;;  %3406 = vadd.xlane.f32.xlu1 %v3405_v20  ;;  %3403 = vadd.xlane.f32.xlu0 %v3402_v27  ;;  %v3429_v4 = vsel %vm2225_vm0, %v13562_v21, 0.0 }
 0x32d   : > { %v3197_v48 = vpop.xlane.xlu1 %3196  ;;  %v3194_v49 = vpop.xlane.xlu0 %3193  ;;  %v3426_v34 = vsel %vm2225_vm0, %v13561_v16, 0.0  ;;  %v13565_v10 = vunpack.c.l.bf16 %v15071_v40  ;;  %vm20207_vm9 = vcmask 654912  }
 0x32e   : > { %v9030_v3 = vsel %vm7421_vm1, %v9029_v36, %v9025_v38  ;;  %v5621_v52 = vmul.f32 0.0625, %v3197_v48  ;;  %v5620_v58 = vmul.f32 0.0625, %v3194_v49  ;;  %v15072_v49 = vld [vmem:[%s15663_s25 + $0x650] sm:$0xff]  }
 0x32f   : > { %v13570_v32 = vunpack.c.h.bf16 %v15072_v49 }
 0x330   : > { %v9039_v53 = vrot.slane %v5621_v52, %v15793_v11  ;;  %v9034_v62 = vrot.slane %v5620_v58, %v15799_v13  ;;  %3412 = vadd.xlane.f32.xlu1 %v3411_v19  ;;  %3409 = vadd.xlane.f32.xlu0 %v3408_v55  ;;  %v3435_v52 = vsel %vm2225_vm0, %v13566_v35, 0.0  ;;  %v3432_v58 = vsel %vm2225_vm0, %v13565_v10, 0.0 }
 0x331   : > { %v3203_v56 = vpop.xlane.xlu1 %3202  ;;  %v3200_v0 = vpop.xlane.xlu0 %3199 }
 0x332   : > { %v9035_v26 = vsel %vm7428_vm2, %v9034_v62, %v9030_v3  ;;  %v5623_v8 = vmul.f32 0.0625, %v3203_v56  ;;  %v5622_v45 = vmul.f32 0.0625, %v3200_v0 }
 0x333   : > { %v9040_v47 = vsel %vm7435_vm3, %v9039_v53, %v9035_v26  ;;  %v13569_v53 = vunpack.c.l.bf16 %v15072_v49 }
 0x334   : > { %v9049_v7 = vrot.slane %v5623_v8, %v15804_v22  ;;  %v9044_v59 = vrot.slane %v5622_v45, %v15807_v23  ;;  %3418 = vadd.xlane.f32.xlu1 %v3417_v2  ;;  %3415 = vadd.xlane.f32.xlu0 %v3414_v30  ;;  %v15073_v2 = vld [vmem:[%s15663_s25 + $0x658] sm:$0xff]   ;;  %v3441_v45 = vsel %vm2225_vm0, %v13570_v32, 0.0 }
 0x335   : > { %v3209_v14 = vpop.xlane.xlu1 %3208  ;;  %v3206_v63 = vpop.xlane.xlu0 %3205  ;;  %v3438_v46 = vsel %vm2225_vm0, %v13569_v53, 0.0 }
 0x336   : > { %v9045_v17 = vsel %vm7442_vm4, %v9044_v59, %v9040_v47  ;;  %v5625_v39 = vmul.f32 0.0625, %v3209_v14  ;;  %v5624_v44 = vmul.f32 0.0625, %v3206_v63  ;;  %v13574_v47 = vunpack.c.h.bf16 %v15073_v2 }
 0x337   : > { %v9050_v20 = vsel %vm7449_vm5, %v9049_v7, %v9045_v17  ;;  %v13573_v7 = vunpack.c.l.bf16 %v15073_v2 }
 0x338   : > { %v9059_v27 = vrot.slane %v5625_v39, %v15821_v41  ;;  %v9054_v28 = vrot.slane %v5624_v44, %v15824_v42  ;;  %3424 = vadd.xlane.f32.xlu1 %v3423_v15  ;;  %3421 = vadd.xlane.f32.xlu0 %v3420_v31  ;;  %v15074_v15 = vld [vmem:[%s15663_s25 + $0x660] sm:$0xff]   ;;  %v3447_v44 = vsel %vm2225_vm0, %v13574_v47, 0.0 }
 0x339   : > { %v3215_v6 = vpop.xlane.xlu1 %3214  ;;  %v3212_v33 = vpop.xlane.xlu0 %3211  ;;  %v3444_v40 = vsel %vm2225_vm0, %v13573_v7, 0.0 }
 0x33a   : > { %v9055_v36 = vsel %vm7456_vm6, %v9054_v28, %v9050_v20  ;;  %v5627_v38 = vmul.f32 0.0625, %v3215_v6  ;;  %v5626_v48 = vmul.f32 0.0625, %v3212_v33  ;;  %v13578_v20 = vunpack.c.h.bf16 %v15074_v15 }
 0x33b   : > { %v9060_v19 = vsel %vm7463_vm7, %v9059_v27, %v9055_v36  ;;  %v13577_v27 = vunpack.c.l.bf16 %v15074_v15 }
 0x33c   : > { %v9069_v55 = vrot.slane %v5627_v38, %v15837_v61  ;;  %v9064_v50 = vrot.slane %v5626_v48, %v15843_v1  ;;  %3430 = vadd.xlane.f32.xlu1 %v3429_v4  ;;  %3427 = vadd.xlane.f32.xlu0 %v3426_v34  ;;  %v15075_v4 = vld [vmem:[%s15663_s25 + $0x668] sm:$0xff]   ;;  %v3453_v48 = vsel %vm2225_vm0, %v13578_v20, 0.0 }
 0x33d   : > { %v3221_v51 = vpop.xlane.xlu1 %3220  ;;  %v3218_v3 = vpop.xlane.xlu0 %3217  ;;  %v3450_v49 = vsel %vm2225_vm0, %v13577_v27, 0.0 }
 0x33e   : > { %v9065_v62 = vsel %vm20169_vm8, %v9064_v50, %v9060_v19  ;;  %v5629_v56 = vmul.f32 0.0625, %v3221_v51  ;;  %v5628_v0 = vmul.f32 0.0625, %v3218_v3  ;;  %v13582_v19 = vunpack.c.h.bf16 %v15075_v4 }
 0x33f   : > { %v9070_v30 = vsel %vm20207_vm9, %v9069_v55, %v9065_v62  ;;  %vm20208_vm9 = vcmask 786112   ;;  %v13581_v55 = vunpack.c.l.bf16 %v15075_v4 }
 0x340   : > { %v9079_v5 = vrot.slane %v5629_v56, %v15852_v18  ;;  %v9074_v29 = vrot.slane %v5628_v0, %v15858_v24  ;;  %3436 = vadd.xlane.f32.xlu1 %v3435_v52  ;;  %3433 = vadd.xlane.f32.xlu0 %v3432_v58  ;;  %v15076_v52 = vld [vmem:[%s15663_s25 + $0x670] sm:$0xff]   ;;  %v3459_v2 = vsel %vm2225_vm0, %v13582_v19, 0.0 }
 0x341   : > { %v3227_v26 = vpop.xlane.xlu1 %3226  ;;  %v3224_v8 = vpop.xlane.xlu0 %3223 }
 0x342   : > { %v9075_v59 = vsel %vm7484_vm10, %v9074_v29, %v9070_v30  ;;  %v5631_v14 = vmul.f32 0.0625, %v3227_v26  ;;  %v5630_v63 = vmul.f32 0.0625, %v3224_v8  ;;  %v3456_v30 = vsel %vm2225_vm0, %v13581_v55, 0.0 }
 0x343   : > { %v9080_v31 = vsel %vm20208_vm9, %v9079_v5, %v9075_v59  ;;  %vm20209_vm9 = vcmask 1042434   ;;  %v13586_v5 = vunpack.c.h.bf16 %v15076_v52  ;;  %v13585_v29 = vunpack.c.l.bf16 %v15076_v52 }
 0x344   : > { %v9089_v21 = vrot.slane %v5631_v14, %v15867_v37  ;;  %v9084_v16 = vrot.slane %v5630_v63, %v15873_v43  ;;  %3442 = vadd.xlane.f32.xlu1 %v3441_v45  ;;  %3439 = vadd.xlane.f32.xlu0 %v3438_v46  ;;  %v15077_v45 = vld [vmem:[%s15663_s25 + $0x678] sm:$0xff]  }
 0x345   : > { %v3233_v17 = vpop.xlane.xlu1 %3232  ;;  %v3230_v39 = vpop.xlane.xlu0 %3229  ;;  %v3465_v14 = vsel %vm2225_vm0, %v13586_v5, 0.0  ;;  %v3462_v63 = vsel %vm2225_vm0, %v13585_v29, 0.0  ;;  %v13590_v15 = vunpack.c.h.bf16 %v15077_v45 }
 0x346   : > { %v9085_v28 = vsel %vm7498_vm12, %v9084_v16, %v9080_v31  ;;  %v5633_v6 = vmul.f32 0.0625, %v3233_v17  ;;  %v5632_v33 = vmul.f32 0.0625, %v3230_v39  ;;  %v13589_v31 = vunpack.c.l.bf16 %v15077_v45  ;;  %v15078_v39 = vld [vmem:[%s15663_s25 + $0x680] sm:$0xff]  }
 0x347   : > { %v9090_v34 = vsel %vm7505_vm13, %v9089_v21, %v9085_v28  ;;  %v13594_v4 = vunpack.c.h.bf16 %v15078_v39 }
 0x348   : > { %v9099_v35 = vrot.slane %v5633_v6, %v15882_v57  ;;  %v9094_v10 = vrot.slane %v5632_v33, %v15887_v60  ;;  %3448 = vadd.xlane.f32.xlu1 %v3447_v44  ;;  %3445 = vadd.xlane.f32.xlu0 %v3444_v40  ;;  %v3471_v6 = vsel %vm2225_vm0, %v13590_v15, 0.0  ;;  %v3468_v33 = vsel %vm2225_vm0, %v13589_v31, 0.0 }
 0x349   : > { %v3239_v36 = vpop.xlane.xlu1 %3238  ;;  %v3236_v38 = vpop.xlane.xlu0 %3235 }
 0x34a   : > { %v9095_v50 = vsel %vm7512_vm14, %v9094_v10, %v9090_v34  ;;  %v5635_v51 = vmul.f32 0.0625, %v3239_v36  ;;  %v5634_v3 = vmul.f32 0.0625, %v3236_v38  ;;  %v13593_v34 = vunpack.c.l.bf16 %v15078_v39  ;;  %v15079_v38 = vld [vmem:[%s15663_s25 + $0x688] sm:$0xff]  }
 0x34b   : > { %v9100_v58 = vsel %vm7519_vm15, %v9099_v35, %v9095_v50  ;;  %v13598_v52 = vunpack.c.h.bf16 %v15079_v38 }
 0x34c   : > { %v17162_v32 = vsel %vm20209_vm9, %v9100_v58, %v17044_v25  ;;  %v9108_v53 = vrot.slane %v5635_v51, %v15796_v12  ;;  %v9104_v62 = vrot.slane %v5634_v3, %v15790_v9  ;;  %3454 = vadd.xlane.f32.xlu1 %v3453_v48  ;;  %3451 = vadd.xlane.f32.xlu0 %v3450_v49  ;;  %v3477_v51 = vsel %vm2225_vm0, %v13594_v4, 0.0 }
 0x34d   : > { %v3245_v56 = vpop.xlane.xlu1 %3244  ;;  %v3242_v0 = vpop.xlane.xlu0 %3241  ;;  %v3474_v3 = vsel %vm2225_vm0, %v13593_v34, 0.0  ;;  %v13597_v58 = vunpack.c.l.bf16 %v15079_v38  ;;  %vm20210_vm9 = vcmask 654912  }
 0x34e   : > { %v9109_v26 = vsel %vm7421_vm1, %v9108_v53, %v9104_v62  ;;  %v5637_v8 = vmul.f32 0.0625, %v3245_v56  ;;  %v5636_v25 = vmul.f32 0.0625, %v3242_v0  ;;  %v15080_v0 = vld [vmem:[%s15663_s25 + $0x690] sm:$0xff]  }
 0x34f   : > { %v13602_v45 = vunpack.c.h.bf16 %v15080_v0 }
 0x350   : > { %v9118_v46 = vrot.slane %v5637_v8, %v15793_v11  ;;  %v9113_v47 = vrot.slane %v5636_v25, %v15799_v13  ;;  %3460 = vadd.xlane.f32.xlu1 %v3459_v2  ;;  %3457 = vadd.xlane.f32.xlu0 %v3456_v30  ;;  %v3483_v8 = vsel %vm2225_vm0, %v13598_v52, 0.0  ;;  %v3480_v25 = vsel %vm2225_vm0, %v13597_v58, 0.0 }
 0x351   : > { %v3251_v7 = vpop.xlane.xlu1 %3250  ;;  %v3248_v59 = vpop.xlane.xlu0 %3247 }
 0x352   : > { %v9114_v21 = vsel %vm7428_vm2, %v9113_v47, %v9109_v26  ;;  %v5639_v16 = vmul.f32 0.0625, %v3251_v7  ;;  %v5638_v17 = vmul.f32 0.0625, %v3248_v59 }
 0x353   : > { %v9119_v44 = vsel %vm7435_vm3, %v9118_v46, %v9114_v21  ;;  %v13601_v46 = vunpack.c.l.bf16 %v15080_v0 }
 0x354   : > { %v9128_v40 = vrot.slane %v5639_v16, %v15804_v22  ;;  %v9123_v20 = vrot.slane %v5638_v17, %v15807_v23  ;;  %3466 = vadd.xlane.f32.xlu1 %v3465_v14  ;;  %3463 = vadd.xlane.f32.xlu0 %v3462_v63  ;;  %v15081_v14 = vld [vmem:[%s15663_s25 + $0x698] sm:$0xff]   ;;  %v3489_v17 = vsel %vm2225_vm0, %v13602_v45, 0.0 }
 0x355   : > { %v3257_v27 = vpop.xlane.xlu1 %3256  ;;  %v3254_v28 = vpop.xlane.xlu0 %3253  ;;  %v3486_v39 = vsel %vm2225_vm0, %v13601_v46, 0.0 }
 0x356   : > { %v9124_v35 = vsel %vm7442_vm4, %v9123_v20, %v9119_v44  ;;  %v5641_v10 = vmul.f32 0.0625, %v3257_v27  ;;  %v5640_v36 = vmul.f32 0.0625, %v3254_v28  ;;  %v13606_v44 = vunpack.c.h.bf16 %v15081_v14 }
 0x357   : > { %v9129_v48 = vsel %vm7449_vm5, %v9128_v40, %v9124_v35  ;;  %v13605_v40 = vunpack.c.l.bf16 %v15081_v14 }
 0x358   : > { %v9138_v49 = vrot.slane %v5641_v10, %v15821_v41  ;;  %v9133_v19 = vrot.slane %v5640_v36, %v15824_v42  ;;  %3472 = vadd.xlane.f32.xlu1 %v3471_v6  ;;  %3469 = vadd.xlane.f32.xlu0 %v3468_v33  ;;  %v15082_v6 = vld [vmem:[%s15663_s25 + $0x6a0] sm:$0xff]   ;;  %v3495_v36 = vsel %vm2225_vm0, %v13606_v44, 0.0 }
 0x359   : > { %v3263_v55 = vpop.xlane.xlu1 %3262  ;;  %v3260_v50 = vpop.xlane.xlu0 %3259  ;;  %v3492_v38 = vsel %vm2225_vm0, %v13605_v40, 0.0 }
 0x35a   : > { %v9134_v53 = vsel %vm7456_vm6, %v9133_v19, %v9129_v48  ;;  %v5643_v62 = vmul.f32 0.0625, %v3263_v55  ;;  %v5642_v56 = vmul.f32 0.0625, %v3260_v50  ;;  %v13610_v48 = vunpack.c.h.bf16 %v15082_v6 }
 0x35b   : > { %v9139_v2 = vsel %vm7463_vm7, %v9138_v49, %v9134_v53  ;;  %v13609_v49 = vunpack.c.l.bf16 %v15082_v6 }
 0x35c   : > { %v9148_v30 = vrot.slane %v5643_v62, %v15837_v61  ;;  %v9143_v5 = vrot.slane %v5642_v56, %v15843_v1  ;;  %3478 = vadd.xlane.f32.xlu1 %v3477_v51  ;;  %3475 = vadd.xlane.f32.xlu0 %v3474_v3  ;;  %v15083_v51 = vld [vmem:[%s15663_s25 + $0x6a8] sm:$0xff]   ;;  %v3501_v56 = vsel %vm2225_vm0, %v13610_v48, 0.0 }
 0x35d   : > { %v3269_v29 = vpop.xlane.xlu1 %3268  ;;  %v3266_v26 = vpop.xlane.xlu0 %3265  ;;  %v3498_v0 = vsel %vm2225_vm0, %v13609_v49, 0.0 }
 0x35e   : > { %v9144_v47 = vsel %vm20169_vm8, %v9143_v5, %v9139_v2  ;;  %v5645_v7 = vmul.f32 0.0625, %v3269_v29  ;;  %v5644_v59 = vmul.f32 0.0625, %v3266_v26  ;;  %v13614_v2 = vunpack.c.h.bf16 %v15083_v51 }
 0x35f   : > { %v9149_v63 = vsel %vm20210_vm9, %v9148_v30, %v9144_v47  ;;  %vm20211_vm9 = vcmask 786112   ;;  %v13613_v30 = vunpack.c.l.bf16 %v15083_v51 }
 0x360   : > { %v9158_v15 = vrot.slane %v5645_v7, %v15852_v18  ;;  %v9153_v31 = vrot.slane %v5644_v59, %v15858_v24  ;;  %3484 = vadd.xlane.f32.xlu1 %v3483_v8  ;;  %3481 = vadd.xlane.f32.xlu0 %v3480_v25  ;;  %v15084_v8 = vld [vmem:[%s15663_s25 + $0x6b0] sm:$0xff]   ;;  %v3507_v14 = vsel %vm2225_vm0, %v13614_v2, 0.0 }
 0x361   : > { %v3275_v21 = vpop.xlane.xlu1 %3274  ;;  %v3272_v16 = vpop.xlane.xlu0 %3271 }
 0x362   : > { %v9154_v20 = vsel %vm7484_vm10, %v9153_v31, %v9149_v63  ;;  %v5647_v27 = vmul.f32 0.0625, %v3275_v21  ;;  %v5646_v28 = vmul.f32 0.0625, %v3272_v16  ;;  %v3504_v63 = vsel %vm2225_vm0, %v13613_v30, 0.0 }
 0x363   : > { %v9159_v33 = vsel %vm20211_vm9, %v9158_v15, %v9154_v20  ;;  %vm20212_vm9 = vcmask 1042434   ;;  %v13618_v15 = vunpack.c.h.bf16 %v15084_v8  ;;  %v13617_v31 = vunpack.c.l.bf16 %v15084_v8 }
 0x364   : > { %v9168_v4 = vrot.slane %v5647_v27, %v15867_v37  ;;  %v9163_v34 = vrot.slane %v5646_v28, %v15873_v43  ;;  %3490 = vadd.xlane.f32.xlu1 %v3489_v17  ;;  %3487 = vadd.xlane.f32.xlu0 %v3486_v39  ;;  %v15085_v17 = vld [vmem:[%s15663_s25 + $0x6b8] sm:$0xff]  }
 0x365   : > { %v3281_v35 = vpop.xlane.xlu1 %3280  ;;  %v3278_v10 = vpop.xlane.xlu0 %3277  ;;  %v3513_v27 = vsel %vm2225_vm0, %v13618_v15, 0.0  ;;  %v3510_v28 = vsel %vm2225_vm0, %v13617_v31, 0.0  ;;  %v13622_v6 = vunpack.c.h.bf16 %v15085_v17 }
 0x366   : > { %v9164_v19 = vsel %vm7498_vm12, %v9163_v34, %v9159_v33  ;;  %v5649_v55 = vmul.f32 0.0625, %v3281_v35  ;;  %v5648_v50 = vmul.f32 0.0625, %v3278_v10  ;;  %v13621_v33 = vunpack.c.l.bf16 %v15085_v17  ;;  %v15086_v10 = vld [vmem:[%s15663_s25 + $0x6c0] sm:$0xff]  }
 0x367   : > { %v9169_v3 = vsel %vm7505_vm13, %v9168_v4, %v9164_v19  ;;  %v13626_v51 = vunpack.c.h.bf16 %v15086_v10 }
 0x368   : > { %v9178_v52 = vrot.slane %v5649_v55, %v15882_v57  ;;  %v9173_v58 = vrot.slane %v5648_v50, %v15887_v60  ;;  %3496 = vadd.xlane.f32.xlu1 %v3495_v36  ;;  %3493 = vadd.xlane.f32.xlu0 %v3492_v38  ;;  %v3519_v55 = vsel %vm2225_vm0, %v13622_v6, 0.0  ;;  %v3516_v50 = vsel %vm2225_vm0, %v13621_v33, 0.0 }
 0x369   : > { %v3287_v53 = vpop.xlane.xlu1 %3286  ;;  %v3284_v62 = vpop.xlane.xlu0 %3283 }
 0x36a   : > { %v9174_v5 = vsel %vm7512_vm14, %v9173_v58, %v9169_v3  ;;  %v5651_v29 = vmul.f32 0.0625, %v3287_v53  ;;  %v5650_v26 = vmul.f32 0.0625, %v3284_v62  ;;  %v13625_v3 = vunpack.c.l.bf16 %v15086_v10  ;;  %v15087_v62 = vld [vmem:[%s15663_s25 + $0x6c8] sm:$0xff]  }
 0x36b   : > { %v9179_v25 = vsel %vm7519_vm15, %v9178_v52, %v9174_v5  ;;  %v13630_v8 = vunpack.c.h.bf16 %v15087_v62 }
 0x36c   : > { %v17221_v45 = vsel %vm20212_vm9, %v9179_v25, %v17103_v54  ;;  %v9187_v46 = vrot.slane %v5651_v29, %v15796_v12  ;;  %v9183_v47 = vrot.slane %v5650_v26, %v15790_v9  ;;  %3502 = vadd.xlane.f32.xlu1 %v3501_v56  ;;  %3499 = vadd.xlane.f32.xlu0 %v3498_v0  ;;  %v3525_v29 = vsel %vm2225_vm0, %v13626_v51, 0.0 }
 0x36d   : > { %v3293_v7 = vpop.xlane.xlu1 %3292  ;;  %v3290_v59 = vpop.xlane.xlu0 %3289  ;;  %v3522_v26 = vsel %vm2225_vm0, %v13625_v3, 0.0  ;;  %v13629_v25 = vunpack.c.l.bf16 %v15087_v62  ;;  %vm20213_vm9 = vcmask 654912  }
 0x36e   : > { %v9188_v21 = vsel %vm7421_vm1, %v9187_v46, %v9183_v47  ;;  %v5653_v16 = vmul.f32 0.0625, %v3293_v7  ;;  %v5652_v54 = vmul.f32 0.0625, %v3290_v59  ;;  %v15088_v59 = vld [vmem:[%s15663_s25 + $0x6d0] sm:$0xff]  }
 0x36f   : > { %v13634_v17 = vunpack.c.h.bf16 %v15088_v59 }
 0x370   : > { %v9197_v39 = vrot.slane %v5653_v16, %v15793_v11  ;;  %v9192_v44 = vrot.slane %v5652_v54, %v15799_v13  ;;  %3508 = vadd.xlane.f32.xlu1 %v3507_v14  ;;  %3505 = vadd.xlane.f32.xlu0 %v3504_v63  ;;  %v3531_v16 = vsel %vm2225_vm0, %v13630_v8, 0.0  ;;  %v3528_v54 = vsel %vm2225_vm0, %v13629_v25, 0.0 }
 0x371   : > { %v3299_v40 = vpop.xlane.xlu1 %3298  ;;  %v3296_v20 = vpop.xlane.xlu0 %3295  ;;  %v3537_v10 = vsel %vm2225_vm0, %v13634_v17, 0.0 }
 0x372   : > { %v9193_v4 = vsel %vm7428_vm2, %v9192_v44, %v9188_v21  ;;  %v5655_v34 = vmul.f32 0.0625, %v3299_v40  ;;  %v5654_v35 = vmul.f32 0.0625, %v3296_v20  ;;  %v15089_v44 = vld [vmem:[%s15663_s25 + $0x6d8] sm:$0xff]  }
 0x373   : > { %v9198_v36 = vsel %vm7435_vm3, %v9197_v39, %v9193_v4  ;;  %v13633_v39 = vunpack.c.l.bf16 %v15088_v59  ;;  %v13638_v4 = vunpack.c.h.bf16 %v15089_v44 }
 0x374   : > { %v9207_v38 = vrot.slane %v5655_v34, %v15804_v22  ;;  %v9202_v48 = vrot.slane %v5654_v35, %v15807_v23  ;;  %3514 = vadd.xlane.f32.xlu1 %v3513_v27  ;;  %3511 = vadd.xlane.f32.xlu0 %v3510_v28 }
 0x375   : > { %v3305_v49 = vpop.xlane.xlu1 %3304  ;;  %v3302_v19 = vpop.xlane.xlu0 %3301 }
 0x376   : > { %v9203_v52 = vsel %vm7442_vm4, %v9202_v48, %v9198_v36  ;;  %v5657_v58 = vmul.f32 0.0625, %v3305_v49  ;;  %v5656_v53 = vmul.f32 0.0625, %v3302_v19  ;;  %v3534_v36 = vsel %vm2225_vm0, %v13633_v39, 0.0 }
 0x377   : > { %v9208_v56 = vsel %vm7449_vm5, %v9207_v38, %v9203_v52  ;;  %v13637_v38 = vunpack.c.l.bf16 %v15089_v44 }
 0x378   : > { %v9217_v0 = vrot.slane %v5657_v58, %v15821_v41  ;;  %v9212_v2 = vrot.slane %v5656_v53, %v15824_v42  ;;  %3520 = vadd.xlane.f32.xlu1 %v3519_v55  ;;  %3517 = vadd.xlane.f32.xlu0 %v3516_v50  ;;  %v15090_v50 = vld [vmem:[%s15663_s25 + $0x6e0] sm:$0xff]   ;;  %v3543_v53 = vsel %vm2225_vm0, %v13638_v4, 0.0 }
 0x379   : > { %v3311_v30 = vpop.xlane.xlu1 %3310  ;;  %v3308_v5 = vpop.xlane.xlu0 %3307 }
 0x37a   : > { %v9213_v46 = vsel %vm7456_vm6, %v9212_v2, %v9208_v56  ;;  %v5659_v47 = vmul.f32 0.0625, %v3311_v30  ;;  %v5658_v7 = vmul.f32 0.0625, %v3308_v5  ;;  %v13642_v2 = vunpack.c.h.bf16 %v15090_v50  ;;  %v15091_v5 = vld [vmem:[%s15663_s25 + $0x6e8] sm:$0xff]  }
 0x37b   : > { %v9218_v14 = vsel %vm7463_vm7, %v9217_v0, %v9213_v46  ;;  %v3540_v0 = vsel %vm2225_vm0, %v13637_v38, 0.0  ;;  %v13641_v30 = vunpack.c.l.bf16 %v15090_v50  ;;  %v13645_v59 = vunpack.c.l.bf16 %v15091_v5 }
 0x37c   : > { %v9227_v63 = vrot.slane %v5659_v47, %v15837_v61  ;;  %v9222_v15 = vrot.slane %v5658_v7, %v15843_v1  ;;  %3526 = vadd.xlane.f32.xlu1 %v3525_v29  ;;  %3523 = vadd.xlane.f32.xlu0 %v3522_v26  ;;  %v13646_v7 = vunpack.c.h.bf16 %v15091_v5 }
 0x37d   : > { %v3317_v31 = vpop.xlane.xlu1 %3316  ;;  %v3314_v21 = vpop.xlane.xlu0 %3313 }
 0x37e   : > { %v9223_v40 = vsel %vm20169_vm8, %v9222_v15, %v9218_v14  ;;  %v5661_v20 = vmul.f32 0.0625, %v3317_v31  ;;  %v5660_v27 = vmul.f32 0.0625, %v3314_v21  ;;  %v3549_v15 = vsel %vm2225_vm0, %v13642_v2, 0.0 }
 0x37f   : > { %v9228_v28 = vsel %vm20213_vm9, %v9227_v63, %v9223_v40  ;;  %vm20214_vm9 = vcmask 786112   ;;  %v3546_v31 = vsel %vm2225_vm0, %v13641_v30, 0.0 }
 0x380   : > { %v9237_v6 = vrot.slane %v5661_v20, %v15852_v18  ;;  %v9232_v33 = vrot.slane %v5660_v27, %v15858_v24  ;;  %3532 = vadd.xlane.f32.xlu1 %v3531_v16  ;;  %3529 = vadd.xlane.f32.xlu0 %v3528_v54  ;;  %v15092_v54 = vld [vmem:[%s15663_s25 + $0x6f0] sm:$0xff]   ;;  %v3555_v20 = vsel %vm2225_vm0, %v13646_v7, 0.0  ;;  %v3552_v27 = vsel %vm2225_vm0, %v13645_v59, 0.0 }
 0x381   : > { %v3323_v34 = vpop.xlane.xlu1 %3322  ;;  %v15429_v35 = vpop.f32.mrb[0].mxu0  ;;  %v13649_v4 = vunpack.c.l.bf16 %v15092_v54 }
 0x382   : > { %v9233_v48 = vsel %vm7484_vm10, %v9232_v33, %v9228_v28  ;;  %v5663_v49 = vmul.f32 0.0625, %v3323_v34  ;;  %v3320_v19 = vpop.xlane.xlu0 %3319  ;;  %v15430_v55 = vpop.f32.mrb[1].mxu0  ;;  %v13650_v33 = vunpack.c.h.bf16 %v15092_v54  ;;  %v15093_v34 = vld [vmem:[%s15663_s25 + $0x6f8] sm:$0xff]  }
 0x383   : > { %v9238_v51 = vsel %vm20214_vm9, %v9237_v6, %v9233_v48  ;;  %v5662_v3 = vmul.f32 0.0625, %v3320_v19  ;;  %v15431_v52 = vadd.f32 %v15430_v55, %v15429_v35  ;;  %vm20215_vm9 = vcmask 1043459  }
 0x384   : > { %v9247_v58 = vrot.slane %v5663_v49, %v15867_v37  ;;  %3538 = vadd.xlane.f32.xlu1 %v3537_v10  ;;  %3535 = vadd.xlane.f32.xlu0 %v3534_v36  ;;  %v13654_v19 = vunpack.c.h.bf16 %v15093_v34 }
 0x385   : > { %v9242_v62 = vrot.slane %v5662_v3, %v15873_v43  ;;  %12654 = vst [vmem:[%s17269_s23] sm:$0xff] %v15431_v52  ;;  %v3329_v56 = vpop.xlane.xlu1 %3328  ;;  %v3558_v3 = vsel %vm2225_vm0, %v13649_v4, 0.0 }
 0x386   : > { %v5665_v29 = vmul.f32 0.0625, %v3329_v56  ;;  %v3326_v26 = vpop.xlane.xlu0 %3325  ;;  %v3567_v30 = vsel %vm2225_vm0, %v13654_v19, 0.0 }
 0x387   : > { %v9243_v8 = vsel %vm7498_vm12, %v9242_v62, %v9238_v51  ;;  %v5664_v25 = vmul.f32 0.0625, %v3326_v26  ;;  %v3561_v51 = vsel %vm2225_vm0, %v13650_v33, 0.0 }
 0x388   : > { %v9257_v46 = vrot.slane %v5665_v29, %v15882_v57  ;;  %v9248_v47 = vsel %vm7505_vm13, %v9247_v58, %v9243_v8  ;;  %3544 = vadd.xlane.f32.xlu1 %v3543_v53  ;;  %3541 = vadd.xlane.f32.xlu0 %v3540_v0  ;;  %v15094_v53 = vld [vmem:[%s15663_s25 + $0x700] sm:$0xff]  }
 0x389   : > { %v9252_v14 = vrot.slane %v5664_v25, %v15887_v60  ;;  %v3335_v63 = vpop.xlane.xlu1 %3334  ;;  %v13658_v8 = vunpack.c.h.bf16 %v15094_v53  ;;  %v13657_v25 = vunpack.c.l.bf16 %v15094_v53 }
 0x38a   : > { %v5667_v21 = vmul.f32 0.0625, %v3335_v63  ;;  %v3332_v16 = vpop.xlane.xlu0 %3331 }
 0x38b   : > { %v9253_v17 = vsel %vm7512_vm14, %v9252_v14, %v9248_v47  ;;  %v5666_v39 = vmul.f32 0.0625, %v3332_v16  ;;  %v3573_v54 = vsel %vm2225_vm0, %v13658_v8, 0.0 }
 0x38c   : > { %v9258_v44 = vsel %vm7519_vm15, %v9257_v46, %v9253_v17  ;;  %v9266_v40 = vrot.slane %v5667_v21, %v15796_v12  ;;  %3550 = vadd.xlane.f32.xlu1 %v3549_v15  ;;  %3547 = vadd.xlane.f32.xlu0 %v3546_v31  ;;  %v15095_v46 = vld [vmem:[%s15663_s25 + $0x708] sm:$0xff]   ;;  %v3570_v17 = vsel %vm2225_vm0, %v13657_v25, 0.0 }
 0x38d   : > { %v9262_v28 = vrot.slane %v5666_v39, %v15790_v9  ;;  %v3341_v6 = vpop.xlane.xlu1 %3340  ;;  %v17290_v35 = vsel %vm20215_vm9, %v9258_v44, %v17162_v32  ;;  %v13653_v32 = vunpack.c.l.bf16 %v15093_v34  ;;  %v13662_v31 = vunpack.c.h.bf16 %v15095_v46 }
 0x38e   : > { %v5669_v10 = vmul.f32 0.0625, %v3341_v6  ;;  %v3338_v36 = vpop.xlane.xlu0 %3337  ;;  %v13661_v39 = vunpack.c.l.bf16 %v15095_v46  ;;  %vm20216_vm9 = vcmask 654912  }
 0x38f   : > { %v9267_v38 = vsel %vm7421_vm1, %v9266_v40, %v9262_v28  ;;  %v5668_v48 = vmul.f32 0.0625, %v3338_v36  ;;  %v3564_v26 = vsel %vm2225_vm0, %v13653_v32, 0.0  ;;  %v3579_v4 = vsel %vm2225_vm0, %v13662_v31, 0.0 }
 0x390   : > { %v9276_v49 = vrot.slane %v5669_v10, %v15793_v11  ;;  %3556 = vadd.xlane.f32.xlu1 %v3555_v20  ;;  %3553 = vadd.xlane.f32.xlu0 %v3552_v27  ;;  %v15096_v20 = vld [vmem:[%s15663_s25 + $0x710] sm:$0xff]   ;;  %v3576_v36 = vsel %vm2225_vm0, %v13661_v39, 0.0 }
 0x391   : > { %v9271_v55 = vrot.slane %v5668_v48, %v15799_v13  ;;  %v3347_v50 = vpop.xlane.xlu1 %3346  ;;  %v13665_v48 = vunpack.c.l.bf16 %v15096_v20 }
 0x392   : > { %v5671_v52 = vmul.f32 0.0625, %v3347_v50  ;;  %v3344_v58 = vpop.xlane.xlu0 %3343 }
 0x393   : > { %v9272_v62 = vsel %vm7428_vm2, %v9271_v55, %v9267_v38  ;;  %v5670_v56 = vmul.f32 0.0625, %v3344_v58  ;;  %v13666_v38 = vunpack.c.h.bf16 %v15096_v20 }
 0x394   : > { %v9286_v0 = vrot.slane %v5671_v52, %v15804_v22  ;;  %v9277_v2 = vsel %vm7435_vm3, %v9276_v49, %v9272_v62  ;;  %3562 = vadd.xlane.f32.xlu1 %v3561_v51  ;;  %3559 = vadd.xlane.f32.xlu0 %v3558_v3  ;;  %v15097_v49 = vld [vmem:[%s15663_s25 + $0x718] sm:$0xff]  }
 0x395   : > { %v9281_v5 = vrot.slane %v5670_v56, %v15807_v23  ;;  %v3353_v29 = vpop.xlane.xlu1 %3352  ;;  %v13670_v52 = vunpack.c.h.bf16 %v15097_v49  ;;  %v3585_v62 = vsel %vm2225_vm0, %v13666_v38, 0.0  ;;  %v3582_v56 = vsel %vm2225_vm0, %v13665_v48, 0.0 }
 0x396   : > { %v5673_v47 = vmul.f32 0.0625, %v3353_v29  ;;  %v3350_v7 = vpop.xlane.xlu0 %3349 }
 0x397   : > { %v9282_v59 = vsel %vm7442_vm4, %v9281_v5, %v9277_v2  ;;  %v5672_v14 = vmul.f32 0.0625, %v3350_v7  ;;  %v15098_v5 = vld [vmem:[%s15663_s25 + $0x720] sm:$0xff]   ;;  %v3591_v46 = vsel %vm2225_vm0, %v13670_v52, 0.0 }
 0x398   : > { %v9296_v63 = vrot.slane %v5673_v47, %v15821_v41  ;;  %v9287_v15 = vsel %vm7449_vm5, %v9286_v0, %v9282_v59  ;;  %3568 = vadd.xlane.f32.xlu1 %v3567_v30  ;;  %3565 = vadd.xlane.f32.xlu0 %v3564_v26  ;;  %v13669_v0 = vunpack.c.l.bf16 %v15097_v49 }
 0x399   : > { %v9291_v21 = vrot.slane %v5672_v14, %v15824_v42  ;;  %v3359_v16 = vpop.xlane.xlu1 %3358  ;;  %v13674_v14 = vunpack.c.h.bf16 %v15098_v5 }
 0x39a   : > { %v5675_v44 = vmul.f32 0.0625, %v3359_v16  ;;  %v3356_v40 = vpop.xlane.xlu0 %3355  ;;  %v3588_v59 = vsel %vm2225_vm0, %v13669_v0, 0.0 }
 0x39b   : > { %v9292_v27 = vsel %vm7456_vm6, %v9291_v21, %v9287_v15  ;;  %v5674_v28 = vmul.f32 0.0625, %v3356_v40  ;;  %v15099_v15 = vld [vmem:[%s15663_s25 + $0x728] sm:$0xff]  }
 0x39c   : > { %v9306_v6 = vrot.slane %v5675_v44, %v15837_v61  ;;  %v9297_v33 = vsel %vm7463_vm7, %v9296_v63, %v9292_v27  ;;  %3574 = vadd.xlane.f32.xlu1 %v3573_v54  ;;  %3571 = vadd.xlane.f32.xlu0 %v3570_v17  ;;  %v13673_v63 = vunpack.c.l.bf16 %v15098_v5  ;;  %v13678_v44 = vunpack.c.h.bf16 %v15099_v15 }
 0x39d   : > { %v9301_v34 = vrot.slane %v5674_v28, %v15843_v1  ;;  %v3365_v10 = vpop.xlane.xlu1 %3364  ;;  %v13677_v40 = vunpack.c.l.bf16 %v15099_v15  ;;  %v3597_v28 = vsel %vm2225_vm0, %v13674_v14, 0.0 }
 0x39e   : > { %v5677_v19 = vmul.f32 0.0625, %v3365_v10  ;;  %v3362_v55 = vpop.xlane.xlu0 %3361  ;;  %v3603_v49 = vsel %vm2225_vm0, %v13678_v44, 0.0 }
 0x39f   : > { %v9302_v50 = vsel %vm20169_vm8, %v9301_v34, %v9297_v33  ;;  %v5676_v51 = vmul.f32 0.0625, %v3362_v55  ;;  %v15100_v34 = vld [vmem:[%s15663_s25 + $0x730] sm:$0xff]  }
 0x3a0   : > { %v9316_v3 = vrot.slane %v5677_v19, %v15852_v18  ;;  %v9307_v32 = vsel %vm20216_vm9, %v9306_v6, %v9302_v50  ;;  %3580 = vadd.xlane.f32.xlu1 %v3579_v4  ;;  %3577 = vadd.xlane.f32.xlu0 %v3576_v36  ;;  %vm20217_vm9 = vcmask 786112   ;;  %v3594_v6 = vsel %vm2225_vm0, %v13673_v63, 0.0 }
 0x3a1   : > { %v9311_v58 = vrot.slane %v5676_v51, %v15858_v24  ;;  %v3371_v53 = vpop.xlane.xlu1 %3370  ;;  %v3600_v19 = vsel %vm2225_vm0, %v13677_v40, 0.0  ;;  %v13682_v51 = vunpack.c.h.bf16 %v15100_v34 }
 0x3a2   : > { %v5679_v2 = vmul.f32 0.0625, %v3371_v53  ;;  %v3368_v30 = vpop.xlane.xlu0 %3367 }
 0x3a3   : > { %v9312_v29 = vsel %vm7484_vm10, %v9311_v58, %v9307_v32  ;;  %v5678_v26 = vmul.f32 0.0625, %v3368_v30  ;;  %v15101_v32 = vld [vmem:[%s15663_s25 + $0x738] sm:$0xff]  }
 0x3a4   : > { %v9326_v8 = vrot.slane %v5679_v2, %v15867_v37  ;;  %v9317_v25 = vsel %vm20217_vm9, %v9316_v3, %v9312_v29  ;;  %3586 = vadd.xlane.f32.xlu1 %v3585_v62  ;;  %3583 = vadd.xlane.f32.xlu0 %v3582_v56  ;;  %v13681_v3 = vunpack.c.l.bf16 %v15100_v34  ;;  %vm20218_vm9 = vcmask 1043459  }
 0x3a5   : > { %v9321_v47 = vrot.slane %v5678_v26, %v15873_v43  ;;  %v3377_v7 = vpop.xlane.xlu1 %3376  ;;  %v13686_v2 = vunpack.c.h.bf16 %v15101_v32  ;;  %v3609_v29 = vsel %vm2225_vm0, %v13682_v51, 0.0 }
 0x3a6   : > { %v5681_v31 = vmul.f32 0.0625, %v3377_v7  ;;  %v3374_v21 = vpop.xlane.xlu0 %3373  ;;  %v3606_v26 = vsel %vm2225_vm0, %v13681_v3, 0.0 }
 0x3a7   : > { %v9322_v16 = vsel %vm7498_vm12, %v9321_v47, %v9317_v25  ;;  %v5680_v54 = vmul.f32 0.0625, %v3374_v21  ;;  %v3615_v63 = vsel %vm2225_vm0, %v13686_v2, 0.0 }
 0x3a8   : > { %v9336_v17 = vrot.slane %v5681_v31, %v15882_v57  ;;  %v9327_v39 = vsel %vm7505_vm13, %v9326_v8, %v9322_v16  ;;  %3592 = vadd.xlane.f32.xlu1 %v3591_v46  ;;  %3589 = vadd.xlane.f32.xlu0 %v3588_v59  ;;  %v15102_v46 = vld [vmem:[%s15663_s25 + $0x740] sm:$0xff]  }
 0x3a9   : > { %v9331_v20 = vrot.slane %v5680_v54, %v15887_v60  ;;  %v3383_v27 = vpop.xlane.xlu1 %3382  ;;  %v13690_v16 = vunpack.c.h.bf16 %v15102_v46  ;;  %v13689_v54 = vunpack.c.l.bf16 %v15102_v46 }
 0x3aa   : > { %v5683_v33 = vmul.f32 0.0625, %v3383_v27  ;;  %v3380_v4 = vpop.xlane.xlu0 %3379 }
 0x3ab   : > { %v9332_v10 = vsel %vm7512_vm14, %v9331_v20, %v9327_v39  ;;  %v5682_v36 = vmul.f32 0.0625, %v3380_v4  ;;  %v3621_v34 = vsel %vm2225_vm0, %v13690_v16, 0.0 }
 0x3ac   : > { %v9337_v38 = vsel %vm7519_vm15, %v9336_v17, %v9332_v10  ;;  %v9345_v48 = vrot.slane %v5683_v33, %v15796_v12  ;;  %3598 = vadd.xlane.f32.xlu1 %v3597_v28  ;;  %3595 = vadd.xlane.f32.xlu0 %v3594_v6  ;;  %v15103_v17 = vld [vmem:[%s15663_s25 + $0x748] sm:$0xff]   ;;  %v3618_v10 = vsel %vm2225_vm0, %v13689_v54, 0.0 }
 0x3ad   : > { %v9341_v55 = vrot.slane %v5682_v36, %v15790_v9  ;;  %v3389_v50 = vpop.xlane.xlu1 %3388  ;;  %v17349_v52 = vsel %vm20218_vm9, %v9337_v38, %v17221_v45  ;;  %v13685_v45 = vunpack.c.l.bf16 %v15101_v32  ;;  %v13694_v6 = vunpack.c.h.bf16 %v15103_v17 }
 0x3ae   : > { %v5685_v58 = vmul.f32 0.0625, %v3389_v50  ;;  %v3386_v53 = vpop.xlane.xlu0 %3385  ;;  %v13693_v36 = vunpack.c.l.bf16 %v15103_v17  ;;  %vm20219_vm9 = vcmask 654912  }
 0x3af   : > { %v9346_v62 = vsel %vm7421_vm1, %v9345_v48, %v9341_v55  ;;  %v5684_v56 = vmul.f32 0.0625, %v3386_v53  ;;  %v3612_v21 = vsel %vm2225_vm0, %v13685_v45, 0.0  ;;  %v3627_v3 = vsel %vm2225_vm0, %v13694_v6, 0.0 }
 0x3b0   : > { %v9355_v0 = vrot.slane %v5685_v58, %v15793_v11  ;;  %3604 = vadd.xlane.f32.xlu1 %v3603_v49  ;;  %3601 = vadd.xlane.f32.xlu0 %v3600_v19  ;;  %v15104_v49 = vld [vmem:[%s15663_s25 + $0x750] sm:$0xff]   ;;  %v3624_v53 = vsel %vm2225_vm0, %v13693_v36, 0.0 }
 0x3b1   : > { %v9350_v30 = vrot.slane %v5684_v56, %v15799_v13  ;;  %v3395_v5 = vpop.xlane.xlu1 %3394  ;;  %v13697_v56 = vunpack.c.l.bf16 %v15104_v49 }
 0x3b2   : > { %v5687_v8 = vmul.f32 0.0625, %v3395_v5  ;;  %v3392_v25 = vpop.xlane.xlu0 %3391 }
 0x3b3   : > { %v9351_v47 = vsel %vm7428_vm2, %v9350_v30, %v9346_v62  ;;  %v5686_v7 = vmul.f32 0.0625, %v3392_v25  ;;  %v13698_v62 = vunpack.c.h.bf16 %v15104_v49 }
 0x3b4   : > { %v9365_v59 = vrot.slane %v5687_v8, %v15804_v22  ;;  %v9356_v14 = vsel %vm7435_vm3, %v9355_v0, %v9351_v47  ;;  %3610 = vadd.xlane.f32.xlu1 %v3609_v29  ;;  %3607 = vadd.xlane.f32.xlu0 %v3606_v26  ;;  %v15105_v0 = vld [vmem:[%s15663_s25 + $0x758] sm:$0xff]  }
 0x3b5   : > { %v9360_v15 = vrot.slane %v5686_v7, %v15807_v23  ;;  %v3401_v31 = vpop.xlane.xlu1 %3400  ;;  %v13702_v8 = vunpack.c.h.bf16 %v15105_v0  ;;  %v3633_v47 = vsel %vm2225_vm0, %v13698_v62, 0.0  ;;  %v3630_v7 = vsel %vm2225_vm0, %v13697_v56, 0.0 }
 0x3b6   : > { %v5689_v39 = vmul.f32 0.0625, %v3401_v31  ;;  %v3398_v44 = vpop.xlane.xlu0 %3397 }
 0x3b7   : > { %v9361_v40 = vsel %vm7442_vm4, %v9360_v15, %v9356_v14  ;;  %v5688_v20 = vmul.f32 0.0625, %v3398_v44  ;;  %v15106_v15 = vld [vmem:[%s15663_s25 + $0x760] sm:$0xff]   ;;  %v3639_v17 = vsel %vm2225_vm0, %v13702_v8, 0.0 }
 0x3b8   : > { %v9375_v27 = vrot.slane %v5689_v39, %v15821_v41  ;;  %v9366_v28 = vsel %vm7449_vm5, %v9365_v59, %v9361_v40  ;;  %3616 = vadd.xlane.f32.xlu1 %v3615_v63  ;;  %3613 = vadd.xlane.f32.xlu0 %v3612_v21  ;;  %v13701_v59 = vunpack.c.l.bf16 %v15105_v0 }
 0x3b9   : > { %v9370_v33 = vrot.slane %v5688_v20, %v15824_v42  ;;  %v3407_v4 = vpop.xlane.xlu1 %3406  ;;  %v13706_v20 = vunpack.c.h.bf16 %v15106_v15 }
 0x3ba   : > { %v5691_v38 = vmul.f32 0.0625, %v3407_v4  ;;  %v3404_v48 = vpop.xlane.xlu0 %3403  ;;  %v3636_v40 = vsel %vm2225_vm0, %v13701_v59, 0.0 }
 0x3bb   : > { %v9371_v19 = vsel %vm7456_vm6, %v9370_v33, %v9366_v28  ;;  %v5690_v55 = vmul.f32 0.0625, %v3404_v48  ;;  %v15107_v28 = vld [vmem:[%s15663_s25 + $0x768] sm:$0xff]  }
 0x3bc   : > { %v9385_v50 = vrot.slane %v5691_v38, %v15837_v61  ;;  %v9376_v51 = vsel %vm7463_vm7, %v9375_v27, %v9371_v19  ;;  %3622 = vadd.xlane.f32.xlu1 %v3621_v34  ;;  %3619 = vadd.xlane.f32.xlu0 %v3618_v10  ;;  %v13705_v27 = vunpack.c.l.bf16 %v15106_v15  ;;  %v13710_v38 = vunpack.c.h.bf16 %v15107_v28 }
 0x3bd   : > { %v9380_v32 = vrot.slane %v5690_v55, %v15843_v1  ;;  %v3413_v58 = vpop.xlane.xlu1 %3412  ;;  %v13709_v48 = vunpack.c.l.bf16 %v15107_v28  ;;  %v3645_v55 = vsel %vm2225_vm0, %v13706_v20, 0.0 }
 0x3be   : > { %v5693_v2 = vmul.f32 0.0625, %v3413_v58  ;;  %v3410_v30 = vpop.xlane.xlu0 %3409  ;;  %v3651_v0 = vsel %vm2225_vm0, %v13710_v38, 0.0 }
 0x3bf   : > { %v9381_v5 = vsel %vm20169_vm8, %v9380_v32, %v9376_v51  ;;  %v5692_v29 = vmul.f32 0.0625, %v3410_v30  ;;  %v15108_v32 = vld [vmem:[%s15663_s25 + $0x770] sm:$0xff]  }
 0x3c0   : > { %v9395_v26 = vrot.slane %v5693_v2, %v15852_v18  ;;  %v9386_v45 = vsel %vm20219_vm9, %v9385_v50, %v9381_v5  ;;  %3628 = vadd.xlane.f32.xlu1 %v3627_v3  ;;  %3625 = vadd.xlane.f32.xlu0 %v3624_v53  ;;  %vm20220_vm9 = vcmask 786112   ;;  %v3642_v50 = vsel %vm2225_vm0, %v13705_v27, 0.0 }
 0x3c1   : > { %v9390_v25 = vrot.slane %v5692_v29, %v15858_v24  ;;  %v3419_v46 = vpop.xlane.xlu1 %3418  ;;  %v3648_v2 = vsel %vm2225_vm0, %v13709_v48, 0.0  ;;  %v13714_v29 = vunpack.c.h.bf16 %v15108_v32 }
 0x3c2   : > { %v5695_v14 = vmul.f32 0.0625, %v3419_v46  ;;  %v3416_v63 = vpop.xlane.xlu0 %3415 }
 0x3c3   : > { %v9391_v31 = vsel %vm7484_vm10, %v9390_v25, %v9386_v45  ;;  %v5694_v21 = vmul.f32 0.0625, %v3416_v63  ;;  %v15109_v45 = vld [vmem:[%s15663_s25 + $0x778] sm:$0xff]  }
 0x3c4   : > { %v9405_v16 = vrot.slane %v5695_v14, %v15867_v37  ;;  %v9396_v54 = vsel %vm20220_vm9, %v9395_v26, %v9391_v31  ;;  %3634 = vadd.xlane.f32.xlu1 %v3633_v47  ;;  %3631 = vadd.xlane.f32.xlu0 %v3630_v7  ;;  %v13713_v26 = vunpack.c.l.bf16 %v15108_v32  ;;  %vm20221_vm9 = vcmask 1044484  }
 0x3c5   : > { %v9400_v39 = vrot.slane %v5694_v21, %v15873_v43  ;;  %v3425_v44 = vpop.xlane.xlu1 %3424  ;;  %v13718_v14 = vunpack.c.h.bf16 %v15109_v45  ;;  %v3657_v31 = vsel %vm2225_vm0, %v13714_v29, 0.0 }
 0x3c6   : > { %v5697_v6 = vmul.f32 0.0625, %v3425_v44  ;;  %v3422_v33 = vpop.xlane.xlu0 %3421  ;;  %v3654_v21 = vsel %vm2225_vm0, %v13713_v26, 0.0 }
 0x3c7   : > { %v9401_v4 = vsel %vm7498_vm12, %v9400_v39, %v9396_v54  ;;  %v5696_v34 = vmul.f32 0.0625, %v3422_v33  ;;  %v3663_v27 = vsel %vm2225_vm0, %v13718_v14, 0.0 }
 0x3c8   : > { %v9415_v10 = vrot.slane %v5697_v6, %v15882_v57  ;;  %v9406_v36 = vsel %vm7505_vm13, %v9405_v16, %v9401_v4  ;;  %3640 = vadd.xlane.f32.xlu1 %v3639_v17  ;;  %3637 = vadd.xlane.f32.xlu0 %v3636_v40  ;;  %v15110_v17 = vld [vmem:[%s15663_s25 + $0x780] sm:$0xff]  }
 0x3c9   : > { %v9410_v49 = vrot.slane %v5696_v34, %v15887_v60  ;;  %v3431_v19 = vpop.xlane.xlu1 %3430  ;;  %v13722_v4 = vunpack.c.h.bf16 %v15110_v17  ;;  %v13721_v34 = vunpack.c.l.bf16 %v15110_v17 }
 0x3ca   : > { %v5699_v51 = vmul.f32 0.0625, %v3431_v19  ;;  %v3428_v3 = vpop.xlane.xlu0 %3427 }
 0x3cb   : > { %v9411_v58 = vsel %vm7512_vm14, %v9410_v49, %v9406_v36  ;;  %v5698_v53 = vmul.f32 0.0625, %v3428_v3  ;;  %v3669_v32 = vsel %vm2225_vm0, %v13722_v4, 0.0 }
 0x3cc   : > { %v9416_v62 = vsel %vm7519_vm15, %v9415_v10, %v9411_v58  ;;  %v9424_v56 = vrot.slane %v5699_v51, %v15796_v12  ;;  %3646 = vadd.xlane.f32.xlu1 %v3645_v55  ;;  %3643 = vadd.xlane.f32.xlu0 %v3642_v50  ;;  %v15111_v10 = vld [vmem:[%s15663_s25 + $0x788] sm:$0xff]   ;;  %v3666_v58 = vsel %vm2225_vm0, %v13721_v34, 0.0 }
 0x3cd   : > { %v9420_v30 = vrot.slane %v5698_v53, %v15790_v9  ;;  %v3437_v5 = vpop.xlane.xlu1 %3436  ;;  %v17408_v8 = vsel %vm20221_vm9, %v9416_v62, %v17290_v35  ;;  %v13717_v35 = vunpack.c.l.bf16 %v15109_v45  ;;  %v13726_v50 = vunpack.c.h.bf16 %v15111_v10 }
 0x3ce   : > { %v5701_v25 = vmul.f32 0.0625, %v3437_v5  ;;  %v3434_v46 = vpop.xlane.xlu0 %3433  ;;  %v13725_v53 = vunpack.c.l.bf16 %v15111_v10  ;;  %vm20222_vm9 = vcmask 654912  }
 0x3cf   : > { %v9425_v47 = vsel %vm7421_vm1, %v9424_v56, %v9420_v30  ;;  %v5700_v7 = vmul.f32 0.0625, %v3434_v46  ;;  %v3660_v33 = vsel %vm2225_vm0, %v13717_v35, 0.0  ;;  %v3675_v26 = vsel %vm2225_vm0, %v13726_v50, 0.0 }
 0x3d0   : > { %v9434_v59 = vrot.slane %v5701_v25, %v15793_v11  ;;  %3652 = vadd.xlane.f32.xlu1 %v3651_v0  ;;  %3649 = vadd.xlane.f32.xlu0 %v3648_v2  ;;  %v15112_v0 = vld [vmem:[%s15663_s25 + $0x790] sm:$0xff]   ;;  %v3672_v46 = vsel %vm2225_vm0, %v13725_v53, 0.0 }
 0x3d1   : > { %v9429_v63 = vrot.slane %v5700_v7, %v15799_v13  ;;  %v3443_v15 = vpop.xlane.xlu1 %3442  ;;  %v13729_v7 = vunpack.c.l.bf16 %v15112_v0 }
 0x3d2   : > { %v5703_v16 = vmul.f32 0.0625, %v3443_v15  ;;  %v3440_v54 = vpop.xlane.xlu0 %3439 }
 0x3d3   : > { %v9430_v39 = vsel %vm7428_vm2, %v9429_v63, %v9425_v47  ;;  %v5702_v44 = vmul.f32 0.0625, %v3440_v54  ;;  %v13730_v47 = vunpack.c.h.bf16 %v15112_v0 }
 0x3d4   : > { %v9444_v40 = vrot.slane %v5703_v16, %v15804_v22  ;;  %v9435_v20 = vsel %vm7435_vm3, %v9434_v59, %v9430_v39  ;;  %3658 = vadd.xlane.f32.xlu1 %v3657_v31  ;;  %3655 = vadd.xlane.f32.xlu0 %v3654_v21  ;;  %v15113_v59 = vld [vmem:[%s15663_s25 + $0x798] sm:$0xff]  }
 0x3d5   : > { %v9439_v28 = vrot.slane %v5702_v44, %v15807_v23  ;;  %v3449_v6 = vpop.xlane.xlu1 %3448  ;;  %v13734_v16 = vunpack.c.h.bf16 %v15113_v59  ;;  %v3681_v39 = vsel %vm2225_vm0, %v13730_v47, 0.0  ;;  %v3678_v44 = vsel %vm2225_vm0, %v13729_v7, 0.0 }
 0x3d6   : > { %v5705_v36 = vmul.f32 0.0625, %v3449_v6  ;;  %v3446_v38 = vpop.xlane.xlu0 %3445 }
 0x3d7   : > { %v9440_v48 = vsel %vm7442_vm4, %v9439_v28, %v9435_v20  ;;  %v5704_v49 = vmul.f32 0.0625, %v3446_v38  ;;  %v15114_v28 = vld [vmem:[%s15663_s25 + $0x7a0] sm:$0xff]   ;;  %v3687_v10 = vsel %vm2225_vm0, %v13734_v16, 0.0 }
 0x3d8   : > { %v9454_v19 = vrot.slane %v5705_v36, %v15821_v41  ;;  %v9445_v55 = vsel %vm7449_vm5, %v9444_v40, %v9440_v48  ;;  %3664 = vadd.xlane.f32.xlu1 %v3663_v27  ;;  %3661 = vadd.xlane.f32.xlu0 %v3660_v33  ;;  %v13733_v40 = vunpack.c.l.bf16 %v15113_v59 }
 0x3d9   : > { %v9449_v51 = vrot.slane %v5704_v49, %v15824_v42  ;;  %v3455_v3 = vpop.xlane.xlu1 %3454  ;;  %v13738_v49 = vunpack.c.h.bf16 %v15114_v28 }
 0x3da   : > { %v5707_v62 = vmul.f32 0.0625, %v3455_v3  ;;  %v3452_v56 = vpop.xlane.xlu0 %3451  ;;  %v3684_v48 = vsel %vm2225_vm0, %v13733_v40, 0.0 }
 0x3db   : > { %v9450_v2 = vsel %vm7456_vm6, %v9449_v51, %v9445_v55  ;;  %v5706_v30 = vmul.f32 0.0625, %v3452_v56  ;;  %v15115_v55 = vld [vmem:[%s15663_s25 + $0x7a8] sm:$0xff]  }
 0x3dc   : > { %v9464_v5 = vrot.slane %v5707_v62, %v15837_v61  ;;  %v9455_v29 = vsel %vm7463_vm7, %v9454_v19, %v9450_v2  ;;  %3670 = vadd.xlane.f32.xlu1 %v3669_v32  ;;  %3667 = vadd.xlane.f32.xlu0 %v3666_v58  ;;  %v13737_v19 = vunpack.c.l.bf16 %v15114_v28  ;;  %v13742_v62 = vunpack.c.h.bf16 %v15115_v55 }
 0x3dd   : > { %v9459_v45 = vrot.slane %v5706_v30, %v15843_v1  ;;  %v3461_v25 = vpop.xlane.xlu1 %3460  ;;  %v13741_v56 = vunpack.c.l.bf16 %v15115_v55  ;;  %v3693_v30 = vsel %vm2225_vm0, %v13738_v49, 0.0 }
 0x3de   : > { %v5709_v14 = vmul.f32 0.0625, %v3461_v25  ;;  %v3458_v63 = vpop.xlane.xlu0 %3457  ;;  %v3699_v59 = vsel %vm2225_vm0, %v13742_v62, 0.0 }
 0x3df   : > { %v9460_v15 = vsel %vm20169_vm8, %v9459_v45, %v9455_v29  ;;  %v5708_v31 = vmul.f32 0.0625, %v3458_v63  ;;  %v15116_v45 = vld [vmem:[%s15663_s25 + $0x7b0] sm:$0xff]  }
 0x3e0   : > { %v9474_v21 = vrot.slane %v5709_v14, %v15852_v18  ;;  %v9465_v35 = vsel %vm20222_vm9, %v9464_v5, %v9460_v15  ;;  %3676 = vadd.xlane.f32.xlu1 %v3675_v26  ;;  %3673 = vadd.xlane.f32.xlu0 %v3672_v46  ;;  %vm20223_vm9 = vcmask 786112   ;;  %v3690_v5 = vsel %vm2225_vm0, %v13737_v19, 0.0 }
 0x3e1   : > { %v9469_v54 = vrot.slane %v5708_v31, %v15858_v24  ;;  %v3467_v17 = vpop.xlane.xlu1 %3466  ;;  %v3696_v14 = vsel %vm2225_vm0, %v13741_v56, 0.0  ;;  %v13746_v31 = vunpack.c.h.bf16 %v15116_v45 }
 0x3e2   : > { %v5711_v20 = vmul.f32 0.0625, %v3467_v17  ;;  %v3464_v27 = vpop.xlane.xlu0 %3463 }
 0x3e3   : > { %v9470_v6 = vsel %vm7484_vm10, %v9469_v54, %v9465_v35  ;;  %v5710_v33 = vmul.f32 0.0625, %v3464_v27  ;;  %v15117_v35 = vld [vmem:[%s15663_s25 + $0x7b8] sm:$0xff]  }
 0x3e4   : > { %v9484_v4 = vrot.slane %v5711_v20, %v15867_v37  ;;  %v9475_v34 = vsel %vm20223_vm9, %v9474_v21, %v9470_v6  ;;  %3682 = vadd.xlane.f32.xlu1 %v3681_v39  ;;  %3679 = vadd.xlane.f32.xlu0 %v3678_v44  ;;  %v13745_v21 = vunpack.c.l.bf16 %v15116_v45  ;;  %vm20224_vm9 = vcmask 1044484  }
 0x3e5   : > { %v9479_v36 = vrot.slane %v5710_v33, %v15873_v43  ;;  %v3473_v38 = vpop.xlane.xlu1 %3472  ;;  %v13750_v20 = vunpack.c.h.bf16 %v15117_v35  ;;  %v3705_v6 = vsel %vm2225_vm0, %v13746_v31, 0.0 }
 0x3e6   : > { %v5713_v50 = vmul.f32 0.0625, %v3473_v38  ;;  %v3470_v51 = vpop.xlane.xlu0 %3469  ;;  %v3702_v33 = vsel %vm2225_vm0, %v13745_v21, 0.0 }
 0x3e7   : > { %v9480_v3 = vsel %vm7498_vm12, %v9479_v36, %v9475_v34  ;;  %v5712_v32 = vmul.f32 0.0625, %v3470_v51  ;;  %v3711_v19 = vsel %vm2225_vm0, %v13750_v20, 0.0 }
 0x3e8   : > { %v9494_v58 = vrot.slane %v5713_v50, %v15882_v57  ;;  %v9485_v53 = vsel %vm7505_vm13, %v9484_v4, %v9480_v3  ;;  %3688 = vadd.xlane.f32.xlu1 %v3687_v10  ;;  %3685 = vadd.xlane.f32.xlu0 %v3684_v48  ;;  %v15118_v10 = vld [vmem:[%s15663_s25 + $0x7c0] sm:$0xff]  }
 0x3e9   : > { %v9489_v0 = vrot.slane %v5712_v32, %v15887_v60  ;;  %v3479_v2 = vpop.xlane.xlu1 %3478  ;;  %v13754_v3 = vunpack.c.h.bf16 %v15118_v10  ;;  %v13753_v32 = vunpack.c.l.bf16 %v15118_v10 }
 0x3ea   : > { %v5715_v29 = vmul.f32 0.0625, %v3479_v2  ;;  %v3476_v26 = vpop.xlane.xlu0 %3475 }
 0x3eb   : > { %v9490_v25 = vsel %vm7512_vm14, %v9489_v0, %v9485_v53  ;;  %v5714_v46 = vmul.f32 0.0625, %v3476_v26  ;;  %v3717_v45 = vsel %vm2225_vm0, %v13754_v3, 0.0 }
 0x3ec   : > { %v9495_v47 = vsel %vm7519_vm15, %v9494_v58, %v9490_v25  ;;  %v9503_v7 = vrot.slane %v5715_v29, %v15796_v12  ;;  %3694 = vadd.xlane.f32.xlu1 %v3693_v30  ;;  %3691 = vadd.xlane.f32.xlu0 %v3690_v5  ;;  %v15119_v58 = vld [vmem:[%s15663_s25 + $0x7c8] sm:$0xff]   ;;  %v3714_v25 = vsel %vm2225_vm0, %v13753_v32, 0.0 }
 0x3ed   : > { %v9499_v63 = vrot.slane %v5714_v46, %v15790_v9  ;;  %v3485_v15 = vpop.xlane.xlu1 %3484  ;;  %v17467_v16 = vsel %vm20224_vm9, %v9495_v47, %v17349_v52  ;;  %v13749_v52 = vunpack.c.l.bf16 %v15117_v35  ;;  %v13758_v5 = vunpack.c.h.bf16 %v15119_v58 }
 0x3ee   : > { %v5717_v54 = vmul.f32 0.0625, %v3485_v15  ;;  %v3482_v17 = vpop.xlane.xlu0 %3481  ;;  %v13757_v46 = vunpack.c.l.bf16 %v15119_v58  ;;  %vm20225_vm9 = vcmask 654912  }
 0x3ef   : > { %v9504_v39 = vsel %vm7421_vm1, %v9503_v7, %v9499_v63  ;;  %v5716_v44 = vmul.f32 0.0625, %v3482_v17  ;;  %v3708_v51 = vsel %vm2225_vm0, %v13749_v52, 0.0  ;;  %v3723_v21 = vsel %vm2225_vm0, %v13758_v5, 0.0 }
 0x3f0   : > { %v9513_v40 = vrot.slane %v5717_v54, %v15793_v11  ;;  %3700 = vadd.xlane.f32.xlu1 %v3699_v59  ;;  %3697 = vadd.xlane.f32.xlu0 %v3696_v14  ;;  %v15120_v59 = vld [vmem:[%s15663_s25 + $0x7d0] sm:$0xff]   ;;  %v3720_v17 = vsel %vm2225_vm0, %v13757_v46, 0.0 }
 0x3f1   : > { %v9508_v27 = vrot.slane %v5716_v44, %v15799_v13  ;;  %v3491_v28 = vpop.xlane.xlu1 %3490  ;;  %v13761_v44 = vunpack.c.l.bf16 %v15120_v59 }
 0x3f2   : > { %v5719_v4 = vmul.f32 0.0625, %v3491_v28  ;;  %v3488_v34 = vpop.xlane.xlu0 %3487 }
 0x3f3   : > { %v9509_v36 = vsel %vm7428_vm2, %v9508_v27, %v9504_v39  ;;  %v5718_v38 = vmul.f32 0.0625, %v3488_v34  ;;  %v13762_v39 = vunpack.c.h.bf16 %v15120_v59 }
 0x3f4   : > { %v9523_v48 = vrot.slane %v5719_v4, %v15804_v22  ;;  %v9514_v49 = vsel %vm7435_vm3, %v9513_v40, %v9509_v36  ;;  %3706 = vadd.xlane.f32.xlu1 %v3705_v6  ;;  %3703 = vadd.xlane.f32.xlu0 %v3702_v33  ;;  %v15121_v40 = vld [vmem:[%s15663_s25 + $0x7d8] sm:$0xff]  }
 0x3f5   : > { %v9518_v55 = vrot.slane %v5718_v38, %v15807_v23  ;;  %v3497_v50 = vpop.xlane.xlu1 %3496  ;;  %v13766_v4 = vunpack.c.h.bf16 %v15121_v40  ;;  %v3729_v36 = vsel %vm2225_vm0, %v13762_v39, 0.0  ;;  %v3726_v38 = vsel %vm2225_vm0, %v13761_v44, 0.0 }
 0x3f6   : > { %v5721_v53 = vmul.f32 0.0625, %v3497_v50  ;;  %v3494_v62 = vpop.xlane.xlu0 %3493 }
 0x3f7   : > { %v9519_v56 = vsel %vm7442_vm4, %v9518_v55, %v9514_v49  ;;  %v5720_v0 = vmul.f32 0.0625, %v3494_v62  ;;  %v15122_v55 = vld [vmem:[%s15663_s25 + $0x7e0] sm:$0xff]   ;;  %v3735_v58 = vsel %vm2225_vm0, %v13766_v4, 0.0 }
 0x3f8   : > { %v9533_v2 = vrot.slane %v5721_v53, %v15821_v41  ;;  %v9524_v30 = vsel %vm7449_vm5, %v9523_v48, %v9519_v56  ;;  %3712 = vadd.xlane.f32.xlu1 %v3711_v19  ;;  %3709 = vadd.xlane.f32.xlu0 %v3708_v51  ;;  %v13765_v48 = vunpack.c.l.bf16 %v15121_v40 }
 0x3f9   : > { %v9528_v29 = vrot.slane %v5720_v0, %v15824_v42  ;;  %v3503_v26 = vpop.xlane.xlu1 %3502  ;;  %v13770_v0 = vunpack.c.h.bf16 %v15122_v55 }
 0x3fa   : > { %v5723_v47 = vmul.f32 0.0625, %v3503_v26  ;;  %v3500_v7 = vpop.xlane.xlu0 %3499  ;;  %v3732_v56 = vsel %vm2225_vm0, %v13765_v48, 0.0 }
 0x3fb   : > { %v9529_v14 = vsel %vm7456_vm6, %v9528_v29, %v9524_v30  ;;  %v5722_v63 = vmul.f32 0.0625, %v3500_v7  ;;  %v15123_v30 = vld [vmem:[%s15663_s25 + $0x7e8] sm:$0xff]  }
 0x3fc   : > { %v9543_v15 = vrot.slane %v5723_v47, %v15837_v61  ;;  %v9534_v31 = vsel %vm7463_vm7, %v9533_v2, %v9529_v14  ;;  %3718 = vadd.xlane.f32.xlu1 %v3717_v45  ;;  %3715 = vadd.xlane.f32.xlu0 %v3714_v25  ;;  %v13769_v2 = vunpack.c.l.bf16 %v15122_v55  ;;  %v13774_v47 = vunpack.c.h.bf16 %v15123_v30 }
 0x3fd   : > { %v9538_v35 = vrot.slane %v5722_v63, %v15843_v1  ;;  %v3509_v54 = vpop.xlane.xlu1 %3508  ;;  %v13773_v7 = vunpack.c.l.bf16 %v15123_v30  ;;  %v3741_v63 = vsel %vm2225_vm0, %v13770_v0, 0.0 }
 0x3fe   : > { %v5725_v20 = vmul.f32 0.0625, %v3509_v54  ;;  %v3506_v27 = vpop.xlane.xlu0 %3505  ;;  %v3747_v44 = vsel %vm2225_vm0, %v13774_v47, 0.0 }
 0x3ff   : > { %v9539_v28 = vsel %vm20169_vm8, %v9538_v35, %v9534_v31  ;;  %v5724_v6 = vmul.f32 0.0625, %v3506_v27  ;;  %v15124_v35 = vld [vmem:[%s15663_s25 + $0x7f0] sm:$0xff]   ;;  %v3744_v40 = vsel %vm2225_vm0, %v13773_v7, 0.0 }
 0x400   : > { %v9553_v33 = vrot.slane %v5725_v20, %v15852_v18  ;;  %v9544_v52 = vsel %vm20225_vm9, %v9543_v15, %v9539_v28  ;;  %3724 = vadd.xlane.f32.xlu1 %v3723_v21  ;;  %3721 = vadd.xlane.f32.xlu0 %v3720_v17  ;;  %vm20226_vm9 = vcmask 786112   ;;  %v3738_v15 = vsel %vm2225_vm0, %v13769_v2, 0.0 }
 0x401   : > { %v9548_v34 = vrot.slane %v5724_v6, %v15858_v24  ;;  %v3515_v10 = vpop.xlane.xlu1 %3514  ;;  %v13778_v6 = vunpack.c.h.bf16 %v15124_v35 }
 0x402   : > { %v5727_v49 = vmul.f32 0.0625, %v3515_v10  ;;  %v3512_v19 = vpop.xlane.xlu0 %3511 }
 0x403   : > { %v9549_v50 = vsel %vm7484_vm10, %v9548_v34, %v9544_v52  ;;  %v5726_v51 = vmul.f32 0.0625, %v3512_v19  ;;  %v15125_v52 = vld [vmem:[%s15663_s25 + $0x7f8] sm:$0xff]  }
 0x404   : > { %v9563_v3 = vrot.slane %v5727_v49, %v15867_v37  ;;  %v9554_v32 = vsel %vm20226_vm9, %v9553_v33, %v9549_v50  ;;  %3730 = vadd.xlane.f32.xlu1 %v3729_v36  ;;  %3727 = vadd.xlane.f32.xlu0 %v3726_v38  ;;  %v13777_v33 = vunpack.c.l.bf16 %v15124_v35  ;;  %vm20227_vm9 = vcmask 1045509  }
 0x405   : > { %v9558_v53 = vrot.slane %v5726_v51, %v15873_v43  ;;  %v3521_v62 = vpop.xlane.xlu1 %3520  ;;  %v13782_v49 = vunpack.c.h.bf16 %v15125_v52  ;;  %v3753_v50 = vsel %vm2225_vm0, %v13778_v6, 0.0 }
 0x406   : > { %v5729_v5 = vmul.f32 0.0625, %v3521_v62  ;;  %v3518_v29 = vpop.xlane.xlu0 %3517  ;;  %v3750_v51 = vsel %vm2225_vm0, %v13777_v33, 0.0 }
 0x407   : > { %v9559_v26 = vsel %vm7498_vm12, %v9558_v53, %v9554_v32  ;;  %v5728_v45 = vmul.f32 0.0625, %v3518_v29  ;;  %v3759_v2 = vsel %vm2225_vm0, %v13782_v49, 0.0 }
 0x408   : > { %v9573_v25 = vrot.slane %v5729_v5, %v15882_v57  ;;  %v9564_v46 = vsel %vm7505_vm13, %v9563_v3, %v9559_v26  ;;  %3736 = vadd.xlane.f32.xlu1 %v3735_v58  ;;  %3733 = vadd.xlane.f32.xlu0 %v3732_v56  ;;  %v15126_v58 = vld [vmem:[%s15663_s25 + $0x800] sm:$0xff]  }
 0x409   : > { %v9568_v59 = vrot.slane %v5728_v45, %v15887_v60  ;;  %v3527_v14 = vpop.xlane.xlu1 %3526  ;;  %v13786_v26 = vunpack.c.h.bf16 %v15126_v58  ;;  %v13785_v45 = vunpack.c.l.bf16 %v15126_v58 }
 0x40a   : > { %v5731_v31 = vmul.f32 0.0625, %v3527_v14  ;;  %v3524_v21 = vpop.xlane.xlu0 %3523 }
 0x40b   : > { %v9569_v54 = vsel %vm7512_vm14, %v9568_v59, %v9564_v46  ;;  %v5730_v17 = vmul.f32 0.0625, %v3524_v21  ;;  %v3765_v35 = vsel %vm2225_vm0, %v13786_v26, 0.0 }
 0x40c   : > { %v9582_v39 = vrot.slane %v5731_v31, %v15796_v12  ;;  %3742 = vadd.xlane.f32.xlu1 %v3741_v63  ;;  %3739 = vadd.xlane.f32.xlu0 %v3738_v15  ;;  %v9574_v20 = vsel %vm7519_vm15, %v9573_v25, %v9569_v54  ;;  %v15127_v25 = vld [vmem:[%s15663_s25 + $0x808] sm:$0xff]   ;;  %v3762_v54 = vsel %vm2225_vm0, %v13785_v45, 0.0 }
 0x40d   : > { %v9578_v27 = vrot.slane %v5730_v17, %v15790_v9  ;;  %v3533_v28 = vpop.xlane.xlu1 %3532  ;;  %v17526_v4 = vsel %vm20227_vm9, %v9574_v20, %v17408_v8  ;;  %v13781_v8 = vunpack.c.l.bf16 %v15125_v52  ;;  %v13790_v15 = vunpack.c.h.bf16 %v15127_v25 }
 0x40e   : > { %v5733_v34 = vmul.f32 0.0625, %v3533_v28  ;;  %v3530_v10 = vpop.xlane.xlu0 %3529  ;;  %v13789_v17 = vunpack.c.l.bf16 %v15127_v25  ;;  %vm20228_vm9 = vcmask 654912  }
 0x40f   : > { %v9583_v36 = vsel %vm7421_vm1, %v9582_v39, %v9578_v27  ;;  %v5732_v38 = vmul.f32 0.0625, %v3530_v10  ;;  %v3756_v29 = vsel %vm2225_vm0, %v13781_v8, 0.0  ;;  %v3771_v33 = vsel %vm2225_vm0, %v13790_v15, 0.0 }
 0x410   : > { %v9592_v48 = vrot.slane %v5733_v34, %v15793_v11  ;;  %3748 = vadd.xlane.f32.xlu1 %v3747_v44  ;;  %3745 = vadd.xlane.f32.xlu0 %v3744_v40  ;;  %v15128_v40 = vld [vmem:[%s15663_s25 + $0x810] sm:$0xff]   ;;  %v3768_v10 = vsel %vm2225_vm0, %v13789_v17, 0.0 }
 0x411   : > { %v9587_v19 = vrot.slane %v5732_v38, %v15799_v13  ;;  %v3539_v55 = vpop.xlane.xlu1 %3538  ;;  %v13793_v38 = vunpack.c.l.bf16 %v15128_v40 }
 0x412   : > { %v5735_v3 = vmul.f32 0.0625, %v3539_v55  ;;  %v3536_v32 = vpop.xlane.xlu0 %3535 }
 0x413   : > { %v9588_v53 = vsel %vm7428_vm2, %v9587_v19, %v9583_v36  ;;  %v5734_v62 = vmul.f32 0.0625, %v3536_v32  ;;  %v13794_v36 = vunpack.c.h.bf16 %v15128_v40 }
 0x414   : > { %v9602_v56 = vrot.slane %v5735_v3, %v15804_v22  ;;  %v9593_v0 = vsel %vm7435_vm3, %v9592_v48, %v9588_v53  ;;  %3754 = vadd.xlane.f32.xlu1 %v3753_v50  ;;  %3751 = vadd.xlane.f32.xlu0 %v3750_v51  ;;  %v15129_v48 = vld [vmem:[%s15663_s25 + $0x818] sm:$0xff]  }
 0x415   : > { %v9597_v30 = vrot.slane %v5734_v62, %v15807_v23  ;;  %v3545_v5 = vpop.xlane.xlu1 %3544  ;;  %v13798_v3 = vunpack.c.h.bf16 %v15129_v48  ;;  %v3777_v53 = vsel %vm2225_vm0, %v13794_v36, 0.0  ;;  %v3774_v62 = vsel %vm2225_vm0, %v13793_v38, 0.0 }
 0x416   : > { %v5737_v46 = vmul.f32 0.0625, %v3545_v5  ;;  %v3542_v47 = vpop.xlane.xlu0 %3541 }
 0x417   : > { %v9598_v7 = vsel %vm7442_vm4, %v9597_v30, %v9593_v0  ;;  %v5736_v59 = vmul.f32 0.0625, %v3542_v47  ;;  %v15130_v30 = vld [vmem:[%s15663_s25 + $0x820] sm:$0xff]   ;;  %v3783_v25 = vsel %vm2225_vm0, %v13798_v3, 0.0 }
 0x418   : > { %v9612_v14 = vrot.slane %v5737_v46, %v15821_v41  ;;  %v9603_v63 = vsel %vm7449_vm5, %v9602_v56, %v9598_v7  ;;  %3760 = vadd.xlane.f32.xlu1 %v3759_v2  ;;  %3757 = vadd.xlane.f32.xlu0 %v3756_v29  ;;  %v13797_v56 = vunpack.c.l.bf16 %v15129_v48 }
 0x419   : > { %v9607_v31 = vrot.slane %v5736_v59, %v15824_v42  ;;  %v3551_v21 = vpop.xlane.xlu1 %3550  ;;  %v13802_v59 = vunpack.c.h.bf16 %v15130_v30 }
 0x41a   : > { %v5739_v39 = vmul.f32 0.0625, %v3551_v21  ;;  %v3548_v44 = vpop.xlane.xlu0 %3547  ;;  %v3780_v7 = vsel %vm2225_vm0, %v13797_v56, 0.0 }
 0x41b   : > { %v9608_v20 = vsel %vm7456_vm6, %v9607_v31, %v9603_v63  ;;  %v5738_v27 = vmul.f32 0.0625, %v3548_v44  ;;  %v15131_v63 = vld [vmem:[%s15663_s25 + $0x828] sm:$0xff]  }
 0x41c   : > { %v9622_v28 = vrot.slane %v5739_v39, %v15837_v61  ;;  %v9613_v6 = vsel %vm7463_vm7, %v9612_v14, %v9608_v20  ;;  %3766 = vadd.xlane.f32.xlu1 %v3765_v35  ;;  %3763 = vadd.xlane.f32.xlu0 %v3762_v54  ;;  %v13801_v14 = vunpack.c.l.bf16 %v15130_v30  ;;  %v13806_v39 = vunpack.c.h.bf16 %v15131_v63 }
 0x41d   : > { %v9617_v52 = vrot.slane %v5738_v27, %v15843_v1  ;;  %v3557_v34 = vpop.xlane.xlu1 %3556  ;;  %v13805_v44 = vunpack.c.l.bf16 %v15131_v63  ;;  %v3789_v27 = vsel %vm2225_vm0, %v13802_v59, 0.0 }
 0x41e   : > { %v5741_v49 = vmul.f32 0.0625, %v3557_v34  ;;  %v3554_v19 = vpop.xlane.xlu0 %3553  ;;  %v3795_v38 = vsel %vm2225_vm0, %v13806_v39, 0.0 }
 0x41f   : > { %v9618_v55 = vsel %vm20169_vm8, %v9617_v52, %v9613_v6  ;;  %v5740_v50 = vmul.f32 0.0625, %v3554_v19  ;;  %v15132_v52 = vld [vmem:[%s15663_s25 + $0x830] sm:$0xff]   ;;  %v3792_v48 = vsel %vm2225_vm0, %v13805_v44, 0.0 }
 0x420   : > { %v9632_v51 = vrot.slane %v5741_v49, %v15852_v18  ;;  %v9623_v8 = vsel %vm20228_vm9, %v9622_v28, %v9618_v55  ;;  %3772 = vadd.xlane.f32.xlu1 %v3771_v33  ;;  %3769 = vadd.xlane.f32.xlu0 %v3768_v10  ;;  %vm20229_vm9 = vcmask 786112   ;;  %v3786_v28 = vsel %vm2225_vm0, %v13801_v14, 0.0 }
 0x421   : > { %v9627_v32 = vrot.slane %v5740_v50, %v15858_v24  ;;  %v3563_v58 = vpop.xlane.xlu1 %3562  ;;  %v13810_v50 = vunpack.c.h.bf16 %v15132_v52 }
 0x422   : > { %v5743_v0 = vmul.f32 0.0625, %v3563_v58  ;;  %v3560_v2 = vpop.xlane.xlu0 %3559 }
 0x423   : > { %v9628_v5 = vsel %vm7484_vm10, %v9627_v32, %v9623_v8  ;;  %v5742_v29 = vmul.f32 0.0625, %v3560_v2  ;;  %v15133_v8 = vld [vmem:[%s15663_s25 + $0x838] sm:$0xff]  }
 0x424   : > { %v9642_v26 = vrot.slane %v5743_v0, %v15867_v37  ;;  %v9633_v45 = vsel %vm20229_vm9, %v9632_v51, %v9628_v5  ;;  %3778 = vadd.xlane.f32.xlu1 %v3777_v53  ;;  %3775 = vadd.xlane.f32.xlu0 %v3774_v62  ;;  %v13809_v51 = vunpack.c.l.bf16 %v15132_v52  ;;  %vm20230_vm9 = vcmask 1045509  }
 0x425   : > { %v9637_v46 = vrot.slane %v5742_v29, %v15873_v43  ;;  %v3569_v47 = vpop.xlane.xlu1 %3568  ;;  %v13814_v0 = vunpack.c.h.bf16 %v15133_v8  ;;  %v3801_v5 = vsel %vm2225_vm0, %v13810_v50, 0.0 }
 0x426   : > { %v5745_v15 = vmul.f32 0.0625, %v3569_v47  ;;  %v3566_v31 = vpop.xlane.xlu0 %3565  ;;  %v3798_v29 = vsel %vm2225_vm0, %v13809_v51, 0.0 }
 0x427   : > { %v9638_v21 = vsel %vm7498_vm12, %v9637_v46, %v9633_v45  ;;  %v5744_v35 = vmul.f32 0.0625, %v3566_v31  ;;  %v3807_v14 = vsel %vm2225_vm0, %v13814_v0, 0.0 }
 0x428   : > { %v9652_v54 = vrot.slane %v5745_v15, %v15882_v57  ;;  %v9643_v17 = vsel %vm7505_vm13, %v9642_v26, %v9638_v21  ;;  %3784 = vadd.xlane.f32.xlu1 %v3783_v25  ;;  %3781 = vadd.xlane.f32.xlu0 %v3780_v7  ;;  %v15134_v25 = vld [vmem:[%s15663_s25 + $0x840] sm:$0xff]  }
 0x429   : > { %v9647_v40 = vrot.slane %v5744_v35, %v15887_v60  ;;  %v3575_v20 = vpop.xlane.xlu1 %3574  ;;  %v13818_v21 = vunpack.c.h.bf16 %v15134_v25  ;;  %v13817_v35 = vunpack.c.l.bf16 %v15134_v25 }
 0x42a   : > { %v5747_v6 = vmul.f32 0.0625, %v3575_v20  ;;  %v3572_v33 = vpop.xlane.xlu0 %3571 }
 0x42b   : > { %v9648_v34 = vsel %vm7512_vm14, %v9647_v40, %v9643_v17  ;;  %v5746_v10 = vmul.f32 0.0625, %v3572_v33  ;;  %v3813_v52 = vsel %vm2225_vm0, %v13818_v21, 0.0 }
 0x42c   : > { %v9661_v36 = vrot.slane %v5747_v6, %v15796_v12  ;;  %3790 = vadd.xlane.f32.xlu1 %v3789_v27  ;;  %3787 = vadd.xlane.f32.xlu0 %v3786_v28  ;;  %v9653_v49 = vsel %vm7519_vm15, %v9652_v54, %v9648_v34  ;;  %v15135_v54 = vld [vmem:[%s15663_s25 + $0x848] sm:$0xff]   ;;  %v3810_v34 = vsel %vm2225_vm0, %v13817_v35, 0.0 }
 0x42d   : > { %v9657_v19 = vrot.slane %v5746_v10, %v15790_v9  ;;  %v3581_v55 = vpop.xlane.xlu1 %3580  ;;  %v17585_v3 = vsel %vm20230_vm9, %v9653_v49, %v17467_v16  ;;  %v13813_v16 = vunpack.c.l.bf16 %v15133_v8  ;;  %v13822_v28 = vunpack.c.h.bf16 %v15135_v54 }
 0x42e   : > { %v5749_v32 = vmul.f32 0.0625, %v3581_v55  ;;  %v3578_v58 = vpop.xlane.xlu0 %3577  ;;  %v13821_v10 = vunpack.c.l.bf16 %v15135_v54  ;;  %vm20231_vm9 = vcmask 654912  }
 0x42f   : > { %v9662_v53 = vsel %vm7421_vm1, %v9661_v36, %v9657_v19  ;;  %v5748_v62 = vmul.f32 0.0625, %v3578_v58  ;;  %v3804_v31 = vsel %vm2225_vm0, %v13813_v16, 0.0  ;;  %v3819_v51 = vsel %vm2225_vm0, %v13822_v28, 0.0 }
 0x430   : > { %v9671_v56 = vrot.slane %v5749_v32, %v15793_v11  ;;  %3796 = vadd.xlane.f32.xlu1 %v3795_v38  ;;  %3793 = vadd.xlane.f32.xlu0 %v3792_v48  ;;  %v15136_v48 = vld [vmem:[%s15663_s25 + $0x850] sm:$0xff]   ;;  %v3816_v58 = vsel %vm2225_vm0, %v13821_v10, 0.0 }
 0x431   : > { %v9666_v2 = vrot.slane %v5748_v62, %v15799_v13  ;;  %v3587_v30 = vpop.xlane.xlu1 %3586  ;;  %v13825_v62 = vunpack.c.l.bf16 %v15136_v48 }
 0x432   : > { %v5751_v26 = vmul.f32 0.0625, %v3587_v30  ;;  %v3584_v45 = vpop.xlane.xlu0 %3583 }
 0x433   : > { %v9667_v46 = vsel %vm7428_vm2, %v9666_v2, %v9662_v53  ;;  %v5750_v47 = vmul.f32 0.0625, %v3584_v45  ;;  %v13826_v53 = vunpack.c.h.bf16 %v15136_v48 }
 0x434   : > { %v9681_v7 = vrot.slane %v5751_v26, %v15804_v22  ;;  %v9672_v59 = vsel %vm7435_vm3, %v9671_v56, %v9667_v46  ;;  %3802 = vadd.xlane.f32.xlu1 %v3801_v5  ;;  %3799 = vadd.xlane.f32.xlu0 %v3798_v29  ;;  %v15137_v56 = vld [vmem:[%s15663_s25 + $0x858] sm:$0xff]  }
 0x435   : > { %v9676_v63 = vrot.slane %v5750_v47, %v15807_v23  ;;  %v3593_v15 = vpop.xlane.xlu1 %3592  ;;  %v13830_v26 = vunpack.c.h.bf16 %v15137_v56  ;;  %v3825_v46 = vsel %vm2225_vm0, %v13826_v53, 0.0  ;;  %v3822_v47 = vsel %vm2225_vm0, %v13825_v62, 0.0 }
 0x436   : > { %v5753_v17 = vmul.f32 0.0625, %v3593_v15  ;;  %v3590_v39 = vpop.xlane.xlu0 %3589 }
 0x437   : > { %v9677_v44 = vsel %vm7442_vm4, %v9676_v63, %v9672_v59  ;;  %v5752_v40 = vmul.f32 0.0625, %v3590_v39  ;;  %v15138_v63 = vld [vmem:[%s15663_s25 + $0x860] sm:$0xff]   ;;  %v3831_v54 = vsel %vm2225_vm0, %v13830_v26, 0.0 }
 0x438   : > { %v9691_v20 = vrot.slane %v5753_v17, %v15821_v41  ;;  %v9682_v27 = vsel %vm7449_vm5, %v9681_v7, %v9677_v44  ;;  %3808 = vadd.xlane.f32.xlu1 %v3807_v14  ;;  %3805 = vadd.xlane.f32.xlu0 %v3804_v31  ;;  %v13829_v7 = vunpack.c.l.bf16 %v15137_v56 }
 0x439   : > { %v9686_v6 = vrot.slane %v5752_v40, %v15824_v42  ;;  %v3599_v33 = vpop.xlane.xlu1 %3598  ;;  %v13834_v40 = vunpack.c.h.bf16 %v15138_v63 }
 0x43a   : > { %v5755_v36 = vmul.f32 0.0625, %v3599_v33  ;;  %v3596_v38 = vpop.xlane.xlu0 %3595  ;;  %v3828_v44 = vsel %vm2225_vm0, %v13829_v7, 0.0 }
 0x43b   : > { %v9687_v49 = vsel %vm7456_vm6, %v9686_v6, %v9682_v27  ;;  %v5754_v19 = vmul.f32 0.0625, %v3596_v38  ;;  %v15139_v27 = vld [vmem:[%s15663_s25 + $0x868] sm:$0xff]  }
 0x43c   : > { %v9701_v55 = vrot.slane %v5755_v36, %v15837_v61  ;;  %v9692_v50 = vsel %vm7463_vm7, %v9691_v20, %v9687_v49  ;;  %3814 = vadd.xlane.f32.xlu1 %v3813_v52  ;;  %3811 = vadd.xlane.f32.xlu0 %v3810_v34  ;;  %v13833_v20 = vunpack.c.l.bf16 %v15138_v63  ;;  %v13838_v36 = vunpack.c.h.bf16 %v15139_v27 }
 0x43d   : > { %v9696_v8 = vrot.slane %v5754_v19, %v15843_v1  ;;  %v3605_v32 = vpop.xlane.xlu1 %3604  ;;  %v13837_v38 = vunpack.c.l.bf16 %v15139_v27  ;;  %v3837_v19 = vsel %vm2225_vm0, %v13834_v40, 0.0 }
 0x43e   : > { %v5757_v0 = vmul.f32 0.0625, %v3605_v32  ;;  %v3602_v2 = vpop.xlane.xlu0 %3601  ;;  %v3843_v62 = vsel %vm2225_vm0, %v13838_v36, 0.0 }
 0x43f   : > { %v9697_v30 = vsel %vm20169_vm8, %v9696_v8, %v9692_v50  ;;  %v5756_v5 = vmul.f32 0.0625, %v3602_v2  ;;  %v15140_v8 = vld [vmem:[%s15663_s25 + $0x870] sm:$0xff]   ;;  %v3840_v56 = vsel %vm2225_vm0, %v13837_v38, 0.0 }
 0x440   : > { %v9711_v29 = vrot.slane %v5757_v0, %v15852_v18  ;;  %v9702_v16 = vsel %vm20231_vm9, %v9701_v55, %v9697_v30  ;;  %3820 = vadd.xlane.f32.xlu1 %v3819_v51  ;;  %3817 = vadd.xlane.f32.xlu0 %v3816_v58  ;;  %vm20232_vm9 = vcmask 786112   ;;  %v3834_v55 = vsel %vm2225_vm0, %v13833_v20, 0.0 }
 0x441   : > { %v9706_v45 = vrot.slane %v5756_v5, %v15858_v24  ;;  %v3611_v25 = vpop.xlane.xlu1 %3610  ;;  %v13842_v5 = vunpack.c.h.bf16 %v15140_v8 }
 0x442   : > { %v5759_v59 = vmul.f32 0.0625, %v3611_v25  ;;  %v3608_v14 = vpop.xlane.xlu0 %3607 }
 0x443   : > { %v9707_v15 = vsel %vm7484_vm10, %v9706_v45, %v9702_v16  ;;  %v5758_v31 = vmul.f32 0.0625, %v3608_v14  ;;  %v15141_v16 = vld [vmem:[%s15663_s25 + $0x878] sm:$0xff]  }
 0x444   : > { %v9721_v21 = vrot.slane %v5759_v59, %v15867_v37  ;;  %v9712_v35 = vsel %vm20232_vm9, %v9711_v29, %v9707_v15  ;;  %3826 = vadd.xlane.f32.xlu1 %v3825_v46  ;;  %3823 = vadd.xlane.f32.xlu0 %v3822_v47  ;;  %v13841_v29 = vunpack.c.l.bf16 %v15140_v8  ;;  %vm20233_vm9 = vcmask 1046534  }
 0x445   : > { %v9716_v17 = vrot.slane %v5758_v31, %v15873_v43  ;;  %v3617_v39 = vpop.xlane.xlu1 %3616  ;;  %v13846_v59 = vunpack.c.h.bf16 %v15141_v16  ;;  %v3849_v15 = vsel %vm2225_vm0, %v13842_v5, 0.0 }
 0x446   : > { %v5761_v28 = vmul.f32 0.0625, %v3617_v39  ;;  %v3614_v6 = vpop.xlane.xlu0 %3613  ;;  %v3846_v31 = vsel %vm2225_vm0, %v13841_v29, 0.0 }
 0x447   : > { %v9717_v33 = vsel %vm7498_vm12, %v9716_v17, %v9712_v35  ;;  %v5760_v52 = vmul.f32 0.0625, %v3614_v6  ;;  %v3855_v20 = vsel %vm2225_vm0, %v13846_v59, 0.0 }
 0x448   : > { %v9731_v34 = vrot.slane %v5761_v28, %v15882_v57  ;;  %v9722_v10 = vsel %vm7505_vm13, %v9721_v21, %v9717_v33  ;;  %3832 = vadd.xlane.f32.xlu1 %v3831_v54  ;;  %3829 = vadd.xlane.f32.xlu0 %v3828_v44  ;;  %v15142_v54 = vld [vmem:[%s15663_s25 + $0x880] sm:$0xff]  }
 0x449   : > { %v9726_v48 = vrot.slane %v5760_v52, %v15887_v60  ;;  %v3623_v49 = vpop.xlane.xlu1 %3622  ;;  %v13850_v33 = vunpack.c.h.bf16 %v15142_v54  ;;  %v13849_v52 = vunpack.c.l.bf16 %v15142_v54 }
 0x44a   : > { %v5763_v50 = vmul.f32 0.0625, %v3623_v49  ;;  %v3620_v51 = vpop.xlane.xlu0 %3619 }
 0x44b   : > { %v9727_v32 = vsel %vm7512_vm14, %v9726_v48, %v9722_v10  ;;  %v5762_v58 = vmul.f32 0.0625, %v3620_v51  ;;  %v3861_v8 = vsel %vm2225_vm0, %v13850_v33, 0.0 }
 0x44c   : > { %v9740_v53 = vrot.slane %v5763_v50, %v15796_v12  ;;  %3838 = vadd.xlane.f32.xlu1 %v3837_v19  ;;  %3835 = vadd.xlane.f32.xlu0 %v3834_v55  ;;  %v9732_v0 = vsel %vm7519_vm15, %v9731_v34, %v9727_v32  ;;  %v15143_v34 = vld [vmem:[%s15663_s25 + $0x888] sm:$0xff]   ;;  %v3858_v32 = vsel %vm2225_vm0, %v13849_v52, 0.0 }
 0x44d   : > { %v9736_v2 = vrot.slane %v5762_v58, %v15790_v9  ;;  %v3629_v30 = vpop.xlane.xlu1 %3628  ;;  %v17644_v26 = vsel %vm20233_vm9, %v9732_v0, %v17526_v4  ;;  %v13845_v4 = vunpack.c.l.bf16 %v15141_v16  ;;  %v13854_v55 = vunpack.c.h.bf16 %v15143_v34 }
 0x44e   : > { %v5765_v45 = vmul.f32 0.0625, %v3629_v30  ;;  %v3626_v25 = vpop.xlane.xlu0 %3625  ;;  %v13853_v58 = vunpack.c.l.bf16 %v15143_v34  ;;  %vm20234_vm9 = vcmask 654912  }
 0x44f   : > { %v9741_v46 = vsel %vm7421_vm1, %v9740_v53, %v9736_v2  ;;  %v5764_v47 = vmul.f32 0.0625, %v3626_v25  ;;  %v3852_v6 = vsel %vm2225_vm0, %v13845_v4, 0.0  ;;  %v3867_v29 = vsel %vm2225_vm0, %v13854_v55, 0.0 }
 0x450   : > { %v9750_v7 = vrot.slane %v5765_v45, %v15793_v11  ;;  %3844 = vadd.xlane.f32.xlu1 %v3843_v62  ;;  %3841 = vadd.xlane.f32.xlu0 %v3840_v56  ;;  %v15144_v56 = vld [vmem:[%s15663_s25 + $0x890] sm:$0xff]   ;;  %v3864_v25 = vsel %vm2225_vm0, %v13853_v58, 0.0 }
 0x451   : > { %v9745_v14 = vrot.slane %v5764_v47, %v15799_v13  ;;  %v3635_v63 = vpop.xlane.xlu1 %3634  ;;  %v13857_v47 = vunpack.c.l.bf16 %v15144_v56 }
 0x452   : > { %v5767_v21 = vmul.f32 0.0625, %v3635_v63  ;;  %v3632_v35 = vpop.xlane.xlu0 %3631 }
 0x453   : > { %v9746_v17 = vsel %vm7428_vm2, %v9745_v14, %v9741_v46  ;;  %v5766_v39 = vmul.f32 0.0625, %v3632_v35  ;;  %v13858_v46 = vunpack.c.h.bf16 %v15144_v56 }
 0x454   : > { %v9760_v44 = vrot.slane %v5767_v21, %v15804_v22  ;;  %v9751_v40 = vsel %vm7435_vm3, %v9750_v7, %v9746_v17  ;;  %3850 = vadd.xlane.f32.xlu1 %v3849_v15  ;;  %3847 = vadd.xlane.f32.xlu0 %v3846_v31  ;;  %v15145_v7 = vld [vmem:[%s15663_s25 + $0x898] sm:$0xff]  }
 0x455   : > { %v9755_v27 = vrot.slane %v5766_v39, %v15807_v23  ;;  %v3641_v28 = vpop.xlane.xlu1 %3640  ;;  %v13862_v21 = vunpack.c.h.bf16 %v15145_v7  ;;  %v3873_v17 = vsel %vm2225_vm0, %v13858_v46, 0.0  ;;  %v3870_v39 = vsel %vm2225_vm0, %v13857_v47, 0.0 }
 0x456   : > { %v5769_v10 = vmul.f32 0.0625, %v3641_v28  ;;  %v3638_v36 = vpop.xlane.xlu0 %3637 }
 0x457   : > { %v9756_v38 = vsel %vm7442_vm4, %v9755_v27, %v9751_v40  ;;  %v5768_v48 = vmul.f32 0.0625, %v3638_v36  ;;  %v15146_v27 = vld [vmem:[%s15663_s25 + $0x8a0] sm:$0xff]   ;;  %v3879_v34 = vsel %vm2225_vm0, %v13862_v21, 0.0 }
 0x458   : > { %v9770_v49 = vrot.slane %v5769_v10, %v15821_v41  ;;  %v9761_v19 = vsel %vm7449_vm5, %v9760_v44, %v9756_v38  ;;  %3856 = vadd.xlane.f32.xlu1 %v3855_v20  ;;  %3853 = vadd.xlane.f32.xlu0 %v3852_v6  ;;  %v13861_v44 = vunpack.c.l.bf16 %v15145_v7 }
 0x459   : > { %v9765_v50 = vrot.slane %v5768_v48, %v15824_v42  ;;  %v3647_v51 = vpop.xlane.xlu1 %3646  ;;  %v13866_v48 = vunpack.c.h.bf16 %v15146_v27 }
 0x45a   : > { %v5771_v53 = vmul.f32 0.0625, %v3647_v51  ;;  %v3644_v62 = vpop.xlane.xlu0 %3643  ;;  %v3876_v38 = vsel %vm2225_vm0, %v13861_v44, 0.0 }
 0x45b   : > { %v9766_v0 = vsel %vm7456_vm6, %v9765_v50, %v9761_v19  ;;  %v5770_v2 = vmul.f32 0.0625, %v3644_v62  ;;  %v15147_v19 = vld [vmem:[%s15663_s25 + $0x8a8] sm:$0xff]  }
 0x45c   : > { %v9780_v30 = vrot.slane %v5771_v53, %v15837_v61  ;;  %v9771_v5 = vsel %vm7463_vm7, %v9770_v49, %v9766_v0  ;;  %3862 = vadd.xlane.f32.xlu1 %v3861_v8  ;;  %3859 = vadd.xlane.f32.xlu0 %v3858_v32  ;;  %v13865_v49 = vunpack.c.l.bf16 %v15146_v27  ;;  %v13870_v53 = vunpack.c.h.bf16 %v15147_v19 }
 0x45d   : > { %v9775_v16 = vrot.slane %v5770_v2, %v15843_v1  ;;  %v3653_v45 = vpop.xlane.xlu1 %3652  ;;  %v3885_v0 = vsel %vm2225_vm0, %v13866_v48, 0.0  ;;  %v15152_v48 = vld [vmem:[%s15663_s25 + $0x8d0] sm:$0xff]  }
 0x45e   : > { %v5773_v59 = vmul.f32 0.0625, %v3653_v45  ;;  %v3650_v14 = vpop.xlane.xlu0 %3649  ;;  %v3882_v2 = vsel %vm2225_vm0, %v13865_v49, 0.0  ;;  %v3891_v45 = vsel %vm2225_vm0, %v13870_v53, 0.0 }
 0x45f   : > { %v9776_v63 = vsel %vm20169_vm8, %v9775_v16, %v9771_v5  ;;  %v5772_v15 = vmul.f32 0.0625, %v3650_v14 }
 0x460   : > { %v9790_v31 = vrot.slane %v5773_v59, %v15852_v18  ;;  %v9781_v4 = vsel %vm20234_vm9, %v9780_v30, %v9776_v63  ;;  %3868 = vadd.xlane.f32.xlu1 %v3867_v29  ;;  %3865 = vadd.xlane.f32.xlu0 %v3864_v25  ;;  %vm20235_vm9 = vcmask 786112   ;;  %v13869_v30 = vunpack.c.l.bf16 %v15147_v19  ;;  %v15148_v29 = vld [vmem:[%s15663_s25 + $0x8b0] sm:$0xff]  }
 0x461   : > { %v9785_v35 = vrot.slane %v5772_v15, %v15858_v24  ;;  %v3659_v54 = vpop.xlane.xlu1 %3658  ;;  %v13874_v7 = vunpack.c.h.bf16 %v15148_v29  ;;  %v13873_v59 = vunpack.c.l.bf16 %v15148_v29  ;;  %v15149_v15 = vld [vmem:[%s15663_s25 + $0x8b8] sm:$0xff]   ;;  %v15154_v29 = vld [vmem:[%s15663_s25 + $0x8e0] sm:$0xff]  }
 0x462   : > { %v5775_v40 = vmul.f32 0.0625, %v3659_v54  ;;  %v3656_v20 = vpop.xlane.xlu0 %3655  ;;  %v3888_v47 = vsel %vm2225_vm0, %v13869_v30, 0.0  ;;  %v13877_v54 = vunpack.c.l.bf16 %v15149_v15 }
 0x463   : > { %v9786_v28 = vsel %vm7484_vm10, %v9785_v35, %v9781_v4  ;;  %v5774_v6 = vmul.f32 0.0625, %v3656_v20  ;;  %v3897_v4 = vsel %vm2225_vm0, %v13874_v7, 0.0  ;;  %v3894_v21 = vsel %vm2225_vm0, %v13873_v59, 0.0 }
 0x464   : > { %v9800_v33 = vrot.slane %v5775_v40, %v15867_v37  ;;  %v9791_v52 = vsel %vm20235_vm9, %v9790_v31, %v9786_v28  ;;  %3874 = vadd.xlane.f32.xlu1 %v3873_v17  ;;  %3871 = vadd.xlane.f32.xlu0 %v3870_v39  ;;  %vm20236_vm9 = vcmask 1046534   ;;  %v13878_v35 = vunpack.c.h.bf16 %v15149_v15  ;;  %v15150_v39 = vld [vmem:[%s15663_s25 + $0x8c0] sm:$0xff]   ;;  %v15155_v15 = vld [vmem:[%s15663_s25 + $0x8e8] sm:$0xff]  }
 0x465   : > { %v9795_v10 = vrot.slane %v5774_v6, %v15873_v43  ;;  %v3665_v36 = vpop.xlane.xlu1 %3664  ;;  %v3900_v40 = vsel %vm2225_vm0, %v13877_v54, 0.0  ;;  %v13882_v20 = vunpack.c.h.bf16 %v15150_v39  ;;  %v13881_v27 = vunpack.c.l.bf16 %v15150_v39  ;;  %v15151_v6 = vld [vmem:[%s15663_s25 + $0x8c8] sm:$0xff]  }
 0x466   : > { %v5777_v55 = vmul.f32 0.0625, %v3665_v36  ;;  %v3662_v50 = vpop.xlane.xlu0 %3661  ;;  %v3903_v44 = vsel %vm2225_vm0, %v13878_v35, 0.0  ;;  %v13885_v36 = vunpack.c.l.bf16 %v15151_v6  ;;  %v13897_v7 = vunpack.c.l.bf16 %v15154_v29 }
 0x467   : > { %v9796_v51 = vsel %vm7498_vm12, %v9795_v10, %v9791_v52  ;;  %v5776_v8 = vmul.f32 0.0625, %v3662_v50  ;;  %v3909_v52 = vsel %vm2225_vm0, %v13882_v20, 0.0  ;;  %v13886_v10 = vunpack.c.h.bf16 %v15151_v6 }
 0x468   : > { %v9810_v32 = vrot.slane %v5777_v55, %v15882_v57  ;;  %v9801_v58 = vsel %vm7505_vm13, %v9800_v33, %v9796_v51  ;;  %3880 = vadd.xlane.f32.xlu1 %v3879_v34  ;;  %3877 = vadd.xlane.f32.xlu0 %v3876_v38  ;;  %v3906_v34 = vsel %vm2225_vm0, %v13881_v27, 0.0  ;;  %v3912_v55 = vsel %vm2225_vm0, %v13885_v36, 0.0 }
 0x469   : > { %v9805_v62 = vrot.slane %v5776_v8, %v15887_v60  ;;  %v17691_v56 = vpop.xlane.xlu1 %3670  ;;  %v3915_v19 = vsel %vm2225_vm0, %v13886_v10, 0.0  ;;  %v13890_v50 = vunpack.c.h.bf16 %v15152_v48  ;;  %v13889_v51 = vunpack.c.l.bf16 %v15152_v48 }
 0x46a   : > { %v17695_v5 = vpop.xlane.xlu0 %3667  ;;  %v13901_v20 = vunpack.c.l.bf16 %v15155_v15 }
 0x46b   : > { %v9806_v16 = vsel %vm7512_vm14, %v9805_v62, %v9801_v58  ;;  %v3921_v53 = vsel %vm2225_vm0, %v13890_v50, 0.0  ;;  %v3918_v62 = vsel %vm2225_vm0, %v13889_v51, 0.0 }
 0x46c   : > { %3886 = vadd.xlane.f32.xlu1 %v3885_v0  ;;  %3883 = vadd.xlane.f32.xlu0 %v3882_v2  ;;  %v9811_v25 = vsel %vm7519_vm15, %v9810_v32, %v9806_v16  ;;  %v15153_v32 = vld [vmem:[%s15663_s25 + $0x8d8] sm:$0xff]  }
 0x46d   : > { %v17701_v46 = vpop.xlane.xlu1 %3676  ;;  %v17706_v14 = vsel %vm20236_vm9, %v9811_v25, %v17585_v3  ;;  %v13894_v0 = vunpack.c.h.bf16 %v15153_v32  ;;  %v13893_v2 = vunpack.c.l.bf16 %v15153_v32  ;;  %v15157_v32 = vld [vmem:[%s15663_s25 + $0x8f8] sm:$0xff]   ;;  %vm20237_vm9 = vcmask 654912  }
 0x46e   : > { %v3674_v63 = vpop.xlane.xlu0 %3673 }
 0x46f   : > { %v3924_v25 = vsel %vm2225_vm0, %v13893_v2, 0.0  ;;  %v5780_v35 = vmul.f32 0.0625, %v3674_v63 }
 0x470   : > { %3892 = vadd.xlane.f32.xlu1 %v3891_v45  ;;  %3889 = vadd.xlane.f32.xlu0 %v3888_v47  ;;  %v3927_v45 = vsel %vm2225_vm0, %v13894_v0, 0.0  ;;  %v13898_v47 = vunpack.c.h.bf16 %v15154_v29 }
 0x471   : > { %v17709_v31 = vpop.xlane.xlu1 %3682  ;;  %v9824_v10 = vrot.slane %v5780_v35, %v15799_v13 }
 0x472   : > { %v17713_v17 = vpop.xlane.xlu0 %3679  ;;  %v3933_v39 = vsel %vm2225_vm0, %v13898_v47, 0.0 }
 0x473   : > { %v5782_v36 = vmul.f32 0.0625, %v17713_v17 }
 0x474   : > { %3898 = vadd.xlane.f32.xlu1 %v3897_v4  ;;  %3895 = vadd.xlane.f32.xlu0 %v3894_v21  ;;  %v5779_v4 = vmul.f32 0.0625, %v17691_v56  ;;  %v5778_v21 = vmul.f32 0.0625, %v17695_v5  ;;  %v5781_v5 = vmul.f32 0.0625, %v17701_v46 }
 0x475   : > { %v17716_v3 = vpop.xlane.xlu1 %3688  ;;  %v9834_v47 = vrot.slane %v5782_v36, %v15807_v23 }
 0x476   : > { %v17720_v28 = vpop.xlane.xlu0 %3685  ;;  %v9815_v56 = vrot.slane %v5778_v21, %v15790_v9  ;;  %v9829_v29 = vrot.slane %v5781_v5, %v15793_v11 }
 0x478   : > { %3904 = vadd.xlane.f32.xlu1 %v3903_v44  ;;  %3901 = vadd.xlane.f32.xlu0 %v3900_v40  ;;  %v3930_v44 = vsel %vm2225_vm0, %v13897_v7, 0.0  ;;  %v13902_v40 = vunpack.c.h.bf16 %v15155_v15  ;;  %v5784_v7 = vmul.f32 0.0625, %v17720_v28  ;;  %v15158_v28 = vld [vmem:[%s15663_s25 + $0x900] sm:$0xff]  }
 0x479   : > { %v17723_v33 = vpop.xlane.xlu1 %3694 }
 0x47a   : > { %v17727_v38 = vpop.xlane.xlu0 %3691 }
 0x47c   : > { %3910 = vadd.xlane.f32.xlu1 %v3909_v52  ;;  %3907 = vadd.xlane.f32.xlu0 %v3906_v34  ;;  %v15156_v52 = vld [vmem:[%s15663_s25 + $0x8f0] sm:$0xff]   ;;  %v9819_v34 = vrot.slane %v5779_v4, %v15796_v12 }
 0x47d   : > { %v17730_v49 = vpop.xlane.xlu1 %3700  ;;  %v13906_v50 = vunpack.c.h.bf16 %v15156_v52  ;;  %v13905_v51 = vunpack.c.l.bf16 %v15156_v52  ;;  %v5785_v52 = vmul.f32 0.0625, %v17716_v3  ;;  %v13913_v3 = vunpack.c.l.bf16 %v15158_v28 }
 0x47e   : > { %v17734_v8 = vpop.xlane.xlu0 %3697  ;;  %v9820_v17 = vsel %vm7421_vm1, %v9819_v34, %v9815_v56 }
 0x47f   : > { %v3945_v21 = vsel %vm2225_vm0, %v13906_v50, 0.0  ;;  %v3942_v35 = vsel %vm2225_vm0, %v13905_v51, 0.0  ;;  %v13914_v50 = vunpack.c.h.bf16 %v15158_v28  ;;  %v15159_v51 = vld [vmem:[%s15663_s25 + $0x908] sm:$0xff]  }
 0x480   : > { %3916 = vadd.xlane.f32.xlu1 %v3915_v19  ;;  %3913 = vadd.xlane.f32.xlu0 %v3912_v55  ;;  %v3939_v19 = vsel %vm2225_vm0, %v13902_v40, 0.0  ;;  %v3936_v55 = vsel %vm2225_vm0, %v13901_v20, 0.0 }
 0x481   : > { %v17737_v58 = vpop.xlane.xlu1 %3706 }
 0x482   : > { %v17741_v30 = vpop.xlane.xlu0 %3703 }
 0x484   : > { %3922 = vadd.xlane.f32.xlu1 %v3921_v53  ;;  %3919 = vadd.xlane.f32.xlu0 %v3918_v62  ;;  %v5783_v53 = vmul.f32 0.0625, %v17709_v31  ;;  %v13910_v31 = vunpack.c.h.bf16 %v15157_v32 }
 0x485   : > { %v17744_v16 = vpop.xlane.xlu1 %3712 }
 0x486   : > { %v17748_v59 = vpop.xlane.xlu0 %3709  ;;  %v3951_v36 = vsel %vm2225_vm0, %v13910_v31, 0.0 }
 0x488   : > { %3928 = vadd.xlane.f32.xlu1 %v3927_v45  ;;  %3925 = vadd.xlane.f32.xlu0 %v3924_v25  ;;  %v9825_v25 = vsel %vm7428_vm2, %v9824_v10, %v9820_v17  ;;  %v5786_v10 = vmul.f32 0.0625, %v17727_v38 }
 0x489   : > { %v3719_v54 = vpop.xlane.xlu1 %3718 }
 0x48a   : > { %v5795_v27 = vmul.f32 0.0625, %v3719_v54  ;;  %v3716_v6 = vpop.xlane.xlu0 %3715  ;;  %v13909_v54 = vunpack.c.l.bf16 %v15157_v32  ;;  %v5787_v32 = vmul.f32 0.0625, %v17723_v33  ;;  %v5788_v33 = vmul.f32 0.0625, %v17734_v8  ;;  %v15160_v8 = vld [vmem:[%s15663_s25 + $0x910] sm:$0xff]  }
 0x48b   : > { %v5794_v63 = vmul.f32 0.0625, %v3716_v6  ;;  %v9830_v6 = vsel %vm7435_vm3, %v9829_v29, %v9825_v25  ;;  %v9854_v25 = vrot.slane %v5786_v10, %v15843_v1 }
 0x48c   : > { %3934 = vadd.xlane.f32.xlu1 %v3933_v39  ;;  %3931 = vadd.xlane.f32.xlu0 %v3930_v44  ;;  %v9898_v62 = vrot.slane %v5795_v27, %v15796_v12  ;;  %v9839_v39 = vrot.slane %v5783_v53, %v15804_v22  ;;  %v9835_v5 = vsel %vm7442_vm4, %v9834_v47, %v9830_v6  ;;  %v13918_v47 = vunpack.c.h.bf16 %v15159_v51 }
 0x48d   : > { %v3725_v48 = vpop.xlane.xlu1 %3724  ;;  %v9894_v46 = vrot.slane %v5794_v63, %v15790_v9  ;;  %v9844_v63 = vrot.slane %v5784_v7, %v15824_v42 }
 0x48e   : > { %v5797_v0 = vmul.f32 0.0625, %v3725_v48  ;;  %v3722_v2 = vpop.xlane.xlu0 %3721 }
 0x48f   : > { %v5796_v45 = vmul.f32 0.0625, %v3722_v2  ;;  %v9899_v44 = vsel %vm7421_vm1, %v9898_v62, %v9894_v46  ;;  %v9840_v2 = vsel %vm7449_vm5, %v9839_v39, %v9835_v5  ;;  %v3963_v5 = vsel %vm2225_vm0, %v13918_v47, 0.0 }
 0x490   : > { %3940 = vadd.xlane.f32.xlu1 %v3939_v19  ;;  %3937 = vadd.xlane.f32.xlu0 %v3936_v55  ;;  %v9908_v40 = vrot.slane %v5797_v0, %v15793_v11  ;;  %v3948_v55 = vsel %vm2225_vm0, %v13909_v54, 0.0  ;;  %v9849_v0 = vrot.slane %v5785_v52, %v15821_v41 }
 0x491   : > { %v9903_v15 = vrot.slane %v5796_v45, %v15799_v13  ;;  %v3731_v4 = vpop.xlane.xlu1 %3730  ;;  %v9845_v45 = vsel %vm7456_vm6, %v9844_v63, %v9840_v2 }
 0x492   : > { %v5799_v20 = vmul.f32 0.0625, %v3731_v4  ;;  %v3728_v27 = vpop.xlane.xlu0 %3727  ;;  %v3954_v4 = vsel %vm2225_vm0, %v13913_v3, 0.0 }
 0x493   : > { %v9904_v34 = vsel %vm7428_vm2, %v9903_v15, %v9899_v44  ;;  %v5798_v56 = vmul.f32 0.0625, %v3728_v27  ;;  %v3957_v15 = vsel %vm2225_vm0, %v13914_v50, 0.0  ;;  %v5789_v27 = vmul.f32 0.0625, %v17730_v49 }
 0x494   : > { %3946 = vadd.xlane.f32.xlu1 %v3945_v21  ;;  %3943 = vadd.xlane.f32.xlu0 %v3942_v35  ;;  %v9918_v53 = vrot.slane %v5799_v20, %v15804_v22  ;;  %v9909_v62 = vsel %vm7435_vm3, %v9908_v40, %v9904_v34  ;;  %v13917_v21 = vunpack.c.l.bf16 %v15159_v51  ;;  %v9859_v35 = vrot.slane %v5787_v32, %v15837_v61 }
 0x495   : > { %v9913_v48 = vrot.slane %v5798_v56, %v15807_v23  ;;  %v3737_v19 = vpop.xlane.xlu1 %3736  ;;  %v9850_v20 = vsel %vm7463_vm7, %v9849_v0, %v9845_v45  ;;  %v9864_v34 = vrot.slane %v5788_v33, %v15858_v24  ;;  %v5790_v56 = vmul.f32 0.0625, %v17741_v30 }
 0x496   : > { %v5801_v46 = vmul.f32 0.0625, %v3737_v19  ;;  %v3734_v38 = vpop.xlane.xlu0 %3733  ;;  %v9855_v52 = vsel %vm20169_vm8, %v9854_v25, %v9850_v20  ;;  %v13921_v49 = vunpack.c.l.bf16 %v15160_v8  ;;  %v15161_v19 = vld [vmem:[%s15663_s25 + $0x918] sm:$0xff]   ;;  %v9869_v32 = vrot.slane %v5789_v27, %v15852_v18 }
 0x497   : > { %v9914_v17 = vsel %vm7442_vm4, %v9913_v48, %v9909_v62  ;;  %v5800_v29 = vmul.f32 0.0625, %v3734_v38  ;;  %v13922_v48 = vunpack.c.h.bf16 %v15160_v8  ;;  %v9874_v0 = vrot.slane %v5790_v56, %v15873_v43 }
 0x498   : > { %3952 = vadd.xlane.f32.xlu1 %v3951_v36  ;;  %3949 = vadd.xlane.f32.xlu0 %v3948_v55  ;;  %v9928_v54 = vrot.slane %v5801_v46, %v15821_v41  ;;  %v9919_v39 = vsel %vm7449_vm5, %v9918_v53, %v9914_v17  ;;  %v3960_v36 = vsel %vm2225_vm0, %v13917_v21, 0.0  ;;  %v5791_v55 = vmul.f32 0.0625, %v17737_v58 }
 0x499   : > { %v9923_v7 = vrot.slane %v5800_v29, %v15824_v42  ;;  %v3743_v31 = vpop.xlane.xlu1 %3742  ;;  %v9860_v53 = vsel %vm20237_vm9, %v9859_v35, %v9855_v52  ;;  %v5792_v58 = vmul.f32 0.0625, %v17748_v59  ;;  %v13926_v2 = vunpack.c.h.bf16 %v15161_v19  ;;  %v15162_v59 = vld [vmem:[%s15663_s25 + $0x920] sm:$0xff]  }
 0x49a   : > { %v5803_v44 = vmul.f32 0.0625, %v3743_v31  ;;  %v3740_v40 = vpop.xlane.xlu0 %3739  ;;  %v9865_v38 = vsel %vm7484_vm10, %v9864_v34, %v9860_v53  ;;  %v3969_v45 = vsel %vm2225_vm0, %v13922_v48, 0.0  ;;  %v3966_v25 = vsel %vm2225_vm0, %v13921_v49, 0.0  ;;  %v15163_v34 = vld [vmem:[%s15663_s25 + $0x928] sm:$0xff]  }
 0x49b   : > { %v9924_v28 = vsel %vm7456_vm6, %v9923_v7, %v9919_v39  ;;  %v5802_v6 = vmul.f32 0.0625, %v3740_v40  ;;  %v13925_v33 = vunpack.c.l.bf16 %v15161_v19  ;;  %v9879_v47 = vrot.slane %v5791_v55, %v15867_v37 }
 0x49c   : > { %3958 = vadd.xlane.f32.xlu1 %v3957_v15  ;;  %3955 = vadd.xlane.f32.xlu0 %v3954_v4  ;;  %v9938_v50 = vrot.slane %v5803_v44, %v15837_v61  ;;  %v9929_v3 = vsel %vm7463_vm7, %v9928_v54, %v9924_v28  ;;  %v5793_v35 = vmul.f32 0.0625, %v17744_v16  ;;  %v9884_v40 = vrot.slane %v5792_v58, %v15887_v60 }
 0x49d   : > { %v9933_v63 = vrot.slane %v5802_v6, %v15843_v1  ;;  %v3749_v10 = vpop.xlane.xlu1 %3748  ;;  %v3975_v8 = vsel %vm2225_vm0, %v13926_v2, 0.0  ;;  %v3972_v28 = vsel %vm2225_vm0, %v13925_v33, 0.0  ;;  %v13930_v6 = vunpack.c.h.bf16 %v15162_v59 }
 0x49e   : > { %v5805_v51 = vmul.f32 0.0625, %v3749_v10  ;;  %v3746_v30 = vpop.xlane.xlu0 %3745  ;;  %v13929_v52 = vunpack.c.l.bf16 %v15162_v59  ;;  %v9889_v10 = vrot.slane %v5793_v35, %v15882_v57  ;;  %v15165_v59 = vld [vmem:[%s15663_s25 + $0x938] sm:$0xff]  }
 0x49f   : > { %v9934_v62 = vsel %vm20169_vm8, %v9933_v63, %v9929_v3  ;;  %v5804_v46 = vmul.f32 0.0625, %v3746_v30  ;;  %vm20238_vm8 = vcmask 786112   ;;  %v13933_v3 = vunpack.c.l.bf16 %v15163_v34 }
 0x4a0   : > { %3964 = vadd.xlane.f32.xlu1 %v3963_v5  ;;  %3961 = vadd.xlane.f32.xlu0 %v3960_v36  ;;  %v9948_v7 = vrot.slane %v5805_v51, %v15852_v18  ;;  %v9939_v31 = vsel %vm20237_vm9, %v9938_v50, %v9934_v62  ;;  %v9870_v21 = vsel %vm20238_vm8, %v9869_v32, %v9865_v38  ;;  %v13934_v50 = vunpack.c.h.bf16 %v15163_v34  ;;  %v15166_v34 = vld [vmem:[%s15663_s25 + $0x940] sm:$0xff]  }
 0x4a1   : > { %v9943_v17 = vrot.slane %v5804_v46, %v15858_v24  ;;  %v3755_v29 = vpop.xlane.xlu1 %3754  ;;  %v9875_v44 = vsel %vm7498_vm12, %v9874_v0, %v9870_v21  ;;  %v3981_v32 = vsel %vm2225_vm0, %v13930_v6, 0.0  ;;  %v3978_v53 = vsel %vm2225_vm0, %v13929_v52, 0.0  ;;  %v15164_v0 = vld [vmem:[%s15663_s25 + $0x930] sm:$0xff]  }
 0x4a2   : > { %v5807_v15 = vmul.f32 0.0625, %v3755_v29  ;;  %v3752_v4 = vpop.xlane.xlu0 %3751  ;;  %v9880_v49 = vsel %vm7505_vm13, %v9879_v47, %v9875_v44  ;;  %v3984_v33 = vsel %vm2225_vm0, %v13933_v3, 0.0  ;;  %v13941_v6 = vunpack.c.l.bf16 %v15165_v59 }
 0x4a3   : > { %v9944_v54 = vsel %vm7484_vm10, %v9943_v17, %v9939_v31  ;;  %v5806_v39 = vmul.f32 0.0625, %v3752_v4  ;;  %v9885_v55 = vsel %vm7512_vm14, %v9884_v40, %v9880_v49  ;;  %v13937_v4 = vunpack.c.l.bf16 %v15164_v0 }
 0x4a4   : > { %3970 = vadd.xlane.f32.xlu1 %v3969_v45  ;;  %3967 = vadd.xlane.f32.xlu0 %v3966_v25  ;;  %v9958_v16 = vrot.slane %v5807_v15, %v15867_v37  ;;  %v9949_v56 = vsel %vm20238_vm8, %v9948_v7, %v9944_v54  ;;  %v9890_v17 = vsel %vm7519_vm15, %v9889_v10, %v9885_v55  ;;  %v3987_v25 = vsel %vm2225_vm0, %v13934_v50, 0.0  ;;  %v15167_v50 = vld [vmem:[%s15663_s25 + $0x948] sm:$0xff]  }
 0x4a5   : > { %v9953_v20 = vrot.slane %v5806_v39, %v15873_v43  ;;  %v3761_v27 = vpop.xlane.xlu1 %3760  ;;  %v13938_v15 = vunpack.c.h.bf16 %v15164_v0  ;;  %v12525_v54 = vsel %vm12510_vm11, %v9890_v17, %v17644_v26  ;;  %v3996_v49 = vsel %vm2225_vm0, %v13941_v6, 0.0 }
 0x4a6   : > { %v5809_v5 = vmul.f32 0.0625, %v3761_v27  ;;  %v3758_v63 = vpop.xlane.xlu0 %3757  ;;  %v13945_v55 = vunpack.c.l.bf16 %v15166_v34  ;;  %v13949_v17 = vunpack.c.l.bf16 %v15167_v50  ;;  %vm20239_vm9 = vcmask 589312  }
 0x4a7   : > { %v9954_v36 = vsel %vm7498_vm12, %v9953_v20, %v9949_v56  ;;  %v5808_v48 = vmul.f32 0.0625, %v3758_v63  ;;  %v3993_v27 = vsel %vm2225_vm0, %v13938_v15, 0.0  ;;  %vm20240_vm8 = vcmask 654912  }
 0x4a8   : > { %v9968_v19 = vrot.slane %v5809_v5, %v15882_v57  ;;  %3976 = vadd.xlane.f32.xlu1 %v3975_v8  ;;  %3973 = vadd.xlane.f32.xlu0 %v3972_v28  ;;  %v9959_v38 = vsel %vm7505_vm13, %v9958_v16, %v9954_v36  ;;  %v13942_v8 = vunpack.c.h.bf16 %v15165_v59  ;;  %v3990_v28 = vsel %vm2225_vm0, %v13937_v4, 0.0 }
 0x4a9   : > { %v9963_v51 = vrot.slane %v5808_v48, %v15887_v60  ;;  %v3767_v30 = vpop.xlane.xlu1 %3766 }
 0x4aa   : > { %v5811_v62 = vmul.f32 0.0625, %v3767_v30  ;;  %v3764_v46 = vpop.xlane.xlu0 %3763  ;;  %v3999_v10 = vsel %vm2225_vm0, %v13942_v8, 0.0 }
 0x4ab   : > { %v5810_v58 = vmul.f32 0.0625, %v3764_v46  ;;  %v9964_v2 = vsel %vm7512_vm14, %v9963_v51, %v9959_v38  ;;  %v13950_v46 = vunpack.c.h.bf16 %v15167_v50 }
 0x4ac   : > { %v9977_v29 = vrot.slane %v5811_v62, %v15796_v12  ;;  %3982 = vadd.xlane.f32.xlu1 %v3981_v32  ;;  %3979 = vadd.xlane.f32.xlu0 %v3978_v53  ;;  %v9969_v45 = vsel %vm7519_vm15, %v9968_v19, %v9964_v2  ;;  %v13946_v19 = vunpack.c.h.bf16 %v15166_v34  ;;  %v4002_v2 = vsel %vm2225_vm0, %v13945_v55, 0.0 }
 0x4ad   : > { %v9973_v47 = vrot.slane %v5810_v58, %v15790_v9  ;;  %v3773_v7 = vpop.xlane.xlu1 %3772  ;;  %v12532_v31 = vsel %vm12510_vm11, %v9969_v45, %v17706_v14  ;;  %v4011_v15 = vsel %vm2225_vm0, %v13950_v46, 0.0 }
 0x4ae   : > { %v5813_v21 = vmul.f32 0.0625, %v3773_v7  ;;  %12638 = vmatprep.mubr.f32.mxu0 %v12532_v31  ;;  %v3770_v35 = vpop.xlane.xlu0 %3769  ;;  %v4005_v58 = vsel %vm2225_vm0, %v13946_v19, 0.0 }
 0x4af   : > { %v9978_v39 = vsel %vm7421_vm1, %v9977_v29, %v9973_v47  ;;  %v5812_v44 = vmul.f32 0.0625, %v3770_v35  ;;  %12639 = vmatmul.mubr.f32.gmra.mrb[2].mxu0 %v12525_v54 }
 0x4b0   : > { %v9987_v40 = vrot.slane %v5813_v21, %v15793_v11  ;;  %3988 = vadd.xlane.f32.xlu1 %v3987_v25  ;;  %3985 = vadd.xlane.f32.xlu0 %v3984_v33  ;;  %v15168_v25 = vld [vmem:[%s15663_s25 + $0x950] sm:$0xff]   ;;  %v4008_v21 = vsel %vm2225_vm0, %v13949_v17, 0.0 }
 0x4b1   : > { %v9982_v14 = vrot.slane %v5812_v44, %v15799_v13  ;;  %v3779_v20 = vpop.xlane.xlu1 %3778  ;;  %v13954_v35 = vunpack.c.h.bf16 %v15168_v25  ;;  %v13953_v54 = vunpack.c.l.bf16 %v15168_v25 }
 0x4b2   : > { %v5815_v52 = vmul.f32 0.0625, %v3779_v20  ;;  %v3776_v26 = vpop.xlane.xlu0 %3775 }
 0x4b3   : > { %v9983_v16 = vsel %vm7428_vm2, %v9982_v14, %v9978_v39  ;;  %v5814_v56 = vmul.f32 0.0625, %v3776_v26  ;;  %v15169_v39 = vld [vmem:[%s15663_s25 + $0x958] sm:$0xff]   ;;  %v4017_v26 = vsel %vm2225_vm0, %v13954_v35, 0.0  ;;  %v4014_v34 = vsel %vm2225_vm0, %v13953_v54, 0.0 }
 0x4b4   : > { %v9997_v5 = vrot.slane %v5815_v52, %v15804_v22  ;;  %v9988_v63 = vsel %vm7435_vm3, %v9987_v40, %v9983_v16  ;;  %3994 = vadd.xlane.f32.xlu1 %v3993_v27  ;;  %3991 = vadd.xlane.f32.xlu0 %v3990_v28  ;;  %v13958_v28 = vunpack.c.h.bf16 %v15169_v39  ;;  %v13957_v16 = vunpack.c.l.bf16 %v15169_v39 }
 0x4b5   : > { %v9992_v36 = vrot.slane %v5814_v56, %v15807_v23  ;;  %v3785_v48 = vpop.xlane.xlu1 %3784 }
 0x4b6   : > { %v5817_v3 = vmul.f32 0.0625, %v3785_v48  ;;  %v3782_v51 = vpop.xlane.xlu0 %3781  ;;  %v4023_v19 = vsel %vm2225_vm0, %v13958_v28, 0.0 }
 0x4b7   : > { %v9993_v30 = vsel %vm7442_vm4, %v9992_v36, %v9988_v63  ;;  %v5816_v32 = vmul.f32 0.0625, %v3782_v51  ;;  %v15170_v63 = vld [vmem:[%s15663_s25 + $0x960] sm:$0xff]  }
 0x4b8   : > { %v10007_v53 = vrot.slane %v5817_v3, %v15821_v41  ;;  %v9998_v62 = vsel %vm7449_vm5, %v9997_v5, %v9993_v30  ;;  %4000 = vadd.xlane.f32.xlu1 %v3999_v10  ;;  %3997 = vadd.xlane.f32.xlu0 %v3996_v49  ;;  %v4020_v3 = vsel %vm2225_vm0, %v13957_v16, 0.0  ;;  %v13962_v51 = vunpack.c.h.bf16 %v15170_v63 }
 0x4b9   : > { %v10002_v38 = vrot.slane %v5816_v32, %v15824_v42  ;;  %v3791_v0 = vpop.xlane.xlu1 %3790  ;;  %v13961_v30 = vunpack.c.l.bf16 %v15170_v63  ;;  %v15171_v32 = vld [vmem:[%s15663_s25 + $0x968] sm:$0xff]  }
 0x4ba   : > { %v5819_v29 = vmul.f32 0.0625, %v3791_v0  ;;  %v3788_v45 = vpop.xlane.xlu0 %3787 }
 0x4bb   : > { %v10003_v33 = vsel %vm7456_vm6, %v10002_v38, %v9998_v62  ;;  %v5818_v47 = vmul.f32 0.0625, %v3788_v45  ;;  %v4029_v45 = vsel %vm2225_vm0, %v13962_v51, 0.0  ;;  %v4026_v25 = vsel %vm2225_vm0, %v13961_v30, 0.0 }
 0x4bc   : > { %v10017_v7 = vrot.slane %v5819_v29, %v15837_v61  ;;  %v10008_v31 = vsel %vm7463_vm7, %v10007_v53, %v10003_v33  ;;  %4006 = vadd.xlane.f32.xlu1 %v4005_v58  ;;  %4003 = vadd.xlane.f32.xlu0 %v4002_v2  ;;  %v13966_v2 = vunpack.c.h.bf16 %v15171_v32  ;;  %v13965_v33 = vunpack.c.l.bf16 %v15171_v32 }
 0x4bd   : > { %v10012_v4 = vrot.slane %v5818_v47, %v15843_v1  ;;  %v3797_v59 = vpop.xlane.xlu1 %3796 }
 0x4be   : > { %v5821_v44 = vmul.f32 0.0625, %v3797_v59  ;;  %v3794_v40 = vpop.xlane.xlu0 %3793  ;;  %v4035_v35 = vsel %vm2225_vm0, %v13966_v2, 0.0 }
 0x4bf   : > { %v10013_v8 = vsel %vm20239_vm9, %v10012_v4, %v10008_v31  ;;  %v5820_v14 = vmul.f32 0.0625, %v3794_v40  ;;  %vm20241_vm9 = vcmask 786112   ;;  %v15172_v31 = vld [vmem:[%s15663_s25 + $0x970] sm:$0xff]  }
 0x4c0   : > { %v10027_v20 = vrot.slane %v5821_v44, %v15852_v18  ;;  %v10018_v27 = vsel %vm20240_vm8, %v10017_v7, %v10013_v8  ;;  %4012 = vadd.xlane.f32.xlu1 %v4011_v15  ;;  %4009 = vadd.xlane.f32.xlu0 %v4008_v21  ;;  %v4032_v44 = vsel %vm2225_vm0, %v13965_v33, 0.0  ;;  %v13970_v40 = vunpack.c.h.bf16 %v15172_v31 }
 0x4c1   : > { %v10022_v6 = vrot.slane %v5820_v14, %v15858_v24  ;;  %v3803_v52 = vpop.xlane.xlu1 %3802  ;;  %v13969_v8 = vunpack.c.l.bf16 %v15172_v31  ;;  %v15173_v14 = vld [vmem:[%s15663_s25 + $0x978] sm:$0xff]   ;;  %vm20242_vm8 = vcmask 589312  }
 0x4c2   : > { %v5823_v56 = vmul.f32 0.0625, %v3803_v52  ;;  %v3800_v5 = vpop.xlane.xlu0 %3799  ;;  %v13973_v63 = vunpack.c.l.bf16 %v15173_v14 }
 0x4c3   : > { %v10023_v10 = vsel %vm7484_vm10, %v10022_v6, %v10018_v27  ;;  %v5822_v36 = vmul.f32 0.0625, %v3800_v5  ;;  %v4038_v5 = vsel %vm2225_vm0, %v13969_v8, 0.0 }
 0x4c4   : > { %v10037_v48 = vrot.slane %v5823_v56, %v15867_v37  ;;  %v10028_v49 = vsel %vm20241_vm9, %v10027_v20, %v10023_v10  ;;  %4018 = vadd.xlane.f32.xlu1 %v4017_v26  ;;  %4015 = vadd.xlane.f32.xlu0 %v4014_v34  ;;  %v13974_v26 = vunpack.c.h.bf16 %v15173_v14  ;;  %v4041_v56 = vsel %vm2225_vm0, %v13970_v40, 0.0 }
 0x4c5   : > { %v10032_v55 = vrot.slane %v5822_v36, %v15873_v43  ;;  %v3809_v50 = vpop.xlane.xlu1 %3808  ;;  %v4044_v32 = vsel %vm2225_vm0, %v13973_v63, 0.0  ;;  %vm20243_vm9 = vcmask 654912  }
 0x4c6   : > { %v5825_v53 = vmul.f32 0.0625, %v3809_v50  ;;  %v3806_v62 = vpop.xlane.xlu0 %3805 }
 0x4c7   : > { %v10033_v46 = vsel %vm7498_vm12, %v10032_v55, %v10028_v49  ;;  %v5824_v38 = vmul.f32 0.0625, %v3806_v62 }
 0x4c8   : > { %v10047_v0 = vrot.slane %v5825_v53, %v15882_v57  ;;  %v10038_v58 = vsel %vm7505_vm13, %v10037_v48, %v10033_v46  ;;  %4024 = vadd.xlane.f32.xlu1 %v4023_v19  ;;  %4021 = vadd.xlane.f32.xlu0 %v4020_v3  ;;  %v15174_v48 = vld [vmem:[%s15663_s25 + $0x980] sm:$0xff]   ;;  %v4047_v3 = vsel %vm2225_vm0, %v13974_v26, 0.0  ;;  %v15175_v46 = vld [vmem:[%s15663_s25 + $0x988] sm:$0xff]  }
 0x4c9   : > { %v10042_v17 = vrot.slane %v5824_v38, %v15887_v60  ;;  %v3815_v29 = vpop.xlane.xlu1 %3814  ;;  %v13978_v53 = vunpack.c.h.bf16 %v15174_v48  ;;  %v13977_v62 = vunpack.c.l.bf16 %v15174_v48  ;;  %v13981_v31 = vunpack.c.l.bf16 %v15175_v46 }
 0x4ca   : > { %v5827_v47 = vmul.f32 0.0625, %v3815_v29  ;;  %v3812_v7 = vpop.xlane.xlu0 %3811 }
 0x4cb   : > { %v10043_v15 = vsel %vm7512_vm14, %v10042_v17, %v10038_v58  ;;  %v5826_v4 = vmul.f32 0.0625, %v3812_v7  ;;  %v4050_v7 = vsel %vm2225_vm0, %v13977_v62, 0.0 }
 0x4cc   : > { %v17914_v59 = vsel %vm7519_vm15, %v10047_v0, %v10043_v15  ;;  %v10056_v21 = vrot.slane %v5827_v47, %v15796_v12  ;;  %4030 = vadd.xlane.f32.xlu1 %v4029_v45  ;;  %4027 = vadd.xlane.f32.xlu0 %v4026_v25  ;;  %v13982_v45 = vunpack.c.h.bf16 %v15175_v46  ;;  %v4053_v47 = vsel %vm2225_vm0, %v13978_v53, 0.0 }
 0x4cd   : > { %v10052_v54 = vrot.slane %v5826_v4, %v15790_v9  ;;  %v3821_v39 = vpop.xlane.xlu1 %3820 }
 0x4ce   : > { %v5829_v20 = vmul.f32 0.0625, %v3821_v39  ;;  %v3818_v27 = vpop.xlane.xlu0 %3817  ;;  %v4059_v40 = vsel %vm2225_vm0, %v13982_v45, 0.0 }
 0x4cf   : > { %v10057_v28 = vsel %vm7421_vm1, %v10056_v21, %v10052_v54  ;;  %v5828_v6 = vmul.f32 0.0625, %v3818_v27  ;;  %v15176_v21 = vld [vmem:[%s15663_s25 + $0x990] sm:$0xff]  }
 0x4d0   : > { %v10066_v52 = vrot.slane %v5829_v20, %v15793_v11  ;;  %4036 = vadd.xlane.f32.xlu1 %v4035_v35  ;;  %4033 = vadd.xlane.f32.xlu0 %v4032_v44  ;;  %v4056_v20 = vsel %vm2225_vm0, %v13981_v31, 0.0  ;;  %v13986_v27 = vunpack.c.h.bf16 %v15176_v21 }
 0x4d1   : > { %v10061_v34 = vrot.slane %v5828_v6, %v15799_v13  ;;  %v3827_v16 = vpop.xlane.xlu1 %3826  ;;  %v15177_v6 = vld [vmem:[%s15663_s25 + $0x998] sm:$0xff]  }
 0x4d2   : > { %v5831_v10 = vmul.f32 0.0625, %v3827_v16  ;;  %v3824_v36 = vpop.xlane.xlu0 %3823  ;;  %v13990_v63 = vunpack.c.h.bf16 %v15177_v6  ;;  %v4065_v48 = vsel %vm2225_vm0, %v13986_v27, 0.0 }
 0x4d3   : > { %v10062_v49 = vsel %vm7428_vm2, %v10061_v34, %v10057_v28  ;;  %v5830_v19 = vmul.f32 0.0625, %v3824_v36  ;;  %v13985_v28 = vunpack.c.l.bf16 %v15176_v21 }
 0x4d4   : > { %v10076_v55 = vrot.slane %v5831_v10, %v15804_v22  ;;  %v10067_v50 = vsel %vm7435_vm3, %v10066_v52, %v10062_v49  ;;  %4042 = vadd.xlane.f32.xlu1 %v4041_v56  ;;  %4039 = vadd.xlane.f32.xlu0 %v4038_v5  ;;  %v4071_v62 = vsel %vm2225_vm0, %v13990_v63, 0.0 }
 0x4d5   : > { %v10071_v51 = vrot.slane %v5830_v19, %v15807_v23  ;;  %v3833_v30 = vpop.xlane.xlu1 %3832  ;;  %v4062_v49 = vsel %vm2225_vm0, %v13985_v28, 0.0  ;;  %v13989_v19 = vunpack.c.l.bf16 %v15177_v6 }
 0x4d6   : > { %v5833_v38 = vmul.f32 0.0625, %v3833_v30  ;;  %v3830_v0 = vpop.xlane.xlu0 %3829 }
 0x4d7   : > { %v10072_v58 = vsel %vm7442_vm4, %v10071_v51, %v10067_v50  ;;  %v5832_v2 = vmul.f32 0.0625, %v3830_v0  ;;  %v4068_v0 = vsel %vm2225_vm0, %v13989_v19, 0.0 }
 0x4d8   : > { %v10086_v17 = vrot.slane %v5833_v38, %v15821_v41  ;;  %v10077_v29 = vsel %vm7449_vm5, %v10076_v55, %v10072_v58  ;;  %4048 = vadd.xlane.f32.xlu1 %v4047_v3  ;;  %4045 = vadd.xlane.f32.xlu0 %v4044_v32  ;;  %v15178_v3 = vld [vmem:[%s15663_s25 + $0x9a0] sm:$0xff]  }
 0x4d9   : > { %v10081_v25 = vrot.slane %v5832_v2, %v15824_v42  ;;  %v3839_v33 = vpop.xlane.xlu1 %3838  ;;  %v13994_v58 = vunpack.c.h.bf16 %v15178_v3  ;;  %v13993_v2 = vunpack.c.l.bf16 %v15178_v3 }
 0x4da   : > { %v5835_v15 = vmul.f32 0.0625, %v3839_v33  ;;  %v3836_v4 = vpop.xlane.xlu0 %3835 }
 0x4db   : > { %v10082_v35 = vsel %vm7456_vm6, %v10081_v25, %v10077_v29  ;;  %v5834_v54 = vmul.f32 0.0625, %v3836_v4  ;;  %v4077_v21 = vsel %vm2225_vm0, %v13994_v58, 0.0 }
 0x4dc   : > { %v10096_v39 = vrot.slane %v5835_v15, %v15837_v61  ;;  %v10087_v44 = vsel %vm7463_vm7, %v10086_v17, %v10082_v35  ;;  %4054 = vadd.xlane.f32.xlu1 %v4053_v47  ;;  %4051 = vadd.xlane.f32.xlu0 %v4050_v7  ;;  %v15179_v17 = vld [vmem:[%s15663_s25 + $0x9a8] sm:$0xff]   ;;  %v4074_v35 = vsel %vm2225_vm0, %v13993_v2, 0.0 }
 0x4dd   : > { %v10091_v8 = vrot.slane %v5834_v54, %v15843_v1  ;;  %v3845_v14 = vpop.xlane.xlu1 %3844  ;;  %v13998_v31 = vunpack.c.h.bf16 %v15179_v17  ;;  %v13997_v54 = vunpack.c.l.bf16 %v15179_v17 }
 0x4de   : > { %v5837_v52 = vmul.f32 0.0625, %v3845_v14  ;;  %v3842_v26 = vpop.xlane.xlu0 %3841 }
 0x4df   : > { %v10092_v34 = vsel %vm20242_vm8, %v10091_v8, %v10087_v44  ;;  %v5836_v16 = vmul.f32 0.0625, %v3842_v26  ;;  %vm20244_vm8 = vcmask 786112   ;;  %v4083_v28 = vsel %vm2225_vm0, %v13998_v31, 0.0 }
 0x4e0   : > { %v10106_v56 = vrot.slane %v5837_v52, %v15852_v18  ;;  %v10097_v5 = vsel %vm20243_vm9, %v10096_v39, %v10092_v34  ;;  %4060 = vadd.xlane.f32.xlu1 %v4059_v40  ;;  %4057 = vadd.xlane.f32.xlu0 %v4056_v20  ;;  %v15180_v40 = vld [vmem:[%s15663_s25 + $0x9b0] sm:$0xff]   ;;  %v4080_v26 = vsel %vm2225_vm0, %v13997_v54, 0.0  ;;  %vm20245_vm9 = vcmask 589312  }
 0x4e1   : > { %v10101_v10 = vrot.slane %v5836_v16, %v15858_v24  ;;  %v3851_v36 = vpop.xlane.xlu1 %3850  ;;  %v14002_v34 = vunpack.c.h.bf16 %v15180_v40  ;;  %v14001_v16 = vunpack.c.l.bf16 %v15180_v40 }
 0x4e2   : > { %v5839_v55 = vmul.f32 0.0625, %v3851_v36  ;;  %v3848_v50 = vpop.xlane.xlu0 %3847 }
 0x4e3   : > { %v10102_v51 = vsel %vm7484_vm10, %v10101_v10, %v10097_v5  ;;  %v5838_v30 = vmul.f32 0.0625, %v3848_v50  ;;  %v4089_v50 = vsel %vm2225_vm0, %v14002_v34, 0.0  ;;  %v4086_v3 = vsel %vm2225_vm0, %v14001_v16, 0.0 }
 0x4e4   : > { %v10116_v32 = vrot.slane %v5839_v55, %v15867_v37  ;;  %v10107_v53 = vsel %vm20244_vm8, %v10106_v56, %v10102_v51  ;;  %4066 = vadd.xlane.f32.xlu1 %v4065_v48  ;;  %4063 = vadd.xlane.f32.xlu0 %v4062_v49  ;;  %v15181_v56 = vld [vmem:[%s15663_s25 + $0x9b8] sm:$0xff]   ;;  %vm20246_vm8 = vcmask 654912  }
 0x4e5   : > { %v10111_v46 = vrot.slane %v5838_v30, %v15873_v43  ;;  %v3857_v38 = vpop.xlane.xlu1 %3856  ;;  %v14006_v49 = vunpack.c.h.bf16 %v15181_v56  ;;  %v14005_v51 = vunpack.c.l.bf16 %v15181_v56 }
 0x4e6   : > { %v5841_v29 = vmul.f32 0.0625, %v3857_v38  ;;  %v3854_v45 = vpop.xlane.xlu0 %3853 }
 0x4e7   : > { %v10112_v25 = vsel %vm7498_vm12, %v10111_v46, %v10107_v53  ;;  %v5840_v33 = vmul.f32 0.0625, %v3854_v45  ;;  %v15182_v53 = vld [vmem:[%s15663_s25 + $0x9c0] sm:$0xff]   ;;  %v4095_v58 = vsel %vm2225_vm0, %v14006_v49, 0.0 }
 0x4e8   : > { %v10126_v47 = vrot.slane %v5841_v29, %v15882_v57  ;;  %v10117_v7 = vsel %vm7505_vm13, %v10116_v32, %v10112_v25  ;;  %4072 = vadd.xlane.f32.xlu1 %v4071_v62  ;;  %4069 = vadd.xlane.f32.xlu0 %v4068_v0  ;;  %v4092_v29 = vsel %vm2225_vm0, %v14005_v51, 0.0  ;;  %v14010_v45 = vunpack.c.h.bf16 %v15182_v53 }
 0x4e9   : > { %v10121_v15 = vrot.slane %v5840_v33, %v15887_v60  ;;  %v3863_v4 = vpop.xlane.xlu1 %3862  ;;  %v14009_v25 = vunpack.c.l.bf16 %v15182_v53  ;;  %v15183_v33 = vld [vmem:[%s15663_s25 + $0x9c8] sm:$0xff]  }
 0x4ea   : > { %v5843_v39 = vmul.f32 0.0625, %v3863_v4  ;;  %v3860_v44 = vpop.xlane.xlu0 %3859 }
 0x4eb   : > { %v10122_v8 = vsel %vm7512_vm14, %v10121_v15, %v10117_v7  ;;  %v5842_v14 = vmul.f32 0.0625, %v3860_v44  ;;  %v4101_v44 = vsel %vm2225_vm0, %v14010_v45, 0.0  ;;  %v4098_v40 = vsel %vm2225_vm0, %v14009_v25, 0.0 }
 0x4ec   : > { %v17971_v20 = vsel %vm7519_vm15, %v10126_v47, %v10122_v8  ;;  %v10135_v27 = vrot.slane %v5843_v39, %v15796_v12  ;;  %4078 = vadd.xlane.f32.xlu1 %v4077_v21  ;;  %4075 = vadd.xlane.f32.xlu0 %v4074_v35  ;;  %v14014_v35 = vunpack.c.h.bf16 %v15183_v33  ;;  %v14013_v8 = vunpack.c.l.bf16 %v15183_v33 }
 0x4ed   : > { %v10131_v6 = vrot.slane %v5842_v14, %v15790_v9  ;;  %v3869_v52 = vpop.xlane.xlu1 %3868 }
 0x4ee   : > { %v5845_v5 = vmul.f32 0.0625, %v3869_v52  ;;  %v3866_v63 = vpop.xlane.xlu0 %3865  ;;  %v4107_v16 = vsel %vm2225_vm0, %v14014_v35, 0.0 }
 0x4ef   : > { %v10136_v10 = vsel %vm7421_vm1, %v10135_v27, %v10131_v6  ;;  %v5844_v36 = vmul.f32 0.0625, %v3866_v63  ;;  %v4104_v63 = vsel %vm2225_vm0, %v14013_v8, 0.0 }
 0x4f0   : > { %v10145_v48 = vrot.slane %v5845_v5, %v15793_v11  ;;  %4084 = vadd.xlane.f32.xlu1 %v4083_v28  ;;  %4081 = vadd.xlane.f32.xlu0 %v4080_v26  ;;  %v15184_v28 = vld [vmem:[%s15663_s25 + $0x9d0] sm:$0xff]  }
 0x4f1   : > { %v10140_v19 = vrot.slane %v5844_v36, %v15799_v13  ;;  %v3875_v55 = vpop.xlane.xlu1 %3874  ;;  %v14017_v36 = vunpack.c.l.bf16 %v15184_v28 }
 0x4f2   : > { %v5847_v30 = vmul.f32 0.0625, %v3875_v55  ;;  %v3872_v32 = vpop.xlane.xlu0 %3871 }
 0x4f3   : > { %v10141_v62 = vsel %vm7428_vm2, %v10140_v19, %v10136_v10  ;;  %v5846_v46 = vmul.f32 0.0625, %v3872_v32  ;;  %v14018_v10 = vunpack.c.h.bf16 %v15184_v28 }
 0x4f4   : > { %v10155_v38 = vrot.slane %v5847_v30, %v15804_v22  ;;  %v10146_v0 = vsel %vm7435_vm3, %v10145_v48, %v10141_v62  ;;  %4090 = vadd.xlane.f32.xlu1 %v4089_v50  ;;  %4087 = vadd.xlane.f32.xlu0 %v4086_v3  ;;  %v15185_v48 = vld [vmem:[%s15663_s25 + $0x9d8] sm:$0xff]  }
 0x4f5   : > { %v10150_v2 = vrot.slane %v5846_v46, %v15807_v23  ;;  %v3881_v17 = vpop.xlane.xlu1 %3880  ;;  %v14022_v30 = vunpack.c.h.bf16 %v15185_v48  ;;  %v4113_v62 = vsel %vm2225_vm0, %v14018_v10, 0.0  ;;  %v4110_v46 = vsel %vm2225_vm0, %v14017_v36, 0.0 }
 0x4f6   : > { %v5849_v47 = vmul.f32 0.0625, %v3881_v17  ;;  %v3878_v7 = vpop.xlane.xlu0 %3877 }
 0x4f7   : > { %v10151_v31 = vsel %vm7442_vm4, %v10150_v2, %v10146_v0  ;;  %v5848_v15 = vmul.f32 0.0625, %v3878_v7  ;;  %v15186_v2 = vld [vmem:[%s15663_s25 + $0x9e0] sm:$0xff]   ;;  %v4119_v33 = vsel %vm2225_vm0, %v14022_v30, 0.0  ;;  %v15189_v30 = vld [vmem:[%s15663_s25 + $0x9f8] sm:$0xff]  }
 0x4f8   : > { %v10165_v4 = vrot.slane %v5849_v47, %v15821_v41  ;;  %v10156_v21 = vsel %vm7449_vm5, %v10155_v38, %v10151_v31  ;;  %4096 = vadd.xlane.f32.xlu1 %v4095_v58  ;;  %4093 = vadd.xlane.f32.xlu0 %v4092_v29  ;;  %v14021_v38 = vunpack.c.l.bf16 %v15185_v48 }
 0x4f9   : > { %v10160_v54 = vrot.slane %v5848_v15, %v15824_v42  ;;  %v3887_v39 = vpop.xlane.xlu1 %3886  ;;  %v14026_v15 = vunpack.c.h.bf16 %v15186_v2 }
 0x4fa   : > { %v5851_v14 = vmul.f32 0.0625, %v3887_v39  ;;  %v3884_v27 = vpop.xlane.xlu0 %3883  ;;  %v4116_v31 = vsel %vm2225_vm0, %v14021_v38, 0.0 }
 0x4fb   : > { %v10161_v6 = vsel %vm7456_vm6, %v10160_v54, %v10156_v21  ;;  %v5850_v52 = vmul.f32 0.0625, %v3884_v27  ;;  %v15187_v21 = vld [vmem:[%s15663_s25 + $0x9e8] sm:$0xff]  }
 0x4fc   : > { %v10175_v26 = vrot.slane %v5851_v14, %v15837_v61  ;;  %v10166_v34 = vsel %vm7463_vm7, %v10165_v4, %v10161_v6  ;;  %4102 = vadd.xlane.f32.xlu1 %v4101_v44  ;;  %4099 = vadd.xlane.f32.xlu0 %v4098_v40  ;;  %v14025_v4 = vunpack.c.l.bf16 %v15186_v2  ;;  %v14030_v14 = vunpack.c.h.bf16 %v15187_v21 }
 0x4fd   : > { %v10170_v56 = vrot.slane %v5850_v52, %v15843_v1  ;;  %v3893_v5 = vpop.xlane.xlu1 %3892  ;;  %v14029_v27 = vunpack.c.l.bf16 %v15187_v21  ;;  %v4125_v52 = vsel %vm2225_vm0, %v14026_v15, 0.0 }
 0x4fe   : > { %v5853_v49 = vmul.f32 0.0625, %v3893_v5  ;;  %v3890_v19 = vpop.xlane.xlu0 %3889  ;;  %v4131_v48 = vsel %vm2225_vm0, %v14030_v14, 0.0 }
 0x4ff   : > { %v10171_v55 = vsel %vm20245_vm9, %v10170_v56, %v10166_v34  ;;  %v5852_v50 = vmul.f32 0.0625, %v3890_v19  ;;  %vm20247_vm9 = vcmask 786112   ;;  %v15188_v56 = vld [vmem:[%s15663_s25 + $0x9f0] sm:$0xff]  }
 0x500   : > { %v10185_v3 = vrot.slane %v5853_v49, %v15852_v18  ;;  %v10176_v51 = vsel %vm20246_vm8, %v10175_v26, %v10171_v55  ;;  %4108 = vadd.xlane.f32.xlu1 %v4107_v16  ;;  %4105 = vadd.xlane.f32.xlu0 %v4104_v63  ;;  %v4122_v26 = vsel %vm2225_vm0, %v14025_v4, 0.0  ;;  %v4128_v49 = vsel %vm2225_vm0, %v14029_v27, 0.0 }
 0x501   : > { %v10180_v32 = vrot.slane %v5852_v50, %v15858_v24  ;;  %v3899_v53 = vpop.xlane.xlu1 %3898  ;;  %vm20248_vm8 = vcmask 1041409  }
 0x502   : > { %v5855_v0 = vmul.f32 0.0625, %v3899_v53  ;;  %v3896_v58 = vpop.xlane.xlu0 %3895 }
 0x503   : > { %v10181_v17 = vsel %vm7484_vm10, %v10180_v32, %v10176_v51  ;;  %v5854_v29 = vmul.f32 0.0625, %v3896_v58  ;;  %v14033_v51 = vunpack.c.l.bf16 %v15188_v56 }
 0x504   : > { %v10195_v45 = vrot.slane %v5855_v0, %v15867_v37  ;;  %v10186_v25 = vsel %vm20247_vm9, %v10185_v3, %v10181_v17  ;;  %4114 = vadd.xlane.f32.xlu1 %v4113_v62  ;;  %4111 = vadd.xlane.f32.xlu0 %v4110_v46  ;;  %v14034_v3 = vunpack.c.h.bf16 %v15188_v56  ;;  %v14038_v0 = vunpack.c.h.bf16 %v15189_v30 }
 0x505   : > { %v10190_v47 = vrot.slane %v5854_v29, %v15873_v43  ;;  %v3905_v7 = vpop.xlane.xlu1 %3904  ;;  %v4134_v17 = vsel %vm2225_vm0, %v14033_v51, 0.0  ;;  %v14037_v29 = vunpack.c.l.bf16 %v15189_v30  ;;  %vm20249_vm9 = vcmask 589312  }
 0x506   : > { %v5857_v35 = vmul.f32 0.0625, %v3905_v7  ;;  %v3902_v54 = vpop.xlane.xlu0 %3901  ;;  %v4137_v2 = vsel %vm2225_vm0, %v14034_v3, 0.0  ;;  %v4143_v4 = vsel %vm2225_vm0, %v14038_v0, 0.0 }
 0x507   : > { %v10191_v39 = vsel %vm7498_vm12, %v10190_v47, %v10186_v25  ;;  %v5856_v44 = vmul.f32 0.0625, %v3902_v54  ;;  %v4140_v54 = vsel %vm2225_vm0, %v14037_v29, 0.0 }
 0x508   : > { %v10205_v40 = vrot.slane %v5857_v35, %v15882_v57  ;;  %v10196_v8 = vsel %vm7505_vm13, %v10195_v45, %v10191_v39  ;;  %4120 = vadd.xlane.f32.xlu1 %v4119_v33  ;;  %4117 = vadd.xlane.f32.xlu0 %v4116_v31  ;;  %v15190_v33 = vld [vmem:[%s15663_s25 + $0xa00] sm:$0xff]  }
 0x509   : > { %v10200_v28 = vrot.slane %v5856_v44, %v15887_v60  ;;  %v3911_v6 = vpop.xlane.xlu1 %3910  ;;  %v14042_v39 = vunpack.c.h.bf16 %v15190_v33  ;;  %v14041_v44 = vunpack.c.l.bf16 %v15190_v33 }
 0x50a   : > { %v5859_v34 = vmul.f32 0.0625, %v3911_v6  ;;  %v3908_v16 = vpop.xlane.xlu0 %3907 }
 0x50b   : > { %v10201_v5 = vsel %vm7512_vm14, %v10200_v28, %v10196_v8  ;;  %v5858_v63 = vmul.f32 0.0625, %v3908_v16  ;;  %v4149_v56 = vsel %vm2225_vm0, %v14042_v39, 0.0 }
 0x50c   : > { %v10206_v10 = vsel %vm7519_vm15, %v10205_v40, %v10201_v5  ;;  %v10214_v36 = vrot.slane %v5859_v34, %v15796_v12  ;;  %4126 = vadd.xlane.f32.xlu1 %v4125_v52  ;;  %4123 = vadd.xlane.f32.xlu0 %v4122_v26  ;;  %v15191_v40 = vld [vmem:[%s15663_s25 + $0xa08] sm:$0xff]   ;;  %v4146_v5 = vsel %vm2225_vm0, %v14041_v44, 0.0 }
 0x50d   : > { %v18033_v19 = vsel %vm20248_vm8, %v10206_v10, %v17914_v59  ;;  %v10210_v55 = vrot.slane %v5858_v63, %v15790_v9  ;;  %v3917_v50 = vpop.xlane.xlu1 %3916  ;;  %v14046_v26 = vunpack.c.h.bf16 %v15191_v40  ;;  %v14045_v63 = vunpack.c.l.bf16 %v15191_v40 }
 0x50e   : > { %v5861_v32 = vmul.f32 0.0625, %v3917_v50  ;;  %v3914_v53 = vpop.xlane.xlu0 %3913  ;;  %vm20250_vm8 = vcmask 654912  }
 0x50f   : > { %v10215_v62 = vsel %vm7421_vm1, %v10214_v36, %v10210_v55  ;;  %v5860_v46 = vmul.f32 0.0625, %v3914_v53  ;;  %v4155_v51 = vsel %vm2225_vm0, %v14046_v26, 0.0  ;;  %v4152_v53 = vsel %vm2225_vm0, %v14045_v63, 0.0 }
 0x510   : > { %v10224_v38 = vrot.slane %v5861_v32, %v15793_v11  ;;  %4132 = vadd.xlane.f32.xlu1 %v4131_v48  ;;  %4129 = vadd.xlane.f32.xlu0 %v4128_v49  ;;  %v15192_v48 = vld [vmem:[%s15663_s25 + $0xa10] sm:$0xff]  }
 0x511   : > { %v10219_v59 = vrot.slane %v5860_v46, %v15799_v13  ;;  %v3923_v58 = vpop.xlane.xlu1 %3922  ;;  %v14049_v46 = vunpack.c.l.bf16 %v15192_v48 }
 0x512   : > { %v5863_v45 = vmul.f32 0.0625, %v3923_v58  ;;  %v3920_v25 = vpop.xlane.xlu0 %3919 }
 0x513   : > { %v10220_v47 = vsel %vm7428_vm2, %v10219_v59, %v10215_v62  ;;  %v5862_v7 = vmul.f32 0.0625, %v3920_v25  ;;  %v14050_v62 = vunpack.c.h.bf16 %v15192_v48 }
 0x514   : > { %v10234_v31 = vrot.slane %v5863_v45, %v15804_v22  ;;  %v10225_v15 = vsel %vm7435_vm3, %v10224_v38, %v10220_v47  ;;  %4138 = vadd.xlane.f32.xlu1 %v4137_v2  ;;  %4135 = vadd.xlane.f32.xlu0 %v4134_v17  ;;  %v15193_v38 = vld [vmem:[%s15663_s25 + $0xa18] sm:$0xff]  }
 0x515   : > { %v10229_v21 = vrot.slane %v5862_v7, %v15807_v23  ;;  %v3929_v35 = vpop.xlane.xlu1 %3928  ;;  %v14054_v45 = vunpack.c.h.bf16 %v15193_v38  ;;  %v4161_v47 = vsel %vm2225_vm0, %v14050_v62, 0.0  ;;  %v4158_v7 = vsel %vm2225_vm0, %v14049_v46, 0.0 }
 0x516   : > { %v5865_v8 = vmul.f32 0.0625, %v3929_v35  ;;  %v3926_v14 = vpop.xlane.xlu0 %3925 }
 0x517   : > { %v10230_v27 = vsel %vm7442_vm4, %v10229_v21, %v10225_v15  ;;  %v5864_v28 = vmul.f32 0.0625, %v3926_v14  ;;  %v15194_v21 = vld [vmem:[%s15663_s25 + $0xa20] sm:$0xff]   ;;  %v4167_v40 = vsel %vm2225_vm0, %v14054_v45, 0.0  ;;  %v15197_v45 = vld [vmem:[%s15663_s25 + $0xa38] sm:$0xff]  }
 0x518   : > { %v10244_v6 = vrot.slane %v5865_v8, %v15821_v41  ;;  %v10235_v52 = vsel %vm7449_vm5, %v10234_v31, %v10230_v27  ;;  %4144 = vadd.xlane.f32.xlu1 %v4143_v4  ;;  %4141 = vadd.xlane.f32.xlu0 %v4140_v54  ;;  %v14053_v31 = vunpack.c.l.bf16 %v15193_v38 }
 0x519   : > { %v10239_v34 = vrot.slane %v5864_v28, %v15824_v42  ;;  %v3935_v16 = vpop.xlane.xlu1 %3934  ;;  %v14058_v28 = vunpack.c.h.bf16 %v15194_v21 }
 0x51a   : > { %v5867_v10 = vmul.f32 0.0625, %v3935_v16  ;;  %v3932_v36 = vpop.xlane.xlu0 %3931  ;;  %v4164_v27 = vsel %vm2225_vm0, %v14053_v31, 0.0 }
 0x51b   : > { %v10240_v49 = vsel %vm7456_vm6, %v10239_v34, %v10235_v52  ;;  %v5866_v55 = vmul.f32 0.0625, %v3932_v36  ;;  %v15195_v52 = vld [vmem:[%s15663_s25 + $0xa28] sm:$0xff]  }
 0x51c   : > { %v10254_v50 = vrot.slane %v5867_v10, %v15837_v61  ;;  %v10245_v3 = vsel %vm7463_vm7, %v10244_v6, %v10240_v49  ;;  %4150 = vadd.xlane.f32.xlu1 %v4149_v56  ;;  %4147 = vadd.xlane.f32.xlu0 %v4146_v5  ;;  %v14057_v6 = vunpack.c.l.bf16 %v15194_v21  ;;  %v14062_v10 = vunpack.c.h.bf16 %v15195_v52 }
 0x51d   : > { %v10249_v30 = vrot.slane %v5866_v55, %v15843_v1  ;;  %v3941_v32 = vpop.xlane.xlu1 %3940  ;;  %v14061_v36 = vunpack.c.l.bf16 %v15195_v52  ;;  %v4173_v55 = vsel %vm2225_vm0, %v14058_v28, 0.0 }
 0x51e   : > { %v5869_v0 = vmul.f32 0.0625, %v3941_v32  ;;  %v3938_v59 = vpop.xlane.xlu0 %3937  ;;  %v4179_v38 = vsel %vm2225_vm0, %v14062_v10, 0.0 }
 0x51f   : > { %v10250_v58 = vsel %vm20249_vm9, %v10249_v30, %v10245_v3  ;;  %v5868_v2 = vmul.f32 0.0625, %v3938_v59  ;;  %vm20251_vm9 = vcmask 786112   ;;  %v15196_v30 = vld [vmem:[%s15663_s25 + $0xa30] sm:$0xff]  }
 0x520   : > { %v10264_v17 = vrot.slane %v5869_v0, %v15852_v18  ;;  %v10255_v29 = vsel %vm20250_vm8, %v10254_v50, %v10250_v58  ;;  %4156 = vadd.xlane.f32.xlu1 %v4155_v51  ;;  %4153 = vadd.xlane.f32.xlu0 %v4152_v53  ;;  %v4170_v50 = vsel %vm2225_vm0, %v14057_v6, 0.0  ;;  %v4176_v0 = vsel %vm2225_vm0, %v14061_v36, 0.0 }
 0x521   : > { %v10259_v25 = vrot.slane %v5868_v2, %v15858_v24  ;;  %v3947_v33 = vpop.xlane.xlu1 %3946  ;;  %vm20252_vm8 = vcmask 1041409  }
 0x522   : > { %v5871_v15 = vmul.f32 0.0625, %v3947_v33  ;;  %v3944_v4 = vpop.xlane.xlu0 %3943 }
 0x523   : > { %v10260_v35 = vsel %vm7484_vm10, %v10259_v25, %v10255_v29  ;;  %v5870_v54 = vmul.f32 0.0625, %v3944_v4  ;;  %v14065_v29 = vunpack.c.l.bf16 %v15196_v30 }
 0x524   : > { %v10274_v39 = vrot.slane %v5871_v15, %v15867_v37  ;;  %v10265_v44 = vsel %vm20251_vm9, %v10264_v17, %v10260_v35  ;;  %4162 = vadd.xlane.f32.xlu1 %v4161_v47  ;;  %4159 = vadd.xlane.f32.xlu0 %v4158_v7  ;;  %v14066_v17 = vunpack.c.h.bf16 %v15196_v30  ;;  %v14070_v15 = vunpack.c.h.bf16 %v15197_v45 }
 0x525   : > { %v10269_v8 = vrot.slane %v5870_v54, %v15873_v43  ;;  %v3953_v14 = vpop.xlane.xlu1 %3952  ;;  %v4182_v35 = vsel %vm2225_vm0, %v14065_v29, 0.0  ;;  %v14069_v54 = vunpack.c.l.bf16 %v15197_v45  ;;  %vm20253_vm9 = vcmask 589312  }
 0x526   : > { %v5873_v26 = vmul.f32 0.0625, %v3953_v14  ;;  %v3950_v34 = vpop.xlane.xlu0 %3949  ;;  %v4185_v21 = vsel %vm2225_vm0, %v14066_v17, 0.0  ;;  %v4191_v6 = vsel %vm2225_vm0, %v14070_v15, 0.0 }
 0x527   : > { %v10270_v16 = vsel %vm7498_vm12, %v10269_v8, %v10265_v44  ;;  %v5872_v56 = vmul.f32 0.0625, %v3950_v34  ;;  %v4188_v34 = vsel %vm2225_vm0, %v14069_v54, 0.0 }
 0x528   : > { %v10284_v5 = vrot.slane %v5873_v26, %v15882_v57  ;;  %v10275_v63 = vsel %vm7505_vm13, %v10274_v39, %v10270_v16  ;;  %4168 = vadd.xlane.f32.xlu1 %v4167_v40  ;;  %4165 = vadd.xlane.f32.xlu0 %v4164_v27  ;;  %v15198_v40 = vld [vmem:[%s15663_s25 + $0xa40] sm:$0xff]  }
 0x529   : > { %v10279_v48 = vrot.slane %v5872_v56, %v15887_v60  ;;  %v3959_v49 = vpop.xlane.xlu1 %3958  ;;  %v14074_v16 = vunpack.c.h.bf16 %v15198_v40  ;;  %v14073_v56 = vunpack.c.l.bf16 %v15198_v40 }
 0x52a   : > { %v5875_v3 = vmul.f32 0.0625, %v3959_v49  ;;  %v3956_v51 = vpop.xlane.xlu0 %3955 }
 0x52b   : > { %v10280_v32 = vsel %vm7512_vm14, %v10279_v48, %v10275_v63  ;;  %v5874_v53 = vmul.f32 0.0625, %v3956_v51  ;;  %v4197_v30 = vsel %vm2225_vm0, %v14074_v16, 0.0 }
 0x52c   : > { %v10285_v62 = vsel %vm7519_vm15, %v10284_v5, %v10280_v32  ;;  %v10293_v46 = vrot.slane %v5875_v3, %v15796_v12  ;;  %4174 = vadd.xlane.f32.xlu1 %v4173_v55  ;;  %4171 = vadd.xlane.f32.xlu0 %v4170_v50  ;;  %v15199_v5 = vld [vmem:[%s15663_s25 + $0xa48] sm:$0xff]   ;;  %v4194_v32 = vsel %vm2225_vm0, %v14073_v56, 0.0 }
 0x52d   : > { %v18092_v59 = vsel %vm20252_vm8, %v10285_v62, %v17971_v20  ;;  %v10289_v58 = vrot.slane %v5874_v53, %v15790_v9  ;;  %v3965_v2 = vpop.xlane.xlu1 %3964  ;;  %v14078_v50 = vunpack.c.h.bf16 %v15199_v5  ;;  %v14077_v53 = vunpack.c.l.bf16 %v15199_v5 }
 0x52e   : > { %v5877_v25 = vmul.f32 0.0625, %v3965_v2  ;;  %v3962_v33 = vpop.xlane.xlu0 %3961  ;;  %vm20254_vm8 = vcmask 654912  }
 0x52f   : > { %v10294_v47 = vsel %vm7421_vm1, %v10293_v46, %v10289_v58  ;;  %v5876_v7 = vmul.f32 0.0625, %v3962_v33  ;;  %v4203_v29 = vsel %vm2225_vm0, %v14078_v50, 0.0  ;;  %v4200_v33 = vsel %vm2225_vm0, %v14077_v53, 0.0 }
 0x530   : > { %v10303_v31 = vrot.slane %v5877_v25, %v15793_v11  ;;  %4180 = vadd.xlane.f32.xlu1 %v4179_v38  ;;  %4177 = vadd.xlane.f32.xlu0 %v4176_v0  ;;  %v15200_v38 = vld [vmem:[%s15663_s25 + $0xa50] sm:$0xff]  }
 0x531   : > { %v10298_v20 = vrot.slane %v5876_v7, %v15799_v13  ;;  %v3971_v4 = vpop.xlane.xlu1 %3970  ;;  %v14081_v7 = vunpack.c.l.bf16 %v15200_v38 }
 0x532   : > { %v5879_v39 = vmul.f32 0.0625, %v3971_v4  ;;  %v3968_v44 = vpop.xlane.xlu0 %3967 }
 0x533   : > { %v10299_v8 = vsel %vm7428_vm2, %v10298_v20, %v10294_v47  ;;  %v5878_v14 = vmul.f32 0.0625, %v3968_v44  ;;  %v14082_v47 = vunpack.c.h.bf16 %v15200_v38 }
 0x534   : > { %v10313_v27 = vrot.slane %v5879_v39, %v15804_v22  ;;  %v10304_v28 = vsel %vm7435_vm3, %v10303_v31, %v10299_v8  ;;  %4186 = vadd.xlane.f32.xlu1 %v4185_v21  ;;  %4183 = vadd.xlane.f32.xlu0 %v4182_v35  ;;  %v15201_v31 = vld [vmem:[%s15663_s25 + $0xa58] sm:$0xff]  }
 0x535   : > { %v10308_v52 = vrot.slane %v5878_v14, %v15807_v23  ;;  %v3977_v26 = vpop.xlane.xlu1 %3976  ;;  %v14086_v39 = vunpack.c.h.bf16 %v15201_v31  ;;  %v4209_v8 = vsel %vm2225_vm0, %v14082_v47, 0.0  ;;  %v4206_v14 = vsel %vm2225_vm0, %v14081_v7, 0.0 }
 0x536   : > { %v5881_v63 = vmul.f32 0.0625, %v3977_v26  ;;  %v3974_v10 = vpop.xlane.xlu0 %3973 }
 0x537   : > { %v10309_v36 = vsel %vm7442_vm4, %v10308_v52, %v10304_v28  ;;  %v5880_v48 = vmul.f32 0.0625, %v3974_v10  ;;  %v15202_v52 = vld [vmem:[%s15663_s25 + $0xa60] sm:$0xff]   ;;  %v4215_v5 = vsel %vm2225_vm0, %v14086_v39, 0.0  ;;  %v15205_v39 = vld [vmem:[%s15663_s25 + $0xa78] sm:$0xff]  }
 0x538   : > { %v10323_v49 = vrot.slane %v5881_v63, %v15821_v41  ;;  %v10314_v55 = vsel %vm7449_vm5, %v10313_v27, %v10309_v36  ;;  %4192 = vadd.xlane.f32.xlu1 %v4191_v6  ;;  %4189 = vadd.xlane.f32.xlu0 %v4188_v34  ;;  %v14085_v27 = vunpack.c.l.bf16 %v15201_v31 }
 0x539   : > { %v10318_v3 = vrot.slane %v5880_v48, %v15824_v42  ;;  %v3983_v51 = vpop.xlane.xlu1 %3982  ;;  %v14090_v48 = vunpack.c.h.bf16 %v15202_v52 }
 0x53a   : > { %v5883_v62 = vmul.f32 0.0625, %v3983_v51  ;;  %v3980_v46 = vpop.xlane.xlu0 %3979  ;;  %v4212_v36 = vsel %vm2225_vm0, %v14085_v27, 0.0 }
 0x53b   : > { %v10319_v0 = vsel %vm7456_vm6, %v10318_v3, %v10314_v55  ;;  %v5882_v58 = vmul.f32 0.0625, %v3980_v46  ;;  %v15203_v55 = vld [vmem:[%s15663_s25 + $0xa68] sm:$0xff]  }
 0x53c   : > { %v10333_v2 = vrot.slane %v5883_v62, %v15837_v61  ;;  %v10324_v17 = vsel %vm7463_vm7, %v10323_v49, %v10319_v0  ;;  %4198 = vadd.xlane.f32.xlu1 %v4197_v30  ;;  %4195 = vadd.xlane.f32.xlu0 %v4194_v32  ;;  %v14089_v49 = vunpack.c.l.bf16 %v15202_v52  ;;  %v14094_v62 = vunpack.c.h.bf16 %v15203_v55 }
 0x53d   : > { %v10328_v45 = vrot.slane %v5882_v58, %v15843_v1  ;;  %v3989_v25 = vpop.xlane.xlu1 %3988  ;;  %v14093_v46 = vunpack.c.l.bf16 %v15203_v55  ;;  %v4221_v58 = vsel %vm2225_vm0, %v14090_v48, 0.0 }
 0x53e   : > { %v5885_v15 = vmul.f32 0.0625, %v3989_v25  ;;  %v3986_v20 = vpop.xlane.xlu0 %3985  ;;  %v4227_v31 = vsel %vm2225_vm0, %v14094_v62, 0.0 }
 0x53f   : > { %v10329_v4 = vsel %vm20253_vm9, %v10328_v45, %v10324_v17  ;;  %v5884_v21 = vmul.f32 0.0625, %v3986_v20  ;;  %vm20255_vm9 = vcmask 786112   ;;  %v15204_v45 = vld [vmem:[%s15663_s25 + $0xa70] sm:$0xff]  }
 0x540   : > { %v10343_v35 = vrot.slane %v5885_v15, %v15852_v18  ;;  %v10334_v54 = vsel %vm20254_vm8, %v10333_v2, %v10329_v4  ;;  %4204 = vadd.xlane.f32.xlu1 %v4203_v29  ;;  %4201 = vadd.xlane.f32.xlu0 %v4200_v33  ;;  %v4218_v2 = vsel %vm2225_vm0, %v14089_v49, 0.0  ;;  %v4224_v15 = vsel %vm2225_vm0, %v14093_v46, 0.0 }
 0x541   : > { %v10338_v44 = vrot.slane %v5884_v21, %v15858_v24  ;;  %v3995_v40 = vpop.xlane.xlu1 %3994  ;;  %vm20256_vm8 = vcmask 1042434  }
 0x542   : > { %v5887_v28 = vmul.f32 0.0625, %v3995_v40  ;;  %v3992_v6 = vpop.xlane.xlu0 %3991 }
 0x543   : > { %v10339_v26 = vsel %vm7484_vm10, %v10338_v44, %v10334_v54  ;;  %v5886_v34 = vmul.f32 0.0625, %v3992_v6  ;;  %v14097_v54 = vunpack.c.l.bf16 %v15204_v45 }
 0x544   : > { %v10353_v16 = vrot.slane %v5887_v28, %v15867_v37  ;;  %v10344_v56 = vsel %vm20255_vm9, %v10343_v35, %v10339_v26  ;;  %4210 = vadd.xlane.f32.xlu1 %v4209_v8  ;;  %4207 = vadd.xlane.f32.xlu0 %v4206_v14  ;;  %v14098_v35 = vunpack.c.h.bf16 %v15204_v45  ;;  %v14102_v28 = vunpack.c.h.bf16 %v15205_v39 }
 0x545   : > { %v10348_v63 = vrot.slane %v5886_v34, %v15873_v43  ;;  %v4001_v10 = vpop.xlane.xlu1 %4000  ;;  %v4230_v26 = vsel %vm2225_vm0, %v14097_v54, 0.0  ;;  %v14101_v34 = vunpack.c.l.bf16 %v15205_v39  ;;  %vm20257_vm9 = vcmask 589312  }
 0x546   : > { %v5889_v50 = vmul.f32 0.0625, %v4001_v10  ;;  %v3998_v3 = vpop.xlane.xlu0 %3997  ;;  %v4233_v52 = vsel %vm2225_vm0, %v14098_v35, 0.0  ;;  %v4239_v49 = vsel %vm2225_vm0, %v14102_v28, 0.0 }
 0x547   : > { %v10349_v51 = vsel %vm7498_vm12, %v10348_v63, %v10344_v56  ;;  %v5888_v30 = vmul.f32 0.0625, %v3998_v3  ;;  %v4236_v3 = vsel %vm2225_vm0, %v14101_v34, 0.0 }
 0x548   : > { %v10363_v32 = vrot.slane %v5889_v50, %v15882_v57  ;;  %v10354_v53 = vsel %vm7505_vm13, %v10353_v16, %v10349_v51  ;;  %4216 = vadd.xlane.f32.xlu1 %v4215_v5  ;;  %4213 = vadd.xlane.f32.xlu0 %v4212_v36  ;;  %v15206_v5 = vld [vmem:[%s15663_s25 + $0xa80] sm:$0xff]  }
 0x549   : > { %v10358_v38 = vrot.slane %v5888_v30, %v15887_v60  ;;  %v4007_v0 = vpop.xlane.xlu1 %4006  ;;  %v14106_v51 = vunpack.c.h.bf16 %v15206_v5  ;;  %v14105_v30 = vunpack.c.l.bf16 %v15206_v5 }
 0x54a   : > { %v5891_v17 = vmul.f32 0.0625, %v4007_v0  ;;  %v4004_v29 = vpop.xlane.xlu0 %4003 }
 0x54b   : > { %v10359_v25 = vsel %vm7512_vm14, %v10358_v38, %v10354_v53  ;;  %v5890_v33 = vmul.f32 0.0625, %v4004_v29  ;;  %v4245_v45 = vsel %vm2225_vm0, %v14106_v51, 0.0 }
 0x54c   : > { %v10364_v47 = vsel %vm7519_vm15, %v10363_v32, %v10359_v25  ;;  %v10372_v7 = vrot.slane %v5891_v17, %v15796_v12  ;;  %4222 = vadd.xlane.f32.xlu1 %v4221_v58  ;;  %4219 = vadd.xlane.f32.xlu0 %v4218_v2  ;;  %v15207_v32 = vld [vmem:[%s15663_s25 + $0xa88] sm:$0xff]   ;;  %v4242_v25 = vsel %vm2225_vm0, %v14105_v30, 0.0 }
 0x54d   : > { %v18151_v20 = vsel %vm20256_vm8, %v10364_v47, %v18033_v19  ;;  %v10368_v4 = vrot.slane %v5890_v33, %v15790_v9  ;;  %v4013_v21 = vpop.xlane.xlu1 %4012  ;;  %v14110_v2 = vunpack.c.h.bf16 %v15207_v32  ;;  %v14109_v33 = vunpack.c.l.bf16 %v15207_v32 }
 0x54e   : > { %v5893_v44 = vmul.f32 0.0625, %v4013_v21  ;;  %v4010_v40 = vpop.xlane.xlu0 %4009  ;;  %vm20258_vm8 = vcmask 654912  }
 0x54f   : > { %v10373_v8 = vsel %vm7421_vm1, %v10372_v7, %v10368_v4  ;;  %v5892_v14 = vmul.f32 0.0625, %v4010_v40  ;;  %v4251_v54 = vsel %vm2225_vm0, %v14110_v2, 0.0  ;;  %v4248_v40 = vsel %vm2225_vm0, %v14109_v33, 0.0 }
 0x550   : > { %v10382_v27 = vrot.slane %v5893_v44, %v15793_v11  ;;  %4228 = vadd.xlane.f32.xlu1 %v4227_v31  ;;  %4225 = vadd.xlane.f32.xlu0 %v4224_v15  ;;  %v15208_v31 = vld [vmem:[%s15663_s25 + $0xa90] sm:$0xff]  }
 0x551   : > { %v10377_v19 = vrot.slane %v5892_v14, %v15799_v13  ;;  %v4019_v6 = vpop.xlane.xlu1 %4018  ;;  %v14113_v14 = vunpack.c.l.bf16 %v15208_v31 }
 0x552   : > { %v5895_v16 = vmul.f32 0.0625, %v4019_v6  ;;  %v4016_v56 = vpop.xlane.xlu0 %4015 }
 0x553   : > { %v10378_v63 = vsel %vm7428_vm2, %v10377_v19, %v10373_v8  ;;  %v5894_v10 = vmul.f32 0.0625, %v4016_v56  ;;  %v14114_v8 = vunpack.c.h.bf16 %v15208_v31 }
 0x554   : > { %v10392_v36 = vrot.slane %v5895_v16, %v15804_v22  ;;  %v10383_v48 = vsel %vm7435_vm3, %v10382_v27, %v10378_v63  ;;  %4234 = vadd.xlane.f32.xlu1 %v4233_v52  ;;  %4231 = vadd.xlane.f32.xlu0 %v4230_v26  ;;  %v15209_v27 = vld [vmem:[%s15663_s25 + $0xa98] sm:$0xff]  }
 0x555   : > { %v10387_v55 = vrot.slane %v5894_v10, %v15807_v23  ;;  %v4025_v50 = vpop.xlane.xlu1 %4024  ;;  %v14118_v16 = vunpack.c.h.bf16 %v15209_v27  ;;  %v4257_v63 = vsel %vm2225_vm0, %v14114_v8, 0.0  ;;  %v4254_v10 = vsel %vm2225_vm0, %v14113_v14, 0.0 }
 0x556   : > { %v5897_v53 = vmul.f32 0.0625, %v4025_v50  ;;  %v4022_v62 = vpop.xlane.xlu0 %4021 }
 0x557   : > { %v10388_v46 = vsel %vm7442_vm4, %v10387_v55, %v10383_v48  ;;  %v5896_v38 = vmul.f32 0.0625, %v4022_v62  ;;  %v15210_v55 = vld [vmem:[%s15663_s25 + $0xaa0] sm:$0xff]   ;;  %v4263_v32 = vsel %vm2225_vm0, %v14118_v16, 0.0 }
 0x558   : > { %v10402_v0 = vrot.slane %v5897_v53, %v15821_v41  ;;  %v10393_v58 = vsel %vm7449_vm5, %v10392_v36, %v10388_v46  ;;  %4240 = vadd.xlane.f32.xlu1 %v4239_v49  ;;  %4237 = vadd.xlane.f32.xlu0 %v4236_v3  ;;  %v14117_v36 = vunpack.c.l.bf16 %v15209_v27 }
 0x559   : > { %v10397_v17 = vrot.slane %v5896_v38, %v15824_v42  ;;  %v4031_v29 = vpop.xlane.xlu1 %4030  ;;  %v14122_v38 = vunpack.c.h.bf16 %v15210_v55 }
 0x55a   : > { %v5899_v47 = vmul.f32 0.0625, %v4031_v29  ;;  %v4028_v7 = vpop.xlane.xlu0 %4027  ;;  %v4260_v46 = vsel %vm2225_vm0, %v14117_v36, 0.0 }
 0x55b   : > { %v10398_v15 = vsel %vm7456_vm6, %v10397_v17, %v10393_v58  ;;  %v5898_v4 = vmul.f32 0.0625, %v4028_v7  ;;  %v15211_v58 = vld [vmem:[%s15663_s25 + $0xaa8] sm:$0xff]  }
 0x55c   : > { %v10412_v21 = vrot.slane %v5899_v47, %v15837_v61  ;;  %v10403_v35 = vsel %vm7463_vm7, %v10402_v0, %v10398_v15  ;;  %4246 = vadd.xlane.f32.xlu1 %v4245_v45  ;;  %4243 = vadd.xlane.f32.xlu0 %v4242_v25  ;;  %v14121_v0 = vunpack.c.l.bf16 %v15210_v55  ;;  %v14126_v47 = vunpack.c.h.bf16 %v15211_v58 }
 0x55d   : > { %v10407_v39 = vrot.slane %v5898_v4, %v15843_v1  ;;  %v4037_v44 = vpop.xlane.xlu1 %4036  ;;  %v14125_v7 = vunpack.c.l.bf16 %v15211_v58  ;;  %v4269_v4 = vsel %vm2225_vm0, %v14122_v38, 0.0 }
 0x55e   : > { %v5901_v28 = vmul.f32 0.0625, %v4037_v44  ;;  %v4034_v19 = vpop.xlane.xlu0 %4033  ;;  %v4275_v27 = vsel %vm2225_vm0, %v14126_v47, 0.0 }
 0x55f   : > { %v10408_v6 = vsel %vm20257_vm9, %v10407_v39, %v10403_v35  ;;  %v5900_v52 = vmul.f32 0.0625, %v4034_v19  ;;  %vm20259_vm9 = vcmask 786112   ;;  %v15212_v39 = vld [vmem:[%s15663_s25 + $0xab0] sm:$0xff]  }
 0x560   : > { %v10422_v26 = vrot.slane %v5901_v28, %v15852_v18  ;;  %v10413_v34 = vsel %vm20258_vm8, %v10412_v21, %v10408_v6  ;;  %4252 = vadd.xlane.f32.xlu1 %v4251_v54  ;;  %4249 = vadd.xlane.f32.xlu0 %v4248_v40  ;;  %v4266_v21 = vsel %vm2225_vm0, %v14121_v0, 0.0  ;;  %v4272_v28 = vsel %vm2225_vm0, %v14125_v7, 0.0 }
 0x561   : > { %v10417_v56 = vrot.slane %v5900_v52, %v15858_v24  ;;  %v4043_v5 = vpop.xlane.xlu1 %4042  ;;  %v14130_v52 = vunpack.c.h.bf16 %v15212_v39  ;;  %vm20260_vm8 = vcmask 1042434  }
 0x562   : > { %v5903_v48 = vmul.f32 0.0625, %v4043_v5  ;;  %v4040_v49 = vpop.xlane.xlu0 %4039 }
 0x563   : > { %v10418_v50 = vsel %vm7484_vm10, %v10417_v56, %v10413_v34  ;;  %v5902_v3 = vmul.f32 0.0625, %v4040_v49  ;;  %v15213_v34 = vld [vmem:[%s15663_s25 + $0xab8] sm:$0xff]  }
 0x564   : > { %v10432_v51 = vrot.slane %v5903_v48, %v15867_v37  ;;  %v10423_v30 = vsel %vm20259_vm9, %v10422_v26, %v10418_v50  ;;  %4258 = vadd.xlane.f32.xlu1 %v4257_v63  ;;  %4255 = vadd.xlane.f32.xlu0 %v4254_v10  ;;  %v14129_v26 = vunpack.c.l.bf16 %v15212_v39  ;;  %v14134_v48 = vunpack.c.h.bf16 %v15213_v34 }
 0x565   : > { %v10427_v53 = vrot.slane %v5902_v3, %v15873_v43  ;;  %v4049_v62 = vpop.xlane.xlu1 %4048  ;;  %v4281_v50 = vsel %vm2225_vm0, %v14130_v52, 0.0  ;;  %vm20261_vm9 = vcmask 589312  }
 0x566   : > { %v5905_v2 = vmul.f32 0.0625, %v4049_v62  ;;  %v4046_v17 = vpop.xlane.xlu0 %4045  ;;  %v4278_v3 = vsel %vm2225_vm0, %v14129_v26, 0.0  ;;  %v4287_v0 = vsel %vm2225_vm0, %v14134_v48, 0.0 }
 0x567   : > { %v10428_v29 = vsel %vm7498_vm12, %v10427_v53, %v10423_v30  ;;  %v5904_v45 = vmul.f32 0.0625, %v4046_v17 }
 0x568   : > { %v10442_v25 = vrot.slane %v5905_v2, %v15882_v57  ;;  %v10433_v33 = vsel %vm7505_vm13, %v10432_v51, %v10428_v29  ;;  %4264 = vadd.xlane.f32.xlu1 %v4263_v32  ;;  %4261 = vadd.xlane.f32.xlu0 %v4260_v46  ;;  %v15214_v32 = vld [vmem:[%s15663_s25 + $0xac0] sm:$0xff]  }
 0x569   : > { %v10437_v31 = vrot.slane %v5904_v45, %v15887_v60  ;;  %v4055_v15 = vpop.xlane.xlu1 %4054  ;;  %v14138_v29 = vunpack.c.h.bf16 %v15214_v32  ;;  %v14137_v45 = vunpack.c.l.bf16 %v15214_v32 }
 0x56a   : > { %v5907_v35 = vmul.f32 0.0625, %v4055_v15  ;;  %v4052_v54 = vpop.xlane.xlu0 %4051 }
 0x56b   : > { %v10438_v44 = vsel %vm7512_vm14, %v10437_v31, %v10433_v33  ;;  %v5906_v40 = vmul.f32 0.0625, %v4052_v54  ;;  %v4293_v39 = vsel %vm2225_vm0, %v14138_v29, 0.0 }
 0x56c   : > { %v10443_v8 = vsel %vm7519_vm15, %v10442_v25, %v10438_v44  ;;  %v10451_v14 = vrot.slane %v5907_v35, %v15796_v12  ;;  %4270 = vadd.xlane.f32.xlu1 %v4269_v4  ;;  %4267 = vadd.xlane.f32.xlu0 %v4266_v21  ;;  %v15215_v25 = vld [vmem:[%s15663_s25 + $0xac8] sm:$0xff]   ;;  %v4290_v44 = vsel %vm2225_vm0, %v14137_v45, 0.0 }
 0x56d   : > { %v10447_v19 = vrot.slane %v5906_v40, %v15790_v9  ;;  %v4061_v6 = vpop.xlane.xlu1 %4060  ;;  %v18212_v16 = vsel %vm20260_vm8, %v10443_v8, %v18092_v59  ;;  %v14133_v59 = vunpack.c.l.bf16 %v15213_v34  ;;  %v14142_v21 = vunpack.c.h.bf16 %v15215_v25 }
 0x56e   : > { %v5909_v56 = vmul.f32 0.0625, %v4061_v6  ;;  %v4058_v5 = vpop.xlane.xlu0 %4057  ;;  %v14141_v40 = vunpack.c.l.bf16 %v15215_v25  ;;  %vm20262_vm8 = vcmask 654912  }
 0x56f   : > { %v10452_v63 = vsel %vm7421_vm1, %v10451_v14, %v10447_v19  ;;  %v5908_v10 = vmul.f32 0.0625, %v4058_v5  ;;  %v4284_v17 = vsel %vm2225_vm0, %v14133_v59, 0.0  ;;  %v4299_v26 = vsel %vm2225_vm0, %v14142_v21, 0.0 }
 0x570   : > { %v10461_v36 = vrot.slane %v5909_v56, %v15793_v11  ;;  %4276 = vadd.xlane.f32.xlu1 %v4275_v27  ;;  %4273 = vadd.xlane.f32.xlu0 %v4272_v28  ;;  %v15216_v27 = vld [vmem:[%s15663_s25 + $0xad0] sm:$0xff]   ;;  %v4296_v5 = vsel %vm2225_vm0, %v14141_v40, 0.0 }
 0x571   : > { %v10456_v49 = vrot.slane %v5908_v10, %v15799_v13  ;;  %v4067_v55 = vpop.xlane.xlu1 %4066  ;;  %v14145_v10 = vunpack.c.l.bf16 %v15216_v27 }
 0x572   : > { %v5911_v51 = vmul.f32 0.0625, %v4067_v55  ;;  %v4064_v30 = vpop.xlane.xlu0 %4063 }
 0x573   : > { %v10457_v53 = vsel %vm7428_vm2, %v10456_v49, %v10452_v63  ;;  %v5910_v62 = vmul.f32 0.0625, %v4064_v30  ;;  %v14146_v63 = vunpack.c.h.bf16 %v15216_v27 }
 0x574   : > { %v10471_v46 = vrot.slane %v5911_v51, %v15804_v22  ;;  %v10462_v38 = vsel %vm7435_vm3, %v10461_v36, %v10457_v53  ;;  %4282 = vadd.xlane.f32.xlu1 %v4281_v50  ;;  %4279 = vadd.xlane.f32.xlu0 %v4278_v3  ;;  %v15217_v36 = vld [vmem:[%s15663_s25 + $0xad8] sm:$0xff]  }
 0x575   : > { %v10466_v58 = vrot.slane %v5910_v62, %v15807_v23  ;;  %v4073_v2 = vpop.xlane.xlu1 %4072  ;;  %v14150_v51 = vunpack.c.h.bf16 %v15217_v36  ;;  %v4305_v53 = vsel %vm2225_vm0, %v14146_v63, 0.0  ;;  %v4302_v62 = vsel %vm2225_vm0, %v14145_v10, 0.0  ;;  %v15220_v63 = vld [vmem:[%s15663_s25 + $0xaf0] sm:$0xff]  }
 0x576   : > { %v5913_v33 = vmul.f32 0.0625, %v4073_v2  ;;  %v4070_v47 = vpop.xlane.xlu0 %4069  ;;  %v15218_v2 = vld [vmem:[%s15663_s25 + $0xae0] sm:$0xff]  }
 0x577   : > { %v10467_v7 = vsel %vm7442_vm4, %v10466_v58, %v10462_v38  ;;  %v5912_v31 = vmul.f32 0.0625, %v4070_v47  ;;  %v14154_v21 = vunpack.c.h.bf16 %v15218_v2 }
 0x578   : > { %v10481_v15 = vrot.slane %v5913_v33, %v15821_v41  ;;  %v10472_v4 = vsel %vm7449_vm5, %v10471_v46, %v10467_v7  ;;  %4288 = vadd.xlane.f32.xlu1 %v4287_v0  ;;  %4285 = vadd.xlane.f32.xlu0 %v4284_v17  ;;  %v14149_v46 = vunpack.c.l.bf16 %v15217_v36  ;;  %v4311_v7 = vsel %vm2225_vm0, %v14150_v51, 0.0 }
 0x579   : > { %v10476_v35 = vrot.slane %v5912_v31, %v15824_v42  ;;  %v4079_v54 = vpop.xlane.xlu1 %4078  ;;  %v14162_v51 = vunpack.c.h.bf16 %v15220_v63 }
 0x57a   : > { %v5915_v8 = vmul.f32 0.0625, %v4079_v54  ;;  %v4076_v14 = vpop.xlane.xlu0 %4075  ;;  %v15219_v54 = vld [vmem:[%s15663_s25 + $0xae8] sm:$0xff]  }
 0x57b   : > { %v10477_v28 = vsel %vm7456_vm6, %v10476_v35, %v10472_v4  ;;  %v5914_v19 = vmul.f32 0.0625, %v4076_v14  ;;  %v4308_v4 = vsel %vm2225_vm0, %v14149_v46, 0.0  ;;  %v14153_v35 = vunpack.c.l.bf16 %v15218_v2 }
 0x57c   : > { %v10491_v6 = vrot.slane %v5915_v8, %v15837_v61  ;;  %v10482_v52 = vsel %vm7463_vm7, %v10481_v15, %v10477_v28  ;;  %4294 = vadd.xlane.f32.xlu1 %v4293_v39  ;;  %4291 = vadd.xlane.f32.xlu0 %v4290_v44  ;;  %v14158_v28 = vunpack.c.h.bf16 %v15219_v54 }
 0x57d   : > { %v10486_v34 = vrot.slane %v5914_v19, %v15843_v1  ;;  %v4085_v56 = vpop.xlane.xlu1 %4084  ;;  %v14157_v19 = vunpack.c.l.bf16 %v15219_v54 }
 0x57e   : > { %v5917_v48 = vmul.f32 0.0625, %v4085_v56  ;;  %v4082_v49 = vpop.xlane.xlu0 %4081 }
 0x57f   : > { %v10487_v55 = vsel %vm20261_vm9, %v10486_v34, %v10482_v52  ;;  %v5916_v50 = vmul.f32 0.0625, %v4082_v49  ;;  %vm20263_vm9 = vcmask 786112   ;;  %v4314_v34 = vsel %vm2225_vm0, %v14153_v35, 0.0 }
 0x580   : > { %v10501_v3 = vrot.slane %v5917_v48, %v15852_v18  ;;  %v10492_v59 = vsel %vm20262_vm8, %v10491_v6, %v10487_v55  ;;  %4300 = vadd.xlane.f32.xlu1 %v4299_v26  ;;  %4297 = vadd.xlane.f32.xlu0 %v4296_v5  ;;  %v4317_v26 = vsel %vm2225_vm0, %v14154_v21, 0.0  ;;  %v4323_v55 = vsel %vm2225_vm0, %v14158_v28, 0.0 }
 0x581   : > { %v10496_v30 = vrot.slane %v5916_v50, %v15858_v24  ;;  %v4091_v32 = vpop.xlane.xlu1 %4090  ;;  %v4320_v50 = vsel %vm2225_vm0, %v14157_v19, 0.0  ;;  %vm20264_vm8 = vcmask 1043459  }
 0x582   : > { %v5919_v38 = vmul.f32 0.0625, %v4091_v32  ;;  %v15432_v0 = vpop.f32.mrb[2].mxu0  ;;  %v4088_v58 = vpop.xlane.xlu0 %4087  ;;  %v15221_v32 = vld [vmem:[%s15663_s25 + $0xaf8] sm:$0xff]  }
 0x583   : > { %v10497_v17 = vsel %vm7484_vm10, %v10496_v30, %v10492_v59  ;;  %v5918_v29 = vmul.f32 0.0625, %v4088_v58  ;;  %v15433_v45 = vpop.f32.mrb[3].mxu0  ;;  %v14161_v30 = vunpack.c.l.bf16 %v15220_v63  ;;  %v14166_v2 = vunpack.c.h.bf16 %v15221_v32 }
 0x584   : > { %v10511_v25 = vrot.slane %v5919_v38, %v15867_v37  ;;  %v10502_v33 = vsel %vm20263_vm9, %v10501_v3, %v10497_v17  ;;  %v15434_v47 = vadd.f32 %v15433_v45, %v15432_v0  ;;  %4306 = vadd.xlane.f32.xlu1 %v4305_v53  ;;  %4303 = vadd.xlane.f32.xlu0 %v4302_v62  ;;  %v4329_v45 = vsel %vm2225_vm0, %v14162_v51, 0.0 }
 0x585   : > { %v10506_v31 = vrot.slane %v5918_v29, %v15873_v43  ;;  %v4097_v15 = vpop.xlane.xlu1 %4096  ;;  %v4335_v35 = vsel %vm2225_vm0, %v14166_v2, 0.0  ;;  %vm20265_vm9 = vcmask 589312  }
 0x586   : > { %12655 = vst [vmem:[%s17269_s23 + $0x8] sm:$0xff] %v15434_v47  ;;  %v5921_v39 = vmul.f32 0.0625, %v4097_v15  ;;  %v4094_v44 = vpop.xlane.xlu0 %4093 }
 0x587   : > { %v10507_v40 = vsel %vm7498_vm12, %v10506_v31, %v10502_v33  ;;  %v5920_v8 = vmul.f32 0.0625, %v4094_v44 }
 0x588   : > { %v10521_v14 = vrot.slane %v5921_v39, %v15882_v57  ;;  %v10512_v27 = vsel %vm7505_vm13, %v10511_v25, %v10507_v40  ;;  %4312 = vadd.xlane.f32.xlu1 %v4311_v7  ;;  %4309 = vadd.xlane.f32.xlu0 %v4308_v4  ;;  %v4326_v25 = vsel %vm2225_vm0, %v14161_v30, 0.0  ;;  %v15222_v7 = vld [vmem:[%s15663_s25 + $0xb00] sm:$0xff]  }
 0x589   : > { %v10516_v6 = vrot.slane %v5920_v8, %v15887_v60  ;;  %v4103_v52 = vpop.xlane.xlu1 %4102  ;;  %v14170_v40 = vunpack.c.h.bf16 %v15222_v7  ;;  %v14169_v8 = vunpack.c.l.bf16 %v15222_v7 }
 0x58a   : > { %v5923_v56 = vmul.f32 0.0625, %v4103_v52  ;;  %v4100_v5 = vpop.xlane.xlu0 %4099 }
 0x58b   : > { %v10517_v10 = vsel %vm7512_vm14, %v10516_v6, %v10512_v27  ;;  %v5922_v36 = vmul.f32 0.0625, %v4100_v5  ;;  %v4341_v63 = vsel %vm2225_vm0, %v14170_v40, 0.0 }
 0x58c   : > { %v10522_v48 = vsel %vm7519_vm15, %v10521_v14, %v10517_v10  ;;  %v10530_v49 = vrot.slane %v5923_v56, %v15796_v12  ;;  %4318 = vadd.xlane.f32.xlu1 %v4317_v26  ;;  %4315 = vadd.xlane.f32.xlu0 %v4314_v34  ;;  %v15223_v14 = vld [vmem:[%s15663_s25 + $0xb08] sm:$0xff]   ;;  %v4338_v10 = vsel %vm2225_vm0, %v14169_v8, 0.0 }
 0x58d   : > { %v10526_v3 = vrot.slane %v5922_v36, %v15790_v9  ;;  %v4109_v59 = vpop.xlane.xlu1 %4108  ;;  %v18272_v53 = vsel %vm20264_vm8, %v10522_v48, %v18151_v20  ;;  %v14165_v20 = vunpack.c.l.bf16 %v15221_v32  ;;  %v14174_v34 = vunpack.c.h.bf16 %v15223_v14 }
 0x58e   : > { %v5925_v62 = vmul.f32 0.0625, %v4109_v59  ;;  %v4106_v46 = vpop.xlane.xlu0 %4105  ;;  %v14173_v36 = vunpack.c.l.bf16 %v15223_v14  ;;  %vm20266_vm8 = vcmask 654912  }
 0x58f   : > { %v10531_v38 = vsel %vm7421_vm1, %v10530_v49, %v10526_v3  ;;  %v5924_v0 = vmul.f32 0.0625, %v4106_v46  ;;  %v4332_v44 = vsel %vm2225_vm0, %v14165_v20, 0.0  ;;  %v4347_v30 = vsel %vm2225_vm0, %v14174_v34, 0.0 }
 0x590   : > { %v10540_v58 = vrot.slane %v5925_v62, %v15793_v11  ;;  %4324 = vadd.xlane.f32.xlu1 %v4323_v55  ;;  %4321 = vadd.xlane.f32.xlu0 %v4320_v50  ;;  %v15224_v55 = vld [vmem:[%s15663_s25 + $0xb10] sm:$0xff]   ;;  %v4344_v46 = vsel %vm2225_vm0, %v14173_v36, 0.0 }
 0x591   : > { %v10535_v17 = vrot.slane %v5924_v0, %v15799_v13  ;;  %v4115_v29 = vpop.xlane.xlu1 %4114  ;;  %v14177_v0 = vunpack.c.l.bf16 %v15224_v55 }
 0x592   : > { %v5927_v33 = vmul.f32 0.0625, %v4115_v29  ;;  %v4112_v47 = vpop.xlane.xlu0 %4111 }
 0x593   : > { %v10536_v31 = vsel %vm7428_vm2, %v10535_v17, %v10531_v38  ;;  %v5926_v15 = vmul.f32 0.0625, %v4112_v47  ;;  %v14178_v38 = vunpack.c.h.bf16 %v15224_v55 }
 0x594   : > { %v10550_v4 = vrot.slane %v5927_v33, %v15804_v22  ;;  %v10541_v21 = vsel %vm7435_vm3, %v10540_v58, %v10536_v31  ;;  %4330 = vadd.xlane.f32.xlu1 %v4329_v45  ;;  %4327 = vadd.xlane.f32.xlu0 %v4326_v25  ;;  %v15225_v58 = vld [vmem:[%s15663_s25 + $0xb18] sm:$0xff]  }
 0x595   : > { %v10545_v54 = vrot.slane %v5926_v15, %v15807_v23  ;;  %v4121_v39 = vpop.xlane.xlu1 %4120  ;;  %v14182_v33 = vunpack.c.h.bf16 %v15225_v58  ;;  %v4353_v31 = vsel %vm2225_vm0, %v14178_v38, 0.0  ;;  %v4350_v15 = vsel %vm2225_vm0, %v14177_v0, 0.0 }
 0x596   : > { %v5929_v27 = vmul.f32 0.0625, %v4121_v39  ;;  %v4118_v28 = vpop.xlane.xlu0 %4117 }
 0x597   : > { %v10546_v19 = vsel %vm7442_vm4, %v10545_v54, %v10541_v21  ;;  %v5928_v6 = vmul.f32 0.0625, %v4118_v28  ;;  %v15226_v54 = vld [vmem:[%s15663_s25 + $0xb20] sm:$0xff]   ;;  %v4359_v14 = vsel %vm2225_vm0, %v14182_v33, 0.0 }
 0x598   : > { %v10560_v52 = vrot.slane %v5929_v27, %v15821_v41  ;;  %v10551_v26 = vsel %vm7449_vm5, %v10550_v4, %v10546_v19  ;;  %4336 = vadd.xlane.f32.xlu1 %v4335_v35  ;;  %4333 = vadd.xlane.f32.xlu0 %v4332_v44  ;;  %v14181_v4 = vunpack.c.l.bf16 %v15225_v58 }
 0x599   : > { %v10555_v56 = vrot.slane %v5928_v6, %v15824_v42  ;;  %v4127_v5 = vpop.xlane.xlu1 %4126  ;;  %v14186_v6 = vunpack.c.h.bf16 %v15226_v54 }
 0x59a   : > { %v5931_v48 = vmul.f32 0.0625, %v4127_v5  ;;  %v4124_v49 = vpop.xlane.xlu0 %4123  ;;  %v4356_v19 = vsel %vm2225_vm0, %v14181_v4, 0.0 }
 0x59b   : > { %v10556_v50 = vsel %vm7456_vm6, %v10555_v56, %v10551_v26  ;;  %v5930_v3 = vmul.f32 0.0625, %v4124_v49  ;;  %v15227_v26 = vld [vmem:[%s15663_s25 + $0xb28] sm:$0xff]  }
 0x59c   : > { %v10570_v59 = vrot.slane %v5931_v48, %v15837_v61  ;;  %v10561_v51 = vsel %vm7463_vm7, %v10560_v52, %v10556_v50  ;;  %4342 = vadd.xlane.f32.xlu1 %v4341_v63  ;;  %4339 = vadd.xlane.f32.xlu0 %v4338_v10  ;;  %v14185_v52 = vunpack.c.l.bf16 %v15226_v54  ;;  %v14190_v48 = vunpack.c.h.bf16 %v15227_v26 }
 0x59d   : > { %v10565_v32 = vrot.slane %v5930_v3, %v15843_v1  ;;  %v4133_v62 = vpop.xlane.xlu1 %4132  ;;  %v14189_v49 = vunpack.c.l.bf16 %v15227_v26  ;;  %v4365_v3 = vsel %vm2225_vm0, %v14186_v6, 0.0 }
 0x59e   : > { %v5933_v2 = vmul.f32 0.0625, %v4133_v62  ;;  %v4130_v17 = vpop.xlane.xlu0 %4129  ;;  %v4371_v58 = vsel %vm2225_vm0, %v14190_v48, 0.0 }
 0x59f   : > { %v10566_v29 = vsel %vm20265_vm9, %v10565_v32, %v10561_v51  ;;  %v5932_v45 = vmul.f32 0.0625, %v4130_v17  ;;  %vm20267_vm9 = vcmask 786112   ;;  %v15228_v32 = vld [vmem:[%s15663_s25 + $0xb30] sm:$0xff]  }
 0x5a0   : > { %v10580_v25 = vrot.slane %v5933_v2, %v15852_v18  ;;  %v10571_v20 = vsel %vm20266_vm8, %v10570_v59, %v10566_v29  ;;  %4348 = vadd.xlane.f32.xlu1 %v4347_v30  ;;  %4345 = vadd.xlane.f32.xlu0 %v4344_v46  ;;  %v4362_v59 = vsel %vm2225_vm0, %v14185_v52, 0.0  ;;  %v4368_v2 = vsel %vm2225_vm0, %v14189_v49, 0.0 }
 0x5a1   : > { %v10575_v47 = vrot.slane %v5932_v45, %v15858_v24  ;;  %v4139_v7 = vpop.xlane.xlu1 %4138  ;;  %v14194_v45 = vunpack.c.h.bf16 %v15228_v32  ;;  %vm20268_vm8 = vcmask 1043459  }
 0x5a2   : > { %v5935_v21 = vmul.f32 0.0625, %v4139_v7  ;;  %v4136_v35 = vpop.xlane.xlu0 %4135 }
 0x5a3   : > { %v10576_v39 = vsel %vm7484_vm10, %v10575_v47, %v10571_v20  ;;  %v5934_v44 = vmul.f32 0.0625, %v4136_v35  ;;  %v15229_v20 = vld [vmem:[%s15663_s25 + $0xb38] sm:$0xff]  }
 0x5a4   : > { %v10590_v40 = vrot.slane %v5935_v21, %v15867_v37  ;;  %v10581_v8 = vsel %vm20267_vm9, %v10580_v25, %v10576_v39  ;;  %4354 = vadd.xlane.f32.xlu1 %v4353_v31  ;;  %4351 = vadd.xlane.f32.xlu0 %v4350_v15  ;;  %v14193_v25 = vunpack.c.l.bf16 %v15228_v32  ;;  %v14198_v21 = vunpack.c.h.bf16 %v15229_v20 }
 0x5a5   : > { %v10585_v27 = vrot.slane %v5934_v44, %v15873_v43  ;;  %v4145_v28 = vpop.xlane.xlu1 %4144  ;;  %v4377_v39 = vsel %vm2225_vm0, %v14194_v45, 0.0  ;;  %vm20269_vm9 = vcmask 589312  }
 0x5a6   : > { %v5937_v34 = vmul.f32 0.0625, %v4145_v28  ;;  %v4142_v56 = vpop.xlane.xlu0 %4141  ;;  %v4374_v44 = vsel %vm2225_vm0, %v14193_v25, 0.0  ;;  %v4383_v52 = vsel %vm2225_vm0, %v14198_v21, 0.0 }
 0x5a7   : > { %v10586_v5 = vsel %vm7498_vm12, %v10585_v27, %v10581_v8  ;;  %v5936_v63 = vmul.f32 0.0625, %v4142_v56 }
 0x5a8   : > { %v10600_v10 = vrot.slane %v5937_v34, %v15882_v57  ;;  %v10591_v36 = vsel %vm7505_vm13, %v10590_v40, %v10586_v5  ;;  %4360 = vadd.xlane.f32.xlu1 %v4359_v14  ;;  %4357 = vadd.xlane.f32.xlu0 %v4356_v19  ;;  %v15230_v14 = vld [vmem:[%s15663_s25 + $0xb40] sm:$0xff]  }
 0x5a9   : > { %v10595_v55 = vrot.slane %v5936_v63, %v15887_v60  ;;  %v4151_v50 = vpop.xlane.xlu1 %4150  ;;  %v14202_v5 = vunpack.c.h.bf16 %v15230_v14  ;;  %v14201_v63 = vunpack.c.l.bf16 %v15230_v14 }
 0x5aa   : > { %v5939_v51 = vmul.f32 0.0625, %v4151_v50  ;;  %v4148_v30 = vpop.xlane.xlu0 %4147 }
 0x5ab   : > { %v10596_v62 = vsel %vm7512_vm14, %v10595_v55, %v10591_v36  ;;  %v5938_v46 = vmul.f32 0.0625, %v4148_v30  ;;  %v4389_v32 = vsel %vm2225_vm0, %v14202_v5, 0.0 }
 0x5ac   : > { %v10601_v38 = vsel %vm7519_vm15, %v10600_v10, %v10596_v62  ;;  %v10609_v0 = vrot.slane %v5939_v51, %v15796_v12  ;;  %4366 = vadd.xlane.f32.xlu1 %v4365_v3  ;;  %4363 = vadd.xlane.f32.xlu0 %v4362_v59  ;;  %v15231_v10 = vld [vmem:[%s15663_s25 + $0xb48] sm:$0xff]   ;;  %v4386_v62 = vsel %vm2225_vm0, %v14201_v63, 0.0 }
 0x5ad   : > { %v10605_v17 = vrot.slane %v5938_v46, %v15790_v9  ;;  %v4157_v29 = vpop.xlane.xlu1 %4156  ;;  %v18331_v33 = vsel %vm20268_vm8, %v10601_v38, %v18212_v16  ;;  %v14197_v16 = vunpack.c.l.bf16 %v15229_v20  ;;  %v14206_v59 = vunpack.c.h.bf16 %v15231_v10 }
 0x5ae   : > { %v5941_v47 = vmul.f32 0.0625, %v4157_v29  ;;  %v4154_v7 = vpop.xlane.xlu0 %4153  ;;  %v14205_v46 = vunpack.c.l.bf16 %v15231_v10  ;;  %vm20270_vm8 = vcmask 654912  }
 0x5af   : > { %v10610_v31 = vsel %vm7421_vm1, %v10609_v0, %v10605_v17  ;;  %v5940_v15 = vmul.f32 0.0625, %v4154_v7  ;;  %v4380_v56 = vsel %vm2225_vm0, %v14197_v16, 0.0  ;;  %v4395_v25 = vsel %vm2225_vm0, %v14206_v59, 0.0 }
 0x5b0   : > { %v10619_v4 = vrot.slane %v5941_v47, %v15793_v11  ;;  %4372 = vadd.xlane.f32.xlu1 %v4371_v58  ;;  %4369 = vadd.xlane.f32.xlu0 %v4368_v2  ;;  %v15232_v58 = vld [vmem:[%s15663_s25 + $0xb50] sm:$0xff]   ;;  %v4392_v7 = vsel %vm2225_vm0, %v14205_v46, 0.0 }
 0x5b1   : > { %v10614_v35 = vrot.slane %v5940_v15, %v15799_v13  ;;  %v4163_v54 = vpop.xlane.xlu1 %4162  ;;  %v14209_v15 = vunpack.c.l.bf16 %v15232_v58 }
 0x5b2   : > { %v5943_v40 = vmul.f32 0.0625, %v4163_v54  ;;  %v4160_v8 = vpop.xlane.xlu0 %4159 }
 0x5b3   : > { %v10615_v27 = vsel %vm7428_vm2, %v10614_v35, %v10610_v31  ;;  %v5942_v28 = vmul.f32 0.0625, %v4160_v8  ;;  %v14210_v31 = vunpack.c.h.bf16 %v15232_v58 }
 0x5b4   : > { %v10629_v19 = vrot.slane %v5943_v40, %v15804_v22  ;;  %v10620_v6 = vsel %vm7435_vm3, %v10619_v4, %v10615_v27  ;;  %4378 = vadd.xlane.f32.xlu1 %v4377_v39  ;;  %4375 = vadd.xlane.f32.xlu0 %v4374_v44  ;;  %v15233_v4 = vld [vmem:[%s15663_s25 + $0xb58] sm:$0xff]  }
 0x5b5   : > { %v10624_v26 = vrot.slane %v5942_v28, %v15807_v23  ;;  %v4169_v34 = vpop.xlane.xlu1 %4168  ;;  %v14214_v40 = vunpack.c.h.bf16 %v15233_v4  ;;  %v4401_v27 = vsel %vm2225_vm0, %v14210_v31, 0.0  ;;  %v4398_v28 = vsel %vm2225_vm0, %v14209_v15, 0.0 }
 0x5b6   : > { %v5945_v36 = vmul.f32 0.0625, %v4169_v34  ;;  %v4166_v48 = vpop.xlane.xlu0 %4165 }
 0x5b7   : > { %v10625_v49 = vsel %vm7442_vm4, %v10624_v26, %v10620_v6  ;;  %v5944_v55 = vmul.f32 0.0625, %v4166_v48  ;;  %v15234_v26 = vld [vmem:[%s15663_s25 + $0xb60] sm:$0xff]   ;;  %v4407_v10 = vsel %vm2225_vm0, %v14214_v40, 0.0 }
 0x5b8   : > { %v10639_v50 = vrot.slane %v5945_v36, %v15821_v41  ;;  %v10630_v3 = vsel %vm7449_vm5, %v10629_v19, %v10625_v49  ;;  %4384 = vadd.xlane.f32.xlu1 %v4383_v52  ;;  %4381 = vadd.xlane.f32.xlu0 %v4380_v56  ;;  %v14213_v19 = vunpack.c.l.bf16 %v15233_v4 }
 0x5b9   : > { %v10634_v51 = vrot.slane %v5944_v55, %v15824_v42  ;;  %v4175_v30 = vpop.xlane.xlu1 %4174  ;;  %v14218_v55 = vunpack.c.h.bf16 %v15234_v26 }
 0x5ba   : > { %v5947_v38 = vmul.f32 0.0625, %v4175_v30  ;;  %v4172_v0 = vpop.xlane.xlu0 %4171  ;;  %v4404_v49 = vsel %vm2225_vm0, %v14213_v19, 0.0 }
 0x5bb   : > { %v10635_v2 = vsel %vm7456_vm6, %v10634_v51, %v10630_v3  ;;  %v5946_v17 = vmul.f32 0.0625, %v4172_v0  ;;  %v15235_v3 = vld [vmem:[%s15663_s25 + $0xb68] sm:$0xff]  }
 0x5bc   : > { %v10649_v29 = vrot.slane %v5947_v38, %v15837_v61  ;;  %v10640_v45 = vsel %vm7463_vm7, %v10639_v50, %v10635_v2  ;;  %4390 = vadd.xlane.f32.xlu1 %v4389_v32  ;;  %4387 = vadd.xlane.f32.xlu0 %v4386_v62  ;;  %v14217_v50 = vunpack.c.l.bf16 %v15234_v26  ;;  %v14222_v38 = vunpack.c.h.bf16 %v15235_v3 }
 0x5bd   : > { %v10644_v20 = vrot.slane %v5946_v17, %v15843_v1  ;;  %v4181_v47 = vpop.xlane.xlu1 %4180  ;;  %v14221_v0 = vunpack.c.l.bf16 %v15235_v3  ;;  %v4413_v17 = vsel %vm2225_vm0, %v14218_v55, 0.0 }
 0x5be   : > { %v5949_v21 = vmul.f32 0.0625, %v4181_v47  ;;  %v4178_v35 = vpop.xlane.xlu0 %4177  ;;  %v4419_v4 = vsel %vm2225_vm0, %v14222_v38, 0.0 }
 0x5bf   : > { %v10645_v54 = vsel %vm20269_vm9, %v10644_v20, %v10640_v45  ;;  %v5948_v39 = vmul.f32 0.0625, %v4178_v35  ;;  %vm20271_vm9 = vcmask 786112   ;;  %v15236_v20 = vld [vmem:[%s15663_s25 + $0xb70] sm:$0xff]  }
 0x5c0   : > { %v10659_v44 = vrot.slane %v5949_v21, %v15852_v18  ;;  %v10650_v16 = vsel %vm20270_vm8, %v10649_v29, %v10645_v54  ;;  %4396 = vadd.xlane.f32.xlu1 %v4395_v25  ;;  %4393 = vadd.xlane.f32.xlu0 %v4392_v7  ;;  %v4410_v29 = vsel %vm2225_vm0, %v14217_v50, 0.0  ;;  %v4416_v21 = vsel %vm2225_vm0, %v14221_v0, 0.0 }
 0x5c1   : > { %v10654_v8 = vrot.slane %v5948_v39, %v15858_v24  ;;  %v4187_v14 = vpop.xlane.xlu1 %4186  ;;  %v14226_v39 = vunpack.c.h.bf16 %v15236_v20  ;;  %vm20272_vm8 = vcmask 1044484  }
 0x5c2   : > { %v5951_v6 = vmul.f32 0.0625, %v4187_v14  ;;  %v4184_v52 = vpop.xlane.xlu0 %4183 }
 0x5c3   : > { %v10655_v34 = vsel %vm7484_vm10, %v10654_v8, %v10650_v16  ;;  %v5950_v56 = vmul.f32 0.0625, %v4184_v52  ;;  %v15237_v16 = vld [vmem:[%s15663_s25 + $0xb78] sm:$0xff]  }
 0x5c4   : > { %v10669_v5 = vrot.slane %v5951_v6, %v15867_v37  ;;  %v10660_v63 = vsel %vm20271_vm9, %v10659_v44, %v10655_v34  ;;  %4402 = vadd.xlane.f32.xlu1 %v4401_v27  ;;  %4399 = vadd.xlane.f32.xlu0 %v4398_v28  ;;  %v14225_v44 = vunpack.c.l.bf16 %v15236_v20  ;;  %v14230_v6 = vunpack.c.h.bf16 %v15237_v16 }
 0x5c5   : > { %v10664_v36 = vrot.slane %v5950_v56, %v15873_v43  ;;  %v4193_v48 = vpop.xlane.xlu1 %4192  ;;  %v4425_v34 = vsel %vm2225_vm0, %v14226_v39, 0.0  ;;  %vm20273_vm9 = vcmask 589312  }
 0x5c6   : > { %v5953_v59 = vmul.f32 0.0625, %v4193_v48  ;;  %v4190_v51 = vpop.xlane.xlu0 %4189  ;;  %v4422_v56 = vsel %vm2225_vm0, %v14225_v44, 0.0  ;;  %v4431_v50 = vsel %vm2225_vm0, %v14230_v6, 0.0 }
 0x5c7   : > { %v10665_v30 = vsel %vm7498_vm12, %v10664_v36, %v10660_v63  ;;  %v5952_v32 = vmul.f32 0.0625, %v4190_v51 }
 0x5c8   : > { %v10679_v62 = vrot.slane %v5953_v59, %v15882_v57  ;;  %v10670_v46 = vsel %vm7505_vm13, %v10669_v5, %v10665_v30  ;;  %4408 = vadd.xlane.f32.xlu1 %v4407_v10  ;;  %4405 = vadd.xlane.f32.xlu0 %v4404_v49  ;;  %v15238_v10 = vld [vmem:[%s15663_s25 + $0xb80] sm:$0xff]  }
 0x5c9   : > { %v10674_v58 = vrot.slane %v5952_v32, %v15887_v60  ;;  %v4199_v2 = vpop.xlane.xlu1 %4198  ;;  %v14234_v30 = vunpack.c.h.bf16 %v15238_v10  ;;  %v14233_v32 = vunpack.c.l.bf16 %v15238_v10 }
 0x5ca   : > { %v5955_v45 = vmul.f32 0.0625, %v4199_v2  ;;  %v4196_v25 = vpop.xlane.xlu0 %4195 }
 0x5cb   : > { %v10675_v47 = vsel %vm7512_vm14, %v10674_v58, %v10670_v46  ;;  %v5954_v7 = vmul.f32 0.0625, %v4196_v25  ;;  %v4437_v20 = vsel %vm2225_vm0, %v14234_v30, 0.0 }
 0x5cc   : > { %v10680_v31 = vsel %vm7519_vm15, %v10679_v62, %v10675_v47  ;;  %v10688_v15 = vrot.slane %v5955_v45, %v15796_v12  ;;  %4414 = vadd.xlane.f32.xlu1 %v4413_v17  ;;  %4411 = vadd.xlane.f32.xlu0 %v4410_v29  ;;  %v15239_v62 = vld [vmem:[%s15663_s25 + $0xb88] sm:$0xff]   ;;  %v4434_v47 = vsel %vm2225_vm0, %v14233_v32, 0.0 }
 0x5cd   : > { %v10684_v35 = vrot.slane %v5954_v7, %v15790_v9  ;;  %v4205_v54 = vpop.xlane.xlu1 %4204  ;;  %v18390_v40 = vsel %vm20272_vm8, %v10680_v31, %v18272_v53  ;;  %v14229_v53 = vunpack.c.l.bf16 %v15237_v16  ;;  %v14238_v29 = vunpack.c.h.bf16 %v15239_v62 }
 0x5ce   : > { %v5957_v8 = vmul.f32 0.0625, %v4205_v54  ;;  %v4202_v14 = vpop.xlane.xlu0 %4201  ;;  %v14237_v7 = vunpack.c.l.bf16 %v15239_v62  ;;  %vm20274_vm8 = vcmask 654912  }
 0x5cf   : > { %v10689_v27 = vsel %vm7421_vm1, %v10688_v15, %v10684_v35  ;;  %v5956_v28 = vmul.f32 0.0625, %v4202_v14  ;;  %v4428_v51 = vsel %vm2225_vm0, %v14229_v53, 0.0  ;;  %v4443_v44 = vsel %vm2225_vm0, %v14238_v29, 0.0 }
 0x5d0   : > { %v10698_v19 = vrot.slane %v5957_v8, %v15793_v11  ;;  %4420 = vadd.xlane.f32.xlu1 %v4419_v4  ;;  %4417 = vadd.xlane.f32.xlu0 %v4416_v21  ;;  %v15240_v4 = vld [vmem:[%s15663_s25 + $0xb90] sm:$0xff]   ;;  %v4440_v14 = vsel %vm2225_vm0, %v14237_v7, 0.0 }
 0x5d1   : > { %v10693_v52 = vrot.slane %v5956_v28, %v15799_v13  ;;  %v4211_v26 = vpop.xlane.xlu1 %4210  ;;  %v14241_v28 = vunpack.c.l.bf16 %v15240_v4 }
 0x5d2   : > { %v5959_v5 = vmul.f32 0.0625, %v4211_v26  ;;  %v4208_v63 = vpop.xlane.xlu0 %4207 }
 0x5d3   : > { %v10694_v36 = vsel %vm7428_vm2, %v10693_v52, %v10689_v27  ;;  %v5958_v48 = vmul.f32 0.0625, %v4208_v63  ;;  %v14242_v27 = vunpack.c.h.bf16 %v15240_v4 }
 0x5d4   : > { %v10708_v49 = vrot.slane %v5959_v5, %v15804_v22  ;;  %v10699_v55 = vsel %vm7435_vm3, %v10698_v19, %v10694_v36  ;;  %4426 = vadd.xlane.f32.xlu1 %v4425_v34  ;;  %4423 = vadd.xlane.f32.xlu0 %v4422_v56  ;;  %v15241_v19 = vld [vmem:[%s15663_s25 + $0xb98] sm:$0xff]  }
 0x5d5   : > { %v10703_v3 = vrot.slane %v5958_v48, %v15807_v23  ;;  %v4217_v59 = vpop.xlane.xlu1 %4216  ;;  %v14246_v5 = vunpack.c.h.bf16 %v15241_v19  ;;  %v4449_v36 = vsel %vm2225_vm0, %v14242_v27, 0.0  ;;  %v4446_v48 = vsel %vm2225_vm0, %v14241_v28, 0.0 }
 0x5d6   : > { %v5961_v46 = vmul.f32 0.0625, %v4217_v59  ;;  %v4214_v38 = vpop.xlane.xlu0 %4213 }
 0x5d7   : > { %v10704_v0 = vsel %vm7442_vm4, %v10703_v3, %v10699_v55  ;;  %v5960_v58 = vmul.f32 0.0625, %v4214_v38  ;;  %v15242_v3 = vld [vmem:[%s15663_s25 + $0xba0] sm:$0xff]   ;;  %v4455_v62 = vsel %vm2225_vm0, %v14246_v5, 0.0 }
 0x5d8   : > { %v10718_v2 = vrot.slane %v5961_v46, %v15821_v41  ;;  %v10709_v17 = vsel %vm7449_vm5, %v10708_v49, %v10704_v0  ;;  %4432 = vadd.xlane.f32.xlu1 %v4431_v50  ;;  %4429 = vadd.xlane.f32.xlu0 %v4428_v51  ;;  %v14245_v49 = vunpack.c.l.bf16 %v15241_v19 }
 0x5d9   : > { %v10713_v45 = vrot.slane %v5960_v58, %v15824_v42  ;;  %v4223_v25 = vpop.xlane.xlu1 %4222  ;;  %v14250_v58 = vunpack.c.h.bf16 %v15242_v3 }
 0x5da   : > { %v5963_v31 = vmul.f32 0.0625, %v4223_v25  ;;  %v4220_v15 = vpop.xlane.xlu0 %4219  ;;  %v4452_v0 = vsel %vm2225_vm0, %v14245_v49, 0.0 }
 0x5db   : > { %v10714_v21 = vsel %vm7456_vm6, %v10713_v45, %v10709_v17  ;;  %v5962_v35 = vmul.f32 0.0625, %v4220_v15  ;;  %v15243_v17 = vld [vmem:[%s15663_s25 + $0xba8] sm:$0xff]  }
 0x5dc   : > { %v10728_v54 = vrot.slane %v5963_v31, %v15837_v61  ;;  %v10719_v39 = vsel %vm7463_vm7, %v10718_v2, %v10714_v21  ;;  %4438 = vadd.xlane.f32.xlu1 %v4437_v20  ;;  %4435 = vadd.xlane.f32.xlu0 %v4434_v47  ;;  %v14249_v2 = vunpack.c.l.bf16 %v15242_v3  ;;  %v14254_v31 = vunpack.c.h.bf16 %v15243_v17 }
 0x5dd   : > { %v10723_v16 = vrot.slane %v5962_v35, %v15843_v1  ;;  %v4229_v8 = vpop.xlane.xlu1 %4228  ;;  %v14253_v15 = vunpack.c.l.bf16 %v15243_v17  ;;  %v4461_v35 = vsel %vm2225_vm0, %v14250_v58, 0.0 }
 0x5de   : > { %v5965_v6 = vmul.f32 0.0625, %v4229_v8  ;;  %v4226_v52 = vpop.xlane.xlu0 %4225  ;;  %v4467_v28 = vsel %vm2225_vm0, %v14254_v31, 0.0 }
 0x5df   : > { %v10724_v26 = vsel %vm20273_vm9, %v10723_v16, %v10719_v39  ;;  %v5964_v34 = vmul.f32 0.0625, %v4226_v52  ;;  %vm20275_vm9 = vcmask 786112   ;;  %v15244_v16 = vld [vmem:[%s15663_s25 + $0xbb0] sm:$0xff]   ;;  %v4464_v19 = vsel %vm2225_vm0, %v14253_v15, 0.0 }
 0x5e0   : > { %v10738_v56 = vrot.slane %v5965_v6, %v15852_v18  ;;  %v10729_v53 = vsel %vm20274_vm8, %v10728_v54, %v10724_v26  ;;  %4444 = vadd.xlane.f32.xlu1 %v4443_v44  ;;  %4441 = vadd.xlane.f32.xlu0 %v4440_v14  ;;  %v4458_v54 = vsel %vm2225_vm0, %v14249_v2, 0.0  ;;  %vm20276_vm8 = vcmask 1044484  }
 0x5e1   : > { %v10733_v63 = vrot.slane %v5964_v34, %v15858_v24  ;;  %v4235_v10 = vpop.xlane.xlu1 %4234  ;;  %v14258_v34 = vunpack.c.h.bf16 %v15244_v16 }
 0x5e2   : > { %v5967_v55 = vmul.f32 0.0625, %v4235_v10  ;;  %v4232_v50 = vpop.xlane.xlu0 %4231 }
 0x5e3   : > { %v10734_v59 = vsel %vm7484_vm10, %v10733_v63, %v10729_v53  ;;  %v5966_v51 = vmul.f32 0.0625, %v4232_v50  ;;  %v15245_v53 = vld [vmem:[%s15663_s25 + $0xbb8] sm:$0xff]  }
 0x5e4   : > { %v10748_v30 = vrot.slane %v5967_v55, %v15867_v37  ;;  %v10739_v32 = vsel %vm20275_vm9, %v10738_v56, %v10734_v59  ;;  %4450 = vadd.xlane.f32.xlu1 %v4449_v36  ;;  %4447 = vadd.xlane.f32.xlu0 %v4446_v48  ;;  %v14257_v56 = vunpack.c.l.bf16 %v15244_v16  ;;  %v14262_v55 = vunpack.c.h.bf16 %v15245_v53 }
 0x5e5   : > { %v10743_v46 = vrot.slane %v5966_v51, %v15873_v43  ;;  %v4241_v38 = vpop.xlane.xlu1 %4240  ;;  %v4473_v59 = vsel %vm2225_vm0, %v14258_v34, 0.0  ;;  %vm20277_vm9 = vcmask 589312  }
 0x5e6   : > { %v5969_v29 = vmul.f32 0.0625, %v4241_v38  ;;  %v4238_v45 = vpop.xlane.xlu0 %4237  ;;  %v4470_v51 = vsel %vm2225_vm0, %v14257_v56, 0.0  ;;  %v4479_v2 = vsel %vm2225_vm0, %v14262_v55, 0.0 }
 0x5e7   : > { %v10744_v25 = vsel %vm7498_vm12, %v10743_v46, %v10739_v32  ;;  %v5968_v20 = vmul.f32 0.0625, %v4238_v45 }
 0x5e8   : > { %v10758_v47 = vrot.slane %v5969_v29, %v15882_v57  ;;  %v10749_v7 = vsel %vm7505_vm13, %v10748_v30, %v10744_v25  ;;  %4456 = vadd.xlane.f32.xlu1 %v4455_v62  ;;  %4453 = vadd.xlane.f32.xlu0 %v4452_v0  ;;  %v15246_v62 = vld [vmem:[%s15663_s25 + $0xbc0] sm:$0xff]  }
 0x5e9   : > { %v10753_v4 = vrot.slane %v5968_v20, %v15887_v60  ;;  %v4247_v21 = vpop.xlane.xlu1 %4246  ;;  %v14266_v25 = vunpack.c.h.bf16 %v15246_v62  ;;  %v14265_v20 = vunpack.c.l.bf16 %v15246_v62 }
 0x5ea   : > { %v5971_v39 = vmul.f32 0.0625, %v4247_v21  ;;  %v4244_v44 = vpop.xlane.xlu0 %4243 }
 0x5eb   : > { %v10754_v8 = vsel %vm7512_vm14, %v10753_v4, %v10749_v7  ;;  %v5970_v14 = vmul.f32 0.0625, %v4244_v44  ;;  %v4485_v16 = vsel %vm2225_vm0, %v14266_v25, 0.0 }
 0x5ec   : > { %v10767_v27 = vrot.slane %v5971_v39, %v15796_v12  ;;  %4462 = vadd.xlane.f32.xlu1 %v4461_v35  ;;  %4459 = vadd.xlane.f32.xlu0 %v4458_v54  ;;  %v10759_v6 = vsel %vm7519_vm15, %v10758_v47, %v10754_v8  ;;  %v15247_v47 = vld [vmem:[%s15663_s25 + $0xbc8] sm:$0xff]   ;;  %v4482_v8 = vsel %vm2225_vm0, %v14265_v20, 0.0 }
 0x5ed   : > { %v10763_v52 = vrot.slane %v5970_v14, %v15790_v9  ;;  %v4253_v26 = vpop.xlane.xlu1 %4252  ;;  %v18449_v5 = vsel %vm20276_vm8, %v10759_v6, %v18331_v33  ;;  %v14261_v33 = vunpack.c.l.bf16 %v15245_v53  ;;  %v14270_v54 = vunpack.c.h.bf16 %v15247_v47 }
 0x5ee   : > { %v5973_v63 = vmul.f32 0.0625, %v4253_v26  ;;  %v4250_v10 = vpop.xlane.xlu0 %4249  ;;  %v14269_v14 = vunpack.c.l.bf16 %v15247_v47  ;;  %vm20278_vm8 = vcmask 654912  }
 0x5ef   : > { %v10768_v36 = vsel %vm7421_vm1, %v10767_v27, %v10763_v52  ;;  %v5972_v48 = vmul.f32 0.0625, %v4250_v10  ;;  %v4476_v45 = vsel %vm2225_vm0, %v14261_v33, 0.0  ;;  %v4491_v56 = vsel %vm2225_vm0, %v14270_v54, 0.0 }
 0x5f0   : > { %v10777_v49 = vrot.slane %v5973_v63, %v15793_v11  ;;  %4468 = vadd.xlane.f32.xlu1 %v4467_v28  ;;  %4465 = vadd.xlane.f32.xlu0 %v4464_v19  ;;  %v15248_v19 = vld [vmem:[%s15663_s25 + $0xbd0] sm:$0xff]   ;;  %v4488_v10 = vsel %vm2225_vm0, %v14269_v14, 0.0 }
 0x5f1   : > { %v10772_v50 = vrot.slane %v5972_v48, %v15799_v13  ;;  %v4259_v3 = vpop.xlane.xlu1 %4258  ;;  %v14273_v48 = vunpack.c.l.bf16 %v15248_v19 }
 0x5f2   : > { %v5975_v30 = vmul.f32 0.0625, %v4259_v3  ;;  %v4256_v32 = vpop.xlane.xlu0 %4255 }
 0x5f3   : > { %v10773_v46 = vsel %vm7428_vm2, %v10772_v50, %v10768_v36  ;;  %v5974_v38 = vmul.f32 0.0625, %v4256_v32  ;;  %v14274_v36 = vunpack.c.h.bf16 %v15248_v19 }
 0x5f4   : > { %v10787_v0 = vrot.slane %v5975_v30, %v15804_v22  ;;  %v10778_v58 = vsel %vm7435_vm3, %v10777_v49, %v10773_v46  ;;  %4474 = vadd.xlane.f32.xlu1 %v4473_v59  ;;  %4471 = vadd.xlane.f32.xlu0 %v4470_v51  ;;  %v15249_v49 = vld [vmem:[%s15663_s25 + $0xbd8] sm:$0xff]  }
 0x5f5   : > { %v10782_v17 = vrot.slane %v5974_v38, %v15807_v23  ;;  %v4265_v29 = vpop.xlane.xlu1 %4264  ;;  %v14278_v30 = vunpack.c.h.bf16 %v15249_v49  ;;  %v4497_v46 = vsel %vm2225_vm0, %v14274_v36, 0.0  ;;  %v4494_v38 = vsel %vm2225_vm0, %v14273_v48, 0.0 }
 0x5f6   : > { %v5977_v7 = vmul.f32 0.0625, %v4265_v29  ;;  %v4262_v31 = vpop.xlane.xlu0 %4261 }
 0x5f7   : > { %v10783_v15 = vsel %vm7442_vm4, %v10782_v17, %v10778_v58  ;;  %v5976_v4 = vmul.f32 0.0625, %v4262_v31  ;;  %v15250_v17 = vld [vmem:[%s15663_s25 + $0xbe0] sm:$0xff]   ;;  %v4503_v47 = vsel %vm2225_vm0, %v14278_v30, 0.0 }
 0x5f8   : > { %v10797_v21 = vrot.slane %v5977_v7, %v15821_v41  ;;  %v10788_v35 = vsel %vm7449_vm5, %v10787_v0, %v10783_v15  ;;  %4480 = vadd.xlane.f32.xlu1 %v4479_v2  ;;  %4477 = vadd.xlane.f32.xlu0 %v4476_v45  ;;  %v14277_v0 = vunpack.c.l.bf16 %v15249_v49 }
 0x5f9   : > { %v10792_v39 = vrot.slane %v5976_v4, %v15824_v42  ;;  %v4271_v44 = vpop.xlane.xlu1 %4270  ;;  %v14282_v4 = vunpack.c.h.bf16 %v15250_v17 }
 0x5fa   : > { %v5979_v27 = vmul.f32 0.0625, %v4271_v44  ;;  %v4268_v28 = vpop.xlane.xlu0 %4267  ;;  %v4500_v15 = vsel %vm2225_vm0, %v14277_v0, 0.0 }
 0x5fb   : > { %v10793_v6 = vsel %vm7456_vm6, %v10792_v39, %v10788_v35  ;;  %v5978_v52 = vmul.f32 0.0625, %v4268_v28  ;;  %v15251_v35 = vld [vmem:[%s15663_s25 + $0xbe8] sm:$0xff]  }
 0x5fc   : > { %v10807_v26 = vrot.slane %v5979_v27, %v15837_v61  ;;  %v10798_v34 = vsel %vm7463_vm7, %v10797_v21, %v10793_v6  ;;  %4486 = vadd.xlane.f32.xlu1 %v4485_v16  ;;  %4483 = vadd.xlane.f32.xlu0 %v4482_v8  ;;  %v14281_v21 = vunpack.c.l.bf16 %v15250_v17  ;;  %v14286_v27 = vunpack.c.h.bf16 %v15251_v35 }
 0x5fd   : > { %v10802_v53 = vrot.slane %v5978_v52, %v15843_v1  ;;  %v4277_v63 = vpop.xlane.xlu1 %4276  ;;  %v14285_v28 = vunpack.c.l.bf16 %v15251_v35  ;;  %v4509_v52 = vsel %vm2225_vm0, %v14282_v4, 0.0 }
 0x5fe   : > { %v5981_v55 = vmul.f32 0.0625, %v4277_v63  ;;  %v4274_v50 = vpop.xlane.xlu0 %4273  ;;  %v4515_v48 = vsel %vm2225_vm0, %v14286_v27, 0.0 }
 0x5ff   : > { %v10803_v3 = vsel %vm20277_vm9, %v10802_v53, %v10798_v34  ;;  %v5980_v59 = vmul.f32 0.0625, %v4274_v50  ;;  %vm20279_vm9 = vcmask 786112   ;;  %v15252_v53 = vld [vmem:[%s15663_s25 + $0xbf0] sm:$0xff]   ;;  %v4512_v49 = vsel %vm2225_vm0, %v14285_v28, 0.0 }
 0x600   : > { %v10817_v51 = vrot.slane %v5981_v55, %v15852_v18  ;;  %v10808_v33 = vsel %vm20278_vm8, %v10807_v26, %v10803_v3  ;;  %4492 = vadd.xlane.f32.xlu1 %v4491_v56  ;;  %4489 = vadd.xlane.f32.xlu0 %v4488_v10  ;;  %v4506_v26 = vsel %vm2225_vm0, %v14281_v21, 0.0  ;;  %vm20280_vm8 = vcmask 1045509  }
 0x601   : > { %v10812_v32 = vrot.slane %v5980_v59, %v15858_v24  ;;  %v4283_v62 = vpop.xlane.xlu1 %4282  ;;  %v14290_v59 = vunpack.c.h.bf16 %v15252_v53 }
 0x602   : > { %v5983_v58 = vmul.f32 0.0625, %v4283_v62  ;;  %v4280_v2 = vpop.xlane.xlu0 %4279 }
 0x603   : > { %v10813_v29 = vsel %vm7484_vm10, %v10812_v32, %v10808_v33  ;;  %v5982_v45 = vmul.f32 0.0625, %v4280_v2  ;;  %v15253_v33 = vld [vmem:[%s15663_s25 + $0xbf8] sm:$0xff]  }
 0x604   : > { %v10827_v25 = vrot.slane %v5983_v58, %v15867_v37  ;;  %v10818_v20 = vsel %vm20279_vm9, %v10817_v51, %v10813_v29  ;;  %4498 = vadd.xlane.f32.xlu1 %v4497_v46  ;;  %4495 = vadd.xlane.f32.xlu0 %v4494_v38  ;;  %v14289_v51 = vunpack.c.l.bf16 %v15252_v53  ;;  %v14294_v58 = vunpack.c.h.bf16 %v15253_v33 }
 0x605   : > { %v10822_v7 = vrot.slane %v5982_v45, %v15873_v43  ;;  %v4289_v31 = vpop.xlane.xlu1 %4288  ;;  %v4521_v29 = vsel %vm2225_vm0, %v14290_v59, 0.0  ;;  %vm20281_vm9 = vcmask 589312  }
 0x606   : > { %v5985_v54 = vmul.f32 0.0625, %v4289_v31  ;;  %v4286_v39 = vpop.xlane.xlu0 %4285  ;;  %v4518_v45 = vsel %vm2225_vm0, %v14289_v51, 0.0  ;;  %v4527_v21 = vsel %vm2225_vm0, %v14294_v58, 0.0 }
 0x607   : > { %v10823_v44 = vsel %vm7498_vm12, %v10822_v7, %v10818_v20  ;;  %v5984_v16 = vmul.f32 0.0625, %v4286_v39 }
 0x608   : > { %v10837_v8 = vrot.slane %v5985_v54, %v15882_v57  ;;  %v10828_v14 = vsel %vm7505_vm13, %v10827_v25, %v10823_v44  ;;  %4504 = vadd.xlane.f32.xlu1 %v4503_v47  ;;  %4501 = vadd.xlane.f32.xlu0 %v4500_v15  ;;  %v15254_v47 = vld [vmem:[%s15663_s25 + $0xc00] sm:$0xff]  }
 0x609   : > { %v10832_v19 = vrot.slane %v5984_v16, %v15887_v60  ;;  %v4295_v6 = vpop.xlane.xlu1 %4294  ;;  %v14298_v44 = vunpack.c.h.bf16 %v15254_v47  ;;  %v14297_v16 = vunpack.c.l.bf16 %v15254_v47 }
 0x60a   : > { %v5987_v34 = vmul.f32 0.0625, %v4295_v6  ;;  %v4292_v56 = vpop.xlane.xlu0 %4291 }
 0x60b   : > { %v10833_v63 = vsel %vm7512_vm14, %v10832_v19, %v10828_v14  ;;  %v5986_v10 = vmul.f32 0.0625, %v4292_v56  ;;  %v4533_v53 = vsel %vm2225_vm0, %v14298_v44, 0.0 }
 0x60c   : > { %v10846_v36 = vrot.slane %v5987_v34, %v15796_v12  ;;  %4510 = vadd.xlane.f32.xlu1 %v4509_v52  ;;  %4507 = vadd.xlane.f32.xlu0 %v4506_v26  ;;  %v10838_v55 = vsel %vm7519_vm15, %v10837_v8, %v10833_v63  ;;  %v15255_v8 = vld [vmem:[%s15663_s25 + $0xc08] sm:$0xff]   ;;  %v4530_v63 = vsel %vm2225_vm0, %v14297_v16, 0.0 }
 0x60d   : > { %v10842_v50 = vrot.slane %v5986_v10, %v15790_v9  ;;  %v4301_v3 = vpop.xlane.xlu1 %4300  ;;  %v18508_v30 = vsel %vm20280_vm8, %v10838_v55, %v18390_v40  ;;  %v14293_v40 = vunpack.c.l.bf16 %v15253_v33  ;;  %v14302_v26 = vunpack.c.h.bf16 %v15255_v8 }
 0x60e   : > { %v5989_v32 = vmul.f32 0.0625, %v4301_v3  ;;  %v4298_v62 = vpop.xlane.xlu0 %4297  ;;  %v14301_v10 = vunpack.c.l.bf16 %v15255_v8  ;;  %vm20282_vm8 = vcmask 654912  }
 0x60f   : > { %v10847_v46 = vsel %vm7421_vm1, %v10846_v36, %v10842_v50  ;;  %v5988_v38 = vmul.f32 0.0625, %v4298_v62  ;;  %v4524_v39 = vsel %vm2225_vm0, %v14293_v40, 0.0  ;;  %v4539_v51 = vsel %vm2225_vm0, %v14302_v26, 0.0 }
 0x610   : > { %v10856_v0 = vrot.slane %v5989_v32, %v15793_v11  ;;  %4516 = vadd.xlane.f32.xlu1 %v4515_v48  ;;  %4513 = vadd.xlane.f32.xlu0 %v4512_v49  ;;  %v15256_v49 = vld [vmem:[%s15663_s25 + $0xc10] sm:$0xff]   ;;  %v4536_v62 = vsel %vm2225_vm0, %v14301_v10, 0.0 }
 0x611   : > { %v10851_v2 = vrot.slane %v5988_v38, %v15799_v13  ;;  %v4307_v17 = vpop.xlane.xlu1 %4306  ;;  %v14305_v38 = vunpack.c.l.bf16 %v15256_v49 }
 0x612   : > { %v5991_v25 = vmul.f32 0.0625, %v4307_v17  ;;  %v4304_v20 = vpop.xlane.xlu0 %4303 }
 0x613   : > { %v10852_v7 = vsel %vm7428_vm2, %v10851_v2, %v10847_v46  ;;  %v5990_v31 = vmul.f32 0.0625, %v4304_v20  ;;  %v14306_v46 = vunpack.c.h.bf16 %v15256_v49 }
 0x614   : > { %v10866_v15 = vrot.slane %v5991_v25, %v15804_v22  ;;  %v10857_v4 = vsel %vm7435_vm3, %v10856_v0, %v10852_v7  ;;  %4522 = vadd.xlane.f32.xlu1 %v4521_v29  ;;  %4519 = vadd.xlane.f32.xlu0 %v4518_v45  ;;  %v15257_v0 = vld [vmem:[%s15663_s25 + $0xc18] sm:$0xff]  }
 0x615   : > { %v10861_v35 = vrot.slane %v5990_v31, %v15807_v23  ;;  %v4313_v54 = vpop.xlane.xlu1 %4312  ;;  %v14310_v25 = vunpack.c.h.bf16 %v15257_v0  ;;  %v4545_v7 = vsel %vm2225_vm0, %v14306_v46, 0.0  ;;  %v4542_v31 = vsel %vm2225_vm0, %v14305_v38, 0.0 }
 0x616   : > { %v5993_v14 = vmul.f32 0.0625, %v4313_v54  ;;  %v4310_v27 = vpop.xlane.xlu0 %4309 }
 0x617   : > { %v10862_v28 = vsel %vm7442_vm4, %v10861_v35, %v10857_v4  ;;  %v5992_v19 = vmul.f32 0.0625, %v4310_v27  ;;  %v15258_v35 = vld [vmem:[%s15663_s25 + $0xc20] sm:$0xff]   ;;  %v4551_v8 = vsel %vm2225_vm0, %v14310_v25, 0.0 }
 0x618   : > { %v10876_v6 = vrot.slane %v5993_v14, %v15821_v41  ;;  %v10867_v52 = vsel %vm7449_vm5, %v10866_v15, %v10862_v28  ;;  %4528 = vadd.xlane.f32.xlu1 %v4527_v21  ;;  %4525 = vadd.xlane.f32.xlu0 %v4524_v39  ;;  %v14309_v15 = vunpack.c.l.bf16 %v15257_v0 }
 0x619   : > { %v10871_v34 = vrot.slane %v5992_v19, %v15824_v42  ;;  %v4319_v56 = vpop.xlane.xlu1 %4318  ;;  %v14314_v19 = vunpack.c.h.bf16 %v15258_v35 }
 0x61a   : > { %v5995_v36 = vmul.f32 0.0625, %v4319_v56  ;;  %v4316_v48 = vpop.xlane.xlu0 %4315  ;;  %v4548_v28 = vsel %vm2225_vm0, %v14309_v15, 0.0 }
 0x61b   : > { %v10872_v55 = vsel %vm7456_vm6, %v10871_v34, %v10867_v52  ;;  %v5994_v50 = vmul.f32 0.0625, %v4316_v48  ;;  %v15259_v52 = vld [vmem:[%s15663_s25 + $0xc28] sm:$0xff]  }
 0x61c   : > { %v10886_v3 = vrot.slane %v5995_v36, %v15837_v61  ;;  %v10877_v59 = vsel %vm7463_vm7, %v10876_v6, %v10872_v55  ;;  %4534 = vadd.xlane.f32.xlu1 %v4533_v53  ;;  %4531 = vadd.xlane.f32.xlu0 %v4530_v63  ;;  %v14313_v6 = vunpack.c.l.bf16 %v15258_v35  ;;  %v14318_v36 = vunpack.c.h.bf16 %v15259_v52 }
 0x61d   : > { %v10881_v33 = vrot.slane %v5994_v50, %v15843_v1  ;;  %v4325_v32 = vpop.xlane.xlu1 %4324  ;;  %v14317_v48 = vunpack.c.l.bf16 %v15259_v52  ;;  %v4557_v50 = vsel %vm2225_vm0, %v14314_v19, 0.0 }
 0x61e   : > { %v5997_v58 = vmul.f32 0.0625, %v4325_v32  ;;  %v4322_v2 = vpop.xlane.xlu0 %4321  ;;  %v4563_v38 = vsel %vm2225_vm0, %v14318_v36, 0.0 }
 0x61f   : > { %v10882_v17 = vsel %vm20281_vm9, %v10881_v33, %v10877_v59  ;;  %v5996_v29 = vmul.f32 0.0625, %v4322_v2  ;;  %vm20283_vm9 = vcmask 786112   ;;  %v15260_v33 = vld [vmem:[%s15663_s25 + $0xc30] sm:$0xff]   ;;  %v4560_v0 = vsel %vm2225_vm0, %v14317_v48, 0.0 }
 0x620   : > { %v10896_v45 = vrot.slane %v5997_v58, %v15852_v18  ;;  %v10887_v40 = vsel %vm20282_vm8, %v10886_v3, %v10882_v17  ;;  %4540 = vadd.xlane.f32.xlu1 %v4539_v51  ;;  %4537 = vadd.xlane.f32.xlu0 %v4536_v62  ;;  %v4554_v3 = vsel %vm2225_vm0, %v14313_v6, 0.0  ;;  %vm20284_vm8 = vcmask 1045509  }
 0x621   : > { %v10891_v20 = vrot.slane %v5996_v29, %v15858_v24  ;;  %v4331_v47 = vpop.xlane.xlu1 %4330  ;;  %v14322_v29 = vunpack.c.h.bf16 %v15260_v33 }
 0x622   : > { %v5999_v4 = vmul.f32 0.0625, %v4331_v47  ;;  %v4328_v21 = vpop.xlane.xlu0 %4327 }
 0x623   : > { %v10892_v54 = vsel %vm7484_vm10, %v10891_v20, %v10887_v40  ;;  %v5998_v39 = vmul.f32 0.0625, %v4328_v21  ;;  %v15261_v40 = vld [vmem:[%s15663_s25 + $0xc38] sm:$0xff]  }
 0x624   : > { %v10906_v44 = vrot.slane %v5999_v4, %v15867_v37  ;;  %v10897_v16 = vsel %vm20283_vm9, %v10896_v45, %v10892_v54  ;;  %4546 = vadd.xlane.f32.xlu1 %v4545_v7  ;;  %4543 = vadd.xlane.f32.xlu0 %v4542_v31  ;;  %v14321_v45 = vunpack.c.l.bf16 %v15260_v33  ;;  %v14326_v4 = vunpack.c.h.bf16 %v15261_v40 }
 0x625   : > { %v10901_v14 = vrot.slane %v5998_v39, %v15873_v43  ;;  %v4337_v27 = vpop.xlane.xlu1 %4336  ;;  %v4569_v54 = vsel %vm2225_vm0, %v14322_v29, 0.0  ;;  %vm20285_vm9 = vcmask 589312  }
 0x626   : > { %v6001_v26 = vmul.f32 0.0625, %v4337_v27  ;;  %v4334_v34 = vpop.xlane.xlu0 %4333  ;;  %v4566_v39 = vsel %vm2225_vm0, %v14321_v45, 0.0  ;;  %v4575_v6 = vsel %vm2225_vm0, %v14326_v4, 0.0 }
 0x627   : > { %v10902_v56 = vsel %vm7498_vm12, %v10901_v14, %v10897_v16  ;;  %v6000_v53 = vmul.f32 0.0625, %v4334_v34 }
 0x628   : > { %v10916_v63 = vrot.slane %v6001_v26, %v15882_v57  ;;  %v10907_v10 = vsel %vm7505_vm13, %v10906_v44, %v10902_v56  ;;  %4552 = vadd.xlane.f32.xlu1 %v4551_v8  ;;  %4549 = vadd.xlane.f32.xlu0 %v4548_v28  ;;  %v15262_v8 = vld [vmem:[%s15663_s25 + $0xc40] sm:$0xff]  }
 0x629   : > { %v10911_v49 = vrot.slane %v6000_v53, %v15887_v60  ;;  %v4343_v55 = vpop.xlane.xlu1 %4342  ;;  %v14330_v56 = vunpack.c.h.bf16 %v15262_v8  ;;  %v14329_v53 = vunpack.c.l.bf16 %v15262_v8 }
 0x62a   : > { %v6003_v59 = vmul.f32 0.0625, %v4343_v55  ;;  %v4340_v51 = vpop.xlane.xlu0 %4339 }
 0x62b   : > { %v10912_v32 = vsel %vm7512_vm14, %v10911_v49, %v10907_v10  ;;  %v6002_v62 = vmul.f32 0.0625, %v4340_v51  ;;  %v4581_v33 = vsel %vm2225_vm0, %v14330_v56, 0.0 }
 0x62c   : > { %v10925_v46 = vrot.slane %v6003_v59, %v15796_v12  ;;  %4558 = vadd.xlane.f32.xlu1 %v4557_v50  ;;  %4555 = vadd.xlane.f32.xlu0 %v4554_v3  ;;  %v10917_v58 = vsel %vm7519_vm15, %v10916_v63, %v10912_v32  ;;  %v15263_v63 = vld [vmem:[%s15663_s25 + $0xc48] sm:$0xff]   ;;  %v4578_v32 = vsel %vm2225_vm0, %v14329_v53, 0.0 }
 0x62d   : > { %v10921_v2 = vrot.slane %v6002_v62, %v15790_v9  ;;  %v4349_v17 = vpop.xlane.xlu1 %4348  ;;  %v18567_v25 = vsel %vm20284_vm8, %v10917_v58, %v18449_v5  ;;  %v14325_v5 = vunpack.c.l.bf16 %v15261_v40  ;;  %v14334_v3 = vunpack.c.h.bf16 %v15263_v63 }
 0x62e   : > { %v6005_v20 = vmul.f32 0.0625, %v4349_v17  ;;  %v4346_v47 = vpop.xlane.xlu0 %4345  ;;  %v14333_v62 = vunpack.c.l.bf16 %v15263_v63  ;;  %vm20286_vm8 = vcmask 654912  }
 0x62f   : > { %v10926_v7 = vsel %vm7421_vm1, %v10925_v46, %v10921_v2  ;;  %v6004_v31 = vmul.f32 0.0625, %v4346_v47  ;;  %v4572_v34 = vsel %vm2225_vm0, %v14325_v5, 0.0  ;;  %v4587_v45 = vsel %vm2225_vm0, %v14334_v3, 0.0 }
 0x630   : > { %v10935_v15 = vrot.slane %v6005_v20, %v15793_v11  ;;  %4564 = vadd.xlane.f32.xlu1 %v4563_v38  ;;  %4561 = vadd.xlane.f32.xlu0 %v4560_v0  ;;  %v15264_v0 = vld [vmem:[%s15663_s25 + $0xc50] sm:$0xff]   ;;  %v4584_v47 = vsel %vm2225_vm0, %v14333_v62, 0.0 }
 0x631   : > { %v10930_v21 = vrot.slane %v6004_v31, %v15799_v13  ;;  %v4355_v35 = vpop.xlane.xlu1 %4354  ;;  %v14337_v31 = vunpack.c.l.bf16 %v15264_v0 }
 0x632   : > { %v6007_v44 = vmul.f32 0.0625, %v4355_v35  ;;  %v4352_v16 = vpop.xlane.xlu0 %4351 }
 0x633   : > { %v10931_v14 = vsel %vm7428_vm2, %v10930_v21, %v10926_v7  ;;  %v6006_v27 = vmul.f32 0.0625, %v4352_v16  ;;  %v14338_v7 = vunpack.c.h.bf16 %v15264_v0 }
 0x634   : > { %v10945_v28 = vrot.slane %v6007_v44, %v15804_v22  ;;  %v10936_v19 = vsel %vm7435_vm3, %v10935_v15, %v10931_v14  ;;  %4570 = vadd.xlane.f32.xlu1 %v4569_v54  ;;  %4567 = vadd.xlane.f32.xlu0 %v4566_v39  ;;  %v15265_v15 = vld [vmem:[%s15663_s25 + $0xc58] sm:$0xff]  }
 0x635   : > { %v10940_v52 = vrot.slane %v6006_v27, %v15807_v23  ;;  %v4361_v26 = vpop.xlane.xlu1 %4360  ;;  %v14342_v44 = vunpack.c.h.bf16 %v15265_v15  ;;  %v4593_v14 = vsel %vm2225_vm0, %v14338_v7, 0.0  ;;  %v4590_v27 = vsel %vm2225_vm0, %v14337_v31, 0.0 }
 0x636   : > { %v6009_v10 = vmul.f32 0.0625, %v4361_v26  ;;  %v4358_v36 = vpop.xlane.xlu0 %4357 }
 0x637   : > { %v10941_v48 = vsel %vm7442_vm4, %v10940_v52, %v10936_v19  ;;  %v6008_v49 = vmul.f32 0.0625, %v4358_v36  ;;  %v15266_v52 = vld [vmem:[%s15663_s25 + $0xc60] sm:$0xff]   ;;  %v4599_v63 = vsel %vm2225_vm0, %v14342_v44, 0.0 }
 0x638   : > { %v10955_v55 = vrot.slane %v6009_v10, %v15821_v41  ;;  %v10946_v50 = vsel %vm7449_vm5, %v10945_v28, %v10941_v48  ;;  %4576 = vadd.xlane.f32.xlu1 %v4575_v6  ;;  %4573 = vadd.xlane.f32.xlu0 %v4572_v34  ;;  %v14341_v28 = vunpack.c.l.bf16 %v15265_v15 }
 0x639   : > { %v10950_v59 = vrot.slane %v6008_v49, %v15824_v42  ;;  %v4367_v51 = vpop.xlane.xlu1 %4366  ;;  %v14346_v49 = vunpack.c.h.bf16 %v15266_v52 }
 0x63a   : > { %v6011_v46 = vmul.f32 0.0625, %v4367_v51  ;;  %v4364_v38 = vpop.xlane.xlu0 %4363  ;;  %v4596_v48 = vsel %vm2225_vm0, %v14341_v28, 0.0 }
 0x63b   : > { %v10951_v58 = vsel %vm7456_vm6, %v10950_v59, %v10946_v50  ;;  %v6010_v2 = vmul.f32 0.0625, %v4364_v38  ;;  %v15267_v50 = vld [vmem:[%s15663_s25 + $0xc68] sm:$0xff]  }
 0x63c   : > { %v10965_v17 = vrot.slane %v6011_v46, %v15837_v61  ;;  %v10956_v29 = vsel %vm7463_vm7, %v10955_v55, %v10951_v58  ;;  %4582 = vadd.xlane.f32.xlu1 %v4581_v33  ;;  %4579 = vadd.xlane.f32.xlu0 %v4578_v32  ;;  %v14345_v55 = vunpack.c.l.bf16 %v15266_v52  ;;  %v14350_v46 = vunpack.c.h.bf16 %v15267_v50 }
 0x63d   : > { %v10960_v40 = vrot.slane %v6010_v2, %v15843_v1  ;;  %v4373_v20 = vpop.xlane.xlu1 %4372  ;;  %v14349_v38 = vunpack.c.l.bf16 %v15267_v50  ;;  %v4605_v2 = vsel %vm2225_vm0, %v14346_v49, 0.0 }
 0x63e   : > { %v6013_v4 = vmul.f32 0.0625, %v4373_v20  ;;  %v4370_v21 = vpop.xlane.xlu0 %4369  ;;  %v4611_v31 = vsel %vm2225_vm0, %v14350_v46, 0.0 }
 0x63f   : > { %v10961_v35 = vsel %vm20285_vm9, %v10960_v40, %v10956_v29  ;;  %v6012_v54 = vmul.f32 0.0625, %v4370_v21  ;;  %vm20287_vm9 = vcmask 786112   ;;  %v15268_v40 = vld [vmem:[%s15663_s25 + $0xc70] sm:$0xff]   ;;  %v4608_v15 = vsel %vm2225_vm0, %v14349_v38, 0.0 }
 0x640   : > { %v10975_v39 = vrot.slane %v6013_v4, %v15852_v18  ;;  %v10966_v5 = vsel %vm20286_vm8, %v10965_v17, %v10961_v35  ;;  %4588 = vadd.xlane.f32.xlu1 %v4587_v45  ;;  %4585 = vadd.xlane.f32.xlu0 %v4584_v47  ;;  %v4602_v17 = vsel %vm2225_vm0, %v14345_v55, 0.0  ;;  %vm20288_vm8 = vcmask 1046534  }
 0x641   : > { %v10970_v16 = vrot.slane %v6012_v54, %v15858_v24  ;;  %v4379_v8 = vpop.xlane.xlu1 %4378  ;;  %v14354_v54 = vunpack.c.h.bf16 %v15268_v40 }
 0x642   : > { %v6015_v19 = vmul.f32 0.0625, %v4379_v8  ;;  %v4376_v6 = vpop.xlane.xlu0 %4375 }
 0x643   : > { %v10971_v26 = vsel %vm7484_vm10, %v10970_v16, %v10966_v5  ;;  %v6014_v34 = vmul.f32 0.0625, %v4376_v6  ;;  %v15269_v5 = vld [vmem:[%s15663_s25 + $0xc78] sm:$0xff]  }
 0x644   : > { %v10985_v56 = vrot.slane %v6015_v19, %v15867_v37  ;;  %v10976_v53 = vsel %vm20287_vm9, %v10975_v39, %v10971_v26  ;;  %4594 = vadd.xlane.f32.xlu1 %v4593_v14  ;;  %4591 = vadd.xlane.f32.xlu0 %v4590_v27  ;;  %v14353_v39 = vunpack.c.l.bf16 %v15268_v40  ;;  %v14358_v19 = vunpack.c.h.bf16 %v15269_v5 }
 0x645   : > { %v10980_v10 = vrot.slane %v6014_v34, %v15873_v43  ;;  %v4385_v36 = vpop.xlane.xlu1 %4384  ;;  %v4617_v26 = vsel %vm2225_vm0, %v14354_v54, 0.0  ;;  %vm20289_vm9 = vcmask 589312  }
 0x646   : > { %v6017_v3 = vmul.f32 0.0625, %v4385_v36  ;;  %v4382_v59 = vpop.xlane.xlu0 %4381  ;;  %v4614_v34 = vsel %vm2225_vm0, %v14353_v39, 0.0  ;;  %v4623_v55 = vsel %vm2225_vm0, %v14358_v19, 0.0 }
 0x647   : > { %v10981_v51 = vsel %vm7498_vm12, %v10980_v10, %v10976_v53  ;;  %v6016_v33 = vmul.f32 0.0625, %v4382_v59 }
 0x648   : > { %v10995_v32 = vrot.slane %v6017_v3, %v15882_v57  ;;  %v10986_v62 = vsel %vm7505_vm13, %v10985_v56, %v10981_v51  ;;  %4600 = vadd.xlane.f32.xlu1 %v4599_v63  ;;  %4597 = vadd.xlane.f32.xlu0 %v4596_v48  ;;  %v15270_v63 = vld [vmem:[%s15663_s25 + $0xc80] sm:$0xff]  }
 0x649   : > { %v10990_v0 = vrot.slane %v6016_v33, %v15887_v60  ;;  %v4391_v58 = vpop.xlane.xlu1 %4390  ;;  %v14362_v51 = vunpack.c.h.bf16 %v15270_v63  ;;  %v14361_v33 = vunpack.c.l.bf16 %v15270_v63 }
 0x64a   : > { %v6019_v29 = vmul.f32 0.0625, %v4391_v58  ;;  %v4388_v45 = vpop.xlane.xlu0 %4387 }
 0x64b   : > { %v10991_v20 = vsel %vm7512_vm14, %v10990_v0, %v10986_v62  ;;  %v6018_v47 = vmul.f32 0.0625, %v4388_v45  ;;  %v4629_v40 = vsel %vm2225_vm0, %v14362_v51, 0.0 }
 0x64c   : > { %v11004_v7 = vrot.slane %v6019_v29, %v15796_v12  ;;  %4606 = vadd.xlane.f32.xlu1 %v4605_v2  ;;  %4603 = vadd.xlane.f32.xlu0 %v4602_v17  ;;  %v10996_v4 = vsel %vm7519_vm15, %v10995_v32, %v10991_v20  ;;  %v15271_v32 = vld [vmem:[%s15663_s25 + $0xc88] sm:$0xff]   ;;  %v4626_v20 = vsel %vm2225_vm0, %v14361_v33, 0.0 }
 0x64d   : > { %v11000_v21 = vrot.slane %v6018_v47, %v15790_v9  ;;  %v4397_v35 = vpop.xlane.xlu1 %4396  ;;  %v18626_v44 = vsel %vm20288_vm8, %v10996_v4, %v18508_v30  ;;  %v14357_v30 = vunpack.c.l.bf16 %v15269_v5  ;;  %v14366_v17 = vunpack.c.h.bf16 %v15271_v32 }
 0x64e   : > { %v6021_v16 = vmul.f32 0.0625, %v4397_v35  ;;  %v4394_v8 = vpop.xlane.xlu0 %4393  ;;  %v14365_v47 = vunpack.c.l.bf16 %v15271_v32  ;;  %vm20290_vm8 = vcmask 654912  }
 0x64f   : > { %v11005_v14 = vsel %vm7421_vm1, %v11004_v7, %v11000_v21  ;;  %v6020_v27 = vmul.f32 0.0625, %v4394_v8  ;;  %v4620_v59 = vsel %vm2225_vm0, %v14357_v30, 0.0  ;;  %v4635_v39 = vsel %vm2225_vm0, %v14366_v17, 0.0 }
 0x650   : > { %v11014_v28 = vrot.slane %v6021_v16, %v15793_v11  ;;  %4612 = vadd.xlane.f32.xlu1 %v4611_v31  ;;  %4609 = vadd.xlane.f32.xlu0 %v4608_v15  ;;  %v15272_v15 = vld [vmem:[%s15663_s25 + $0xc90] sm:$0xff]   ;;  %v4632_v8 = vsel %vm2225_vm0, %v14365_v47, 0.0 }
 0x651   : > { %v11009_v6 = vrot.slane %v6020_v27, %v15799_v13  ;;  %v4403_v52 = vpop.xlane.xlu1 %4402  ;;  %v14369_v27 = vunpack.c.l.bf16 %v15272_v15 }
 0x652   : > { %v6023_v56 = vmul.f32 0.0625, %v4403_v52  ;;  %v4400_v53 = vpop.xlane.xlu0 %4399 }
 0x653   : > { %v11010_v10 = vsel %vm7428_vm2, %v11009_v6, %v11005_v14  ;;  %v6022_v36 = vmul.f32 0.0625, %v4400_v53  ;;  %v14370_v14 = vunpack.c.h.bf16 %v15272_v15 }
 0x654   : > { %v11024_v48 = vrot.slane %v6023_v56, %v15804_v22  ;;  %v11015_v49 = vsel %vm7435_vm3, %v11014_v28, %v11010_v10  ;;  %4618 = vadd.xlane.f32.xlu1 %v4617_v26  ;;  %4615 = vadd.xlane.f32.xlu0 %v4614_v34  ;;  %v15273_v28 = vld [vmem:[%s15663_s25 + $0xc98] sm:$0xff]  }
 0x655   : > { %v11019_v50 = vrot.slane %v6022_v36, %v15807_v23  ;;  %v4409_v3 = vpop.xlane.xlu1 %4408  ;;  %v14374_v56 = vunpack.c.h.bf16 %v15273_v28  ;;  %v4641_v10 = vsel %vm2225_vm0, %v14370_v14, 0.0  ;;  %v4638_v36 = vsel %vm2225_vm0, %v14369_v27, 0.0 }
 0x656   : > { %v6025_v62 = vmul.f32 0.0625, %v4409_v3  ;;  %v4406_v46 = vpop.xlane.xlu0 %4405 }
 0x657   : > { %v11020_v38 = vsel %vm7442_vm4, %v11019_v50, %v11015_v49  ;;  %v6024_v0 = vmul.f32 0.0625, %v4406_v46  ;;  %v15274_v50 = vld [vmem:[%s15663_s25 + $0xca0] sm:$0xff]   ;;  %v4647_v32 = vsel %vm2225_vm0, %v14374_v56, 0.0 }
 0x658   : > { %v11034_v58 = vrot.slane %v6025_v62, %v15821_v41  ;;  %v11025_v2 = vsel %vm7449_vm5, %v11024_v48, %v11020_v38  ;;  %4624 = vadd.xlane.f32.xlu1 %v4623_v55  ;;  %4621 = vadd.xlane.f32.xlu0 %v4620_v59  ;;  %v14373_v48 = vunpack.c.l.bf16 %v15273_v28 }
 0x659   : > { %v11029_v29 = vrot.slane %v6024_v0, %v15824_v42  ;;  %v4415_v45 = vpop.xlane.xlu1 %4414  ;;  %v14378_v0 = vunpack.c.h.bf16 %v15274_v50 }
 0x65a   : > { %v6027_v7 = vmul.f32 0.0625, %v4415_v45  ;;  %v4412_v31 = vpop.xlane.xlu0 %4411  ;;  %v4644_v38 = vsel %vm2225_vm0, %v14373_v48, 0.0 }
 0x65b   : > { %v11030_v4 = vsel %vm7456_vm6, %v11029_v29, %v11025_v2  ;;  %v6026_v21 = vmul.f32 0.0625, %v4412_v31  ;;  %v15275_v2 = vld [vmem:[%s15663_s25 + $0xca8] sm:$0xff]  }
 0x65c   : > { %v11044_v35 = vrot.slane %v6027_v7, %v15837_v61  ;;  %v11035_v54 = vsel %vm7463_vm7, %v11034_v58, %v11030_v4  ;;  %4630 = vadd.xlane.f32.xlu1 %v4629_v40  ;;  %4627 = vadd.xlane.f32.xlu0 %v4626_v20  ;;  %v14377_v58 = vunpack.c.l.bf16 %v15274_v50  ;;  %v14382_v47 = vunpack.c.h.bf16 %v15275_v2 }
 0x65d   : > { %v11039_v5 = vrot.slane %v6026_v21, %v15843_v1  ;;  %v4421_v16 = vpop.xlane.xlu1 %4420  ;;  %v4653_v4 = vsel %vm2225_vm0, %v14378_v0, 0.0  ;;  %v15280_v0 = vld [vmem:[%s15663_s25 + $0xcd0] sm:$0xff]  }
 0x65e   : > { %v6029_v19 = vmul.f32 0.0625, %v4421_v16  ;;  %v4418_v6 = vpop.xlane.xlu0 %4417  ;;  %v4650_v21 = vsel %vm2225_vm0, %v14377_v58, 0.0  ;;  %v4659_v16 = vsel %vm2225_vm0, %v14382_v47, 0.0 }
 0x65f   : > { %v11040_v52 = vsel %vm20289_vm9, %v11039_v5, %v11035_v54  ;;  %v6028_v26 = vmul.f32 0.0625, %v4418_v6  ;;  %vm20291_vm9 = vcmask 786112  }
 0x660   : > { %v11054_v34 = vrot.slane %v6029_v19, %v15852_v18  ;;  %v11045_v30 = vsel %vm20290_vm8, %v11044_v35, %v11040_v52  ;;  %4636 = vadd.xlane.f32.xlu1 %v4635_v39  ;;  %4633 = vadd.xlane.f32.xlu0 %v4632_v8  ;;  %v14381_v35 = vunpack.c.l.bf16 %v15275_v2  ;;  %v15276_v39 = vld [vmem:[%s15663_s25 + $0xcb0] sm:$0xff]   ;;  %vm20292_vm8 = vcmask 1046534  }
 0x661   : > { %v11049_v53 = vrot.slane %v6028_v26, %v15858_v24  ;;  %v4427_v63 = vpop.xlane.xlu1 %4426  ;;  %v14386_v28 = vunpack.c.h.bf16 %v15276_v39  ;;  %v14385_v19 = vunpack.c.l.bf16 %v15276_v39  ;;  %v15277_v26 = vld [vmem:[%s15663_s25 + $0xcb8] sm:$0xff]   ;;  %v15282_v39 = vld [vmem:[%s15663_s25 + $0xce0] sm:$0xff]  }
 0x662   : > { %v6031_v49 = vmul.f32 0.0625, %v4427_v63  ;;  %v4424_v55 = vpop.xlane.xlu0 %4423  ;;  %v4656_v27 = vsel %vm2225_vm0, %v14381_v35, 0.0  ;;  %v14389_v63 = vunpack.c.l.bf16 %v15277_v26 }
 0x663   : > { %v11050_v3 = vsel %vm7484_vm10, %v11049_v53, %v11045_v30  ;;  %v6030_v59 = vmul.f32 0.0625, %v4424_v55  ;;  %v4665_v30 = vsel %vm2225_vm0, %v14386_v28, 0.0  ;;  %v4662_v56 = vsel %vm2225_vm0, %v14385_v19, 0.0 }
 0x664   : > { %v11064_v51 = vrot.slane %v6031_v49, %v15867_v37  ;;  %v11055_v33 = vsel %vm20291_vm9, %v11054_v34, %v11050_v3  ;;  %4642 = vadd.xlane.f32.xlu1 %v4641_v10  ;;  %4639 = vadd.xlane.f32.xlu0 %v4638_v36  ;;  %v14390_v53 = vunpack.c.h.bf16 %v15277_v26  ;;  %v15278_v36 = vld [vmem:[%s15663_s25 + $0xcc0] sm:$0xff]   ;;  %v4668_v49 = vsel %vm2225_vm0, %v14389_v63, 0.0  ;;  %v15283_v26 = vld [vmem:[%s15663_s25 + $0xce8] sm:$0xff]  }
 0x665   : > { %v11059_v62 = vrot.slane %v6030_v59, %v15873_v43  ;;  %v4433_v46 = vpop.xlane.xlu1 %4432  ;;  %v14394_v55 = vunpack.c.h.bf16 %v15278_v36  ;;  %v14393_v50 = vunpack.c.l.bf16 %v15278_v36  ;;  %v15279_v59 = vld [vmem:[%s15663_s25 + $0xcc8] sm:$0xff]   ;;  %v14409_v28 = vunpack.c.l.bf16 %v15282_v39 }
 0x666   : > { %v6033_v17 = vmul.f32 0.0625, %v4433_v46  ;;  %v4430_v29 = vpop.xlane.xlu0 %4429  ;;  %v4671_v48 = vsel %vm2225_vm0, %v14390_v53, 0.0  ;;  %v14397_v46 = vunpack.c.l.bf16 %v15279_v59  ;;  %vm20293_vm9 = vcmask 589312  }
 0x667   : > { %v11060_v45 = vsel %vm7498_vm12, %v11059_v62, %v11055_v33  ;;  %v6032_v40 = vmul.f32 0.0625, %v4430_v29  ;;  %v4677_v33 = vsel %vm2225_vm0, %v14394_v55, 0.0  ;;  %v14398_v62 = vunpack.c.h.bf16 %v15279_v59 }
 0x668   : > { %v11074_v20 = vrot.slane %v6033_v17, %v15882_v57  ;;  %4648 = vadd.xlane.f32.xlu1 %v4647_v32  ;;  %4645 = vadd.xlane.f32.xlu0 %v4644_v38  ;;  %v11065_v7 = vsel %vm7505_vm13, %v11064_v51, %v11060_v45  ;;  %v4674_v32 = vsel %vm2225_vm0, %v14393_v50, 0.0  ;;  %v4680_v17 = vsel %vm2225_vm0, %v14397_v46, 0.0 }
 0x669   : > { %v11069_v31 = vrot.slane %v6032_v40, %v15887_v60  ;;  %v18673_v15 = vpop.xlane.xlu1 %4438  ;;  %v4683_v2 = vsel %vm2225_vm0, %v14398_v62, 0.0  ;;  %v14402_v29 = vunpack.c.h.bf16 %v15280_v0  ;;  %v14401_v45 = vunpack.c.l.bf16 %v15280_v0 }
 0x66a   : > { %v18677_v54 = vpop.xlane.xlu0 %4435  ;;  %v14413_v55 = vunpack.c.l.bf16 %v15283_v26 }
 0x66b   : > { %v11070_v5 = vsel %vm7512_vm14, %v11069_v31, %v11065_v7  ;;  %v4689_v7 = vsel %vm2225_vm0, %v14402_v29, 0.0  ;;  %v4686_v31 = vsel %vm2225_vm0, %v14401_v45, 0.0 }
 0x66c   : > { %4654 = vadd.xlane.f32.xlu1 %v4653_v4  ;;  %4651 = vadd.xlane.f32.xlu0 %v4650_v21  ;;  %v11075_v8 = vsel %vm7519_vm15, %v11074_v20, %v11070_v5  ;;  %v15281_v20 = vld [vmem:[%s15663_s25 + $0xcd8] sm:$0xff]  }
 0x66d   : > { %v18683_v14 = vpop.xlane.xlu1 %4444  ;;  %v18688_v6 = vsel %vm20292_vm8, %v11075_v8, %v18567_v25  ;;  %v14406_v4 = vunpack.c.h.bf16 %v15281_v20  ;;  %v14405_v21 = vunpack.c.l.bf16 %v15281_v20  ;;  %v15285_v20 = vld [vmem:[%s15663_s25 + $0xcf8] sm:$0xff]   ;;  %vm20294_vm8 = vcmask 654912  }
 0x66e   : > { %v4442_v52 = vpop.xlane.xlu0 %4441 }
 0x66f   : > { %v4692_v8 = vsel %vm2225_vm0, %v14405_v21, 0.0  ;;  %v6036_v53 = vmul.f32 0.0625, %v4442_v52 }
 0x670   : > { %4660 = vadd.xlane.f32.xlu1 %v4659_v16  ;;  %4657 = vadd.xlane.f32.xlu0 %v4656_v27  ;;  %v4695_v16 = vsel %vm2225_vm0, %v14406_v4, 0.0  ;;  %v14410_v27 = vunpack.c.h.bf16 %v15282_v39 }
 0x671   : > { %v18691_v34 = vpop.xlane.xlu1 %4450  ;;  %v11088_v62 = vrot.slane %v6036_v53, %v15799_v13 }
 0x672   : > { %v18695_v10 = vpop.xlane.xlu0 %4447  ;;  %v4701_v36 = vsel %vm2225_vm0, %v14410_v27, 0.0 }
 0x673   : > { %v6038_v46 = vmul.f32 0.0625, %v18695_v10 }
 0x674   : > { %4666 = vadd.xlane.f32.xlu1 %v4665_v30  ;;  %4663 = vadd.xlane.f32.xlu0 %v4662_v56  ;;  %v6035_v30 = vmul.f32 0.0625, %v18673_v15  ;;  %v6034_v56 = vmul.f32 0.0625, %v18677_v54  ;;  %v6037_v54 = vmul.f32 0.0625, %v18683_v14 }
 0x675   : > { %v18698_v25 = vpop.xlane.xlu1 %4456  ;;  %v11098_v27 = vrot.slane %v6038_v46, %v15807_v23 }
 0x676   : > { %v18702_v3 = vpop.xlane.xlu0 %4453  ;;  %v11079_v15 = vrot.slane %v6034_v56, %v15790_v9  ;;  %v11093_v39 = vrot.slane %v6037_v54, %v15793_v11 }
 0x678   : > { %4672 = vadd.xlane.f32.xlu1 %v4671_v48  ;;  %4669 = vadd.xlane.f32.xlu0 %v4668_v49  ;;  %v4698_v48 = vsel %vm2225_vm0, %v14409_v28, 0.0  ;;  %v14414_v49 = vunpack.c.h.bf16 %v15283_v26  ;;  %v6040_v28 = vmul.f32 0.0625, %v18702_v3  ;;  %v15286_v3 = vld [vmem:[%s15663_s25 + $0xd00] sm:$0xff]  }
 0x679   : > { %v18705_v51 = vpop.xlane.xlu1 %4462 }
 0x67a   : > { %v18709_v38 = vpop.xlane.xlu0 %4459 }
 0x67c   : > { %4678 = vadd.xlane.f32.xlu1 %v4677_v33  ;;  %4675 = vadd.xlane.f32.xlu0 %v4674_v32  ;;  %v15284_v33 = vld [vmem:[%s15663_s25 + $0xcf0] sm:$0xff]   ;;  %v11083_v32 = vrot.slane %v6035_v30, %v15796_v12 }
 0x67d   : > { %v18712_v58 = vpop.xlane.xlu1 %4468  ;;  %v14418_v29 = vunpack.c.h.bf16 %v15284_v33  ;;  %v14417_v45 = vunpack.c.l.bf16 %v15284_v33  ;;  %v6041_v33 = vmul.f32 0.0625, %v18698_v25  ;;  %v14425_v25 = vunpack.c.l.bf16 %v15286_v3 }
 0x67e   : > { %v18716_v40 = vpop.xlane.xlu0 %4465  ;;  %v11084_v10 = vsel %vm7421_vm1, %v11083_v32, %v11079_v15 }
 0x67f   : > { %v4713_v56 = vsel %vm2225_vm0, %v14418_v29, 0.0  ;;  %v4710_v53 = vsel %vm2225_vm0, %v14417_v45, 0.0  ;;  %v14426_v29 = vunpack.c.h.bf16 %v15286_v3  ;;  %v15287_v45 = vld [vmem:[%s15663_s25 + $0xd08] sm:$0xff]  }
 0x680   : > { %4684 = vadd.xlane.f32.xlu1 %v4683_v2  ;;  %4681 = vadd.xlane.f32.xlu0 %v4680_v17  ;;  %v4707_v2 = vsel %vm2225_vm0, %v14414_v49, 0.0  ;;  %v4704_v17 = vsel %vm2225_vm0, %v14413_v55, 0.0 }
 0x681   : > { %v18719_v47 = vpop.xlane.xlu1 %4474 }
 0x682   : > { %v18723_v35 = vpop.xlane.xlu0 %4471 }
 0x684   : > { %4690 = vadd.xlane.f32.xlu1 %v4689_v7  ;;  %4687 = vadd.xlane.f32.xlu0 %v4686_v31  ;;  %v6039_v7 = vmul.f32 0.0625, %v18691_v34  ;;  %v14422_v34 = vunpack.c.h.bf16 %v15285_v20 }
 0x685   : > { %v18726_v5 = vpop.xlane.xlu1 %4480 }
 0x686   : > { %v18730_v19 = vpop.xlane.xlu0 %4477  ;;  %v4719_v46 = vsel %vm2225_vm0, %v14422_v34, 0.0 }
 0x688   : > { %4696 = vadd.xlane.f32.xlu1 %v4695_v16  ;;  %4693 = vadd.xlane.f32.xlu0 %v4692_v8  ;;  %v11089_v8 = vsel %vm7428_vm2, %v11088_v62, %v11084_v10  ;;  %v6042_v62 = vmul.f32 0.0625, %v18709_v38 }
 0x689   : > { %v4487_v63 = vpop.xlane.xlu1 %4486 }
 0x68a   : > { %v6051_v50 = vmul.f32 0.0625, %v4487_v63  ;;  %v4484_v59 = vpop.xlane.xlu0 %4483  ;;  %v14421_v63 = vunpack.c.l.bf16 %v15285_v20  ;;  %v6043_v20 = vmul.f32 0.0625, %v18705_v51  ;;  %v6044_v51 = vmul.f32 0.0625, %v18716_v40  ;;  %v15288_v40 = vld [vmem:[%s15663_s25 + $0xd10] sm:$0xff]  }
 0x68b   : > { %v6050_v52 = vmul.f32 0.0625, %v4484_v59  ;;  %v11094_v59 = vsel %vm7435_vm3, %v11093_v39, %v11089_v8  ;;  %v11118_v8 = vrot.slane %v6042_v62, %v15843_v1 }
 0x68c   : > { %4702 = vadd.xlane.f32.xlu1 %v4701_v36  ;;  %4699 = vadd.xlane.f32.xlu0 %v4698_v48  ;;  %v11162_v31 = vrot.slane %v6051_v50, %v15796_v12  ;;  %v11103_v36 = vrot.slane %v6039_v7, %v15804_v22  ;;  %v11099_v54 = vsel %vm7442_vm4, %v11098_v27, %v11094_v59  ;;  %v14430_v27 = vunpack.c.h.bf16 %v15287_v45 }
 0x68d   : > { %v4493_v0 = vpop.xlane.xlu1 %4492  ;;  %v11158_v14 = vrot.slane %v6050_v52, %v15790_v9  ;;  %v11108_v52 = vrot.slane %v6040_v28, %v15824_v42 }
 0x68e   : > { %v6053_v4 = vmul.f32 0.0625, %v4493_v0  ;;  %v4490_v21 = vpop.xlane.xlu0 %4489 }
 0x68f   : > { %v6052_v16 = vmul.f32 0.0625, %v4490_v21  ;;  %v11163_v48 = vsel %vm7421_vm1, %v11162_v31, %v11158_v14  ;;  %v11104_v21 = vsel %vm7449_vm5, %v11103_v36, %v11099_v54  ;;  %v4731_v54 = vsel %vm2225_vm0, %v14430_v27, 0.0 }
 0x690   : > { %4708 = vadd.xlane.f32.xlu1 %v4707_v2  ;;  %4705 = vadd.xlane.f32.xlu0 %v4704_v17  ;;  %v11172_v49 = vrot.slane %v6053_v4, %v15793_v11  ;;  %v4716_v17 = vsel %vm2225_vm0, %v14421_v63, 0.0  ;;  %v11113_v4 = vrot.slane %v6041_v33, %v15821_v41 }
 0x691   : > { %v11167_v26 = vrot.slane %v6052_v16, %v15799_v13  ;;  %v4499_v30 = vpop.xlane.xlu1 %4498  ;;  %v11109_v16 = vsel %vm7456_vm6, %v11108_v52, %v11104_v21 }
 0x692   : > { %v6055_v55 = vmul.f32 0.0625, %v4499_v30  ;;  %v4496_v50 = vpop.xlane.xlu0 %4495  ;;  %v4722_v30 = vsel %vm2225_vm0, %v14425_v25, 0.0 }
 0x693   : > { %v11168_v32 = vsel %vm7428_vm2, %v11167_v26, %v11163_v48  ;;  %v6054_v15 = vmul.f32 0.0625, %v4496_v50  ;;  %v4725_v26 = vsel %vm2225_vm0, %v14426_v29, 0.0  ;;  %v6045_v50 = vmul.f32 0.0625, %v18712_v58 }
 0x694   : > { %4714 = vadd.xlane.f32.xlu1 %v4713_v56  ;;  %4711 = vadd.xlane.f32.xlu0 %v4710_v53  ;;  %v11182_v7 = vrot.slane %v6055_v55, %v15804_v22  ;;  %v11173_v31 = vsel %vm7435_vm3, %v11172_v49, %v11168_v32  ;;  %v14429_v56 = vunpack.c.l.bf16 %v15287_v45  ;;  %v11123_v53 = vrot.slane %v6043_v20, %v15837_v61 }
 0x695   : > { %v11177_v0 = vrot.slane %v6054_v15, %v15807_v23  ;;  %v4505_v2 = vpop.xlane.xlu1 %4504  ;;  %v11114_v55 = vsel %vm7463_vm7, %v11113_v4, %v11109_v16  ;;  %v11128_v32 = vrot.slane %v6044_v51, %v15858_v24  ;;  %v6046_v15 = vmul.f32 0.0625, %v18723_v35 }
 0x696   : > { %v6057_v14 = vmul.f32 0.0625, %v4505_v2  ;;  %v4502_v38 = vpop.xlane.xlu0 %4501  ;;  %v11119_v33 = vsel %vm20293_vm9, %v11118_v8, %v11114_v55  ;;  %v14433_v58 = vunpack.c.l.bf16 %v15288_v40  ;;  %v15289_v2 = vld [vmem:[%s15663_s25 + $0xd18] sm:$0xff]   ;;  %v11133_v20 = vrot.slane %v6045_v50, %v15852_v18 }
 0x697   : > { %v11178_v10 = vsel %vm7442_vm4, %v11177_v0, %v11173_v31  ;;  %v6056_v39 = vmul.f32 0.0625, %v4502_v38  ;;  %v14434_v0 = vunpack.c.h.bf16 %v15288_v40  ;;  %v11138_v4 = vrot.slane %v6046_v15, %v15873_v43 }
 0x698   : > { %4720 = vadd.xlane.f32.xlu1 %v4719_v46  ;;  %4717 = vadd.xlane.f32.xlu0 %v4716_v17  ;;  %v11192_v63 = vrot.slane %v6057_v14, %v15821_v41  ;;  %v11183_v36 = vsel %vm7449_vm5, %v11182_v7, %v11178_v10  ;;  %v4728_v46 = vsel %vm2225_vm0, %v14429_v56, 0.0  ;;  %v6047_v17 = vmul.f32 0.0625, %v18719_v47 }
 0x699   : > { %v11187_v28 = vrot.slane %v6056_v39, %v15824_v42  ;;  %v4511_v34 = vpop.xlane.xlu1 %4510  ;;  %v11124_v7 = vsel %vm20294_vm8, %v11123_v53, %v11119_v33  ;;  %v6048_v47 = vmul.f32 0.0625, %v18730_v19  ;;  %v14438_v21 = vunpack.c.h.bf16 %v15289_v2  ;;  %v15290_v19 = vld [vmem:[%s15663_s25 + $0xd20] sm:$0xff]  }
 0x69a   : > { %v6059_v48 = vmul.f32 0.0625, %v4511_v34  ;;  %v4508_v49 = vpop.xlane.xlu0 %4507  ;;  %v11129_v38 = vsel %vm7484_vm10, %v11128_v32, %v11124_v7  ;;  %v4737_v16 = vsel %vm2225_vm0, %v14434_v0, 0.0  ;;  %v4734_v8 = vsel %vm2225_vm0, %v14433_v58, 0.0  ;;  %v15291_v32 = vld [vmem:[%s15663_s25 + $0xd28] sm:$0xff]  }
 0x69b   : > { %v11188_v3 = vsel %vm7456_vm6, %v11187_v28, %v11183_v36  ;;  %v6058_v59 = vmul.f32 0.0625, %v4508_v49  ;;  %v14437_v51 = vunpack.c.l.bf16 %v15289_v2  ;;  %v11143_v27 = vrot.slane %v6047_v17, %v15867_v37 }
 0x69c   : > { %4726 = vadd.xlane.f32.xlu1 %v4725_v26  ;;  %4723 = vadd.xlane.f32.xlu0 %v4722_v30  ;;  %v11202_v29 = vrot.slane %v6059_v48, %v15837_v61  ;;  %v11193_v25 = vsel %vm7463_vm7, %v11192_v63, %v11188_v3  ;;  %v6049_v53 = vmul.f32 0.0625, %v18726_v5  ;;  %v11148_v49 = vrot.slane %v6048_v47, %v15887_v60 }
 0x69d   : > { %v11197_v52 = vrot.slane %v6058_v59, %v15843_v1  ;;  %v4517_v62 = vpop.xlane.xlu1 %4516  ;;  %v4743_v40 = vsel %vm2225_vm0, %v14438_v21, 0.0  ;;  %v4740_v3 = vsel %vm2225_vm0, %v14437_v51, 0.0  ;;  %v14442_v59 = vunpack.c.h.bf16 %v15290_v19 }
 0x69e   : > { %v6061_v45 = vmul.f32 0.0625, %v4517_v62  ;;  %v4514_v35 = vpop.xlane.xlu0 %4513  ;;  %v14441_v33 = vunpack.c.l.bf16 %v15290_v19  ;;  %v11153_v62 = vrot.slane %v6049_v53, %v15882_v57  ;;  %v15293_v19 = vld [vmem:[%s15663_s25 + $0xd38] sm:$0xff]  }
 0x69f   : > { %v11198_v31 = vsel %vm20293_vm9, %v11197_v52, %v11193_v25  ;;  %v6060_v14 = vmul.f32 0.0625, %v4514_v35  ;;  %vm20295_vm9 = vcmask 786112   ;;  %v14445_v25 = vunpack.c.l.bf16 %v15291_v32 }
 0x6a0   : > { %4732 = vadd.xlane.f32.xlu1 %v4731_v54  ;;  %4729 = vadd.xlane.f32.xlu0 %v4728_v46  ;;  %v11212_v28 = vrot.slane %v6061_v45, %v15852_v18  ;;  %v11203_v34 = vsel %vm20294_vm8, %v11202_v29, %v11198_v31  ;;  %v11134_v56 = vsel %vm20295_vm9, %v11133_v20, %v11129_v38  ;;  %vm20296_vm8 = vmmov %vm20295_vm9  ;;  %v14446_v29 = vunpack.c.h.bf16 %v15291_v32  ;;  %v15294_v32 = vld [vmem:[%s15663_s25 + $0xd40] sm:$0xff]  }
 0x6a1   : > { %v11207_v10 = vrot.slane %v6060_v14, %v15858_v24  ;;  %v4523_v39 = vpop.xlane.xlu1 %4522  ;;  %v11139_v48 = vsel %vm7498_vm12, %v11138_v4, %v11134_v56  ;;  %v4749_v20 = vsel %vm2225_vm0, %v14442_v59, 0.0  ;;  %v4746_v7 = vsel %vm2225_vm0, %v14441_v33, 0.0  ;;  %v15292_v4 = vld [vmem:[%s15663_s25 + $0xd30] sm:$0xff]  }
 0x6a2   : > { %v6063_v26 = vmul.f32 0.0625, %v4523_v39  ;;  %v4520_v30 = vpop.xlane.xlu0 %4519  ;;  %v11144_v58 = vsel %vm7505_vm13, %v11143_v27, %v11139_v48  ;;  %v4752_v51 = vsel %vm2225_vm0, %v14445_v25, 0.0  ;;  %v14453_v59 = vunpack.c.l.bf16 %v15293_v19 }
 0x6a3   : > { %v11208_v63 = vsel %vm7484_vm10, %v11207_v10, %v11203_v34  ;;  %v6062_v36 = vmul.f32 0.0625, %v4520_v30  ;;  %v11149_v17 = vsel %vm7512_vm14, %v11148_v49, %v11144_v58  ;;  %v14449_v30 = vunpack.c.l.bf16 %v15292_v4 }
 0x6a4   : > { %4738 = vadd.xlane.f32.xlu1 %v4737_v16  ;;  %4735 = vadd.xlane.f32.xlu0 %v4734_v8  ;;  %v11222_v5 = vrot.slane %v6063_v26, %v15867_v37  ;;  %v11213_v15 = vsel %vm20296_vm8, %v11212_v28, %v11208_v63  ;;  %v11154_v10 = vsel %vm7519_vm15, %v11153_v62, %v11149_v17  ;;  %v4755_v8 = vsel %vm2225_vm0, %v14446_v29, 0.0  ;;  %v15295_v29 = vld [vmem:[%s15663_s25 + $0xd48] sm:$0xff]  }
 0x6a5   : > { %v11217_v55 = vrot.slane %v6062_v36, %v15873_v43  ;;  %v4529_v50 = vpop.xlane.xlu1 %4528  ;;  %v14450_v26 = vunpack.c.h.bf16 %v15292_v4  ;;  %v12539_v63 = vsel %vm12510_vm11, %v11154_v10, %v18626_v44  ;;  %v4764_v58 = vsel %vm2225_vm0, %v14453_v59, 0.0 }
 0x6a6   : > { %v6065_v54 = vmul.f32 0.0625, %v4529_v50  ;;  %v4526_v52 = vpop.xlane.xlu0 %4525  ;;  %v14457_v17 = vunpack.c.l.bf16 %v15294_v32  ;;  %v14461_v10 = vunpack.c.l.bf16 %v15295_v29  ;;  %vm20297_vm9 = vcmask 589312  }
 0x6a7   : > { %v11218_v46 = vsel %vm7498_vm12, %v11217_v55, %v11213_v15  ;;  %v6064_v0 = vmul.f32 0.0625, %v4526_v52  ;;  %v4761_v50 = vsel %vm2225_vm0, %v14450_v26, 0.0  ;;  %vm20298_vm8 = vcmask 654912  }
 0x6a8   : > { %v11232_v2 = vrot.slane %v6065_v54, %v15882_v57  ;;  %4744 = vadd.xlane.f32.xlu1 %v4743_v40  ;;  %4741 = vadd.xlane.f32.xlu0 %v4740_v3  ;;  %v11223_v38 = vsel %vm7505_vm13, %v11222_v5, %v11218_v46  ;;  %v14454_v40 = vunpack.c.h.bf16 %v15293_v19  ;;  %v4758_v3 = vsel %vm2225_vm0, %v14449_v30, 0.0 }
 0x6a9   : > { %v11227_v45 = vrot.slane %v6064_v0, %v15887_v60  ;;  %v4535_v35 = vpop.xlane.xlu1 %4534 }
 0x6aa   : > { %v6067_v31 = vmul.f32 0.0625, %v4535_v35  ;;  %v4532_v14 = vpop.xlane.xlu0 %4531  ;;  %v4767_v62 = vsel %vm2225_vm0, %v14454_v40, 0.0 }
 0x6ab   : > { %v6066_v47 = vmul.f32 0.0625, %v4532_v14  ;;  %v11228_v21 = vsel %vm7512_vm14, %v11227_v45, %v11223_v38  ;;  %v14462_v14 = vunpack.c.h.bf16 %v15295_v29 }
 0x6ac   : > { %v11241_v39 = vrot.slane %v6067_v31, %v15796_v12  ;;  %4750 = vadd.xlane.f32.xlu1 %v4749_v20  ;;  %4747 = vadd.xlane.f32.xlu0 %v4746_v7  ;;  %v11233_v16 = vsel %vm7519_vm15, %v11232_v2, %v11228_v21  ;;  %v14458_v2 = vunpack.c.h.bf16 %v15294_v32  ;;  %v4770_v21 = vsel %vm2225_vm0, %v14457_v17, 0.0 }
 0x6ad   : > { %v11237_v27 = vrot.slane %v6066_v47, %v15790_v9  ;;  %v4541_v28 = vpop.xlane.xlu1 %4540  ;;  %v12546_v34 = vsel %vm12510_vm11, %v11233_v16, %v18688_v6  ;;  %v4779_v26 = vsel %vm2225_vm0, %v14462_v14, 0.0 }
 0x6ae   : > { %v6069_v56 = vmul.f32 0.0625, %v4541_v28  ;;  %12643 = vmatprep.mubr.f32.mxu1 %v12546_v34  ;;  %v4538_v53 = vpop.xlane.xlu0 %4537  ;;  %v4773_v47 = vsel %vm2225_vm0, %v14458_v2, 0.0 }
 0x6af   : > { %v11242_v36 = vsel %vm7421_vm1, %v11241_v39, %v11237_v27  ;;  %v6068_v48 = vmul.f32 0.0625, %v4538_v53  ;;  %12644 = vmatmul.mubr.f32.vlgmr.msra.gmra.mrb[0].mxu1 %v12539_v63 }
 0x6b0   : > { %v11251_v49 = vrot.slane %v6069_v56, %v15793_v11  ;;  %4756 = vadd.xlane.f32.xlu1 %v4755_v8  ;;  %4753 = vadd.xlane.f32.xlu0 %v4752_v51  ;;  %v15296_v8 = vld [vmem:[%s15663_s25 + $0xd50] sm:$0xff]   ;;  %v4776_v56 = vsel %vm2225_vm0, %v14461_v10, 0.0 }
 0x6b1   : > { %v11246_v6 = vrot.slane %v6068_v48, %v15799_v13  ;;  %v4547_v55 = vpop.xlane.xlu1 %4546  ;;  %v14466_v53 = vunpack.c.h.bf16 %v15296_v8  ;;  %v14465_v63 = vunpack.c.l.bf16 %v15296_v8 }
 0x6b2   : > { %v6071_v33 = vmul.f32 0.0625, %v4547_v55  ;;  %v4544_v44 = vpop.xlane.xlu0 %4543 }
 0x6b3   : > { %v11247_v5 = vsel %vm7428_vm2, %v11246_v6, %v11242_v36  ;;  %v6070_v15 = vmul.f32 0.0625, %v4544_v44  ;;  %v15297_v36 = vld [vmem:[%s15663_s25 + $0xd58] sm:$0xff]   ;;  %v4785_v44 = vsel %vm2225_vm0, %v14466_v53, 0.0  ;;  %v4782_v32 = vsel %vm2225_vm0, %v14465_v63, 0.0 }
 0x6b4   : > { %v11261_v54 = vrot.slane %v6071_v33, %v15804_v22  ;;  %v11252_v52 = vsel %vm7435_vm3, %v11251_v49, %v11247_v5  ;;  %4762 = vadd.xlane.f32.xlu1 %v4761_v50  ;;  %4759 = vadd.xlane.f32.xlu0 %v4758_v3  ;;  %v14470_v3 = vunpack.c.h.bf16 %v15297_v36  ;;  %v14469_v5 = vunpack.c.l.bf16 %v15297_v36 }
 0x6b5   : > { %v11256_v46 = vrot.slane %v6070_v15, %v15807_v23  ;;  %v4553_v0 = vpop.xlane.xlu1 %4552 }
 0x6b6   : > { %v6073_v25 = vmul.f32 0.0625, %v4553_v0  ;;  %v4550_v45 = vpop.xlane.xlu0 %4549  ;;  %v4791_v2 = vsel %vm2225_vm0, %v14470_v3, 0.0 }
 0x6b7   : > { %v11257_v35 = vsel %vm7442_vm4, %v11256_v46, %v11252_v52  ;;  %v6072_v20 = vmul.f32 0.0625, %v4550_v45  ;;  %v15298_v52 = vld [vmem:[%s15663_s25 + $0xd60] sm:$0xff]  }
 0x6b8   : > { %v11271_v7 = vrot.slane %v6073_v25, %v15821_v41  ;;  %v11262_v31 = vsel %vm7449_vm5, %v11261_v54, %v11257_v35  ;;  %4768 = vadd.xlane.f32.xlu1 %v4767_v62  ;;  %4765 = vadd.xlane.f32.xlu0 %v4764_v58  ;;  %v4788_v25 = vsel %vm2225_vm0, %v14469_v5, 0.0  ;;  %v14474_v45 = vunpack.c.h.bf16 %v15298_v52 }
 0x6b9   : > { %v11266_v38 = vrot.slane %v6072_v20, %v15824_v42  ;;  %v4559_v4 = vpop.xlane.xlu1 %4558  ;;  %v14473_v35 = vunpack.c.l.bf16 %v15298_v52  ;;  %v15299_v20 = vld [vmem:[%s15663_s25 + $0xd68] sm:$0xff]  }
 0x6ba   : > { %v6075_v39 = vmul.f32 0.0625, %v4559_v4  ;;  %v4556_v16 = vpop.xlane.xlu0 %4555 }
 0x6bb   : > { %v11267_v51 = vsel %vm7456_vm6, %v11266_v38, %v11262_v31  ;;  %v6074_v27 = vmul.f32 0.0625, %v4556_v16  ;;  %v4797_v16 = vsel %vm2225_vm0, %v14474_v45, 0.0  ;;  %v4794_v8 = vsel %vm2225_vm0, %v14473_v35, 0.0 }
 0x6bc   : > { %v11281_v28 = vrot.slane %v6075_v39, %v15837_v61  ;;  %v11272_v34 = vsel %vm7463_vm7, %v11271_v7, %v11267_v51  ;;  %4774 = vadd.xlane.f32.xlu1 %v4773_v47  ;;  %4771 = vadd.xlane.f32.xlu0 %v4770_v21  ;;  %v14478_v21 = vunpack.c.h.bf16 %v15299_v20  ;;  %v14477_v51 = vunpack.c.l.bf16 %v15299_v20 }
 0x6bd   : > { %v11276_v30 = vrot.slane %v6074_v27, %v15843_v1  ;;  %v4565_v19 = vpop.xlane.xlu1 %4564 }
 0x6be   : > { %v6077_v48 = vmul.f32 0.0625, %v4565_v19  ;;  %v4562_v49 = vpop.xlane.xlu0 %4561  ;;  %v4803_v53 = vsel %vm2225_vm0, %v14478_v21, 0.0 }
 0x6bf   : > { %v11277_v40 = vsel %vm20297_vm9, %v11276_v30, %v11272_v34  ;;  %v6076_v6 = vmul.f32 0.0625, %v4562_v49  ;;  %vm20299_vm9 = vcmask 786112   ;;  %v15300_v34 = vld [vmem:[%s15663_s25 + $0xd70] sm:$0xff]  }
 0x6c0   : > { %v11291_v55 = vrot.slane %v6077_v48, %v15852_v18  ;;  %v11282_v50 = vsel %vm20298_vm8, %v11281_v28, %v11277_v40  ;;  %4780 = vadd.xlane.f32.xlu1 %v4779_v26  ;;  %4777 = vadd.xlane.f32.xlu0 %v4776_v56  ;;  %v4800_v48 = vsel %vm2225_vm0, %v14477_v51, 0.0  ;;  %v14482_v49 = vunpack.c.h.bf16 %v15300_v34 }
 0x6c1   : > { %v11286_v59 = vrot.slane %v6076_v6, %v15858_v24  ;;  %v4571_v33 = vpop.xlane.xlu1 %4570  ;;  %v14481_v40 = vunpack.c.l.bf16 %v15300_v34  ;;  %v15301_v6 = vld [vmem:[%s15663_s25 + $0xd78] sm:$0xff]   ;;  %vm20300_vm8 = vcmask 589312  }
 0x6c2   : > { %v6079_v15 = vmul.f32 0.0625, %v4571_v33  ;;  %v4568_v54 = vpop.xlane.xlu0 %4567  ;;  %v14485_v52 = vunpack.c.l.bf16 %v15301_v6 }
 0x6c3   : > { %v11287_v62 = vsel %vm7484_vm10, %v11286_v59, %v11282_v50  ;;  %v6078_v46 = vmul.f32 0.0625, %v4568_v54  ;;  %v4806_v54 = vsel %vm2225_vm0, %v14481_v40, 0.0 }
 0x6c4   : > { %v11301_v0 = vrot.slane %v6079_v15, %v15867_v37  ;;  %v11292_v58 = vsel %vm20299_vm9, %v11291_v55, %v11287_v62  ;;  %4786 = vadd.xlane.f32.xlu1 %v4785_v44  ;;  %4783 = vadd.xlane.f32.xlu0 %v4782_v32  ;;  %v14486_v44 = vunpack.c.h.bf16 %v15301_v6  ;;  %v4809_v15 = vsel %vm2225_vm0, %v14482_v49, 0.0 }
 0x6c5   : > { %v11296_v17 = vrot.slane %v6078_v46, %v15873_v43  ;;  %v4577_v29 = vpop.xlane.xlu1 %4576  ;;  %v4812_v20 = vsel %vm2225_vm0, %v14485_v52, 0.0  ;;  %vm20301_vm9 = vcmask 654912  }
 0x6c6   : > { %v6081_v7 = vmul.f32 0.0625, %v4577_v29  ;;  %v4574_v31 = vpop.xlane.xlu0 %4573 }
 0x6c7   : > { %v11297_v14 = vsel %vm7498_vm12, %v11296_v17, %v11292_v58  ;;  %v6080_v38 = vmul.f32 0.0625, %v4574_v31 }
 0x6c8   : > { %v11311_v4 = vrot.slane %v6081_v7, %v15882_v57  ;;  %v11302_v47 = vsel %vm7505_vm13, %v11301_v0, %v11297_v14  ;;  %4792 = vadd.xlane.f32.xlu1 %v4791_v2  ;;  %4789 = vadd.xlane.f32.xlu0 %v4788_v25  ;;  %v15302_v0 = vld [vmem:[%s15663_s25 + $0xd80] sm:$0xff]   ;;  %v4815_v25 = vsel %vm2225_vm0, %v14486_v44, 0.0  ;;  %v15303_v14 = vld [vmem:[%s15663_s25 + $0xd88] sm:$0xff]  }
 0x6c9   : > { %v11306_v10 = vrot.slane %v6080_v38, %v15887_v60  ;;  %v4583_v39 = vpop.xlane.xlu1 %4582  ;;  %v14490_v7 = vunpack.c.h.bf16 %v15302_v0  ;;  %v14489_v31 = vunpack.c.l.bf16 %v15302_v0  ;;  %v14493_v34 = vunpack.c.l.bf16 %v15303_v14 }
 0x6ca   : > { %v6083_v27 = vmul.f32 0.0625, %v4583_v39  ;;  %v4580_v28 = vpop.xlane.xlu0 %4579 }
 0x6cb   : > { %v11307_v26 = vsel %vm7512_vm14, %v11306_v10, %v11302_v47  ;;  %v6082_v30 = vmul.f32 0.0625, %v4580_v28  ;;  %v4818_v28 = vsel %vm2225_vm0, %v14489_v31, 0.0 }
 0x6cc   : > { %v18896_v19 = vsel %vm7519_vm15, %v11311_v4, %v11307_v26  ;;  %v11320_v56 = vrot.slane %v6083_v27, %v15796_v12  ;;  %4798 = vadd.xlane.f32.xlu1 %v4797_v16  ;;  %4795 = vadd.xlane.f32.xlu0 %v4794_v8  ;;  %v14494_v16 = vunpack.c.h.bf16 %v15303_v14  ;;  %v4821_v27 = vsel %vm2225_vm0, %v14490_v7, 0.0 }
 0x6cd   : > { %v11316_v63 = vrot.slane %v6082_v30, %v15790_v9  ;;  %v4589_v36 = vpop.xlane.xlu1 %4588 }
 0x6ce   : > { %v6085_v55 = vmul.f32 0.0625, %v4589_v36  ;;  %v4586_v50 = vpop.xlane.xlu0 %4585  ;;  %v4827_v49 = vsel %vm2225_vm0, %v14494_v16, 0.0 }
 0x6cf   : > { %v11321_v3 = vsel %vm7421_vm1, %v11320_v56, %v11316_v63  ;;  %v6084_v59 = vmul.f32 0.0625, %v4586_v50  ;;  %v15310_v56 = vld [vmem:[%s15663_s25 + $0xdc0] sm:$0xff]  }
 0x6d0   : > { %v11330_v33 = vrot.slane %v6085_v55, %v15793_v11  ;;  %4804 = vadd.xlane.f32.xlu1 %v4803_v53  ;;  %4801 = vadd.xlane.f32.xlu0 %v4800_v48  ;;  %v4824_v55 = vsel %vm2225_vm0, %v14493_v34, 0.0  ;;  %v14522_v50 = vunpack.c.h.bf16 %v15310_v56 }
 0x6d1   : > { %v11325_v32 = vrot.slane %v6084_v59, %v15799_v13  ;;  %v4595_v5 = vpop.xlane.xlu1 %4594  ;;  %v15326_v59 = vld [vmem:[%s15663_s25 + $0xe40] sm:$0xff]  }
 0x6d2   : > { %v6087_v62 = vmul.f32 0.0625, %v4595_v5  ;;  %v4592_v46 = vpop.xlane.xlu0 %4591 }
 0x6d3   : > { %v11326_v58 = vsel %vm7428_vm2, %v11325_v32, %v11321_v3  ;;  %v6086_v2 = vmul.f32 0.0625, %v4592_v46  ;;  %v14521_v3 = vunpack.c.l.bf16 %v15310_v56  ;;  %v15311_v32 = vld [vmem:[%s15663_s25 + $0xdc8] sm:$0xff]  }
 0x6d4   : > { %v11340_v17 = vrot.slane %v6087_v62, %v15804_v22  ;;  %v11331_v29 = vsel %vm7435_vm3, %v11330_v33, %v11326_v58  ;;  %4810 = vadd.xlane.f32.xlu1 %v4809_v15  ;;  %4807 = vadd.xlane.f32.xlu0 %v4806_v54  ;;  %v14585_v62 = vunpack.c.l.bf16 %v15326_v59  ;;  %v4869_v58 = vsel %vm2225_vm0, %v14522_v50, 0.0 }
 0x6d5   : > { %v11335_v45 = vrot.slane %v6086_v2, %v15807_v23  ;;  %v4601_v35 = vpop.xlane.xlu1 %4600  ;;  %v4866_v2 = vsel %vm2225_vm0, %v14521_v3, 0.0 }
 0x6d6   : > { %v6089_v38 = vmul.f32 0.0625, %v4601_v35  ;;  %v4598_v4 = vpop.xlane.xlu0 %4597  ;;  %v4962_v31 = vsel %vm2225_vm0, %v14585_v62, 0.0 }
 0x6d7   : > { %v11336_v47 = vsel %vm7442_vm4, %v11335_v45, %v11331_v29  ;;  %v6088_v21 = vmul.f32 0.0625, %v4598_v4 }
 0x6d8   : > { %v11350_v10 = vrot.slane %v6089_v38, %v15821_v41  ;;  %v11341_v39 = vsel %vm7449_vm5, %v11340_v17, %v11336_v47  ;;  %4816 = vadd.xlane.f32.xlu1 %v4815_v25  ;;  %4813 = vadd.xlane.f32.xlu0 %v4812_v20  ;;  %v14525_v17 = vunpack.c.l.bf16 %v15311_v32  ;;  %v14526_v47 = vunpack.c.h.bf16 %v15311_v32 }
 0x6d9   : > { %v11345_v8 = vrot.slane %v6088_v21, %v15824_v42  ;;  %v4607_v51 = vpop.xlane.xlu1 %4606  ;;  %v14586_v21 = vunpack.c.h.bf16 %v15326_v59 }
 0x6da   : > { %v6091_v26 = vmul.f32 0.0625, %v4607_v51  ;;  %v4604_v30 = vpop.xlane.xlu0 %4603  ;;  %v4872_v4 = vsel %vm2225_vm0, %v14525_v17, 0.0  ;;  %v4875_v56 = vsel %vm2225_vm0, %v14526_v47, 0.0 }
 0x6db   : > { %v11346_v53 = vsel %vm7456_vm6, %v11345_v8, %v11341_v39  ;;  %v6090_v63 = vmul.f32 0.0625, %v4604_v30 }
 0x6dc   : > { %v11360_v36 = vrot.slane %v6091_v26, %v15837_v61  ;;  %v11351_v48 = vsel %vm7463_vm7, %v11350_v10, %v11346_v53  ;;  %4822 = vadd.xlane.f32.xlu1 %v4821_v27  ;;  %4819 = vadd.xlane.f32.xlu0 %v4818_v28  ;;  %v15318_v10 = vld [vmem:[%s15663_s25 + $0xe00] sm:$0xff]   ;;  %v4965_v53 = vsel %vm2225_vm0, %v14586_v21, 0.0 }
 0x6dd   : > { %v11355_v40 = vrot.slane %v6090_v63, %v15843_v1  ;;  %v4613_v6 = vpop.xlane.xlu1 %4612  ;;  %v14554_v34 = vunpack.c.h.bf16 %v15318_v10  ;;  %v14553_v63 = vunpack.c.l.bf16 %v15318_v10 }
 0x6de   : > { %v6093_v33 = vmul.f32 0.0625, %v4613_v6  ;;  %v4610_v44 = vpop.xlane.xlu0 %4609 }
 0x6df   : > { %v11356_v5 = vsel %vm20300_vm8, %v11355_v40, %v11351_v48  ;;  %v6092_v15 = vmul.f32 0.0625, %v4610_v44  ;;  %vm20302_vm8 = vcmask 786112   ;;  %v15327_v40 = vld [vmem:[%s15663_s25 + $0xe48] sm:$0xff]   ;;  %v4917_v59 = vsel %vm2225_vm0, %v14554_v34, 0.0 }
 0x6e0   : > { %v11370_v54 = vrot.slane %v6093_v33, %v15852_v18  ;;  %v11361_v52 = vsel %vm20301_vm9, %v11360_v36, %v11356_v5  ;;  %4828 = vadd.xlane.f32.xlu1 %v4827_v49  ;;  %4825 = vadd.xlane.f32.xlu0 %v4824_v55  ;;  %v15342_v49 = vld [vmem:[%s15663_s25 + $0xec0] sm:$0xff]   ;;  %v4914_v32 = vsel %vm2225_vm0, %v14553_v63, 0.0  ;;  %vm20303_vm9 = vcmask 589312  }
 0x6e1   : > { %v11365_v46 = vrot.slane %v6092_v15, %v15858_v24  ;;  %v4619_v0 = vpop.xlane.xlu1 %4618  ;;  %v14649_v5 = vunpack.c.l.bf16 %v15342_v49  ;;  %v14589_v15 = vunpack.c.l.bf16 %v15327_v40 }
 0x6e2   : > { %v6095_v29 = vmul.f32 0.0625, %v4619_v0  ;;  %v4616_v25 = vpop.xlane.xlu0 %4615 }
 0x6e3   : > { %v11366_v45 = vsel %vm7484_vm10, %v11365_v46, %v11361_v52  ;;  %v6094_v35 = vmul.f32 0.0625, %v4616_v25  ;;  %v5058_v25 = vsel %vm2225_vm0, %v14649_v5, 0.0 }
 0x6e4   : > { %v11380_v20 = vrot.slane %v6095_v29, %v15867_v37  ;;  %v11371_v7 = vsel %vm20302_vm8, %v11370_v54, %v11366_v45  ;;  %4870 = vadd.xlane.f32.xlu1 %v4869_v58  ;;  %4867 = vadd.xlane.f32.xlu0 %v4866_v2  ;;  %v18961_v54 = vld [vmem:[%s15663_s25 + $0xdd0] sm:$0xff]   ;;  %v4968_v45 = vsel %vm2225_vm0, %v14589_v15, 0.0  ;;  %vm20304_vm8 = vcmask 654912  }
 0x6e5   : > { %v11375_v14 = vrot.slane %v6094_v35, %v15873_v43  ;;  %v4625_v38 = vpop.xlane.xlu1 %4624  ;;  %v14529_v2 = vunpack.c.l.bf16 %v18961_v54  ;;  %v14650_v35 = vunpack.c.h.bf16 %v15342_v49 }
 0x6e6   : > { %v6097_v39 = vmul.f32 0.0625, %v4625_v38  ;;  %v4622_v16 = vpop.xlane.xlu0 %4621 }
 0x6e7   : > { %v11376_v8 = vsel %vm7498_vm12, %v11375_v14, %v11371_v7  ;;  %v6096_v51 = vmul.f32 0.0625, %v4622_v16  ;;  %v4878_v21 = vsel %vm2225_vm0, %v14529_v2, 0.0  ;;  %v5061_v16 = vsel %vm2225_vm0, %v14650_v35, 0.0 }
 0x6e8   : > { %v11390_v27 = vrot.slane %v6097_v39, %v15882_v57  ;;  %v11381_v28 = vsel %vm7505_vm13, %v11380_v20, %v11376_v8  ;;  %4963 = vadd.xlane.f32.xlu1 %v4962_v31  ;;  %4873 = vadd.xlane.f32.xlu0 %v4872_v4  ;;  %v18970_v31 = vld [vmem:[%s15663_s25 + $0xe08] sm:$0xff]   ;;  %v14590_v8 = vunpack.c.h.bf16 %v15327_v40 }
 0x6e9   : > { %v11385_v26 = vrot.slane %v6096_v51, %v15887_v60  ;;  %v4631_v30 = vpop.xlane.xlu1 %4630  ;;  %v14557_v51 = vunpack.c.l.bf16 %v18970_v31 }
 0x6ea   : > { %v6099_v36 = vmul.f32 0.0625, %v4631_v30  ;;  %v4628_v48 = vpop.xlane.xlu0 %4627  ;;  %v4971_v49 = vsel %vm2225_vm0, %v14590_v8, 0.0 }
 0x6eb   : > { %v11386_v6 = vsel %vm7512_vm14, %v11385_v26, %v11381_v28  ;;  %v6098_v55 = vmul.f32 0.0625, %v4628_v48  ;;  %v4920_v40 = vsel %vm2225_vm0, %v14557_v51, 0.0 }
 0x6ec   : > { %v18954_v50 = vsel %vm7519_vm15, %v11390_v27, %v11386_v6  ;;  %v11399_v3 = vrot.slane %v6099_v36, %v15796_v12  ;;  %4876 = vadd.xlane.f32.xlu1 %v4875_v56  ;;  %4966 = vadd.xlane.f32.xlu0 %v4965_v53  ;;  %v15334_v27 = vld [vmem:[%s15663_s25 + $0xe80] sm:$0xff]  }
 0x6ed   : > { %v11395_v33 = vrot.slane %v6098_v55, %v15790_v9  ;;  %v4637_v44 = vpop.xlane.xlu1 %4636  ;;  %v14618_v63 = vunpack.c.h.bf16 %v15334_v27  ;;  %v14617_v6 = vunpack.c.l.bf16 %v15334_v27 }
 0x6ee   : > { %v6101_v52 = vmul.f32 0.0625, %v4637_v44  ;;  %v4634_v62 = vpop.xlane.xlu0 %4633 }
 0x6ef   : > { %v11400_v46 = vsel %vm7421_vm1, %v11399_v3, %v11395_v33  ;;  %v6100_v0 = vmul.f32 0.0625, %v4634_v62  ;;  %v18988_v33 = vld [vmem:[%s15663_s25 + $0xec8] sm:$0xff]  }
 0x6f0   : > { %v11409_v58 = vrot.slane %v6101_v52, %v15793_v11  ;;  %4918 = vadd.xlane.f32.xlu1 %v4917_v59  ;;  %4915 = vadd.xlane.f32.xlu0 %v4914_v32  ;;  %v15358_v59 = vld [vmem:[%s15663_s25 + $0xf40] sm:$0xff]   ;;  %v5013_v52 = vsel %vm2225_vm0, %v14618_v63, 0.0  ;;  %v14653_v2 = vunpack.c.l.bf16 %v18988_v33  ;;  %v14530_v63 = vunpack.c.h.bf16 %v18961_v54 }
 0x6f1   : > { %v11404_v17 = vrot.slane %v6100_v0, %v15799_v13  ;;  %v4643_v29 = vpop.xlane.xlu1 %4642  ;;  %v5010_v0 = vsel %vm2225_vm0, %v14617_v6, 0.0 }
 0x6f2   : > { %v6103_v20 = vmul.f32 0.0625, %v4643_v29  ;;  %v4640_v7 = vpop.xlane.xlu0 %4639 }
 0x6f3   : > { %v11405_v14 = vsel %vm7428_vm2, %v11404_v17, %v11400_v46  ;;  %v6102_v38 = vmul.f32 0.0625, %v4640_v7  ;;  %v18998_v17 = vld [vmem:[%s15663_s25 + $0xd90] sm:$0xff]  }
 0x6f4   : > { %v11419_v4 = vrot.slane %v6103_v20, %v15804_v22  ;;  %v11410_v47 = vsel %vm7435_vm3, %v11409_v58, %v11405_v14  ;;  %5059 = vadd.xlane.f32.xlu1 %v5058_v25  ;;  %4969 = vadd.xlane.f32.xlu0 %v4968_v45  ;;  %v14713_v58 = vunpack.c.l.bf16 %v15358_v59  ;;  %v14497_v14 = vunpack.c.l.bf16 %v18998_v17 }
 0x6f5   : > { %v11414_v10 = vrot.slane %v6102_v38, %v15807_v23  ;;  %v4649_v39 = vpop.xlane.xlu1 %4648 }
 0x6f6   : > { %v6105_v28 = vmul.f32 0.0625, %v4649_v39  ;;  %v4646_v34 = vpop.xlane.xlu0 %4645 }
 0x6f7   : > { %v11415_v26 = vsel %vm7442_vm4, %v11414_v10, %v11410_v47  ;;  %v6104_v30 = vmul.f32 0.0625, %v4646_v34  ;;  %v5154_v47 = vsel %vm2225_vm0, %v14713_v58, 0.0  ;;  %v14714_v10 = vunpack.c.h.bf16 %v15358_v59 }
 0x6f8   : > { %v11429_v56 = vrot.slane %v6105_v28, %v15821_v41  ;;  %v11420_v53 = vsel %vm7449_vm5, %v11419_v4, %v11415_v26  ;;  %4879 = vadd.xlane.f32.xlu1 %v4878_v21  ;;  %5062 = vadd.xlane.f32.xlu0 %v5061_v16  ;;  %v5064_v21 = vsel %vm2225_vm0, %v14653_v2, 0.0  ;;  %v4830_v34 = vsel %vm2225_vm0, %v14497_v14, 0.0 }
 0x6f9   : > { %v11424_v36 = vrot.slane %v6104_v30, %v15824_v42  ;;  %v4655_v48 = vpop.xlane.xlu1 %4654 }
 0x6fa   : > { %v6107_v55 = vmul.f32 0.0625, %v4655_v48  ;;  %v4652_v3 = vpop.xlane.xlu0 %4651  ;;  %v19019_v48 = vld [vmem:[%s15663_s25 + $0xe50] sm:$0xff]  }
 0x6fb   : > { %v11425_v44 = vsel %vm7456_vm6, %v11424_v36, %v11420_v53  ;;  %v6106_v32 = vmul.f32 0.0625, %v4652_v3  ;;  %v14558_v53 = vunpack.c.h.bf16 %v18970_v31  ;;  %v19016_v36 = vld [vmem:[%s15663_s25 + $0xe88] sm:$0xff]   ;;  %v14593_v54 = vunpack.c.l.bf16 %v19019_v48 }
 0x6fc   : > { %v11439_v5 = vrot.slane %v6107_v55, %v15837_v61  ;;  %v11430_v15 = vsel %vm7463_vm7, %v11429_v56, %v11425_v44  ;;  %4972 = vadd.xlane.f32.xlu1 %v4971_v49  ;;  %4921 = vadd.xlane.f32.xlu0 %v4920_v40  ;;  %v5157_v56 = vsel %vm2225_vm0, %v14714_v10, 0.0  ;;  %v14621_v31 = vunpack.c.l.bf16 %v19016_v36 }
 0x6fd   : > { %v11434_v62 = vrot.slane %v6106_v32, %v15843_v1  ;;  %v4661_v46 = vpop.xlane.xlu1 %4660 }
 0x6fe   : > { %v6109_v29 = vmul.f32 0.0625, %v4661_v46  ;;  %v4658_v25 = vpop.xlane.xlu0 %4657  ;;  %v15350_v46 = vld [vmem:[%s15663_s25 + $0xf00] sm:$0xff]  }
 0x6ff   : > { %v11435_v45 = vsel %vm20303_vm9, %v11434_v62, %v11430_v15  ;;  %v6108_v35 = vmul.f32 0.0625, %v4658_v25  ;;  %vm20305_vm9 = vcmask 786112   ;;  %v4881_v15 = vsel %vm2225_vm0, %v14530_v63, 0.0 }
 0x700   : > { %v11449_v20 = vrot.slane %v6109_v29, %v15852_v18  ;;  %v11440_v7 = vsel %vm20304_vm8, %v11439_v5, %v11435_v45  ;;  %5014 = vadd.xlane.f32.xlu1 %v5013_v52  ;;  %5011 = vadd.xlane.f32.xlu0 %v5010_v0  ;;  %v4923_v5 = vsel %vm2225_vm0, %v14558_v53, 0.0  ;;  %v5016_v25 = vsel %vm2225_vm0, %v14621_v31, 0.0 }
 0x701   : > { %v11444_v38 = vrot.slane %v6108_v35, %v15858_v24  ;;  %v4667_v4 = vpop.xlane.xlu1 %4666  ;;  %v4974_v45 = vsel %vm2225_vm0, %v14593_v54, 0.0  ;;  %vm20306_vm8 = vcmask 1041409   ;;  %v14681_v14 = vunpack.c.l.bf16 %v15350_v46  ;;  %v19058_v54 = vld [vmem:[%s15663_s25 + $0xdd8] sm:$0xff]  }
 0x702   : > { %v6111_v39 = vmul.f32 0.0625, %v4667_v4  ;;  %v4664_v16 = vpop.xlane.xlu0 %4663  ;;  %v19042_v4 = vld [vmem:[%s15663_s25 + $0xf48] sm:$0xff]  }
 0x703   : > { %v11445_v8 = vsel %vm7484_vm10, %v11444_v38, %v11440_v7  ;;  %v6110_v51 = vmul.f32 0.0625, %v4664_v16  ;;  %v14654_v38 = vunpack.c.h.bf16 %v18988_v33 }
 0x704   : > { %v11459_v27 = vrot.slane %v6111_v39, %v15867_v37  ;;  %v11450_v28 = vsel %vm20305_vm9, %v11449_v20, %v11445_v8  ;;  %5155 = vadd.xlane.f32.xlu1 %v5154_v47  ;;  %5065 = vadd.xlane.f32.xlu0 %v5064_v21  ;;  %vm20307_vm9 = vcmask 589312  }
 0x705   : > { %v11454_v26 = vrot.slane %v6110_v51, %v15873_v43  ;;  %v4673_v30 = vpop.xlane.xlu1 %4672  ;;  %v5067_v33 = vsel %vm2225_vm0, %v14654_v38, 0.0 }
 0x706   : > { %v6113_v49 = vmul.f32 0.0625, %v4673_v30  ;;  %v4670_v40 = vpop.xlane.xlu0 %4669  ;;  %v15374_v30 = vld [vmem:[%s15663_s25 + $0xfc0] sm:$0xff]  }
 0x707   : > { %v11455_v6 = vsel %vm7498_vm12, %v11454_v26, %v11450_v28  ;;  %v6112_v55 = vmul.f32 0.0625, %v4670_v40  ;;  %v14682_v28 = vunpack.c.h.bf16 %v15350_v46  ;;  %v14777_v31 = vunpack.c.l.bf16 %v15374_v30 }
 0x708   : > { %v11469_v3 = vrot.slane %v6113_v49, %v15882_v57  ;;  %v11460_v59 = vsel %vm7505_vm13, %v11459_v27, %v11455_v6  ;;  %4831 = vadd.xlane.f32.xlu1 %v4830_v34  ;;  %5158 = vadd.xlane.f32.xlu0 %v5157_v56  ;;  %v5106_v27 = vsel %vm2225_vm0, %v14681_v14, 0.0  ;;  %v14533_v46 = vunpack.c.l.bf16 %v19058_v54 }
 0x709   : > { %v11464_v44 = vrot.slane %v6112_v55, %v15887_v60  ;;  %v4679_v32 = vpop.xlane.xlu1 %4678 }
 0x70a   : > { %v6115_v52 = vmul.f32 0.0625, %v4679_v32  ;;  %v4676_v62 = vpop.xlane.xlu0 %4675 }
 0x70b   : > { %v11465_v0 = vsel %vm7512_vm14, %v11464_v44, %v11460_v59  ;;  %v6114_v58 = vmul.f32 0.0625, %v4676_v62  ;;  %v14778_v59 = vunpack.c.h.bf16 %v15374_v30 }
 0x70c   : > { %v11470_v2 = vsel %vm7519_vm15, %v11469_v3, %v11465_v0  ;;  %v11478_v29 = vrot.slane %v6115_v52, %v15796_v12  ;;  %4924 = vadd.xlane.f32.xlu1 %v4923_v5  ;;  %4882 = vadd.xlane.f32.xlu0 %v4881_v15  ;;  %v5109_v3 = vsel %vm2225_vm0, %v14682_v28, 0.0 }
 0x70d   : > { %v19037_v35 = vsel %vm20306_vm8, %v11470_v2, %v18896_v19  ;;  %v11474_v20 = vrot.slane %v6114_v58, %v15790_v9  ;;  %v4685_v7 = vpop.xlane.xlu1 %4684  ;;  %v14717_v19 = vunpack.c.l.bf16 %v19042_v4  ;;  %v5253_v2 = vsel %vm2225_vm0, %v14778_v59, 0.0 }
 0x70e   : > { %v6117_v47 = vmul.f32 0.0625, %v4685_v7  ;;  %v4682_v21 = vpop.xlane.xlu0 %4681  ;;  %v19069_v7 = vld [vmem:[%s15663_s25 + $0xe10] sm:$0xff]   ;;  %vm20308_vm8 = vcmask 654912  }
 0x70f   : > { %v11479_v10 = vsel %vm7421_vm1, %v11478_v29, %v11474_v20  ;;  %v6116_v39 = vmul.f32 0.0625, %v4682_v21  ;;  %v5160_v40 = vsel %vm2225_vm0, %v14717_v19, 0.0  ;;  %v5250_v29 = vsel %vm2225_vm0, %v14777_v31, 0.0 }
 0x710   : > { %v11488_v16 = vrot.slane %v6117_v47, %v15793_v11  ;;  %5017 = vadd.xlane.f32.xlu1 %v5016_v25  ;;  %4975 = vadd.xlane.f32.xlu0 %v4974_v45  ;;  %v14498_v25 = vunpack.c.h.bf16 %v18998_v17  ;;  %v14594_v19 = vunpack.c.h.bf16 %v19019_v48 }
 0x711   : > { %v11483_v8 = vrot.slane %v6116_v39, %v15799_v13  ;;  %v4691_v51 = vpop.xlane.xlu1 %4690 }
 0x712   : > { %v6119_v34 = vmul.f32 0.0625, %v4691_v51  ;;  %v4688_v26 = vpop.xlane.xlu0 %4687  ;;  %v4833_v17 = vsel %vm2225_vm0, %v14498_v25, 0.0  ;;  %v19080_v51 = vld [vmem:[%s15663_s25 + $0xed0] sm:$0xff]  }
 0x713   : > { %v11484_v56 = vsel %vm7428_vm2, %v11483_v8, %v11479_v10  ;;  %v6118_v53 = vmul.f32 0.0625, %v4688_v26  ;;  %v4884_v10 = vsel %vm2225_vm0, %v14533_v46, 0.0  ;;  %v14561_v8 = vunpack.c.l.bf16 %v19069_v7 }
 0x714   : > { %v11498_v63 = vrot.slane %v6119_v34, %v15804_v22  ;;  %v11489_v49 = vsel %vm7435_vm3, %v11488_v16, %v11484_v56  ;;  %5107 = vadd.xlane.f32.xlu1 %v5106_v27  ;;  %5068 = vadd.xlane.f32.xlu0 %v5067_v33  ;;  %v14657_v56 = vunpack.c.l.bf16 %v19080_v51 }
 0x715   : > { %v11493_v6 = vrot.slane %v6118_v53, %v15807_v23  ;;  %v4697_v55 = vpop.xlane.xlu1 %4696 }
 0x716   : > { %v6121_v44 = vmul.f32 0.0625, %v4697_v55  ;;  %v4694_v32 = vpop.xlane.xlu0 %4693 }
 0x717   : > { %v11494_v5 = vsel %vm7442_vm4, %v11493_v6, %v11489_v49  ;;  %v6120_v15 = vmul.f32 0.0625, %v4694_v32  ;;  %v4926_v49 = vsel %vm2225_vm0, %v14561_v8, 0.0 }
 0x718   : > { %v11508_v52 = vrot.slane %v6121_v44, %v15821_v41  ;;  %v11499_v62 = vsel %vm7449_vm5, %v11498_v63, %v11494_v5  ;;  %5161 = vadd.xlane.f32.xlu1 %v5160_v40  ;;  %5110 = vadd.xlane.f32.xlu0 %v5109_v3  ;;  %v4977_v63 = vsel %vm2225_vm0, %v14594_v19, 0.0  ;;  %v14622_v40 = vunpack.c.h.bf16 %v19016_v36  ;;  %v19091_v3 = vld [vmem:[%s15663_s25 + $0xf08] sm:$0xff]  }
 0x719   : > { %v11503_v0 = vrot.slane %v6120_v15, %v15824_v42  ;;  %v4703_v58 = vpop.xlane.xlu1 %4702  ;;  %v5070_v5 = vsel %vm2225_vm0, %v14657_v56, 0.0  ;;  %v14685_v46 = vunpack.c.l.bf16 %v19091_v3  ;;  %v19112_v19 = vld [vmem:[%s15663_s25 + $0xfc8] sm:$0xff]  }
 0x71a   : > { %v6123_v45 = vmul.f32 0.0625, %v4703_v58  ;;  %v4700_v20 = vpop.xlane.xlu0 %4699  ;;  %v5019_v36 = vsel %vm2225_vm0, %v14622_v40, 0.0 }
 0x71b   : > { %v11504_v14 = vsel %vm7456_vm6, %v11503_v0, %v11499_v62  ;;  %v6122_v38 = vmul.f32 0.0625, %v4700_v20  ;;  %v14718_v62 = vunpack.c.h.bf16 %v19042_v4  ;;  %v15366_v0 = vld [vmem:[%s15663_s25 + $0xf80] sm:$0xff]  }
 0x71c   : > { %v11518_v47 = vrot.slane %v6123_v45, %v15837_v61  ;;  %v11509_v21 = vsel %vm7463_vm7, %v11508_v52, %v11504_v14  ;;  %5254 = vadd.xlane.f32.xlu1 %v5253_v2  ;;  %5251 = vadd.xlane.f32.xlu0 %v5250_v29  ;;  %v14746_v14 = vunpack.c.h.bf16 %v15366_v0 }
 0x71d   : > { %v11513_v39 = vrot.slane %v6122_v38, %v15843_v1  ;;  %v4709_v16 = vpop.xlane.xlu1 %4708  ;;  %v14745_v38 = vunpack.c.l.bf16 %v15366_v0 }
 0x71e   : > { %v6125_v27 = vmul.f32 0.0625, %v4709_v16  ;;  %v4706_v33 = vpop.xlane.xlu0 %4705 }
 0x71f   : > { %v11514_v28 = vsel %vm20307_vm9, %v11513_v39, %v11509_v21  ;;  %v6124_v34 = vmul.f32 0.0625, %v4706_v33  ;;  %vm20309_vm9 = vcmask 786112   ;;  %v5163_v21 = vsel %vm2225_vm0, %v14718_v62, 0.0  ;;  %v19134_v62 = vld [vmem:[%s15663_s25 + $0xe90] sm:$0xff]  }
 0x720   : > { %v11528_v26 = vrot.slane %v6125_v27, %v15852_v18  ;;  %v11519_v30 = vsel %vm20308_vm8, %v11518_v47, %v11514_v28  ;;  %4885 = vadd.xlane.f32.xlu1 %v4884_v10  ;;  %4834 = vadd.xlane.f32.xlu0 %v4833_v17  ;;  %v5112_v10 = vsel %vm2225_vm0, %v14685_v46, 0.0  ;;  %v19109_v17 = vld [vmem:[%s15663_s25 + $0xd98] sm:$0xff]   ;;  %vm20310_vm8 = vcmask 1041409  }
 0x721   : > { %v11523_v48 = vrot.slane %v6124_v34, %v15858_v24  ;;  %v4715_v53 = vpop.xlane.xlu1 %4714  ;;  %v5205_v34 = vsel %vm2225_vm0, %v14746_v14, 0.0  ;;  %v19137_v46 = vld [vmem:[%s15663_s25 + $0xe58] sm:$0xff]  }
 0x722   : > { %v6127_v6 = vmul.f32 0.0625, %v4715_v53  ;;  %v4712_v55 = vpop.xlane.xlu0 %4711  ;;  %v14501_v53 = vunpack.c.l.bf16 %v19109_v17  ;;  %v14597_v14 = vunpack.c.l.bf16 %v19137_v46 }
 0x723   : > { %v11524_v59 = vsel %vm7484_vm10, %v11523_v48, %v11519_v30  ;;  %v6126_v31 = vmul.f32 0.0625, %v4712_v55 }
 0x724   : > { %v11538_v44 = vrot.slane %v6127_v6, %v15867_v37  ;;  %v11529_v32 = vsel %vm20309_vm9, %v11528_v26, %v11524_v59  ;;  %4978 = vadd.xlane.f32.xlu1 %v4977_v63  ;;  %4927 = vadd.xlane.f32.xlu0 %v4926_v49  ;;  %v5202_v26 = vsel %vm2225_vm0, %v14745_v38, 0.0  ;;  %v14781_v63 = vunpack.c.l.bf16 %v19112_v19 }
 0x725   : > { %v11533_v15 = vrot.slane %v6126_v31, %v15873_v43  ;;  %v4721_v52 = vpop.xlane.xlu1 %4720  ;;  %vm20311_vm9 = vcmask 589312  }
 0x726   : > { %v6129_v58 = vmul.f32 0.0625, %v4721_v52  ;;  %v4718_v2 = vpop.xlane.xlu0 %4717 }
 0x727   : > { %v11534_v29 = vsel %vm7498_vm12, %v11533_v15, %v11529_v32  ;;  %v6128_v25 = vmul.f32 0.0625, %v4718_v2  ;;  %v4836_v32 = vsel %vm2225_vm0, %v14501_v53, 0.0  ;;  %v14534_v15 = vunpack.c.h.bf16 %v19058_v54  ;;  %v19159_v53 = vld [vmem:[%s15663_s25 + $0xf50] sm:$0xff]  }
 0x728   : > { %v11548_v45 = vrot.slane %v6129_v58, %v15882_v57  ;;  %v11539_v20 = vsel %vm7505_vm13, %v11538_v44, %v11534_v29  ;;  %5071 = vadd.xlane.f32.xlu1 %v5070_v5  ;;  %5020 = vadd.xlane.f32.xlu0 %v5019_v36  ;;  %v5256_v5 = vsel %vm2225_vm0, %v14781_v63, 0.0 }
 0x729   : > { %v11543_v4 = vrot.slane %v6128_v25, %v15887_v60  ;;  %v4727_v47 = vpop.xlane.xlu1 %4726 }
 0x72a   : > { %v6131_v39 = vmul.f32 0.0625, %v4727_v47  ;;  %v4724_v16 = vpop.xlane.xlu0 %4723 }
 0x72b   : > { %v11544_v8 = vsel %vm7512_vm14, %v11543_v4, %v11539_v20  ;;  %v6130_v27 = vmul.f32 0.0625, %v4724_v16  ;;  %v14625_v20 = vunpack.c.l.bf16 %v19134_v62  ;;  %v14686_v16 = vunpack.c.h.bf16 %v19091_v3 }
 0x72c   : > { %v11549_v33 = vsel %vm7519_vm15, %v11548_v45, %v11544_v8  ;;  %v11557_v28 = vrot.slane %v6131_v39, %v15796_v12  ;;  %5164 = vadd.xlane.f32.xlu1 %v5163_v21  ;;  %5113 = vadd.xlane.f32.xlu0 %v5112_v10  ;;  %v4887_v45 = vsel %vm2225_vm0, %v14534_v15, 0.0 }
 0x72d   : > { %v19121_v30 = vsel %vm20310_vm8, %v11549_v33, %v18954_v50  ;;  %v11553_v56 = vrot.slane %v6130_v27, %v15790_v9  ;;  %v4733_v48 = vpop.xlane.xlu1 %4732  ;;  %v14562_v50 = vunpack.c.h.bf16 %v19069_v7  ;;  %v5022_v33 = vsel %vm2225_vm0, %v14625_v20, 0.0  ;;  %v19178_v20 = vld [vmem:[%s15663_s25 + $0xe18] sm:$0xff]  }
 0x72e   : > { %v6133_v49 = vmul.f32 0.0625, %v4733_v48  ;;  %v4730_v40 = vpop.xlane.xlu0 %4729  ;;  %v19156_v48 = vld [vmem:[%s15663_s25 + $0xf88] sm:$0xff]   ;;  %vm20312_vm8 = vcmask 654912  }
 0x72f   : > { %v11558_v6 = vsel %vm7421_vm1, %v11557_v28, %v11553_v56  ;;  %v6132_v55 = vmul.f32 0.0625, %v4730_v40  ;;  %v4929_v29 = vsel %vm2225_vm0, %v14562_v50, 0.0  ;;  %v4980_v28 = vsel %vm2225_vm0, %v14597_v14, 0.0  ;;  %v19181_v14 = vld [vmem:[%s15663_s25 + $0xde0] sm:$0xff]  }
 0x730   : > { %v11567_v59 = vrot.slane %v6133_v49, %v15793_v11  ;;  %5206 = vadd.xlane.f32.xlu1 %v5205_v34  ;;  %5203 = vadd.xlane.f32.xlu0 %v5202_v26  ;;  %v14658_v34 = vunpack.c.h.bf16 %v19080_v51  ;;  %v14749_v50 = vunpack.c.l.bf16 %v19156_v48 }
 0x731   : > { %v11562_v31 = vrot.slane %v6132_v55, %v15799_v13  ;;  %v4739_v44 = vpop.xlane.xlu1 %4738 }
 0x732   : > { %v6135_v52 = vmul.f32 0.0625, %v4739_v44  ;;  %v4736_v36 = vpop.xlane.xlu0 %4735 }
 0x733   : > { %v11563_v0 = vsel %vm7428_vm2, %v11562_v31, %v11558_v6  ;;  %v6134_v58 = vmul.f32 0.0625, %v4736_v36  ;;  %v5115_v6 = vsel %vm2225_vm0, %v14686_v16, 0.0  ;;  %v14721_v31 = vunpack.c.l.bf16 %v19159_v53 }
 0x734   : > { %v11577_v7 = vrot.slane %v6135_v52, %v15804_v22  ;;  %v11568_v2 = vsel %vm7435_vm3, %v11567_v59, %v11563_v0  ;;  %4837 = vadd.xlane.f32.xlu1 %v4836_v32  ;;  %5257 = vadd.xlane.f32.xlu0 %v5256_v5  ;;  %v5073_v59 = vsel %vm2225_vm0, %v14658_v34, 0.0  ;;  %v14502_v0 = vunpack.c.h.bf16 %v19109_v17 }
 0x735   : > { %v11572_v25 = vrot.slane %v6134_v58, %v15807_v23  ;;  %v4745_v54 = vpop.xlane.xlu1 %4744  ;;  %v14565_v16 = vunpack.c.l.bf16 %v19178_v20 }
 0x736   : > { %v6137_v38 = vmul.f32 0.0625, %v4745_v54  ;;  %v4742_v4 = vpop.xlane.xlu0 %4741 }
 0x737   : > { %v11573_v47 = vsel %vm7442_vm4, %v11572_v25, %v11568_v2  ;;  %v6136_v21 = vmul.f32 0.0625, %v4742_v4  ;;  %v5208_v2 = vsel %vm2225_vm0, %v14749_v50, 0.0  ;;  %v14782_v25 = vunpack.c.h.bf16 %v19112_v19  ;;  %v19200_v50 = vld [vmem:[%s15663_s25 + $0xf10] sm:$0xff]  }
 0x738   : > { %v11587_v10 = vrot.slane %v6137_v38, %v15821_v41  ;;  %v11578_v39 = vsel %vm7449_vm5, %v11577_v7, %v11573_v47  ;;  %4930 = vadd.xlane.f32.xlu1 %v4929_v29  ;;  %4888 = vadd.xlane.f32.xlu0 %v4887_v45  ;;  %v5166_v29 = vsel %vm2225_vm0, %v14721_v31, 0.0  ;;  %v19203_v31 = vld [vmem:[%s15663_s25 + $0xed8] sm:$0xff]  }
 0x739   : > { %v11582_v8 = vrot.slane %v6136_v21, %v15824_v42  ;;  %v4751_v27 = vpop.xlane.xlu1 %4750  ;;  %v4839_v21 = vsel %vm2225_vm0, %v14502_v0, 0.0  ;;  %v14689_v0 = vunpack.c.l.bf16 %v19200_v50 }
 0x73a   : > { %v6139_v26 = vmul.f32 0.0625, %v4751_v27  ;;  %v4748_v56 = vpop.xlane.xlu0 %4747 }
 0x73b   : > { %v11583_v63 = vsel %vm7456_vm6, %v11582_v8, %v11578_v39  ;;  %v6138_v49 = vmul.f32 0.0625, %v4748_v56  ;;  %v5259_v39 = vsel %vm2225_vm0, %v14782_v25, 0.0  ;;  %v14537_v8 = vunpack.c.l.bf16 %v19181_v14 }
 0x73c   : > { %v11597_v3 = vrot.slane %v6139_v26, %v15837_v61  ;;  %v11588_v40 = vsel %vm7463_vm7, %v11587_v10, %v11583_v63  ;;  %5023 = vadd.xlane.f32.xlu1 %v5022_v33  ;;  %4981 = vadd.xlane.f32.xlu0 %v4980_v28  ;;  %v14626_v63 = vunpack.c.h.bf16 %v19134_v62 }
 0x73d   : > { %v11592_v55 = vrot.slane %v6138_v49, %v15843_v1  ;;  %v4757_v51 = vpop.xlane.xlu1 %4756  ;;  %v14598_v49 = vunpack.c.h.bf16 %v19137_v46 }
 0x73e   : > { %v6141_v44 = vmul.f32 0.0625, %v4757_v51  ;;  %v4754_v32 = vpop.xlane.xlu0 %4753 }
 0x73f   : > { %v11593_v5 = vsel %vm20311_vm9, %v11592_v55, %v11588_v40  ;;  %v6140_v15 = vmul.f32 0.0625, %v4754_v32  ;;  %vm20313_vm9 = vcmask 786112   ;;  %v4890_v55 = vsel %vm2225_vm0, %v14537_v8, 0.0 }
 0x740   : > { %v11607_v52 = vrot.slane %v6141_v44, %v15852_v18  ;;  %v11598_v36 = vsel %vm20312_vm8, %v11597_v3, %v11593_v5  ;;  %5116 = vadd.xlane.f32.xlu1 %v5115_v6  ;;  %5074 = vadd.xlane.f32.xlu0 %v5073_v59  ;;  %v4932_v6 = vsel %vm2225_vm0, %v14565_v16, 0.0  ;;  %v5025_v5 = vsel %vm2225_vm0, %v14626_v63, 0.0  ;;  %v19228_v16 = vld [vmem:[%s15663_s25 + $0xfd0] sm:$0xff]  }
 0x741   : > { %v11602_v58 = vrot.slane %v6140_v15, %v15858_v24  ;;  %v4763_v7 = vpop.xlane.xlu1 %4762  ;;  %v4983_v15 = vsel %vm2225_vm0, %v14598_v49, 0.0  ;;  %vm20314_vm8 = vcmask 1042434   ;;  %v14785_v63 = vunpack.c.l.bf16 %v19228_v16 }
 0x742   : > { %v6143_v54 = vmul.f32 0.0625, %v4763_v7  ;;  %v4760_v45 = vpop.xlane.xlu0 %4759 }
 0x743   : > { %v11603_v38 = vsel %vm7484_vm10, %v11602_v58, %v11598_v36  ;;  %v6142_v4 = vmul.f32 0.0625, %v4760_v45  ;;  %v14661_v58 = vunpack.c.l.bf16 %v19203_v31 }
 0x744   : > { %v11617_v17 = vrot.slane %v6143_v54, %v15867_v37  ;;  %v11608_v47 = vsel %vm20313_vm9, %v11607_v52, %v11603_v38  ;;  %5209 = vadd.xlane.f32.xlu1 %v5208_v2  ;;  %5167 = vadd.xlane.f32.xlu0 %v5166_v29  ;;  %v14750_v38 = vunpack.c.h.bf16 %v19156_v48  ;;  %vm20315_vm9 = vcmask 589312  }
 0x745   : > { %v11612_v10 = vrot.slane %v6142_v4, %v15873_v43  ;;  %v4769_v19 = vpop.xlane.xlu1 %4768 }
 0x746   : > { %v6145_v27 = vmul.f32 0.0625, %v4769_v19  ;;  %v4766_v33 = vpop.xlane.xlu0 %4765 }
 0x747   : > { %v11613_v28 = vsel %vm7498_vm12, %v11612_v10, %v11608_v47  ;;  %v6144_v34 = vmul.f32 0.0625, %v4766_v33  ;;  %v5118_v47 = vsel %vm2225_vm0, %v14689_v0, 0.0  ;;  %v19250_v0 = vld [vmem:[%s15663_s25 + $0xe60] sm:$0xff]  }
 0x748   : > { %v11627_v26 = vrot.slane %v6145_v27, %v15882_v57  ;;  %v11618_v56 = vsel %vm7505_vm13, %v11617_v17, %v11613_v28  ;;  %4840 = vadd.xlane.f32.xlu1 %v4839_v21  ;;  %5260 = vadd.xlane.f32.xlu0 %v5259_v39  ;;  %v14722_v21 = vunpack.c.h.bf16 %v19159_v53  ;;  %v19225_v39 = vld [vmem:[%s15663_s25 + $0xda0] sm:$0xff]   ;;  %v5211_v28 = vsel %vm2225_vm0, %v14750_v38, 0.0 }
 0x749   : > { %v11622_v3 = vrot.slane %v6144_v34, %v15887_v60  ;;  %v4775_v40 = vpop.xlane.xlu1 %4774 }
 0x74a   : > { %v6147_v51 = vmul.f32 0.0625, %v4775_v40  ;;  %v4772_v59 = vpop.xlane.xlu0 %4771 }
 0x74b   : > { %v11623_v44 = vsel %vm7512_vm14, %v11622_v3, %v11618_v56  ;;  %v6146_v32 = vmul.f32 0.0625, %v4772_v59  ;;  %v14505_v56 = vunpack.c.l.bf16 %v19225_v39  ;;  %v14566_v59 = vunpack.c.h.bf16 %v19178_v20 }
 0x74c   : > { %v11628_v62 = vsel %vm7519_vm15, %v11627_v26, %v11623_v44  ;;  %v11636_v46 = vrot.slane %v6147_v51, %v15796_v12  ;;  %4933 = vadd.xlane.f32.xlu1 %v4932_v6  ;;  %4891 = vadd.xlane.f32.xlu0 %v4890_v55  ;;  %v5169_v26 = vsel %vm2225_vm0, %v14722_v21, 0.0 }
 0x74d   : > { %v11632_v52 = vrot.slane %v6146_v32, %v15790_v9  ;;  %v4781_v36 = vpop.xlane.xlu1 %4780  ;;  %v19215_v7 = vsel %vm20314_vm8, %v11628_v62, %v19037_v35  ;;  %v5076_v35 = vsel %vm2225_vm0, %v14661_v58, 0.0  ;;  %v4842_v62 = vsel %vm2225_vm0, %v14505_v56, 0.0  ;;  %v19269_v56 = vld [vmem:[%s15663_s25 + $0xf90] sm:$0xff]  }
 0x74e   : > { %v6149_v2 = vmul.f32 0.0625, %v4781_v36  ;;  %v4778_v29 = vpop.xlane.xlu0 %4777  ;;  %v19247_v36 = vld [vmem:[%s15663_s25 + $0xe98] sm:$0xff]   ;;  %vm20316_vm8 = vcmask 654912  }
 0x74f   : > { %v11637_v25 = vsel %vm7421_vm1, %v11636_v46, %v11632_v52  ;;  %v6148_v54 = vmul.f32 0.0625, %v4778_v29  ;;  %v5262_v46 = vsel %vm2225_vm0, %v14785_v63, 0.0  ;;  %v14629_v38 = vunpack.c.l.bf16 %v19247_v36  ;;  %v19272_v63 = vld [vmem:[%s15663_s25 + $0xf58] sm:$0xff]  }
 0x750   : > { %v11646_v45 = vrot.slane %v6149_v2, %v15793_v11  ;;  %5026 = vadd.xlane.f32.xlu1 %v5025_v5  ;;  %4984 = vadd.xlane.f32.xlu0 %v4983_v15  ;;  %v14538_v5 = vunpack.c.h.bf16 %v19181_v14 }
 0x751   : > { %v11641_v4 = vrot.slane %v6148_v54, %v15799_v13  ;;  %v4787_v17 = vpop.xlane.xlu1 %4786 }
 0x752   : > { %v6151_v10 = vmul.f32 0.0625, %v4787_v17  ;;  %v4784_v19 = vpop.xlane.xlu0 %4783 }
 0x753   : > { %v11642_v8 = vsel %vm7428_vm2, %v11641_v4, %v11637_v25  ;;  %v6150_v27 = vmul.f32 0.0625, %v4784_v19  ;;  %v4935_v25 = vsel %vm2225_vm0, %v14566_v59, 0.0  ;;  %v14601_v4 = vunpack.c.l.bf16 %v19250_v0 }
 0x754   : > { %v11656_v48 = vrot.slane %v6151_v10, %v15804_v22  ;;  %v11647_v33 = vsel %vm7435_vm3, %v11646_v45, %v11642_v8  ;;  %5119 = vadd.xlane.f32.xlu1 %v5118_v47  ;;  %5077 = vadd.xlane.f32.xlu0 %v5076_v35  ;;  %v4893_v45 = vsel %vm2225_vm0, %v14538_v5, 0.0  ;;  %v14690_v8 = vunpack.c.h.bf16 %v19200_v50 }
 0x755   : > { %v11651_v34 = vrot.slane %v6150_v27, %v15807_v23  ;;  %v4793_v53 = vpop.xlane.xlu1 %4792  ;;  %v14753_v59 = vunpack.c.l.bf16 %v19269_v56 }
 0x756   : > { %v6153_v49 = vmul.f32 0.0625, %v4793_v53  ;;  %v4790_v3 = vpop.xlane.xlu0 %4789 }
 0x757   : > { %v11652_v40 = vsel %vm7442_vm4, %v11651_v34, %v11647_v33  ;;  %v6152_v6 = vmul.f32 0.0625, %v4790_v3  ;;  %v5028_v33 = vsel %vm2225_vm0, %v14629_v38, 0.0  ;;  %v14662_v34 = vunpack.c.h.bf16 %v19203_v31 }
 0x758   : > { %v11666_v55 = vrot.slane %v6153_v49, %v15821_v41  ;;  %v11657_v51 = vsel %vm7449_vm5, %v11656_v48, %v11652_v40  ;;  %5212 = vadd.xlane.f32.xlu1 %v5211_v28  ;;  %5170 = vadd.xlane.f32.xlu0 %v5169_v26  ;;  %v4986_v28 = vsel %vm2225_vm0, %v14601_v4, 0.0  ;;  %v19294_v4 = vld [vmem:[%s15663_s25 + $0xde8] sm:$0xff]  }
 0x759   : > { %v11661_v44 = vrot.slane %v6152_v6, %v15824_v42  ;;  %v4799_v32 = vpop.xlane.xlu1 %4798  ;;  %v5121_v6 = vsel %vm2225_vm0, %v14690_v8, 0.0 }
 0x75a   : > { %v6155_v15 = vmul.f32 0.0625, %v4799_v32  ;;  %v4796_v52 = vpop.xlane.xlu0 %4795 }
 0x75b   : > { %v11662_v58 = vsel %vm7456_vm6, %v11661_v44, %v11657_v51  ;;  %v6154_v2 = vmul.f32 0.0625, %v4796_v52  ;;  %v5079_v51 = vsel %vm2225_vm0, %v14662_v34, 0.0  ;;  %v14725_v44 = vunpack.c.l.bf16 %v19272_v63 }
 0x75c   : > { %v11676_v20 = vrot.slane %v6155_v15, %v15837_v61  ;;  %v11667_v29 = vsel %vm7463_vm7, %v11666_v55, %v11662_v58  ;;  %4843 = vadd.xlane.f32.xlu1 %v4842_v62  ;;  %5263 = vadd.xlane.f32.xlu0 %v5262_v46  ;;  %v14506_v58 = vunpack.c.h.bf16 %v19225_v39 }
 0x75d   : > { %v11671_v54 = vrot.slane %v6154_v2, %v15843_v1  ;;  %v4805_v14 = vpop.xlane.xlu1 %4804 }
 0x75e   : > { %v6157_v17 = vmul.f32 0.0625, %v4805_v14  ;;  %v4802_v47 = vpop.xlane.xlu0 %4801  ;;  %v19291_v14 = vld [vmem:[%s15663_s25 + $0xe20] sm:$0xff]  }
 0x75f   : > { %v11672_v35 = vsel %vm20315_vm9, %v11671_v54, %v11667_v29  ;;  %v6156_v21 = vmul.f32 0.0625, %v4802_v47  ;;  %vm20317_vm9 = vcmask 786112   ;;  %v5214_v29 = vsel %vm2225_vm0, %v14753_v59, 0.0  ;;  %v19319_v59 = vld [vmem:[%s15663_s25 + $0xee0] sm:$0xff]  }
 0x760   : > { %v11686_v10 = vrot.slane %v6157_v17, %v15852_v18  ;;  %v11677_v19 = vsel %vm20316_vm8, %v11676_v20, %v11672_v35  ;;  %4936 = vadd.xlane.f32.xlu1 %v4935_v25  ;;  %4894 = vadd.xlane.f32.xlu0 %v4893_v45  ;;  %v5172_v25 = vsel %vm2225_vm0, %v14725_v44, 0.0  ;;  %v14786_v54 = vunpack.c.h.bf16 %v19228_v16 }
 0x761   : > { %v11681_v27 = vrot.slane %v6156_v21, %v15858_v24  ;;  %v4811_v48 = vpop.xlane.xlu1 %4810  ;;  %v4845_v21 = vsel %vm2225_vm0, %v14506_v58, 0.0  ;;  %vm20318_vm8 = vcmask 1042434   ;;  %v14665_v58 = vunpack.c.l.bf16 %v19319_v59 }
 0x762   : > { %v6159_v53 = vmul.f32 0.0625, %v4811_v48  ;;  %v4808_v26 = vpop.xlane.xlu0 %4807  ;;  %v5265_v8 = vsel %vm2225_vm0, %v14786_v54, 0.0  ;;  %v14754_v54 = vunpack.c.h.bf16 %v19269_v56 }
 0x763   : > { %v11682_v49 = vsel %vm7484_vm10, %v11681_v27, %v11677_v19  ;;  %v6158_v3 = vmul.f32 0.0625, %v4808_v26  ;;  %v14541_v27 = vunpack.c.l.bf16 %v19294_v4 }
 0x764   : > { %v11696_v50 = vrot.slane %v6159_v53, %v15867_v37  ;;  %v11687_v40 = vsel %vm20317_vm9, %v11686_v10, %v11682_v49  ;;  %5029 = vadd.xlane.f32.xlu1 %v5028_v33  ;;  %4987 = vadd.xlane.f32.xlu0 %v4986_v28  ;;  %v14569_v10 = vunpack.c.l.bf16 %v19291_v14  ;;  %v5217_v56 = vsel %vm2225_vm0, %v14754_v54, 0.0 }
 0x765   : > { %v11691_v55 = vrot.slane %v6158_v3, %v15873_v43  ;;  %v4817_v31 = vpop.xlane.xlu1 %4816 }
 0x766   : > { %v6161_v32 = vmul.f32 0.0625, %v4817_v31  ;;  %v4814_v62 = vpop.xlane.xlu0 %4813  ;;  %v4938_v49 = vsel %vm2225_vm0, %v14569_v10, 0.0 }
 0x767   : > { %v11692_v46 = vsel %vm7498_vm12, %v11691_v55, %v11687_v40  ;;  %v6160_v5 = vmul.f32 0.0625, %v4814_v62  ;;  %v4896_v40 = vsel %vm2225_vm0, %v14541_v27, 0.0  ;;  %v19316_v55 = vld [vmem:[%s15663_s25 + $0xf18] sm:$0xff]  }
 0x768   : > { %v11706_v15 = vrot.slane %v6161_v32, %v15882_v57  ;;  %v11697_v52 = vsel %vm7505_vm13, %v11696_v50, %v11692_v46  ;;  %5122 = vadd.xlane.f32.xlu1 %v5121_v6  ;;  %5080 = vadd.xlane.f32.xlu0 %v5079_v51  ;;  %v14602_v6 = vunpack.c.h.bf16 %v19250_v0  ;;  %v14693_v46 = vunpack.c.l.bf16 %v19316_v55 }
 0x769   : > { %v11701_v2 = vrot.slane %v6160_v5, %v15887_v60  ;;  %v4823_v20 = vpop.xlane.xlu1 %4822 }
 0x76a   : > { %v6163_v45 = vmul.f32 0.0625, %v4823_v20  ;;  %v4820_v38 = vpop.xlane.xlu0 %4819 }
 0x76b   : > { %v11702_v17 = vsel %vm7512_vm14, %v11701_v2, %v11697_v52  ;;  %v6162_v47 = vmul.f32 0.0625, %v4820_v38  ;;  %v4989_v52 = vsel %vm2225_vm0, %v14602_v6, 0.0 }
 0x76c   : > { %v11707_v39 = vsel %vm7519_vm15, %v11706_v15, %v11702_v17  ;;  %v11715_v35 = vrot.slane %v6163_v45, %v15796_v12  ;;  %5215 = vadd.xlane.f32.xlu1 %v5214_v29  ;;  %5173 = vadd.xlane.f32.xlu0 %v5172_v25  ;;  %v5124_v25 = vsel %vm2225_vm0, %v14693_v46, 0.0  ;;  %v14542_v46 = vunpack.c.h.bf16 %v19294_v4 }
 0x76d   : > { %v11711_v16 = vrot.slane %v6162_v47, %v15790_v9  ;;  %v4829_v19 = vpop.xlane.xlu1 %4828  ;;  %v19306_v48 = vsel %vm20318_vm8, %v11707_v39, %v19121_v30  ;;  %v14630_v30 = vunpack.c.h.bf16 %v19247_v36  ;;  %v5082_v47 = vsel %vm2225_vm0, %v14665_v58, 0.0 }
 0x76e   : > { %v6165_v33 = vmul.f32 0.0625, %v4829_v19  ;;  %v4826_v28 = vpop.xlane.xlu0 %4825  ;;  %v14726_v39 = vunpack.c.h.bf16 %v19272_v63 }
 0x76f   : > { %v11716_v34 = vsel %vm7421_vm1, %v11715_v35, %v11711_v16  ;;  %v6164_v53 = vmul.f32 0.0625, %v4826_v28  ;;  %v5031_v15 = vsel %vm2225_vm0, %v14630_v30, 0.0  ;;  %v19338_v35 = vld [vmem:[%s15663_s25 + $0xda8] sm:$0xff]   ;;  %v19341_v16 = vld [vmem:[%s15663_s25 + $0xfd8] sm:$0xff]  }
 0x770   : > { %v11725_v26 = vrot.slane %v6165_v33, %v15793_v11  ;;  %4846 = vadd.xlane.f32.xlu1 %v4845_v21  ;;  %5266 = vadd.xlane.f32.xlu0 %v5265_v8  ;;  %v14509_v33 = vunpack.c.l.bf16 %v19338_v35 }
 0x771   : > { %v11720_v3 = vrot.slane %v6164_v53, %v15799_v13  ;;  %v4871_v50 = vpop.xlane.xlu1 %4870  ;;  %v5175_v53 = vsel %vm2225_vm0, %v14726_v39, 0.0 }
 0x772   : > { %v6179_v31 = vmul.f32 0.0625, %v4871_v50  ;;  %v4868_v51 = vpop.xlane.xlu0 %4867 }
 0x773   : > { %v11721_v44 = vsel %vm7428_vm2, %v11720_v3, %v11716_v34  ;;  %v6178_v32 = vmul.f32 0.0625, %v4868_v51 }
 0x774   : > { %v11794_v62 = vrot.slane %v6179_v31, %v15796_v12  ;;  %4939 = vadd.xlane.f32.xlu1 %v4938_v49  ;;  %4897 = vadd.xlane.f32.xlu0 %v4896_v40  ;;  %v19325_v5 = vsel %vm7435_vm3, %v11725_v26, %v11721_v44  ;;  %v14789_v26 = vunpack.c.l.bf16 %v19341_v16  ;;  %v4848_v31 = vsel %vm2225_vm0, %v14509_v33, 0.0 }
 0x775   : > { %v11790_v36 = vrot.slane %v6178_v32, %v15790_v9  ;;  %v4964_v0 = vpop.xlane.xlu1 %4963 }
 0x776   : > { %v4874_v2 = vpop.xlane.xlu0 %4873  ;;  %v6210_v45 = vmul.f32 0.0625, %v4964_v0  ;;  %v5268_v32 = vsel %vm2225_vm0, %v14789_v26, 0.0  ;;  %v19363_v0 = vld [vmem:[%s15663_s25 + $0xe68] sm:$0xff]  }
 0x777   : > { %v11795_v20 = vsel %vm7421_vm1, %v11794_v62, %v11790_v36  ;;  %v6180_v29 = vmul.f32 0.0625, %v4874_v2  ;;  %v14570_v62 = vunpack.c.h.bf16 %v19291_v14  ;;  %v19360_v36 = vld [vmem:[%s15663_s25 + $0xea0] sm:$0xff]   ;;  %v14605_v14 = vunpack.c.l.bf16 %v19363_v0 }
 0x778   : > { %5032 = vadd.xlane.f32.xlu1 %v5031_v15  ;;  %4990 = vadd.xlane.f32.xlu0 %v4989_v52  ;;  %v11948_v28 = vrot.slane %v6210_v45, %v15790_v9 }
 0x779   : > { %v11799_v38 = vrot.slane %v6180_v29, %v15799_v13  ;;  %v4877_v17 = vpop.xlane.xlu1 %4876 }
 0x77a   : > { %v6181_v21 = vmul.f32 0.0625, %v4877_v17  ;;  %v4967_v10 = vpop.xlane.xlu0 %4966  ;;  %v4899_v17 = vsel %vm2225_vm0, %v14542_v46, 0.0 }
 0x77b   : > { %v11800_v19 = vsel %vm7428_vm2, %v11799_v38, %v11795_v20  ;;  %v6211_v8 = vmul.f32 0.0625, %v4967_v10  ;;  %v4941_v38 = vsel %vm2225_vm0, %v14570_v62, 0.0 }
 0x77c   : > { %v11804_v27 = vrot.slane %v6181_v21, %v15793_v11  ;;  %5125 = vadd.xlane.f32.xlu1 %v5124_v25  ;;  %5083 = vadd.xlane.f32.xlu0 %v5082_v47  ;;  %v14633_v25 = vunpack.c.l.bf16 %v19360_v36 }
 0x77d   : > { %v11952_v63 = vrot.slane %v6211_v8, %v15796_v12  ;;  %v4919_v34 = vpop.xlane.xlu1 %4918 }
 0x77e   : > { %v11805_v49 = vsel %vm7435_vm3, %v11804_v27, %v11800_v19  ;;  %v6195_v3 = vmul.f32 0.0625, %v4919_v34  ;;  %v4916_v50 = vpop.xlane.xlu0 %4915  ;;  %v5034_v8 = vsel %vm2225_vm0, %v14633_v25, 0.0  ;;  %v4992_v27 = vsel %vm2225_vm0, %v14605_v14, 0.0 }
 0x77f   : > { %v11953_v40 = vsel %vm7421_vm1, %v11952_v63, %v11948_v28  ;;  %v6194_v30 = vmul.f32 0.0625, %v4916_v50  ;;  %v14694_v63 = vunpack.c.h.bf16 %v19316_v55  ;;  %v14666_v34 = vunpack.c.h.bf16 %v19319_v59 }
 0x780   : > { %v11873_v6 = vrot.slane %v6195_v3, %v15796_v12  ;;  %5218 = vadd.xlane.f32.xlu1 %v5217_v56  ;;  %5176 = vadd.xlane.f32.xlu0 %v5175_v53  ;;  %v19381_v53 = vld [vmem:[%s15663_s25 + $0xf98] sm:$0xff]  }
 0x781   : > { %v11869_v51 = vrot.slane %v6194_v30, %v15790_v9  ;;  %v5060_v44 = vpop.xlane.xlu1 %5059  ;;  %v14757_v55 = vunpack.c.l.bf16 %v19381_v53 }
 0x782   : > { %v15435_v15 = vpop.f32.mrb[0].mxu1  ;;  %v4970_v52 = vpop.xlane.xlu0 %4969  ;;  %v6242_v54 = vmul.f32 0.0625, %v5060_v44  ;;  %v5127_v44 = vsel %vm2225_vm0, %v14694_v63, 0.0 }
 0x783   : > { %v11874_v58 = vsel %vm7421_vm1, %v11873_v6, %v11869_v51  ;;  %v6212_v2 = vmul.f32 0.0625, %v4970_v52  ;;  %v15436_v20 = vpop.f32.mrb[1].mxu1 }
 0x784   : > { %v15437_v29 = vadd.f32 %v15436_v20, %v15435_v15  ;;  %4849 = vadd.xlane.f32.xlu1 %v4848_v31  ;;  %5269 = vadd.xlane.f32.xlu0 %v5268_v32  ;;  %v12106_v56 = vrot.slane %v6242_v54, %v15790_v9 }
 0x785   : > { %v11957_v4 = vrot.slane %v6212_v2, %v15799_v13  ;;  %v4880_v45 = vpop.xlane.xlu1 %4879 }
 0x786   : > { %12656 = vst [vmem:[%s17269_s23 + $0x10] sm:$0xff] %v15437_v29  ;;  %v6182_v47 = vmul.f32 0.0625, %v4880_v45  ;;  %v5063_v39 = vpop.xlane.xlu0 %5062  ;;  %v5220_v29 = vsel %vm2225_vm0, %v14757_v55, 0.0  ;;  %v14790_v45 = vunpack.c.h.bf16 %v19341_v16 }
 0x787   : > { %v11958_v21 = vsel %vm7428_vm2, %v11957_v4, %v11953_v40  ;;  %v6243_v10 = vmul.f32 0.0625, %v5063_v39  ;;  %v19387_v40 = vld [vmem:[%s15663_s25 + $0xf60] sm:$0xff]   ;;  %v14510_v4 = vunpack.c.h.bf16 %v19338_v35 }
 0x788   : > { %v11809_v19 = vrot.slane %v6182_v47, %v15807_v23  ;;  %4942 = vadd.xlane.f32.xlu1 %v4941_v38  ;;  %4900 = vadd.xlane.f32.xlu0 %v4899_v17  ;;  %v14729_v32 = vunpack.c.l.bf16 %v19387_v40  ;;  %v19407_v38 = vld [vmem:[%s15663_s25 + $0xe28] sm:$0xff]   ;;  %v19410_v17 = vld [vmem:[%s15663_s25 + $0xdf0] sm:$0xff]  }
 0x789   : > { %v12110_v33 = vrot.slane %v6243_v10, %v15796_v12  ;;  %v4973_v28 = vpop.xlane.xlu1 %4972  ;;  %v14545_v10 = vunpack.c.l.bf16 %v19410_v17  ;;  %v4851_v16 = vsel %vm2225_vm0, %v14510_v4, 0.0 }
 0x78a   : > { %v19384_v26 = vsel %vm7442_vm4, %v11809_v19, %v11805_v49  ;;  %v6213_v3 = vmul.f32 0.0625, %v4973_v28  ;;  %v4922_v50 = vpop.xlane.xlu0 %4921  ;;  %v5085_v49 = vsel %vm2225_vm0, %v14666_v34, 0.0  ;;  %v5178_v54 = vsel %vm2225_vm0, %v14729_v32, 0.0 }
 0x78b   : > { %v12111_v30 = vsel %vm7421_vm1, %v12110_v33, %v12106_v56  ;;  %v6196_v6 = vmul.f32 0.0625, %v4922_v50  ;;  %v4902_v50 = vsel %vm2225_vm0, %v14545_v10, 0.0 }
 0x78c   : > { %v11962_v31 = vrot.slane %v6213_v3, %v15793_v11  ;;  %5035 = vadd.xlane.f32.xlu1 %v5034_v8  ;;  %4993 = vadd.xlane.f32.xlu0 %v4992_v27  ;;  %v5271_v27 = vsel %vm2225_vm0, %v14790_v45, 0.0 }
 0x78d   : > { %v11878_v59 = vrot.slane %v6196_v6, %v15799_v13  ;;  %v5015_v51 = vpop.xlane.xlu1 %5014 }
 0x78e   : > { %v19397_v62 = vsel %vm7435_vm3, %v11962_v31, %v11958_v21  ;;  %v6227_v46 = vmul.f32 0.0625, %v5015_v51  ;;  %v5012_v15 = vpop.xlane.xlu0 %5011  ;;  %v14573_v21 = vunpack.c.l.bf16 %v19407_v38  ;;  %v14606_v51 = vunpack.c.h.bf16 %v19363_v0 }
 0x78f   : > { %v11879_v52 = vsel %vm7428_vm2, %v11878_v59, %v11874_v58  ;;  %v6226_v2 = vmul.f32 0.0625, %v5012_v15  ;;  %v14634_v59 = vunpack.c.h.bf16 %v19360_v36 }
 0x790   : > { %v12031_v20 = vrot.slane %v6227_v46, %v15796_v12  ;;  %5128 = vadd.xlane.f32.xlu1 %v5127_v44  ;;  %5086 = vadd.xlane.f32.xlu0 %v5085_v49  ;;  %v4944_v3 = vsel %vm2225_vm0, %v14573_v21, 0.0  ;;  %v19434_v46 = vld [vmem:[%s15663_s25 + $0xee8] sm:$0xff]  }
 0x791   : > { %v12027_v25 = vrot.slane %v6226_v2, %v15790_v9  ;;  %v5156_v14 = vpop.xlane.xlu1 %5155 }
 0x792   : > { %v5066_v58 = vpop.xlane.xlu0 %5065  ;;  %v6274_v19 = vmul.f32 0.0625, %v5156_v14  ;;  %v14669_v14 = vunpack.c.l.bf16 %v19434_v46 }
 0x793   : > { %v12032_v47 = vsel %vm7421_vm1, %v12031_v20, %v12027_v25  ;;  %v6244_v39 = vmul.f32 0.0625, %v5066_v58  ;;  %v5037_v25 = vsel %vm2225_vm0, %v14634_v59, 0.0 }
 0x794   : > { %5221 = vadd.xlane.f32.xlu1 %v5220_v29  ;;  %5179 = vadd.xlane.f32.xlu0 %v5178_v54  ;;  %v12264_v6 = vrot.slane %v6274_v19, %v15790_v9 }
 0x795   : > { %v12115_v8 = vrot.slane %v6244_v39, %v15799_v13  ;;  %v4832_v35 = vpop.xlane.xlu1 %4831 }
 0x796   : > { %v6166_v56 = vmul.f32 0.0625, %v4832_v35  ;;  %v5159_v33 = vpop.xlane.xlu0 %5158  ;;  %v5088_v35 = vsel %vm2225_vm0, %v14669_v14, 0.0 }
 0x797   : > { %v12116_v28 = vsel %vm7428_vm2, %v12115_v8, %v12111_v30  ;;  %v6275_v63 = vmul.f32 0.0625, %v5159_v33  ;;  %v19427_v30 = vld [vmem:[%s15663_s25 + $0xf20] sm:$0xff]  }
 0x798   : > { %v11730_v34 = vrot.slane %v6166_v56, %v15807_v23  ;;  %4852 = vadd.xlane.f32.xlu1 %v4851_v16  ;;  %5272 = vadd.xlane.f32.xlu0 %v5271_v27  ;;  %v14697_v36 = vunpack.c.l.bf16 %v19427_v30  ;;  %v14730_v16 = vunpack.c.h.bf16 %v19387_v40  ;;  %v19457_v27 = vld [vmem:[%s15663_s25 + $0xdb0] sm:$0xff]  }
 0x799   : > { %v12268_v31 = vrot.slane %v6275_v63, %v15796_v12  ;;  %v4925_v55 = vpop.xlane.xlu1 %4924 }
 0x79a   : > { %v19431_v44 = vsel %vm7442_vm4, %v11730_v34, %v19325_v5  ;;  %v6197_v49 = vmul.f32 0.0625, %v4925_v55  ;;  %v4883_v32 = vpop.xlane.xlu0 %4882  ;;  %v4995_v5 = vsel %vm2225_vm0, %v14606_v51, 0.0  ;;  %v5130_v10 = vsel %vm2225_vm0, %v14697_v36, 0.0 }
 0x79b   : > { %v12269_v15 = vsel %vm7421_vm1, %v12268_v31, %v12264_v6  ;;  %v6183_v2 = vmul.f32 0.0625, %v4883_v32 }
 0x79c   : > { %v11883_v20 = vrot.slane %v6197_v49, %v15793_v11  ;;  %4945 = vadd.xlane.f32.xlu1 %v4944_v3  ;;  %4903 = vadd.xlane.f32.xlu0 %v4902_v50  ;;  %v14513_v3 = vunpack.c.l.bf16 %v19457_v27 }
 0x79d   : > { %v11814_v0 = vrot.slane %v6183_v2, %v15804_v22  ;;  %v5018_v29 = vpop.xlane.xlu1 %5017 }
 0x79e   : > { %v19444_v54 = vsel %vm7435_vm3, %v11883_v20, %v11879_v52  ;;  %v6228_v4 = vmul.f32 0.0625, %v5018_v29  ;;  %v4976_v45 = vpop.xlane.xlu0 %4975  ;;  %v14758_v52 = vunpack.c.h.bf16 %v19381_v53  ;;  %v4854_v32 = vsel %vm2225_vm0, %v14513_v3, 0.0 }
 0x79f   : > { %v19448_v58 = vsel %vm7449_vm5, %v11814_v0, %v19384_v26  ;;  %v6214_v39 = vmul.f32 0.0625, %v4976_v45  ;;  %v19460_v26 = vld [vmem:[%s15663_s25 + $0xfe0] sm:$0xff]   ;;  %v14574_v29 = vunpack.c.h.bf16 %v19407_v38  ;;  %v19491_v45 = vld [vmem:[%s15663_s25 + $0xe70] sm:$0xff]  }
 0x7a0   : > { %v12036_v21 = vrot.slane %v6228_v4, %v15799_v13  ;;  %5038 = vadd.xlane.f32.xlu1 %v5037_v25  ;;  %4996 = vadd.xlane.f32.xlu0 %v4995_v5  ;;  %v14793_v53 = vunpack.c.l.bf16 %v19460_v26  ;;  %v5223_v31 = vsel %vm2225_vm0, %v14758_v52, 0.0  ;;  %v19485_v25 = vld [vmem:[%s15663_s25 + $0xea8] sm:$0xff]  }
 0x7a1   : > { %v11967_v19 = vrot.slane %v6214_v39, %v15807_v23  ;;  %v5108_v8 = vpop.xlane.xlu1 %5107  ;;  %v14637_v38 = vunpack.c.l.bf16 %v19485_v25 }
 0x7a2   : > { %v19463_v56 = vsel %vm7428_vm2, %v12036_v21, %v12032_v47  ;;  %v5069_v33 = vpop.xlane.xlu0 %5068  ;;  %v6258_v40 = vmul.f32 0.0625, %v5108_v8  ;;  %v5181_v47 = vsel %vm2225_vm0, %v14730_v16, 0.0  ;;  %v5274_v2 = vsel %vm2225_vm0, %v14793_v53, 0.0 }
 0x7a3   : > { %v19467_v63 = vsel %vm7442_vm4, %v11967_v19, %v19397_v62  ;;  %v6245_v34 = vmul.f32 0.0625, %v5069_v33  ;;  %v5040_v53 = vsel %vm2225_vm0, %v14637_v38, 0.0 }
 0x7a4   : > { %5131 = vadd.xlane.f32.xlu1 %v5130_v10  ;;  %5089 = vadd.xlane.f32.xlu0 %v5088_v35  ;;  %v12185_v20 = vrot.slane %v6258_v40, %v15790_v9  ;;  %v14609_v35 = vunpack.c.l.bf16 %v19491_v45 }
 0x7a5   : > { %v12120_v50 = vrot.slane %v6245_v34, %v15793_v11  ;;  %v5162_v6 = vpop.xlane.xlu1 %5161 }
 0x7a6   : > { %v6276_v55 = vmul.f32 0.0625, %v5162_v6  ;;  %v5111_v59 = vpop.xlane.xlu0 %5110  ;;  %v4998_v6 = vsel %vm2225_vm0, %v14609_v35, 0.0  ;;  %v14794_v35 = vunpack.c.h.bf16 %v19460_v26 }
 0x7a7   : > { %v19475_v62 = vsel %vm7435_vm3, %v12120_v50, %v12116_v28  ;;  %v6259_v51 = vmul.f32 0.0625, %v5111_v59  ;;  %v14546_v28 = vunpack.c.h.bf16 %v19410_v17 }
 0x7a8   : > { %v12273_v49 = vrot.slane %v6276_v55, %v15799_v13  ;;  %5224 = vadd.xlane.f32.xlu1 %v5223_v31  ;;  %5182 = vadd.xlane.f32.xlu0 %v5181_v47  ;;  %v14698_v31 = vunpack.c.h.bf16 %v19427_v30  ;;  %v14670_v47 = vunpack.c.h.bf16 %v19434_v46  ;;  %v19512_v55 = vld [vmem:[%s15663_s25 + $0xfa0] sm:$0xff]  }
 0x7a9   : > { %v12189_v36 = vrot.slane %v6259_v51, %v15796_v12  ;;  %v5255_v0 = vpop.xlane.xlu1 %5254  ;;  %v4905_v8 = vsel %vm2225_vm0, %v14546_v28, 0.0  ;;  %v14761_v30 = vunpack.c.l.bf16 %v19512_v55 }
 0x7aa   : > { %v19488_v5 = vsel %vm7428_vm2, %v12273_v49, %v12269_v15  ;;  %v6307_v14 = vmul.f32 0.0625, %v5255_v0  ;;  %v5252_v4 = vpop.xlane.xlu0 %5251  ;;  %v4947_v15 = vsel %vm2225_vm0, %v14574_v29, 0.0  ;;  %v5091_v29 = vsel %vm2225_vm0, %v14670_v47, 0.0 }
 0x7ab   : > { %v19494_v39 = vsel %vm7421_vm1, %v12189_v36, %v12185_v20  ;;  %v6306_v21 = vmul.f32 0.0625, %v5252_v4 }
 0x7ac   : > { %v12426_v10 = vrot.slane %v6307_v14, %v15796_v12  ;;  %4855 = vadd.xlane.f32.xlu1 %v4854_v32  ;;  %5275 = vadd.xlane.f32.xlu0 %v5274_v2  ;;  %v19519_v32 = vld [vmem:[%s15663_s25 + $0xf68] sm:$0xff]  }
 0x7ad   : > { %v12422_v17 = vrot.slane %v6306_v21, %v15790_v9  ;;  %v4886_v19 = vpop.xlane.xlu1 %4885  ;;  %v14733_v28 = vunpack.c.l.bf16 %v19519_v32 }
 0x7ae   : > { %v6184_v52 = vmul.f32 0.0625, %v4886_v19  ;;  %v4835_v16 = vpop.xlane.xlu0 %4834 }
 0x7af   : > { %v19503_v33 = vsel %vm7421_vm1, %v12426_v10, %v12422_v17  ;;  %v6167_v34 = vmul.f32 0.0625, %v4835_v16  ;;  %v5226_v17 = vsel %vm2225_vm0, %v14761_v30, 0.0 }
 0x7b0   : > { %v11819_v3 = vrot.slane %v6184_v52, %v15824_v42  ;;  %4948 = vadd.xlane.f32.xlu1 %v4947_v15  ;;  %4906 = vadd.xlane.f32.xlu0 %v4905_v8  ;;  %v14514_v8 = vunpack.c.h.bf16 %v19457_v27  ;;  %v19546_v52 = vld [vmem:[%s15663_s25 + $0xe30] sm:$0xff]  }
 0x7b1   : > { %v11735_v40 = vrot.slane %v6167_v34, %v15804_v22  ;;  %v4979_v50 = vpop.xlane.xlu1 %4978  ;;  %v14577_v27 = vunpack.c.l.bf16 %v19546_v52 }
 0x7b2   : > { %v19516_v59 = vsel %vm7456_vm6, %v11819_v3, %v19448_v58  ;;  %v6215_v51 = vmul.f32 0.0625, %v4979_v50  ;;  %v4928_v49 = vpop.xlane.xlu0 %4927  ;;  %v5133_v58 = vsel %vm2225_vm0, %v14698_v31, 0.0  ;;  %v19553_v3 = vld [vmem:[%s15663_s25 + $0xdf8] sm:$0xff]   ;;  %v5277_v31 = vsel %vm2225_vm0, %v14794_v35, 0.0 }
 0x7b3   : > { %v19523_v2 = vsel %vm7449_vm5, %v11735_v40, %v19431_v44  ;;  %v6198_v20 = vmul.f32 0.0625, %v4928_v49  ;;  %v14549_v47 = vunpack.c.l.bf16 %v19553_v3 }
 0x7b4   : > { %v11972_v36 = vrot.slane %v6215_v51, %v15804_v22  ;;  %5041 = vadd.xlane.f32.xlu1 %v5040_v53  ;;  %4999 = vadd.xlane.f32.xlu0 %v4998_v6 }
 0x7b5   : > { %v11888_v46 = vrot.slane %v6198_v20, %v15807_v23  ;;  %v5072_v0 = vpop.xlane.xlu1 %5071 }
 0x7b6   : > { %v19533_v44 = vsel %vm7449_vm5, %v11972_v36, %v19467_v63  ;;  %v6246_v14 = vmul.f32 0.0625, %v5072_v0  ;;  %v5021_v4 = vpop.xlane.xlu0 %5020  ;;  %v5184_v63 = vsel %vm2225_vm0, %v14733_v28, 0.0  ;;  %v14610_v28 = vunpack.c.h.bf16 %v19491_v45 }
 0x7b7   : > { %v19537_v21 = vsel %vm7442_vm4, %v11888_v46, %v19444_v54  ;;  %v6229_v10 = vmul.f32 0.0625, %v5021_v4  ;;  %v4950_v46 = vsel %vm2225_vm0, %v14577_v27, 0.0 }
 0x7b8   : > { %v12125_v38 = vrot.slane %v6246_v14, %v15807_v23  ;;  %5134 = vadd.xlane.f32.xlu1 %v5133_v58  ;;  %5092 = vadd.xlane.f32.xlu0 %v5091_v29  ;;  %v14638_v29 = vunpack.c.h.bf16 %v19485_v25  ;;  %v19580_v14 = vld [vmem:[%s15663_s25 + $0xf28] sm:$0xff]  }
 0x7b9   : > { %v12041_v19 = vrot.slane %v6229_v10, %v15793_v11  ;;  %v5165_v15 = vpop.xlane.xlu1 %5164  ;;  %v19583_v10 = vld [vmem:[%s15663_s25 + $0xef0] sm:$0xff]  }
 0x7ba   : > { %v19550_v54 = vsel %vm7442_vm4, %v12125_v38, %v19475_v62  ;;  %v6277_v16 = vmul.f32 0.0625, %v5165_v15  ;;  %v5114_v34 = vpop.xlane.xlu0 %5113  ;;  %v4857_v62 = vsel %vm2225_vm0, %v14514_v8, 0.0  ;;  %v5043_v45 = vsel %vm2225_vm0, %v14638_v29, 0.0 }
 0x7bb   : > { %v19557_v53 = vsel %vm7435_vm3, %v12041_v19, %v19463_v56  ;;  %v6260_v40 = vmul.f32 0.0625, %v5114_v34  ;;  %v5001_v15 = vsel %vm2225_vm0, %v14610_v28, 0.0 }
 0x7bc   : > { %v12278_v50 = vrot.slane %v6277_v16, %v15793_v11  ;;  %5227 = vadd.xlane.f32.xlu1 %v5226_v17  ;;  %5185 = vadd.xlane.f32.xlu0 %v5184_v63  ;;  %v14673_v63 = vunpack.c.l.bf16 %v19583_v10 }
 0x7bd   : > { %v12194_v26 = vrot.slane %v6260_v40, %v15799_v13  ;;  %v5207_v6 = vpop.xlane.xlu1 %5206 }
 0x7be   : > { %v19567_v56 = vsel %vm7435_vm3, %v12278_v50, %v19488_v5  ;;  %v6291_v51 = vmul.f32 0.0625, %v5207_v6  ;;  %v5204_v49 = vpop.xlane.xlu0 %5203  ;;  %v4908_v5 = vsel %vm2225_vm0, %v14549_v47, 0.0  ;;  %v19609_v47 = vld [vmem:[%s15663_s25 + $0xdb8] sm:$0xff]  }
 0x7bf   : > { %v19571_v20 = vsel %vm7428_vm2, %v12194_v26, %v19494_v39  ;;  %v6290_v36 = vmul.f32 0.0625, %v5204_v49 }
 0x7c0   : > { %v12347_v30 = vrot.slane %v6291_v51, %v15796_v12  ;;  %4858 = vadd.xlane.f32.xlu1 %v4857_v62  ;;  %5278 = vadd.xlane.f32.xlu0 %v5277_v31  ;;  %v14762_v62 = vunpack.c.h.bf16 %v19512_v55  ;;  %v14734_v31 = vunpack.c.h.bf16 %v19519_v32  ;;  %v14517_v55 = vunpack.c.l.bf16 %v19609_v47 }
 0x7c1   : > { %v12343_v0 = vrot.slane %v6290_v36, %v15790_v9  ;;  %v4838_v58 = vpop.xlane.xlu1 %4837  ;;  %v14701_v9 = vunpack.c.l.bf16 %v19580_v14  ;;  %v19616_v36 = vld [vmem:[%s15663_s25 + $0xfe8] sm:$0xff]  }
 0x7c2   : > { %v6168_v39 = vmul.f32 0.0625, %v4838_v58  ;;  %v5258_v4 = vpop.xlane.xlu0 %5257  ;;  %v14797_v29 = vunpack.c.l.bf16 %v19616_v36 }
 0x7c3   : > { %v19586_v12 = vsel %vm7421_vm1, %v12347_v30, %v12343_v0  ;;  %v6308_v38 = vmul.f32 0.0625, %v5258_v4  ;;  %v5136_v27 = vsel %vm2225_vm0, %v14701_v9, 0.0  ;;  %v4860_v9 = vsel %vm2225_vm0, %v14517_v55, 0.0 }
 0x7c4   : > { %v11740_v17 = vrot.slane %v6168_v39, %v15824_v42  ;;  %4951 = vadd.xlane.f32.xlu1 %v4950_v46  ;;  %4909 = vadd.xlane.f32.xlu0 %v4908_v5  ;;  %v5187_v5 = vsel %vm2225_vm0, %v14734_v31, 0.0  ;;  %vm20319_vm1 = vcmask 589312  }
 0x7c5   : > { %v12431_v25 = vrot.slane %v6308_v38, %v15799_v13  ;;  %v4931_v19 = vpop.xlane.xlu1 %4930  ;;  %vm20322_vm9 = vmmov %vm20319_vm1 }
 0x7c6   : > { %v19596_v8 = vsel %vm7456_vm6, %v11740_v17, %v19523_v2  ;;  %v6199_v35 = vmul.f32 0.0625, %v4931_v19  ;;  %v4889_v16 = vpop.xlane.xlu0 %4888  ;;  %v5094_v2 = vsel %vm2225_vm0, %v14673_v63, 0.0  ;;  %v19643_v63 = vld [vmem:[%s15663_s25 + $0xeb0] sm:$0xff]   ;;  %vm20324_vm8 = vmmov %vm20319_vm1 }
 0x7c7   : > { %v19600_v34 = vsel %vm7428_vm2, %v12431_v25, %v19503_v33  ;;  %v6185_v40 = vmul.f32 0.0625, %v4889_v16 }
 0x7c8   : > { %v11893_v50 = vrot.slane %v6199_v35, %v15804_v22  ;;  %5044 = vadd.xlane.f32.xlu1 %v5043_v45  ;;  %5002 = vadd.xlane.f32.xlu0 %v5001_v15  ;;  %v14578_v45 = vunpack.c.h.bf16 %v19546_v52  ;;  %v14550_v15 = vunpack.c.h.bf16 %v19553_v3  ;;  %v14641_v52 = vunpack.c.l.bf16 %v19643_v63 }
 0x7c9   : > { %v11824_v26 = vrot.slane %v6185_v40, %v15821_v41  ;;  %v5024_v6 = vpop.xlane.xlu1 %5023  ;;  %v19650_v40 = vld [vmem:[%s15663_s25 + $0xe78] sm:$0xff]  }
 0x7ca   : > { %v19613_v33 = vsel %vm7449_vm5, %v11893_v50, %v19537_v21  ;;  %v6230_v51 = vmul.f32 0.0625, %v5024_v6  ;;  %v4982_v49 = vpop.xlane.xlu0 %4981  ;;  %v5229_v21 = vsel %vm2225_vm0, %v14762_v62, 0.0  ;;  %v14613_v62 = vunpack.c.l.bf16 %v19650_v40 }
 0x7cb   : > { %v19620_v30 = vsel %vm7463_vm7, %v11824_v26, %v19516_v59  ;;  %v6216_v46 = vmul.f32 0.0625, %v4982_v49 }
 0x7cc   : > { %v12046_v0 = vrot.slane %v6230_v51, %v15807_v23  ;;  %5137 = vadd.xlane.f32.xlu1 %v5136_v27  ;;  %5095 = vadd.xlane.f32.xlu0 %v5094_v2  ;;  %v4911_v2 = vsel %vm2225_vm0, %v14550_v15, 0.0 }
 0x7cd   : > { %v11977_v32 = vrot.slane %v6216_v46, %v15824_v42  ;;  %v5117_v58 = vpop.xlane.xlu1 %5116 }
 0x7ce   : > { %v19630_v59 = vsel %vm7442_vm4, %v12046_v0, %v19557_v53  ;;  %v6261_v28 = vmul.f32 0.0625, %v5117_v58  ;;  %v5075_v39 = vpop.xlane.xlu0 %5074  ;;  %v5280_v53 = vsel %vm2225_vm0, %v14797_v29, 0.0  ;;  %v5046_v0 = vsel %vm2225_vm0, %v14641_v52, 0.0 }
 0x7cf   : > { %v19634_v4 = vsel %vm7456_vm6, %v11977_v32, %v19533_v44  ;;  %v6247_v38 = vmul.f32 0.0625, %v5075_v39  ;;  %v14702_v58 = vunpack.c.h.bf16 %v19580_v14  ;;  %v19684_v39 = vld [vmem:[%s15663_s25 + $0xf70] sm:$0xff]  }
 0x7d0   : > { %v12199_v17 = vrot.slane %v6261_v28, %v15793_v11  ;;  %5230 = vadd.xlane.f32.xlu1 %v5229_v21  ;;  %5188 = vadd.xlane.f32.xlu0 %v5187_v5  ;;  %v14674_v21 = vunpack.c.h.bf16 %v19583_v10  ;;  %v19677_v5 = vld [vmem:[%s15663_s25 + $0xfa8] sm:$0xff]  }
 0x7d1   : > { %v12130_v25 = vrot.slane %v6247_v38, %v15804_v22  ;;  %v5210_v19 = vpop.xlane.xlu1 %5209  ;;  %v14765_v14 = vunpack.c.l.bf16 %v19677_v5 }
 0x7d2   : > { %v19647_v44 = vsel %vm7435_vm3, %v12199_v17, %v19571_v20  ;;  %v6292_v35 = vmul.f32 0.0625, %v5210_v19  ;;  %v5168_v16 = vpop.xlane.xlu0 %5167  ;;  %v4953_v20 = vsel %vm2225_vm0, %v14578_v45, 0.0  ;;  %v5097_v19 = vsel %vm2225_vm0, %v14674_v21, 0.0  ;;  %v19732_v21 = vld [vmem:[%s15663_s25 + $0xef8] sm:$0xff]  }
 0x7d3   : > { %v19654_v50 = vsel %vm7449_vm5, %v12130_v25, %v19550_v54  ;;  %v6278_v27 = vmul.f32 0.0625, %v5168_v16 }
 0x7d4   : > { %v12352_v26 = vrot.slane %v6292_v35, %v15799_v13  ;;  %4861 = vadd.xlane.f32.xlu1 %v4860_v9  ;;  %5281 = vadd.xlane.f32.xlu0 %v5280_v53  ;;  %v14737_v53 = vunpack.c.l.bf16 %v19684_v39 }
 0x7d5   : > { %v12283_v3 = vrot.slane %v6278_v27, %v15807_v23  ;;  %v4841_v6 = vpop.xlane.xlu1 %4840 }
 0x7d6   : > { %v19664_v54 = vsel %vm7428_vm2, %v12352_v26, %v19586_v12  ;;  %v6169_v31 = vmul.f32 0.0625, %v4841_v6  ;;  %v5261_v13 = vpop.xlane.xlu0 %5260  ;;  %v5004_v12 = vsel %vm2225_vm0, %v14613_v62, 0.0  ;;  %v5232_v26 = vsel %vm2225_vm0, %v14765_v14, 0.0  ;;  %vm20320_vm2 = vmmov %vm20319_vm1 }
 0x7d7   : > { %v19668_v51 = vsel %vm7442_vm4, %v12283_v3, %v19567_v56  ;;  %v6309_v49 = vmul.f32 0.0625, %v5261_v13  ;;  %v14518_v6 = vunpack.c.h.bf16 %v19609_v47  ;;  %v14614_v47 = vunpack.c.h.bf16 %v19650_v40 }
 0x7d8   : > { %v11745_v46 = vrot.slane %v6169_v31, %v15821_v41  ;;  %4954 = vadd.xlane.f32.xlu1 %v4953_v20  ;;  %4912 = vadd.xlane.f32.xlu0 %v4911_v2  ;;  %v14798_v20 = vunpack.c.h.bf16 %v19616_v36  ;;  %v19715_v31 = vld [vmem:[%s15663_s25 + $0xe38] sm:$0xff]  }
 0x7d9   : > { %v12436_v55 = vrot.slane %v6309_v49, %v15793_v11  ;;  %v4934_v32 = vpop.xlane.xlu1 %4933 }
 0x7da   : > { %v19681_v56 = vsel %vm7463_vm7, %v11745_v46, %v19596_v8  ;;  %v6200_v29 = vmul.f32 0.0625, %v4934_v32  ;;  %v4892_v28 = vpop.xlane.xlu0 %4891  ;;  %v5139_v8 = vsel %vm2225_vm0, %v14702_v58, 0.0  ;;  %v14581_v32 = vunpack.c.l.bf16 %v19715_v31 }
 0x7db   : > { %v19688_v38 = vsel %vm7435_vm3, %v12436_v55, %v19600_v34  ;;  %v6186_v17 = vmul.f32 0.0625, %v4892_v28  ;;  %v5283_v55 = vsel %vm2225_vm0, %v14798_v20, 0.0 }
 0x7dc   : > { %v11898_v9 = vrot.slane %v6200_v29, %v15824_v42  ;;  %5047 = vadd.xlane.f32.xlu1 %v5046_v0  ;;  %5005 = vadd.xlane.f32.xlu0 %v5004_v12  ;;  %v4863_v0 = vsel %vm2225_vm0, %v14518_v6, 0.0  ;;  %v4956_v14 = vsel %vm2225_vm0, %v14581_v32, 0.0  ;;  %v19766_v6 = vld [vmem:[%s15663_s25 + $0xff0] sm:$0xff]  }
 0x7dd   : > { %v11829_v10 = vrot.slane %v6186_v17, %v15843_v1  ;;  %v5027_v25 = vpop.xlane.xlu1 %5026  ;;  %v5007_v17 = vsel %vm2225_vm0, %v14614_v47, 0.0  ;;  %v14801_v47 = vunpack.c.l.bf16 %v19766_v6 }
 0x7de   : > { %v19698_v34 = vsel %vm7456_vm6, %v11898_v9, %v19613_v33  ;;  %v6231_v45 = vmul.f32 0.0625, %v5027_v25  ;;  %v4985_v15 = vpop.xlane.xlu0 %4984  ;;  %v5190_v33 = vsel %vm2225_vm0, %v14737_v53, 0.0  ;;  %v14642_v25 = vunpack.c.h.bf16 %v19643_v63 }
 0x7df   : > { %v19702_v35 = vsel %vm20319_vm1, %v11829_v10, %v19620_v30  ;;  %v6217_v16 = vmul.f32 0.0625, %v4985_v15  ;;  %v14677_v10 = vunpack.c.l.bf16 %v19732_v21  ;;  %v14738_v63 = vunpack.c.h.bf16 %v19684_v39 }
 0x7e0   : > { %v12051_v27 = vrot.slane %v6231_v45, %v15804_v22  ;;  %5140 = vadd.xlane.f32.xlu1 %v5139_v8  ;;  %5098 = vadd.xlane.f32.xlu0 %v5097_v19 }
 0x7e1   : > { %v11982_v52 = vrot.slane %v6217_v16, %v15821_v41  ;;  %v5120_v3 = vpop.xlane.xlu1 %5119 }
 0x7e2   : > { %v19712_v30 = vsel %vm7449_vm5, %v12051_v27, %v19630_v59  ;;  %v6262_v2 = vmul.f32 0.0625, %v5120_v3  ;;  %v5078_v62 = vpop.xlane.xlu0 %5077  ;;  %v5100_v27 = vsel %vm2225_vm0, %v14677_v10, 0.0 }
 0x7e3   : > { %v19719_v13 = vsel %vm7463_vm7, %v11982_v52, %v19634_v4  ;;  %v6248_v49 = vmul.f32 0.0625, %v5078_v62  ;;  %v5193_v62 = vsel %vm2225_vm0, %v14738_v63, 0.0  ;;  %v14678_v63 = vunpack.c.h.bf16 %v19732_v21 }
 0x7e4   : > { %v12204_v46 = vrot.slane %v6262_v2, %v15807_v23  ;;  %5233 = vadd.xlane.f32.xlu1 %v5232_v26  ;;  %5191 = vadd.xlane.f32.xlu0 %v5190_v33  ;;  %v5049_v26 = vsel %vm2225_vm0, %v14642_v25, 0.0 }
 0x7e5   : > { %v12135_v36 = vrot.slane %v6248_v49, %v15824_v42  ;;  %v5213_v59 = vpop.xlane.xlu1 %5212 }
 0x7e6   : > { %v19729_v4 = vsel %vm7442_vm4, %v12204_v46, %v19647_v44  ;;  %v6293_v12 = vmul.f32 0.0625, %v5213_v59  ;;  %v5171_v58 = vpop.xlane.xlu0 %5170  ;;  %v19779_v59 = vld [vmem:[%s15663_s25 + $0xeb8] sm:$0xff]  }
 0x7e7   : > { %v19736_v40 = vsel %vm7456_vm6, %v12135_v36, %v19654_v50  ;;  %v6279_v29 = vmul.f32 0.0625, %v5171_v58  ;;  %v14766_v36 = vunpack.c.h.bf16 %v19677_v5 }
 0x7e8   : > { %v12357_v28 = vrot.slane %v6293_v12, %v15793_v11  ;;  %4864 = vadd.xlane.f32.xlu1 %v4863_v0  ;;  %5284 = vadd.xlane.f32.xlu0 %v5283_v55  ;;  %v19749_v11 = vld [vmem:[%s15663_s25 + $0xf30] sm:$0xff]  }
 0x7e9   : > { %v12288_v9 = vrot.slane %v6279_v29, %v15804_v22  ;;  %v4844_v44 = vpop.xlane.xlu1 %4843  ;;  %v14705_v52 = vunpack.c.l.bf16 %v19749_v11  ;;  %v14645_v29 = vunpack.c.l.bf16 %v19779_v59 }
 0x7ea   : > { %v19746_v50 = vsel %vm7435_vm3, %v12357_v28, %v19664_v54  ;;  %v6170_v8 = vmul.f32 0.0625, %v4844_v44  ;;  %v5264_v19 = vpop.xlane.xlu0 %5263  ;;  %vm20321_vm3 = vcmask 654912  }
 0x7eb   : > { %v19753_v53 = vsel %vm7449_vm5, %v12288_v9, %v19668_v51  ;;  %v6310_v45 = vmul.f32 0.0625, %v5264_v19  ;;  %v14582_v9 = vunpack.c.h.bf16 %v19715_v31  ;;  %v5052_v19 = vsel %vm2225_vm0, %v14645_v29, 0.0  ;;  %vm20325_vm1 = vmmov %vm20321_vm3 }
 0x7ec   : > { %v11750_v15 = vrot.slane %v6170_v8, %v15843_v1  ;;  %5008 = vadd.xlane.f32.xlu1 %v5007_v17  ;;  %4957 = vadd.xlane.f32.xlu0 %v4956_v14  ;;  %v5286_v17 = vsel %vm2225_vm0, %v14801_v47, 0.0 }
 0x7ed   : > { %v12441_v16 = vrot.slane %v6310_v45, %v15807_v23  ;;  %v4937_v54 = vpop.xlane.xlu1 %4936 }
 0x7ee   : > { %v19763_v51 = vsel %vm20320_vm2, %v11750_v15, %v19681_v56  ;;  %v6201_v3 = vmul.f32 0.0625, %v4937_v54  ;;  %v4895_v33 = vpop.xlane.xlu0 %4894  ;;  %v5142_v56 = vsel %vm2225_vm0, %v14705_v52, 0.0  ;;  %v14706_v15 = vunpack.c.h.bf16 %v19749_v11 }
 0x7ef   : > { %v19770_v39 = vsel %vm7442_vm4, %v12441_v16, %v19688_v38  ;;  %v6187_v20 = vmul.f32 0.0625, %v4895_v33  ;;  %v19810_v16 = vld [vmem:[%s15663_s25 + $0xfb0] sm:$0xff]  }
 0x7f0   : > { %v11903_v2 = vrot.slane %v6201_v3, %v15821_v41  ;;  %5101 = vadd.xlane.f32.xlu1 %v5100_v27  ;;  %5050 = vadd.xlane.f32.xlu0 %v5049_v26  ;;  %v15365_v26 = vld [vmem:[%s15663_s25 + $0xf78] sm:$0xff]   ;;  %v14769_v21 = vunpack.c.l.bf16 %v19810_v16 }
 0x7f1   : > { %v11834_v49 = vrot.slane %v6187_v20, %v15837_v61  ;;  %v5030_v46 = vpop.xlane.xlu1 %5029 }
 0x7f2   : > { %v19783_v38 = vsel %vm7463_vm7, %v11903_v2, %v19698_v34  ;;  %v6232_v0 = vmul.f32 0.0625, %v5030_v46  ;;  %v4988_v55 = vpop.xlane.xlu0 %4987  ;;  %v5235_v34 = vsel %vm2225_vm0, %v14766_v36, 0.0  ;;  %v5103_v2 = vsel %vm2225_vm0, %v14678_v63, 0.0 }
 0x7f3   : > { %v19787_v32 = vsel %vm20321_vm3, %v11834_v49, %v19702_v35  ;;  %v6218_v12 = vmul.f32 0.0625, %v4988_v55  ;;  %v5238_v36 = vsel %vm2225_vm0, %v14769_v21, 0.0 }
 0x7f4   : > { %v12056_v58 = vrot.slane %v6232_v0, %v15824_v42  ;;  %5194 = vadd.xlane.f32.xlu1 %v5193_v62  ;;  %5143 = vadd.xlane.f32.xlu0 %v5142_v56  ;;  %v14741_v62 = vunpack.c.l.bf16 %v15365_v26 }
 0x7f5   : > { %v11987_v5 = vrot.slane %v6218_v12, %v15843_v1  ;;  %v5123_v28 = vpop.xlane.xlu1 %5122  ;;  %v14646_v12 = vunpack.c.h.bf16 %v19779_v59  ;;  %v14742_v59 = vunpack.c.h.bf16 %v15365_v26 }
 0x7f6   : > { %v19797_v35 = vsel %vm7456_vm6, %v12056_v58, %v19712_v30  ;;  %v6263_v44 = vmul.f32 0.0625, %v5123_v28  ;;  %v5081_v14 = vpop.xlane.xlu0 %5080  ;;  %v4959_v30 = vsel %vm2225_vm0, %v14582_v9, 0.0  ;;  %v14802_v58 = vunpack.c.h.bf16 %v19766_v6  ;;  %v15357_v28 = vld [vmem:[%s15663_s25 + $0xf38] sm:$0xff]  }
 0x7f7   : > { %v19801_v10 = vsel %vm20322_vm9, %v11987_v5, %v19719_v13  ;;  %v6249_v25 = vmul.f32 0.0625, %v5081_v14  ;;  %v5199_v63 = vsel %vm2225_vm0, %v14742_v59, 0.0  ;;  %vm20329_vm9 = vmmov %vm20325_vm1 }
 0x7f8   : > { %v12209_v8 = vrot.slane %v6263_v44, %v15804_v22  ;;  %5287 = vadd.xlane.f32.xlu1 %v5286_v17  ;;  %5236 = vadd.xlane.f32.xlu0 %v5235_v34  ;;  %v5289_v14 = vsel %vm2225_vm0, %v14802_v58, 0.0 }
 0x7f9   : > { %v12140_v31 = vrot.slane %v6249_v25, %v15821_v41  ;;  %v5216_v45 = vpop.xlane.xlu1 %5215  ;;  %v14709_v25 = vunpack.c.l.bf16 %v15357_v28 }
 0x7fa   : > { %v19814_v13 = vsel %vm7449_vm5, %v12209_v8, %v19729_v4  ;;  %v6294_v54 = vmul.f32 0.0625, %v5216_v45  ;;  %v5174_v27 = vpop.xlane.xlu0 %5173  ;;  %v5145_v4 = vsel %vm2225_vm0, %v14706_v15, 0.0 }
 0x7fb   : > { %v19819_v52 = vsel %vm7463_vm7, %v12140_v31, %v19736_v40  ;;  %v6280_v3 = vmul.f32 0.0625, %v5174_v27  ;;  %v15381_v31 = vld [vmem:[%s15663_s25 + $0xff8] sm:$0xff]  }
 0x7fc   : > { %v12362_v33 = vrot.slane %v6294_v54, %v15807_v23  ;;  %5053 = vadd.xlane.f32.xlu1 %v5052_v19  ;;  %4960 = vadd.xlane.f32.xlu0 %v4959_v30  ;;  %v14805_v26 = vunpack.c.l.bf16 %v15381_v31 }
 0x7fd   : > { %v12293_v11 = vrot.slane %v6280_v3, %v15824_v42  ;;  %v4847_v20 = vpop.xlane.xlu1 %4846  ;;  %v14770_v3 = vunpack.c.h.bf16 %v19810_v16 }
 0x7fe   : > { %v19828_v49 = vsel %vm7442_vm4, %v12362_v33, %v19746_v50  ;;  %v6171_v40 = vmul.f32 0.0625, %v4847_v20  ;;  %v5267_v46 = vpop.xlane.xlu0 %5266  ;;  %v5196_v50 = vsel %vm2225_vm0, %v14741_v62, 0.0  ;;  %vm20323_vm4 = vmmov %vm20321_vm3  ;;  %v15373_v33 = vld [vmem:[%s15663_s25 + $0xfb8] sm:$0xff]   ;;  %v5292_v16 = vsel %vm2225_vm0, %v14805_v26, 0.0  ;;  %s20097_s25 = scalar_lea.sflag [#allocation3], %s152_s21 }
 0x7ff   : > { %v19832_v23 = vsel %vm7456_vm6, %v12293_v11, %v19753_v53  ;;  %v6311_v56 = vmul.f32 0.0625, %v5267_v46  ;;  %v14773_v62 = vunpack.c.l.bf16 %v15373_v33  ;;  %vm20328_vm3 = vmmov %vm20320_vm2 }
 0x800   : > { %v11755_v47 = vrot.slane %v6171_v40, %v15837_v61  ;;  %5146 = vadd.xlane.f32.xlu1 %v5145_v4  ;;  %5104 = vadd.xlane.f32.xlu0 %v5103_v2 }
 0x801   : > { %v12446_v0 = vrot.slane %v6311_v56, %v15804_v22  ;;  %v4940_v55 = vpop.xlane.xlu1 %4939  ;;  %v5241_v56 = vsel %vm2225_vm0, %v14770_v3, 0.0 }
 0x802   : > { %v19842_v53 = vsel %vm20323_vm4, %v11755_v47, %v19763_v51  ;;  %v6202_v29 = vmul.f32 0.0625, %v4940_v55  ;;  %v4898_v5 = vpop.xlane.xlu0 %4897  ;;  %v5055_v51 = vsel %vm2225_vm0, %v14646_v12, 0.0  ;;  %v14710_v47 = vunpack.c.h.bf16 %v15357_v28  ;;  %vm20330_vm4 = vmmov %vm20320_vm2 }
 0x803   : > { %v19847_v17 = vsel %vm7449_vm5, %v12446_v0, %v19770_v39  ;;  %v6188_v34 = vmul.f32 0.0625, %v4898_v5  ;;  %v5244_v12 = vsel %vm2225_vm0, %v14773_v62, 0.0  ;;  %v14774_v28 = vunpack.c.h.bf16 %v15373_v33 }
 0x804   : > { %v11908_v9 = vrot.slane %v6202_v29, %v15843_v1  ;;  %5239 = vadd.xlane.f32.xlu1 %v5238_v36  ;;  %5197 = vadd.xlane.f32.xlu0 %v5196_v50  ;;  %v5151_v5 = vsel %vm2225_vm0, %v14710_v47, 0.0 }
 0x805   : > { %v11839_v6 = vrot.slane %v6188_v34, %v15858_v24  ;;  %v5033_v44 = vpop.xlane.xlu1 %5032  ;;  %v14806_v34 = vunpack.c.h.bf16 %v15381_v31 }
 0x806   : > { %v19855_v8 = vsel %vm20324_vm8, %v11908_v9, %v19783_v38  ;;  %v6233_v39 = vmul.f32 0.0625, %v5033_v44  ;;  %v4991_v19 = vpop.xlane.xlu0 %4990  ;;  %v5148_v38 = vsel %vm2225_vm0, %v14709_v25, 0.0 }
 0x807   : > { %v19860_v45 = vsel %vm7484_vm10, %v11839_v6, %v19787_v32  ;;  %v6219_v30 = vmul.f32 0.0625, %v4991_v19  ;;  %v5295_v25 = vsel %vm2225_vm0, %v14806_v34, 0.0 }
 0x808   : > { %v12061_v15 = vrot.slane %v6233_v39, %v15821_v41  ;;  %5056 = vadd.xlane.f32.xlu1 %v5055_v51  ;;  %5290 = vadd.xlane.f32.xlu0 %v5289_v14  ;;  %v5247_v14 = vsel %vm2225_vm0, %v14774_v28, 0.0  ;;  %vm20327_vm0 = vcmask 786112  }
 0x809   : > { %v11992_v54 = vrot.slane %v6219_v30, %v15837_v61  ;;  %v5126_v27 = vpop.xlane.xlu1 %5125  ;;  %vm20331_vm8 = vmmov %vm20327_vm0 }
 0x80a   : > { %v12062_v32 = vsel %vm7463_vm7, %v12061_v15, %v19797_v35  ;;  %v6264_v21 = vmul.f32 0.0625, %v5126_v27  ;;  %v5084_v11 = vpop.xlane.xlu0 %5083 }
 0x80b   : > { %v11993_v20 = vsel %vm20325_vm1, %v11992_v54, %v19801_v10  ;;  %v6250_v4 = vmul.f32 0.0625, %v5084_v11 }
 0x80c   : > { %v12214_v2 = vrot.slane %v6264_v21, %v15824_v42  ;;  %5200 = vadd.xlane.f32.xlu1 %v5199_v63  ;;  %5149 = vadd.xlane.f32.xlu0 %v5148_v38 }
 0x80d   : > { %v12145_v40 = vrot.slane %v6250_v4, %v15843_v1  ;;  %v5219_v46 = vpop.xlane.xlu1 %5218 }
 0x80e   : > { %v12215_v35 = vsel %vm7456_vm6, %v12214_v2, %v19814_v13  ;;  %v6295_v36 = vmul.f32 0.0625, %v5219_v46  ;;  %v5177_v0 = vpop.xlane.xlu0 %5176 }
 0x80f   : > { %v12146_v10 = vsel %vm20320_vm2, %v12145_v40, %v19819_v52  ;;  %v6281_v55 = vmul.f32 0.0625, %v5177_v0 }
 0x810   : > { %v12367_v50 = vrot.slane %v6295_v36, %v15804_v22  ;;  %5293 = vadd.xlane.f32.xlu1 %v5292_v16  ;;  %5242 = vadd.xlane.f32.xlu0 %v5241_v56 }
 0x811   : > { %v12298_v58 = vrot.slane %v6281_v55, %v15821_v41  ;;  %v4850_v29 = vpop.xlane.xlu1 %4849 }
 0x812   : > { %v12368_v13 = vsel %vm7449_vm5, %v12367_v50, %v19828_v49  ;;  %v6172_v9 = vmul.f32 0.0625, %v4850_v29  ;;  %v5270_v59 = vpop.xlane.xlu0 %5269  ;;  %vm20326_vm5 = vmmov %vm20325_vm1 }
 0x813   : > { %v12299_v52 = vsel %vm7463_vm7, %v12298_v58, %v19832_v23  ;;  %v6312_v22 = vmul.f32 0.0625, %v5270_v59 }
 0x814   : > { %v11760_v6 = vrot.slane %v6172_v9, %v15858_v24  ;;  %5245 = vadd.xlane.f32.xlu1 %v5244_v12  ;;  %5152 = vadd.xlane.f32.xlu0 %v5151_v5 }
 0x815   : > { %v12451_v44 = vrot.slane %v6312_v22, %v15824_v42  ;;  %v4943_v51 = vpop.xlane.xlu1 %4942 }
 0x816   : > { %v11761_v49 = vsel %vm7484_vm10, %v11760_v6, %v19842_v53  ;;  %v6203_v39 = vmul.f32 0.0625, %v4943_v51  ;;  %v4901_v19 = vpop.xlane.xlu0 %4900 }
 0x817   : > { %v12452_v23 = vsel %vm7456_vm6, %v12451_v44, %v19847_v17  ;;  %v6189_v31 = vmul.f32 0.0625, %v4901_v19 }
 0x818   : > { %v11913_v30 = vrot.slane %v6203_v39, %v15837_v61  ;;  %5248 = vadd.xlane.f32.xlu1 %v5247_v14  ;;  %5296 = vadd.xlane.f32.xlu0 %v5295_v25 }
 0x819   : > { %v11844_v15 = vrot.slane %v6189_v31, %v15852_v18  ;;  %v5036_v63 = vpop.xlane.xlu1 %5035 }
 0x81a   : > { %v11914_v54 = vsel %vm20326_vm5, %v11913_v30, %v19855_v8  ;;  %v6234_v27 = vmul.f32 0.0625, %v5036_v63  ;;  %v4994_v38 = vpop.xlane.xlu0 %4993 }
 0x81b   : > { %v11845_v53 = vsel %vm20327_vm0, %v11844_v15, %v19860_v45  ;;  %v6220_v26 = vmul.f32 0.0625, %v4994_v38 }
 0x81c   : > { %v12066_v3 = vrot.slane %v6234_v27, %v15843_v1 }
 0x81d   : > { %v11997_v17 = vrot.slane %v6220_v26, %v15858_v24  ;;  %v5129_v33 = vpop.xlane.xlu1 %5128 }
 0x81e   : > { %v12067_v21 = vsel %vm20328_vm3, %v12066_v3, %v12062_v32  ;;  %v6265_v11 = vmul.f32 0.0625, %v5129_v33  ;;  %v5087_v4 = vpop.xlane.xlu0 %5086  ;;  %vm20336_vm3 = vmmov %vm20326_vm5 }
 0x81f   : > { %v11998_v2 = vsel %vm7484_vm10, %v11997_v17, %v11993_v20  ;;  %v6251_v62 = vmul.f32 0.0625, %v5087_v4 }
 0x820   : > { %v12219_v8 = vrot.slane %v6265_v11, %v15821_v41 }
 0x821   : > { %v12150_v40 = vrot.slane %v6251_v62, %v15837_v61  ;;  %v5222_v46 = vpop.xlane.xlu1 %5221 }
 0x822   : > { %v12220_v45 = vsel %vm7463_vm7, %v12219_v8, %v12215_v35  ;;  %v6296_v16 = vmul.f32 0.0625, %v5222_v46  ;;  %v5180_v56 = vpop.xlane.xlu0 %5179 }
 0x823   : > { %v12151_v47 = vsel %vm20329_vm9, %v12150_v40, %v12146_v10  ;;  %v6282_v36 = vmul.f32 0.0625, %v5180_v56 }
 0x824   : > { %v12372_v0 = vrot.slane %v6296_v16, %v15824_v42 }
 0x825   : > { %v12303_v32 = vrot.slane %v6282_v36, %v15843_v1  ;;  %v4853_v55 = vpop.xlane.xlu1 %4852 }
 0x826   : > { %v12373_v20 = vsel %vm7456_vm6, %v12372_v0, %v12368_v13  ;;  %v6173_v50 = vmul.f32 0.0625, %v4853_v55  ;;  %v5273_v12 = vpop.xlane.xlu0 %5272  ;;  %vm20332_vm6 = vmmov %vm20325_vm1 }
 0x827   : > { %v12304_v58 = vsel %vm20330_vm4, %v12303_v32, %v12299_v52  ;;  %v6313_v29 = vmul.f32 0.0625, %v5273_v12  ;;  %vm20333_vm1 = vmmov %vm20327_vm0 }
 0x828   : > { %v11765_v5 = vrot.slane %v6173_v50, %v15852_v18  ;;  %vm20334_vm0 = vmmov %vm20320_vm2 }
 0x829   : > { %v12456_v35 = vrot.slane %v6313_v29, %v15821_v41  ;;  %v4946_v28 = vpop.xlane.xlu1 %4945  ;;  %vm20337_vm9 = vmmov %vm20333_vm1 }
 0x82a   : > { %v11766_v10 = vsel %vm20331_vm8, %v11765_v5, %v11761_v49  ;;  %v6204_v34 = vmul.f32 0.0625, %v4946_v28  ;;  %v4904_v9 = vpop.xlane.xlu0 %4903  ;;  %vm20338_vm4 = vmmov %vm20334_vm0 }
 0x82b   : > { %v12457_v42 = vsel %vm7463_vm7, %v12456_v35, %v12452_v23  ;;  %v6190_v59 = vmul.f32 0.0625, %v4904_v9  ;;  %vm20339_vm8 = vmmov %vm20336_vm3 }
 0x82c   : > { %v11918_v22 = vrot.slane %v6204_v34, %v15858_v24 }
 0x82d   : > { %v11849_v13 = vrot.slane %v6190_v59, %v15873_v43  ;;  %v5039_v6 = vpop.xlane.xlu1 %5038 }
 0x82e   : > { %v11919_v52 = vsel %vm7484_vm10, %v11918_v22, %v11914_v54  ;;  %v6235_v44 = vmul.f32 0.0625, %v5039_v6  ;;  %v4997_v51 = vpop.xlane.xlu0 %4996 }
 0x82f   : > { %v11850_v14 = vsel %vm7498_vm12, %v11849_v13, %v11845_v53  ;;  %v6221_v25 = vmul.f32 0.0625, %v4997_v51 }
 0x830   : > { %v12071_v39 = vrot.slane %v6235_v44, %v15837_v61 }
 0x831   : > { %v12002_v49 = vrot.slane %v6221_v25, %v15852_v18  ;;  %v5132_v19 = vpop.xlane.xlu1 %5131 }
 0x832   : > { %v12072_v23 = vsel %vm20332_vm6, %v12071_v39, %v12067_v21  ;;  %v6266_v31 = vmul.f32 0.0625, %v5132_v19  ;;  %v5090_v30 = vpop.xlane.xlu0 %5089  ;;  %vm20340_vm6 = vmmov %vm20333_vm1 }
 0x833   : > { %v12003_v15 = vsel %vm20333_vm1, %v12002_v49, %v11998_v2  ;;  %v6252_v63 = vmul.f32 0.0625, %v5090_v30 }
 0x834   : > { %v12224_v27 = vrot.slane %v6266_v31, %v15843_v1 }
 0x835   : > { %v12155_v54 = vrot.slane %v6252_v63, %v15858_v24  ;;  %v5225_v38 = vpop.xlane.xlu1 %5224 }
 0x836   : > { %v12225_v53 = vsel %vm20320_vm2, %v12224_v27, %v12220_v45  ;;  %v6297_v26 = vmul.f32 0.0625, %v5225_v38  ;;  %v5183_v3 = vpop.xlane.xlu0 %5182  ;;  %vm20342_vm2 = vmmov %vm20340_vm6 }
 0x837   : > { %v12156_v17 = vsel %vm7484_vm10, %v12155_v54, %v12151_v47  ;;  %v6283_v33 = vmul.f32 0.0625, %v5183_v3 }
 0x838   : > { %v12377_v11 = vrot.slane %v6297_v26, %v15821_v41 }
 0x839   : > { %v12308_v21 = vrot.slane %v6283_v33, %v15837_v61  ;;  %v4856_v4 = vpop.xlane.xlu1 %4855 }
 0x83a   : > { %v12378_v2 = vsel %vm7463_vm7, %v12377_v11, %v12373_v20  ;;  %v6174_v62 = vmul.f32 0.0625, %v4856_v4  ;;  %v5276_v8 = vpop.xlane.xlu0 %5275  ;;  %vm20335_vm7 = vmmov %vm20333_vm1 }
 0x83b   : > { %v12309_v40 = vsel %vm20326_vm5, %v12308_v21, %v12304_v58  ;;  %v6314_v46 = vmul.f32 0.0625, %v5276_v8  ;;  %vm20341_vm1 = vmmov %vm20336_vm3  ;;  %vm20343_vm5 = vcmask 1043459  }
 0x83c   : > { %v11770_v16 = vrot.slane %v6174_v62, %v15873_v43 }
 0x83d   : > { %v12461_v45 = vrot.slane %v6314_v46, %v15843_v1  ;;  %v4949_v56 = vpop.xlane.xlu1 %4948 }
 0x83e   : > { %v11771_v47 = vsel %vm7498_vm12, %v11770_v16, %v11766_v10  ;;  %v6205_v36 = vmul.f32 0.0625, %v4949_v56  ;;  %v4907_v0 = vpop.xlane.xlu0 %4906 }
 0x83f   : > { %v12462_v41 = vsel %vm20334_vm0, %v12461_v45, %v12457_v42  ;;  %v6191_v32 = vmul.f32 0.0625, %v4907_v0  ;;  %vm20344_vm0 = vmmov %vm20343_vm5 }
 0x840   : > { %v11923_v55 = vrot.slane %v6205_v36, %v15852_v18 }
 0x841   : > { %v11854_v20 = vrot.slane %v6191_v32, %v15867_v37  ;;  %v5042_v50 = vpop.xlane.xlu1 %5041 }
 0x842   : > { %v11924_v12 = vsel %vm20335_vm7, %v11923_v55, %v11919_v52  ;;  %v6236_v58 = vmul.f32 0.0625, %v5042_v50  ;;  %v5000_v29 = vpop.xlane.xlu0 %4999  ;;  %vm20345_vm7 = vcmask 1044484  }
 0x843   : > { %v11855_v5 = vsel %vm7505_vm13, %v11854_v20, %v11850_v14  ;;  %v6222_v35 = vmul.f32 0.0625, %v5000_v29 }
 0x844   : > { %v12076_v28 = vrot.slane %v6236_v58, %v15858_v24 }
 0x845   : > { %v12007_v10 = vrot.slane %v6222_v35, %v15873_v43  ;;  %v5135_v34 = vpop.xlane.xlu1 %5134 }
 0x846   : > { %v12077_v9 = vsel %vm7484_vm10, %v12076_v28, %v12072_v23  ;;  %v6267_v42 = vmul.f32 0.0625, %v5135_v34  ;;  %v5093_v59 = vpop.xlane.xlu0 %5092 }
 0x847   : > { %v12008_v22 = vsel %vm7498_vm12, %v12007_v10, %v12003_v15  ;;  %v6253_v13 = vmul.f32 0.0625, %v5093_v59 }
 0x848   : > { %v12229_v6 = vrot.slane %v6267_v42, %v15837_v61 }
 0x849   : > { %v12160_v52 = vrot.slane %v6253_v13, %v15852_v18  ;;  %v5228_v44 = vpop.xlane.xlu1 %5227 }
 0x84a   : > { %v12230_v51 = vsel %vm20336_vm3, %v12229_v6, %v12225_v53  ;;  %v6298_v14 = vmul.f32 0.0625, %v5228_v44  ;;  %v5186_v25 = vpop.xlane.xlu0 %5185  ;;  %vm20346_vm3 = vmmov %vm20345_vm7 }
 0x84b   : > { %v12161_v39 = vsel %vm20337_vm9, %v12160_v52, %v12156_v17  ;;  %v6284_v49 = vmul.f32 0.0625, %v5186_v25  ;;  %vm20347_vm9 = vcmask 1045509  }
 0x84c   : > { %v12382_v19 = vrot.slane %v6298_v14, %v15843_v1 }
 0x84d   : > { %v12313_v23 = vrot.slane %v6284_v49, %v15858_v24  ;;  %v4859_v31 = vpop.xlane.xlu1 %4858 }
 0x84e   : > { %v12383_v30 = vsel %vm20338_vm4, %v12382_v19, %v12378_v2  ;;  %v6175_v15 = vmul.f32 0.0625, %v4859_v31  ;;  %v5279_v63 = vpop.xlane.xlu0 %5278  ;;  %vm20348_vm4 = vmmov %vm20347_vm9 }
 0x84f   : > { %v12314_v27 = vsel %vm7484_vm10, %v12313_v23, %v12309_v40  ;;  %v6315_v54 = vmul.f32 0.0625, %v5279_v63 }
 0x850   : > { %v11775_v38 = vrot.slane %v6175_v15, %v15867_v37 }
 0x851   : > { %v12466_v53 = vrot.slane %v6315_v54, %v15837_v61  ;;  %v4952_v26 = vpop.xlane.xlu1 %4951 }
 0x852   : > { %v11776_v3 = vsel %vm7505_vm13, %v11775_v38, %v11771_v47  ;;  %v6206_v17 = vmul.f32 0.0625, %v4952_v26  ;;  %v4910_v33 = vpop.xlane.xlu0 %4909 }
 0x853   : > { %v19958_v1 = vsel %vm20339_vm8, %v12466_v53, %v12462_v41  ;;  %v6192_v11 = vmul.f32 0.0625, %v4910_v33  ;;  %vm20349_vm8 = vcmask 1046534  }
 0x854   : > { %v11928_v21 = vrot.slane %v6206_v17, %v15873_v43 }
 0x855   : > { %v11859_v4 = vrot.slane %v6192_v11, %v15887_v60  ;;  %v5045_v2 = vpop.xlane.xlu1 %5044 }
 0x856   : > { %v19963_v62 = vsel %vm7498_vm12, %v11928_v21, %v11924_v12  ;;  %v6237_v8 = vmul.f32 0.0625, %v5045_v2  ;;  %v5003_v40 = vpop.xlane.xlu0 %5002 }
 0x857   : > { %v11860_v46 = vsel %vm7512_vm14, %v11859_v4, %v11855_v5  ;;  %v6223_v16 = vmul.f32 0.0625, %v5003_v40 }
 0x858   : > { %v12081_v45 = vrot.slane %v6237_v8, %v15852_v18 }
 0x859   : > { %v12012_v56 = vrot.slane %v6223_v16, %v15867_v37  ;;  %v5138_v47 = vpop.xlane.xlu1 %5137 }
 0x85a   : > { %v19969_v36 = vsel %vm20340_vm6, %v12081_v45, %v12077_v9  ;;  %v6268_v0 = vmul.f32 0.0625, %v5138_v47  ;;  %v5096_v41 = vpop.xlane.xlu0 %5095  ;;  %vm20350_vm6 = vmmov %vm20342_vm2 }
 0x85b   : > { %v12013_v32 = vsel %vm7505_vm13, %v12012_v56, %v12008_v22  ;;  %v6254_v55 = vmul.f32 0.0625, %v5096_v41 }
 0x85c   : > { %v12234_v20 = vrot.slane %v6268_v0, %v15858_v24 }
 0x85d   : > { %v12165_v50 = vrot.slane %v6254_v55, %v15873_v43  ;;  %v5231_v12 = vpop.xlane.xlu1 %5230 }
 0x85e   : > { %v19975_v58 = vsel %vm7484_vm10, %v12234_v20, %v12230_v51  ;;  %v6299_v29 = vmul.f32 0.0625, %v5231_v12  ;;  %v5189_v5 = vpop.xlane.xlu0 %5188 }
 0x85f   : > { %v19978_v35 = vsel %vm7498_vm12, %v12165_v50, %v12161_v39  ;;  %v6285_v28 = vmul.f32 0.0625, %v5189_v5 }
 0x860   : > { %v12387_v10 = vrot.slane %v6299_v29, %v15837_v61 }
 0x861   : > { %v12318_v34 = vrot.slane %v6285_v28, %v15852_v18  ;;  %v4862_v9 = vpop.xlane.xlu1 %4861 }
 0x862   : > { %v19983_v42 = vsel %vm20341_vm1, %v12387_v10, %v12383_v30  ;;  %v19985_v59 = vpop.xlane.xlu0 %5281  ;;  %v6176_v19 = vmul.f32 0.0625, %v4862_v9  ;;  %vm20351_vm1 = vmmov %vm20342_vm2 }
 0x863   : > { %v19988_v22 = vsel %vm20342_vm2, %v12318_v34, %v12314_v27  ;;  %vm20353_vm2 = vmmov %vm20349_vm8 }
 0x864   : > { %v11780_v30 = vrot.slane %v6176_v19, %v15887_v60 }
 0x865   : > { %v4955_v13 = vpop.xlane.xlu1 %4954 }
 0x866   : > { %v4913_v6 = vpop.xlane.xlu0 %4912  ;;  %v11781_v53 = vsel %vm7512_vm14, %v11780_v30, %v11776_v3  ;;  %v6207_v56 = vmul.f32 0.0625, %v4955_v13 }
 0x867   : > { %v6193_v52 = vmul.f32 0.0625, %v4913_v6 }
 0x868   : > { %v11933_v55 = vrot.slane %v6207_v56, %v15867_v37 }
 0x869   : > { %v11864_v44 = vrot.slane %v6193_v52, %v15882_v57  ;;  %v5048_v51 = vpop.xlane.xlu1 %5047 }
 0x86a   : > { %v5006_v14 = vpop.xlane.xlu0 %5005  ;;  %v11934_v5 = vsel %vm7505_vm13, %v11933_v55, %v19963_v62  ;;  %v6238_v52 = vmul.f32 0.0625, %v5048_v51 }
 0x86b   : > { %v11865_v61 = vsel %vm7519_vm15, %v11864_v44, %v11860_v46  ;;  %v6224_v15 = vmul.f32 0.0625, %v5006_v14 }
 0x86c   : > { %v12556_v25 = vsel %vm20343_vm5, %v11865_v61, %v19306_v48 }
 0x86d   : > { %v19994_v39 = vpop.xlane.xlu1 %5140  ;;  %v12017_v48 = vrot.slane %v6224_v15, %v15887_v60 }
 0x86e   : > { %v5099_v49 = vpop.xlane.xlu0 %5098 }
 0x86f   : > { %v12018_v2 = vsel %vm7512_vm14, %v12017_v48, %v12013_v32 }
 0x871   : > { %v19996_v23 = vpop.xlane.xlu1 %5233 }
 0x872   : > { %v5192_v31 = vpop.xlane.xlu0 %5191 }
 0x875   : > { %v4865_v63 = vpop.xlane.xlu1 %4864 }
 0x876   : > { %v6177_v27 = vmul.f32 0.0625, %v4865_v63  ;;  %v19999_v54 = vpop.xlane.xlu0 %5284 }
 0x878   : > { %v11785_v38 = vrot.slane %v6177_v27, %v15882_v57  ;;  %v12086_v27 = vrot.slane %v6238_v52, %v15873_v43 }
 0x879   : > { %v5009_v26 = vpop.xlane.xlu1 %5008 }
 0x87a   : > { %v11786_v17 = vsel %vm7519_vm15, %v11785_v38, %v11781_v53  ;;  %v6225_v33 = vmul.f32 0.0625, %v5009_v26  ;;  %v4958_v11 = vpop.xlane.xlu0 %4957  ;;  %v6286_v38 = vmul.f32 0.0625, %v5192_v31 }
 0x87b   : > { %v12549_v21 = vsel %vm20344_vm0, %v11786_v17, %v19215_v7  ;;  %v6208_v0 = vmul.f32 0.0625, %v4958_v11  ;;  %v6255_v7 = vmul.f32 0.0625, %v5099_v49 }
 0x87c   : > { %v12022_v4 = vrot.slane %v6225_v33, %v15882_v57 }
 0x87d   : > { %v5102_v8 = vpop.xlane.xlu1 %5101  ;;  %v11938_v50 = vrot.slane %v6208_v0, %v15887_v60  ;;  %v12170_v28 = vrot.slane %v6255_v7, %v15867_v37 }
 0x87e   : > { %v12023_v40 = vsel %vm7519_vm15, %v12022_v4, %v12018_v2  ;;  %v5051_v46 = vpop.xlane.xlu0 %5050  ;;  %v6256_v32 = vmul.f32 0.0625, %v5102_v8  ;;  %v12087_v4 = vsel %vm7498_vm12, %v12086_v27, %v19969_v36  ;;  %v12323_v2 = vrot.slane %v6286_v38, %v15873_v43 }
 0x87f   : > { %v12557_v3 = vsel %vm20345_vm7, %v12023_v40, %v12556_v25  ;;  %v11939_v9 = vsel %vm7512_vm14, %v11938_v50, %v11934_v5  ;;  %v6239_v61 = vmul.f32 0.0625, %v5051_v46  ;;  %v12171_v62 = vsel %vm7505_vm13, %v12170_v28, %v19978_v35 }
 0x880   : > { %v12175_v13 = vrot.slane %v6256_v32, %v15887_v60  ;;  %v6316_v46 = vmul.f32 0.0625, %v19985_v59  ;;  %v6269_v36 = vmul.f32 0.0625, %v19994_v39  ;;  %v6300_v32 = vmul.f32 0.0625, %v19996_v23 }
 0x881   : > { %v5195_v16 = vpop.xlane.xlu1 %5194  ;;  %v12091_v53 = vrot.slane %v6239_v61, %v15867_v37  ;;  %v6317_v23 = vmul.f32 0.0625, %v19999_v54 }
 0x882   : > { %v5144_v45 = vpop.xlane.xlu0 %5143  ;;  %v12176_v15 = vsel %vm7512_vm14, %v12175_v13, %v12171_v62  ;;  %v6287_v48 = vmul.f32 0.0625, %v5195_v16  ;;  %v12471_v5 = vrot.slane %v6316_v46, %v15858_v24  ;;  %v12239_v52 = vrot.slane %v6269_v36, %v15852_v18 }
 0x883   : > { %v12092_v31 = vsel %vm7505_vm13, %v12091_v53, %v12087_v4 }
 0x884   : > { %v12328_v8 = vrot.slane %v6287_v48, %v15867_v37 }
 0x885   : > { %v20011_v47 = vpop.xlane.xlu1 %5287 }
 0x886   : > { %v5237_v41 = vpop.xlane.xlu0 %5236 }
 0x887   : > { %v6301_v13 = vmul.f32 0.0625, %v5237_v41  ;;  %v12472_v41 = vsel %vm7484_vm10, %v12471_v5, %v19958_v1 }
 0x889   : > { %v5054_v20 = vpop.xlane.xlu1 %5053 }
 0x88a   : > { %v4961_v12 = vpop.xlane.xlu0 %4960  ;;  %v6240_v49 = vmul.f32 0.0625, %v5054_v20  ;;  %v12324_v20 = vsel %vm7498_vm12, %v12323_v2, %v19988_v22 }
 0x88b   : > { %v6209_v29 = vmul.f32 0.0625, %v4961_v12  ;;  %v12329_v59 = vsel %vm7505_vm13, %v12328_v8, %v12324_v20  ;;  %v6270_v12 = vmul.f32 0.0625, %v5144_v45 }
 0x88c   : > { %v12096_v17 = vrot.slane %v6240_v49, %v15887_v60 }
 0x88d   : > { %v11943_v10 = vrot.slane %v6209_v29, %v15882_v57  ;;  %v5147_v34 = vpop.xlane.xlu1 %5146  ;;  %v12244_v61 = vrot.slane %v6270_v12, %v15873_v43 }
 0x88e   : > { %v5105_v6 = vpop.xlane.xlu0 %5104  ;;  %v6271_v28 = vmul.f32 0.0625, %v5147_v34  ;;  %v6318_v34 = vmul.f32 0.0625, %v20011_v47  ;;  %v12476_v47 = vrot.slane %v6317_v23, %v15852_v18 }
 0x88f   : > { %v11944_v44 = vsel %vm7519_vm15, %v11943_v10, %v11939_v9  ;;  %v6257_v14 = vmul.f32 0.0625, %v5105_v6 }
 0x890   : > { %v12550_v25 = vsel %vm20346_vm3, %v11944_v44, %v12549_v21  ;;  %v12249_v62 = vrot.slane %v6271_v28, %v15867_v37  ;;  %v12481_v48 = vrot.slane %v6318_v34, %v15873_v43 }
 0x891   : > { %v12180_v19 = vrot.slane %v6257_v14, %v15882_v57  ;;  %v5240_v30 = vpop.xlane.xlu1 %5239  ;;  %v12392_v14 = vrot.slane %v6300_v32, %v15858_v24  ;;  %v12240_v24 = vsel %vm20350_vm6, %v12239_v52, %v19975_v58 }
 0x892   : > { %v5198_v63 = vpop.xlane.xlu0 %5197  ;;  %v6302_v44 = vmul.f32 0.0625, %v5240_v30  ;;  %v12245_v53 = vsel %vm7498_vm12, %v12244_v61, %v12240_v24 }
 0x893   : > { %v12181_v51 = vsel %vm7519_vm15, %v12180_v19, %v12176_v15  ;;  %v6288_v35 = vmul.f32 0.0625, %v5198_v63  ;;  %v12397_v15 = vrot.slane %v6301_v13, %v15852_v18  ;;  %v12393_v1 = vsel %vm7484_vm10, %v12392_v14, %v19983_v42  ;;  %vm20352_vm10 = vmmov %vm20351_vm1 }
 0x894   : > { %v12558_v26 = vsel %vm20347_vm9, %v12181_v51, %v12557_v3  ;;  %v12097_v3 = vsel %vm7512_vm14, %v12096_v17, %v12092_v31  ;;  %v12402_v38 = vrot.slane %v6302_v44, %v15873_v43  ;;  %v12250_v17 = vsel %vm7505_vm13, %v12249_v62, %v12245_v53 }
 0x895   : > { %v5057_v33 = vpop.xlane.xlu1 %5056  ;;  %v12333_v16 = vrot.slane %v6288_v35, %v15887_v60  ;;  %v12477_v43 = vsel %vm20352_vm10, %v12476_v47, %v12472_v41 }
 0x896   : > { %v6241_v11 = vmul.f32 0.0625, %v5057_v33  ;;  %v5291_v21 = vpop.xlane.xlu0 %5290 }
 0x897   : > { %v12334_v10 = vsel %vm7512_vm14, %v12333_v16, %v12329_v59  ;;  %v6319_v49 = vmul.f32 0.0625, %v5291_v21 }
 0x898   : > { %v12101_v40 = vrot.slane %v6241_v11, %v15882_v57  ;;  %v12398_v11 = vsel %vm20351_vm1, %v12397_v15, %v12393_v1 }
 0x899   : > { %v5201_v56 = vpop.xlane.xlu1 %5200  ;;  %v12486_v35 = vrot.slane %v6319_v49, %v15867_v37  ;;  %v12403_v31 = vsel %vm7498_vm12, %v12402_v38, %v12398_v11 }
 0x89a   : > { %v12102_v0 = vsel %vm7519_vm15, %v12101_v40, %v12097_v3  ;;  %v6289_v55 = vmul.f32 0.0625, %v5201_v56  ;;  %v5150_v7 = vpop.xlane.xlu0 %5149  ;;  %v12482_v40 = vsel %vm7498_vm12, %v12481_v48, %v12477_v43 }
 0x89b   : > { %v12551_v50 = vsel %vm20348_vm4, %v12102_v0, %v12550_v25  ;;  %v6272_v39 = vmul.f32 0.0625, %v5150_v7 }
 0x89c   : > { %v12338_v29 = vrot.slane %v6289_v55, %v15882_v57 }
 0x89d   : > { %v5294_v9 = vpop.xlane.xlu1 %5293  ;;  %v12254_v54 = vrot.slane %v6272_v39, %v15887_v60 }
 0x89e   : > { %v5243_v6 = vpop.xlane.xlu0 %5242  ;;  %v12339_v22 = vsel %vm7519_vm15, %v12338_v29, %v12334_v10  ;;  %v6320_v30 = vmul.f32 0.0625, %v5294_v9 }
 0x89f   : > { %v12559_v45 = vsel %vm20349_vm8, %v12339_v22, %v12558_v26  ;;  %v6303_v25 = vmul.f32 0.0625, %v5243_v6  ;;  %v12255_v21 = vsel %vm7512_vm14, %v12254_v54, %v12250_v17 }
 0x8a0   : > { %v12491_v42 = vrot.slane %v6320_v30, %v15887_v60 }
 0x8a1   : > { %v5246_v19 = vpop.xlane.xlu1 %5245  ;;  %v12407_v26 = vrot.slane %v6303_v25, %v15867_v37 }
 0x8a2   : > { %v6304_v63 = vmul.f32 0.0625, %v5246_v19  ;;  %v5153_v27 = vpop.xlane.xlu0 %5152 }
 0x8a3   : > { %v6273_v51 = vmul.f32 0.0625, %v5153_v27  ;;  %v12408_v46 = vsel %vm7505_vm13, %v12407_v26, %v12403_v31 }
 0x8a4   : > { %v12412_v58 = vrot.slane %v6304_v63, %v15887_v60  ;;  %v12487_v60 = vsel %vm7505_vm13, %v12486_v35, %v12482_v40 }
 0x8a5   : > { %v12259_v18 = vrot.slane %v6273_v51, %v15882_v57  ;;  %v5249_v33 = vpop.xlane.xlu1 %5248  ;;  %v12492_v55 = vsel %vm7512_vm14, %v12491_v42, %v12487_v60 }
 0x8a6   : > { %v6305_v4 = vmul.f32 0.0625, %v5249_v33  ;;  %v5297_v2 = vpop.xlane.xlu0 %5296  ;;  %v12413_v0 = vsel %vm7512_vm14, %v12412_v58, %v12408_v46 }
 0x8a7   : > { %v6321_v8 = vmul.f32 0.0625, %v5297_v2  ;;  %v12260_v37 = vsel %vm7519_vm15, %v12259_v18, %v12255_v21 }
 0x8a8   : > { %v12417_v3 = vrot.slane %v6305_v4, %v15882_v57  ;;  %v12552_v16 = vsel %vm20353_vm2, %v12260_v37, %v12551_v50 }
 0x8a9   : > { %v12496_v56 = vrot.slane %v6321_v8, %v15882_v57 }
 0x8aa   : > { %v12418_v7 = vsel %vm7519_vm15, %v12417_v3, %v12413_v0 }
 0x8ab   : > { %v12497_v36 = vsel %vm7519_vm15, %v12496_v56, %v12492_v55  ;;  %v12553_v20 = vsel %vm12510_vm11, %v12418_v7, %v12552_v16 }
 0x8ac   : > { %v12560_v32 = vsel %vm12510_vm11, %v12497_v36, %v12559_v45 }
 0x8ad   : > { %12648 = vmatprep.mubr.f32.mxu1 %v12560_v32 }
 0x8ae   : > { %12649 = vmatmul.mubr.f32.gmra.mrb[2].mxu1 %v12553_v20 }
 0x97f   : > { %12665 = sbr.rel (!%p15649_p5) target bundleno = 2466 (0x9a2), region = 32 }
 0x981   : > { %v15438_v59 = vpop.f32.mrb[2].mxu1 }
 0x982   : > { %v15439_v50 = vpop.f32.mrb[3].mxu1 }
 0x983   : > { %v15440_v12 = vadd.f32 %v15439_v50, %v15438_v59 }
 0x985   : > { %12657 = vst [vmem:[%s17269_s23 + $0x18] sm:$0xff] %v15440_v12 }
 0x986   : > { %s20361_s26 = smov (!%p12668_p11, %s12667_s26), 4 }
 0x987   : > { %s20102_s27 = sshll.u32 %s20361_s26, 7 }
 0x988   : > { %s12672_s28 = ssub.s32 512, %s20102_s27 }
 0x989   : > { %12673 = vsyncadd %s20097_s25, %s12672_s28  ;;  %p12751_p12 = scmp.ne.s32.totalorder %s20102_s27, 0  ;;  %s12758_s29 = sshll.u32 %s15632_s13, 9 }
 0x98a   : > { %s20111_s3 = scalar_lea.hbm %s20160_s2, %s12758_s29  ;;  %s12678_s4 = sshll.u32 %s17269_s23, 4  ;;  %s20114_s4 = int_to_ptr.vmem [resolvable:$true] %s12678_s4 }
 0x98b   : > { %s15529_s5 = scalar_lea.vmem %s20114_s4, %s20102_s27  ;;  %s15593_s6 = smov [#allocation2]  }
 0x98c   : > { %p15530_p13 = scmp.ne.s32.totalorder %s20114_s4, %s15529_s5  ;;  %s15533_s7 = sshll.u32 %s15593_s6, 4  ;;  %s15534_s7 = int_to_ptr.vmem [resolvable:$false] %s15533_s7 }
 0x98d   : > { %s15535_s13 = scalar_lea.vmem %s15534_s7, 1024  ;;  %p15536_p2 = scmp.lt.s32.totalorder %s20114_s4, %s15534_s7 }
 0x98e   : > { %p15531_p0 = pnand %p15530_p13, %p12751_p12  ;;  %p15537_p3 = scmp.lt.s32.totalorder %s15535_s13, %s15529_s5 }
 0x990   : > { %p15532_p1 = pneg %p15531_p0  ;;  %p15538_p4 = por %p15537_p3, %p15536_p2 }
 0x992   : > { %p15539_p5 = pnand %p15538_p4, %p15532_p1 }
 0x994   : > { %15542 = shalt.err (!%p15539_p5)
}
 0x995   : > { %s15543_s8 = scalar_lea.hbm %s20111_s3, %s20102_s27  ;;  %s15547_s17 = scalar_lea.hbm %s20160_s2, 768 }
 0x996   : > { %p15544_p7 = scmp.ne.s32.totalorder %s20111_s3, %s15543_s8  ;;  %p15548_p10 = scmp.lt.u32.totalorder %s20111_s3, %s20160_s2 }
 0x997   : > { %p15549_p11 = scmp.lt.u32.totalorder %s15547_s17, %s15543_s8  ;;  %p15551_p0 = scmp.lt.u32.totalorder %s15543_s8, %s20111_s3 }
 0x998   : > { %p15545_p8 = pnand %p15544_p7, %p12751_p12 }
 0x999   : > { %p15550_p13 = por %p15549_p11, %p15548_p10 }
 0x99a   : > { %p15546_p9 = pneg %p15545_p8 }
 0x99b   : > { %p15552_p1 = por %p15551_p0, %p15550_p13 }
 0x99d   : > { %p15553_p2 = pnand %p15552_p1, %p15546_p9 }
 0x99f   : > { %15556 = shalt.err (!%p15553_p2)
}
 0x9a0   : > { %s15594_s23 = smov 128   ;;  %s15595_s24 = smov 8  }
 0x9a1   : > { %12684 = dma.vmem_to_hbm [thread:$0]  (%p12751_p12), %s20114_s4, %s20102_s27, %s20111_s3, %s20097_s25, %s15594_s23, %s15594_s23, %s15595_s24  }
 0x9a2 PF: > { %p15494_p3 = scmp.ge.s32.totalorder %s15591_s12, 2  ;;  %s12693_s26 = sand.u32 1, %s15579_s9  }
 0x9a3   : > { %s12694_s28 = scalar_lea.sflag [#allocation3], %s12693_s26 }
 0x9a4   : > { %p15491_p4 = pnand %p15494_p3, %p15653_p6 }
 0x9a6   : > { %15574 = dma.done.wait (!%p15491_p4), %s12694_s28, 512  }
 0x9a7   : > { %15576 = vsyncadd (!%p15491_p4), %s12694_s28, 4294966784  ;;  %p12_p5 = scmp.ge.s32.totalorder %s15636_s15, 4   ;;  %s20354_s9 = smov %s15583_s10 }
 0x9a8   : > { %s20355_s10 = smov %s15587_s11  ;;  %s20356_s11 = smov %s15647_s18 }
 0x9a9   : > { %s20357_s12 = smov %s15636_s15  ;;  %14 = sbr.rel (!%p12_p5) target bundleno = 3 (0x3), region = 63 }
 0x9b0   :  { %12699 = vsyncpa [#allocation3], 1 }
 0x9b1   :  { %12701 = vsyncpa [#allocation3 + $0x1], 1 }

</bundles_post_ra>
